<compile_context>
chip_gen: v5e
topology: v5e:2x2
jax: 0.10.0
libtpu: 0.0.40
codegen_flags: <defaults>
</compile_context>

<pallas_src>
import jax
import jax.numpy as jnp
from jax.experimental import pallas as pl
from jax.experimental.pallas import tpu as pltpu


# ----------------------------- Pallas kernels ------------------------------

def _conv_bias_relu_pool_kernel(cols_ref, w_ref, b_ref, o_ref):
    """Fused conv(as matmul) + bias + ReLU + 2x2 max-pool for one (branch, G-tile).

    cols_ref: (4, g, K)  bf16  -- 4 pool-window phases of the im2col rows
    w_ref:    (K, C)     bf16
    b_ref:    (1, C)     f32
    o_ref:    (g, C)     bf16  -- pooled activations
    """
    phases, g, k = cols_ref.shape
    # Single MXU weight push: collapse the phase axis into M (layout-free reshape).
    z = jnp.dot(cols_ref[...].reshape(phases * g, k), w_ref[...],
                preferred_element_type=jnp.float32)          # (4g, C) f32
    z = z.reshape(phases, g, -1)
    # Shared bias and monotone ReLU commute with the max -> pool first, epilogue after.
    pooled = jnp.max(z, axis=0)                               # (g, C) f32, VPU
    acc = pooled + b_ref[...]                                 # f32 epilogue (v5e-safe)
    o_ref[...] = jnp.maximum(acc, 0.0).astype(o_ref.dtype)


def _mlp_head_kernel(f1_ref, f2_ref, v_ref,
                     w1a_ref, w1b_ref, w1v_ref, b1_ref,
                     w2_ref, b2_ref, w3_ref, b3_ref, o_ref):
    """Fused fc1(ReLU) -> fc2(ReLU) -> fc3; fc1 is split row-wise so the XLA
    concatenate of [f1 | f2 | vec] disappears (three summed dots)."""
    z1 = (jnp.dot(f1_ref[...], w1a_ref[...], preferred_element_type=jnp.float32)
          + jnp.dot(f2_ref[...], w1b_ref[...], preferred_element_type=jnp.float32)
          + jnp.dot(v_ref[...], w1v_ref[...], preferred_element_type=jnp.float32)
          + b1_ref[...])
    z1 = jnp.maximum(z1, 0.0)
    z2 = jnp.dot(z1.astype(jnp.bfloat16), w2_ref[...],
                 preferred_element_type=jnp.float32) + b2_ref[...]
    z2 = jnp.maximum(z2, 0.0)
    z3 = jnp.dot(z2.astype(jnp.bfloat16), w3_ref[...],
                 preferred_element_type=jnp.float32) + b3_ref[...]
    o_ref[...] = z3.astype(o_ref.dtype)


# ------------------------------ glue helpers --------------------------------

def _round_up(v, m):
    return (v + m - 1) // m * m


def _pick_g_tile(g, k):
    """Row-tile for the im2col matrix: ~8 MiB per cols buffer (4 phases, bf16),
    capped at 2048 rows, multiple of 8."""
    cap = (1_048_576 // k) // 8 * 8          # 4 * g * k * 2 bytes <= 8 MiB
    cap = max(8, min(2048, cap))
    return min(_round_up(g, 8), cap)


def _im2col_pool_phases(x, kh=5, kw=5):
    """x: (2, N, H, W, Cin) -> cols (2, 4, G, K) bf16, plus (Hp, Wp).

    Phase p = 2*i + j holds the im2col rows of conv-output pixels
    (2*py + i, 2*px + j); max-reducing over the 4 phases inside the kernel
    implements floor-mode 2x2/stride-2 max pooling.  Built with strided slices
    of the (un-expanded) input -> no transpose of the 25x-expanded array."""
    x = x.astype(jnp.bfloat16)
    b2, n, h, w, cin = x.shape
    ho, wo = h - kh + 1, w - kw + 1
    hp, wp = ho // 2, wo // 2
    k = kh * kw * cin
    phases = []
    for i in range(2):
        for j in range(2):
            taps = [x[:, :, i + dy:i + dy + 2 * hp:2, j + dx:j + dx + 2 * wp:2, :]
                    for dy in range(kh) for dx in range(kw)]
            ph = jnp.concatenate(taps, axis=-1)                # (2, N, hp, wp, K)
            phases.append(ph.reshape(b2, n * hp * wp, k))
    cols = jnp.stack(phases, axis=1)                           # (2, 4, G, K)
    return cols, hp, wp


def conv5x5_relu_pool(x, w2d, b):
    """x: (2, N, H, W, Cin) bf16; w2d: (2, 25*Cin, Cout) bf16; b: (2, 1, Cout) f32.
    Returns (2, N, Hp, Wp, Cout) bf16 == max_pool2d(relu(conv5x5(x))) per branch."""
    _, n, _, _, _ = x.shape
    cols, hp, wp = _im2col_pool_phases(x)                      # (2, 4, G, K) bf16
    g = n * hp * wp
    k = cols.shape[-1]
    cout = w2d.shape[-1]

    g_tile = _pick_g_tile(g, k)
    g_pad = _round_up(g, g_tile)
    if g_pad != g:
        cols = jnp.pad(cols, ((0, 0), (0, 0), (0, g_pad - g), (0, 0)))
    n_gt = g_pad // g_tile

    # Double-buffered IO + rough in-kernel f32 intermediates, with margin.
    needed = 2 * (4 * g_tile * k * 2 + k * cout * 2 + cout * 4 + g_tile * cout * 2)
    needed += 2 * (4 * g_tile * cout * 4)                      # dot result + pooled (f32)
    vmem_limit = int(min(64 << 20, max(32 << 20, needed + (8 << 20))))

    y = pl.pallas_call(
        _conv_bias_relu_pool_kernel,
        grid=(2, n_gt),                                        # (branch, G-tile)
        in_specs=[
            pl.BlockSpec((pl.Squeezed(), 4, g_tile, k), lambda br, gi: (br, 0, gi, 0)),
            pl.BlockSpec((pl.Squeezed(), k, cout), lambda br, gi: (br, 0, 0)),
            pl.BlockSpec((pl.Squeezed(), 1, cout), lambda br, gi: (br, 0, 0)),
        ],
        out_specs=pl.BlockSpec((pl.Squeezed(), g_tile, cout), lambda br, gi: (br, gi, 0)),
        out_shape=jax.ShapeDtypeStruct((2, g_pad, cout), jnp.bfloat16),
        compiler_params=pltpu.CompilerParams(
            dimension_semantics=("parallel", "parallel"),
            vmem_limit_bytes=vmem_limit),
    )(cols, w2d, b)
    return y[:, :g].reshape(2, n, hp, wp, cout)


def mlp_head(f1, f2, vec, params):
    m = f1.shape[0]
    n_out = params["fc3_b"].shape[-1]
    vmem = pl.BlockSpec(memory_space=pltpu.MemorySpace.VMEM)
    return pl.pallas_call(
        _mlp_head_kernel,
        out_shape=jax.ShapeDtypeStruct((m, n_out), jnp.float32),
        in_specs=[vmem] * 11,
        out_specs=vmem,
    )(f1, f2, vec,
      params["fc1_w_f1"], params["fc1_w_f2"], params["fc1_w_vec"], params["fc1_b"],
      params["fc2_w"], params["fc2_b"],
      params["fc3_w"], params["fc3_b"])


def _spatial_after_branch(s):
    for _ in range(3):                                         # (conv k=5 valid) then pool /2
        s = (s - 4) // 2
    return s


# ------------------------------ parameters ---------------------------------

def init_params(key, frame_history_len, height, width, n_actions):
    hf = _spatial_after_branch(height)
    wf = _spatial_after_branch(width)
    to_linear = 128 * hf * wf                                  # == to_linearA == to_linearB

    keys = iter(jax.random.split(key, 32))
    s = 0.05
    chans = [frame_history_len, 32, 64, 128]

    p = {}
    for i in (1, 2, 3):
        cin, cout = chans[i - 1], chans[i]
        # Branches A and B stacked on the leading axis; weights HWIO -> (25*Cin, Cout).
        w = s * jax.random.normal(next(keys), (2, 5, 5, cin, cout), jnp.float32)
        p[f"conv{i}_w"] = w.reshape(2, 25 * cin, cout).astype(jnp.bfloat16)
        p[f"conv{i}_b"] = s * jax.random.normal(next(keys), (2, 1, cout), jnp.float32)
    # NOTE: fc1 is split row-wise into [branch-A | branch-B | vec] blocks and its
    # rows are in NHWC-flatten order (equivalent re-parameterization of the
    # PyTorch NCHW-flatten fc1 weight); importing PyTorch weights requires the
    # corresponding row permutation + split.
    p["fc1_w_f1"] = (s * jax.random.normal(next(keys), (to_linear, 512), jnp.float32)).astype(jnp.bfloat16)
    p["fc1_w_f2"] = (s * jax.random.normal(next(keys), (to_linear, 512), jnp.float32)).astype(jnp.bfloat16)
    p["fc1_w_vec"] = s * jax.random.normal(next(keys), (4, 512), jnp.float32)
    p["fc1_b"] = s * jax.random.normal(next(keys), (1, 512), jnp.float32)
    p["fc2_w"] = (s * jax.random.normal(next(keys), (512, 256), jnp.float32)).astype(jnp.bfloat16)
    p["fc2_b"] = s * jax.random.normal(next(keys), (1, 256), jnp.float32)
    p["fc3_w"] = (s * jax.random.normal(next(keys), (256, n_actions), jnp.float32)).astype(jnp.bfloat16)
    p["fc3_b"] = s * jax.random.normal(next(keys), (1, n_actions), jnp.float32)
    return p


# -------------------------------- forward ----------------------------------

def dqn_forward(params, x1_nchw, x2_nchw, vec):
    """x1, x2: (N, frame_history_len, H, W) NCHW (PyTorch convention); vec: (N, 4)."""
    x = jnp.stack([x1_nchw, x2_nchw], axis=0).astype(jnp.bfloat16)  # (2, N, C, H, W)
    x = jnp.transpose(x, (0, 1, 3, 4, 2))                           # -> (2, N, H, W, C)

    for i in (1, 2, 3):
        x = conv5x5_relu_pool(x, params[f"conv{i}_w"], params[f"conv{i}_b"])

    n = x.shape[1]
    f1 = x[0].reshape(n, -1)                                        # bf16, NHWC flatten order
    f2 = x[1].reshape(n, -1)
    return mlp_head(f1, f2, vec.astype(jnp.float32), params)


# --------------------------- pure-JAX reference ------------------------------

def _reference_forward(params, x1_nchw, x2_nchw, vec):
    x = jnp.stack([x1_nchw, x2_nchw], axis=0).astype(jnp.bfloat16)
    x = jnp.transpose(x, (0, 1, 3, 4, 2))
    for i in (1, 2, 3):
        cols, hp, wp = _im2col_pool_phases(x)                      # (2, 4, G, K) bf16
        z = jnp.einsum("bpgk,bkc->bpgc", cols, params[f"conv{i}_w"],
                       preferred_element_type=jnp.float32)
        z = jnp.max(z, axis=1) + params[f"conv{i}_b"]
        z = jnp.maximum(z, 0.0).astype(jnp.bfloat16)
        n = x.shape[1]
        x = z.reshape(2, n, hp, wp, -1)
    n = x.shape[1]
    f1 = x[0].reshape(n, -1)
    f2 = x[1].reshape(n, -1)
    z1 = (jnp.dot(f1, params["fc1_w_f1"], preferred_element_type=jnp.float32)
          + jnp.dot(f2, params["fc1_w_f2"], preferred_element_type=jnp.float32)
          + jnp.dot(vec.astype(jnp.float32), params["fc1_w_vec"],
                    preferred_element_type=jnp.float32)
          + params["fc1_b"])
    z1 = jnp.maximum(z1, 0.0)
    z2 = jnp.dot(z1.astype(jnp.bfloat16), params["fc2_w"],
                 preferred_element_type=jnp.float32) + params["fc2_b"]
    z2 = jnp.maximum(z2, 0.0)
    return jnp.dot(z2.astype(jnp.bfloat16), params["fc3_w"],
                   preferred_element_type=jnp.float32) + params["fc3_b"]


# --------------------------------- main -------------------------------------

if __name__ == "__main__":
    N = 2                 # batch
    FRAME_HIST = 4        # frame_history_len
    H_IMG = W_IMG = 40    # survives 3x (conv5 valid + pool2)
    N_ACTIONS = 6

    params = init_params(jax.random.PRNGKey(1), FRAME_HIST, H_IMG, W_IMG, N_ACTIONS)

    k1, k2, k3 = jax.random.split(jax.random.PRNGKey(0), 3)
    x1 = jax.random.normal(k1, (N, FRAME_HIST, H_IMG, W_IMG), jnp.float32)
    x2 = jax.random.normal(k2, (N, FRAME_HIST, H_IMG, W_IMG), jnp.float32)
    vec = jax.random.normal(k3, (N, 4), jnp.float32)

    out = jax.block_until_ready(jax.jit(dqn_forward)(params, x1, x2, vec))
    assert out.shape == (N, N_ACTIONS), out.shape
    assert bool(jnp.all(jnp.isfinite(out)))

    ref = jax.block_until_ready(jax.jit(_reference_forward)(params, x1, x2, vec))
    max_err = float(jnp.max(jnp.abs(out - ref)))
    assert jnp.allclose(out, ref, atol=1e-2, rtol=1e-2), max_err

    print("KERNEL_OK")
</pallas_src>

<mosaic_0001>
module attributes {stable_mosaic.version = 11 : i64} {
  func.func @_conv_bias_relu_pool_kernel(%arg0: i32, %arg1: i32, %arg2: memref<1x4x648x100xbf16, #tpu.memory_space<vmem>>, %arg3: memref<1x100x32xbf16, #tpu.memory_space<vmem>>, %arg4: memref<1x1x32xf32, #tpu.memory_space<vmem>>, %arg5: memref<1x648x32xbf16, #tpu.memory_space<vmem>>) attributes {dimension_semantics = [#tpu.dimension_semantics<parallel>, #tpu.dimension_semantics<parallel>], iteration_bounds = array<i64: 2, 1>, scalar_prefetch = 0 : i64, scratch_operands = 0 : i64, tpu.core_type = #tpu.core_type<tc>, window_params = [{transform_indices = @transform_0, window_bounds = array<i64: 1, 4, 648, 100>}, {transform_indices = @transform_1, window_bounds = array<i64: 1, 100, 32>}, {transform_indices = @transform_2, window_bounds = array<i64: 1, 1, 32>}, {transform_indices = @transform_3, window_bounds = array<i64: 1, 648, 32>}]} {
    %c0 = arith.constant 0 : index
    %c0_0 = arith.constant 0 : index
    %c0_1 = arith.constant 0 : index
    %c0_2 = arith.constant 0 : index
    %0 = vector.load %arg2[%c0, %c0_0, %c0_1, %c0_2] : memref<1x4x648x100xbf16, #tpu.memory_space<vmem>>, vector<1x4x648x100xbf16>
    %1 = vector.shape_cast %0 : vector<1x4x648x100xbf16> to vector<4x648x100xbf16>
    %2 = vector.shape_cast %1 : vector<4x648x100xbf16> to vector<2592x100xbf16>
    %c0_3 = arith.constant 0 : index
    %c0_4 = arith.constant 0 : index
    %c0_5 = arith.constant 0 : index
    %3 = vector.load %arg3[%c0_3, %c0_4, %c0_5] : memref<1x100x32xbf16, #tpu.memory_space<vmem>>, vector<1x100x32xbf16>
    %4 = vector.shape_cast %3 : vector<1x100x32xbf16> to vector<100x32xbf16>
    %cst = arith.constant dense<0.000000e+00> : vector<2592x32xf32>
    %5 = tpu.matmul %2, %4, %cst {dimension_numbers = #tpu.dot_dimension_numbers<[1], [0], [0], [1], [0, 0, 1, 1], [], []>} : vector<2592x100xbf16>, vector<100x32xbf16>, vector<2592x32xf32> -> vector<2592x32xf32>
    %6 = vector.shape_cast %5 : vector<2592x32xf32> to vector<4x648x32xf32>
    %cst_6 = arith.constant dense<0xFF800000> : vector<648x32xf32>
    %7 = vector.multi_reduction <maximumf>, %6, %cst_6 [0] : vector<4x648x32xf32> to vector<648x32xf32>
    %c0_7 = arith.constant 0 : index
    %c0_8 = arith.constant 0 : index
    %c0_9 = arith.constant 0 : index
    %8 = vector.load %arg4[%c0_7, %c0_8, %c0_9] : memref<1x1x32xf32, #tpu.memory_space<vmem>>, vector<1x1x32xf32>
    %9 = vector.shape_cast %8 : vector<1x1x32xf32> to vector<1x32xf32>
    %10 = vector.broadcast %9 : vector<1x32xf32> to vector<648x32xf32>
    %11 = arith.addf %7, %10 : vector<648x32xf32>
    %cst_10 = arith.constant 0.000000e+00 : f32
    %12 = vector.broadcast %cst_10 : f32 to vector<648x32xf32>
    %13 = arith.maximumf %11, %12 : vector<648x32xf32>
    %14 = arith.truncf %13 : vector<648x32xf32> to vector<648x32xbf16>
    %c0_11 = arith.constant 0 : index
    %c0_12 = arith.constant 0 : index
    %c0_13 = arith.constant 0 : index
    %15 = vector.load %arg5[%c0_11, %c0_12, %c0_13] : memref<1x648x32xbf16, #tpu.memory_space<vmem>>, vector<1x648x32xbf16>
    %16 = vector.shape_cast %15 : vector<1x648x32xbf16> to vector<648x32xbf16>
    %17 = vector.shape_cast %14 : vector<648x32xbf16> to vector<1x648x32xbf16>
    tpu.vector_store %arg5[%c0_11, %c0_12, %c0_13], %17 {strides = array<i32>} : memref<1x648x32xbf16, #tpu.memory_space<vmem>>, vector<1x648x32xbf16>,
    return
  }
  func.func @transform_0(%arg0: i32, %arg1: i32) -> (i32, i32, i32, i32) {
    %c0_i32 = arith.constant 0 : i32
    %c0_i32_0 = arith.constant 0 : i32
    %c0_i32_1 = arith.constant 0 : i32
    return %arg0, %c0_i32, %arg1, %c0_i32_0 : i32, i32, i32, i32
  }
  func.func @transform_1(%arg0: i32, %arg1: i32) -> (i32, i32, i32) {
    %c0_i32 = arith.constant 0 : i32
    %c0_i32_0 = arith.constant 0 : i32
    %c0_i32_1 = arith.constant 0 : i32
    return %arg0, %c0_i32, %c0_i32_0 : i32, i32, i32
  }
  func.func @transform_2(%arg0: i32, %arg1: i32) -> (i32, i32, i32) {
    %c0_i32 = arith.constant 0 : i32
    %c0_i32_0 = arith.constant 0 : i32
    %c0_i32_1 = arith.constant 0 : i32
    return %arg0, %c0_i32, %c0_i32_0 : i32, i32, i32
  }
  func.func @transform_3(%arg0: i32, %arg1: i32) -> (i32, i32, i32) {
    %c0_i32 = arith.constant 0 : i32
    %c0_i32_0 = arith.constant 0 : i32
    return %arg0, %arg1, %c0_i32 : i32, i32, i32
  }
}

module attributes {stable_mosaic.version = 11 : i64} {
  func.func @_conv_bias_relu_pool_kernel(%arg0: i32, %arg1: i32, %arg2: memref<1x4x104x800xbf16, #tpu.memory_space<vmem>>, %arg3: memref<1x800x64xbf16, #tpu.memory_space<vmem>>, %arg4: memref<1x1x64xf32, #tpu.memory_space<vmem>>, %arg5: memref<1x104x64xbf16, #tpu.memory_space<vmem>>) attributes {dimension_semantics = [#tpu.dimension_semantics<parallel>, #tpu.dimension_semantics<parallel>], iteration_bounds = array<i64: 2, 1>, scalar_prefetch = 0 : i64, scratch_operands = 0 : i64, tpu.core_type = #tpu.core_type<tc>, window_params = [{transform_indices = @transform_0, window_bounds = array<i64: 1, 4, 104, 800>}, {transform_indices = @transform_1, window_bounds = array<i64: 1, 800, 64>}, {transform_indices = @transform_2, window_bounds = array<i64: 1, 1, 64>}, {transform_indices = @transform_3, window_bounds = array<i64: 1, 104, 64>}]} {
    %c0 = arith.constant 0 : index
    %c0_0 = arith.constant 0 : index
    %c0_1 = arith.constant 0 : index
    %c0_2 = arith.constant 0 : index
    %0 = vector.load %arg2[%c0, %c0_0, %c0_1, %c0_2] : memref<1x4x104x800xbf16, #tpu.memory_space<vmem>>, vector<1x4x104x800xbf16>
    %1 = vector.shape_cast %0 : vector<1x4x104x800xbf16> to vector<4x104x800xbf16>
    %2 = vector.shape_cast %1 : vector<4x104x800xbf16> to vector<416x800xbf16>
    %c0_3 = arith.constant 0 : index
    %c0_4 = arith.constant 0 : index
    %c0_5 = arith.constant 0 : index
    %3 = vector.load %arg3[%c0_3, %c0_4, %c0_5] : memref<1x800x64xbf16, #tpu.memory_space<vmem>>, vector<1x800x64xbf16>
    %4 = vector.shape_cast %3 : vector<1x800x64xbf16> to vector<800x64xbf16>
    %cst = arith.constant dense<0.000000e+00> : vector<416x64xf32>
    %5 = tpu.matmul %2, %4, %cst {dimension_numbers = #tpu.dot_dimension_numbers<[1], [0], [0], [1], [0, 0, 1, 1], [], []>} : vector<416x800xbf16>, vector<800x64xbf16>, vector<416x64xf32> -> vector<416x64xf32>
    %6 = vector.shape_cast %5 : vector<416x64xf32> to vector<4x104x64xf32>
    %cst_6 = arith.constant dense<0xFF800000> : vector<104x64xf32>
    %7 = vector.multi_reduction <maximumf>, %6, %cst_6 [0] : vector<4x104x64xf32> to vector<104x64xf32>
    %c0_7 = arith.constant 0 : index
    %c0_8 = arith.constant 0 : index
    %c0_9 = arith.constant 0 : index
    %8 = vector.load %arg4[%c0_7, %c0_8, %c0_9] : memref<1x1x64xf32, #tpu.memory_space<vmem>>, vector<1x1x64xf32>
    %9 = vector.shape_cast %8 : vector<1x1x64xf32> to vector<1x64xf32>
    %10 = vector.broadcast %9 : vector<1x64xf32> to vector<104x64xf32>
    %11 = arith.addf %7, %10 : vector<104x64xf32>
    %cst_10 = arith.constant 0.000000e+00 : f32
    %12 = vector.broadcast %cst_10 : f32 to vector<104x64xf32>
    %13 = arith.maximumf %11, %12 : vector<104x64xf32>
    %14 = arith.truncf %13 : vector<104x64xf32> to vector<104x64xbf16>
    %c0_11 = arith.constant 0 : index
    %c0_12 = arith.constant 0 : index
    %c0_13 = arith.constant 0 : index
    %15 = vector.load %arg5[%c0_11, %c0_12, %c0_13] : memref<1x104x64xbf16, #tpu.memory_space<vmem>>, vector<1x104x64xbf16>
    %16 = vector.shape_cast %15 : vector<1x104x64xbf16> to vector<104x64xbf16>
    %17 = vector.shape_cast %14 : vector<104x64xbf16> to vector<1x104x64xbf16>
    tpu.vector_store %arg5[%c0_11, %c0_12, %c0_13], %17 {strides = array<i32>} : memref<1x104x64xbf16, #tpu.memory_space<vmem>>, vector<1x104x64xbf16>,
    return
  }
  func.func @transform_0(%arg0: i32, %arg1: i32) -> (i32, i32, i32, i32) {
    %c0_i32 = arith.constant 0 : i32
    %c0_i32_0 = arith.constant 0 : i32
    %c0_i32_1 = arith.constant 0 : i32
    return %arg0, %c0_i32, %arg1, %c0_i32_0 : i32, i32, i32, i32
  }
  func.func @transform_1(%arg0: i32, %arg1: i32) -> (i32, i32, i32) {
    %c0_i32 = arith.constant 0 : i32
    %c0_i32_0 = arith.constant 0 : i32
    %c0_i32_1 = arith.constant 0 : i32
    return %arg0, %c0_i32, %c0_i32_0 : i32, i32, i32
  }
  func.func @transform_2(%arg0: i32, %arg1: i32) -> (i32, i32, i32) {
    %c0_i32 = arith.constant 0 : i32
    %c0_i32_0 = arith.constant 0 : i32
    %c0_i32_1 = arith.constant 0 : i32
    return %arg0, %c0_i32, %c0_i32_0 : i32, i32, i32
  }
  func.func @transform_3(%arg0: i32, %arg1: i32) -> (i32, i32, i32) {
    %c0_i32 = arith.constant 0 : i32
    %c0_i32_0 = arith.constant 0 : i32
    return %arg0, %arg1, %c0_i32 : i32, i32, i32
  }
}

module attributes {stable_mosaic.version = 11 : i64} {
  func.func @_conv_bias_relu_pool_kernel(%arg0: i32, %arg1: i32, %arg2: memref<1x4x8x1600xbf16, #tpu.memory_space<vmem>>, %arg3: memref<1x1600x128xbf16, #tpu.memory_space<vmem>>, %arg4: memref<1x1x128xf32, #tpu.memory_space<vmem>>, %arg5: memref<1x8x128xbf16, #tpu.memory_space<vmem>>) attributes {dimension_semantics = [#tpu.dimension_semantics<parallel>, #tpu.dimension_semantics<parallel>], iteration_bounds = array<i64: 2, 1>, scalar_prefetch = 0 : i64, scratch_operands = 0 : i64, tpu.core_type = #tpu.core_type<tc>, window_params = [{transform_indices = @transform_0, window_bounds = array<i64: 1, 4, 8, 1600>}, {transform_indices = @transform_1, window_bounds = array<i64: 1, 1600, 128>}, {transform_indices = @transform_2, window_bounds = array<i64: 1, 1, 128>}, {transform_indices = @transform_3, window_bounds = array<i64: 1, 8, 128>}]} {
    %c0 = arith.constant 0 : index
    %c0_0 = arith.constant 0 : index
    %c0_1 = arith.constant 0 : index
    %c0_2 = arith.constant 0 : index
    %0 = vector.load %arg2[%c0, %c0_0, %c0_1, %c0_2] : memref<1x4x8x1600xbf16, #tpu.memory_space<vmem>>, vector<1x4x8x1600xbf16>
    %1 = vector.shape_cast %0 : vector<1x4x8x1600xbf16> to vector<4x8x1600xbf16>
    %2 = vector.shape_cast %1 : vector<4x8x1600xbf16> to vector<32x1600xbf16>
    %c0_3 = arith.constant 0 : index
    %c0_4 = arith.constant 0 : index
    %c0_5 = arith.constant 0 : index
    %3 = vector.load %arg3[%c0_3, %c0_4, %c0_5] : memref<1x1600x128xbf16, #tpu.memory_space<vmem>>, vector<1x1600x128xbf16>
    %4 = vector.shape_cast %3 : vector<1x1600x128xbf16> to vector<1600x128xbf16>
    %cst = arith.constant dense<0.000000e+00> : vector<32x128xf32>
    %5 = tpu.matmul %2, %4, %cst {dimension_numbers = #tpu.dot_dimension_numbers<[1], [0], [0], [1], [0, 0, 1, 1], [], []>} : vector<32x1600xbf16>, vector<1600x128xbf16>, vector<32x128xf32> -> vector<32x128xf32>
    %6 = vector.shape_cast %5 : vector<32x128xf32> to vector<4x8x128xf32>
    %cst_6 = arith.constant dense<0xFF800000> : vector<8x128xf32>
    %7 = vector.multi_reduction <maximumf>, %6, %cst_6 [0] : vector<4x8x128xf32> to vector<8x128xf32>
    %c0_7 = arith.constant 0 : index
    %c0_8 = arith.constant 0 : index
    %c0_9 = arith.constant 0 : index
    %8 = vector.load %arg4[%c0_7, %c0_8, %c0_9] : memref<1x1x128xf32, #tpu.memory_space<vmem>>, vector<1x1x128xf32>
    %9 = vector.shape_cast %8 : vector<1x1x128xf32> to vector<1x128xf32>
    %10 = vector.broadcast %9 : vector<1x128xf32> to vector<8x128xf32>
    %11 = arith.addf %7, %10 : vector<8x128xf32>
    %cst_10 = arith.constant 0.000000e+00 : f32
    %12 = vector.broadcast %cst_10 : f32 to vector<8x128xf32>
    %13 = arith.maximumf %11, %12 : vector<8x128xf32>
    %14 = arith.truncf %13 : vector<8x128xf32> to vector<8x128xbf16>
    %c0_11 = arith.constant 0 : index
    %c0_12 = arith.constant 0 : index
    %c0_13 = arith.constant 0 : index
    %15 = vector.load %arg5[%c0_11, %c0_12, %c0_13] : memref<1x8x128xbf16, #tpu.memory_space<vmem>>, vector<1x8x128xbf16>
    %16 = vector.shape_cast %15 : vector<1x8x128xbf16> to vector<8x128xbf16>
    %17 = vector.shape_cast %14 : vector<8x128xbf16> to vector<1x8x128xbf16>
    tpu.vector_store %arg5[%c0_11, %c0_12, %c0_13], %17 {strides = array<i32>} : memref<1x8x128xbf16, #tpu.memory_space<vmem>>, vector<1x8x128xbf16>,
    return
  }
  func.func @transform_0(%arg0: i32, %arg1: i32) -> (i32, i32, i32, i32) {
    %c0_i32 = arith.constant 0 : i32
    %c0_i32_0 = arith.constant 0 : i32
    %c0_i32_1 = arith.constant 0 : i32
    return %arg0, %c0_i32, %arg1, %c0_i32_0 : i32, i32, i32, i32
  }
  func.func @transform_1(%arg0: i32, %arg1: i32) -> (i32, i32, i32) {
    %c0_i32 = arith.constant 0 : i32
    %c0_i32_0 = arith.constant 0 : i32
    %c0_i32_1 = arith.constant 0 : i32
    return %arg0, %c0_i32, %c0_i32_0 : i32, i32, i32
  }
  func.func @transform_2(%arg0: i32, %arg1: i32) -> (i32, i32, i32) {
    %c0_i32 = arith.constant 0 : i32
    %c0_i32_0 = arith.constant 0 : i32
    %c0_i32_1 = arith.constant 0 : i32
    return %arg0, %c0_i32, %c0_i32_0 : i32, i32, i32
  }
  func.func @transform_3(%arg0: i32, %arg1: i32) -> (i32, i32, i32) {
    %c0_i32 = arith.constant 0 : i32
    %c0_i32_0 = arith.constant 0 : i32
    return %arg0, %arg1, %c0_i32 : i32, i32, i32
  }
}

module attributes {stable_mosaic.version = 11 : i64} {
  func.func @_mlp_head_kernel(%arg0: memref<2x128xbf16, #tpu.memory_space<vmem>>, %arg1: memref<2x128xbf16, #tpu.memory_space<vmem>>, %arg2: memref<2x4xf32, #tpu.memory_space<vmem>>, %arg3: memref<128x512xbf16, #tpu.memory_space<vmem>>, %arg4: memref<128x512xbf16, #tpu.memory_space<vmem>>, %arg5: memref<4x512xf32, #tpu.memory_space<vmem>>, %arg6: memref<1x512xf32, #tpu.memory_space<vmem>>, %arg7: memref<512x256xbf16, #tpu.memory_space<vmem>>, %arg8: memref<1x256xf32, #tpu.memory_space<vmem>>, %arg9: memref<256x6xbf16, #tpu.memory_space<vmem>>, %arg10: memref<1x6xf32, #tpu.memory_space<vmem>>, %arg11: memref<2x6xf32, #tpu.memory_space<vmem>>) attributes {dimension_semantics = [], scalar_prefetch = 0 : i64, scratch_operands = 0 : i64, tpu.core_type = #tpu.core_type<tc>} {
    %c0 = arith.constant 0 : index
    %c0_0 = arith.constant 0 : index
    %0 = vector.load %arg0[%c0, %c0_0] : memref<2x128xbf16, #tpu.memory_space<vmem>>, vector<2x128xbf16>
    %c0_1 = arith.constant 0 : index
    %c0_2 = arith.constant 0 : index
    %1 = vector.load %arg3[%c0_1, %c0_2] : memref<128x512xbf16, #tpu.memory_space<vmem>>, vector<128x512xbf16>
    %cst = arith.constant dense<0.000000e+00> : vector<2x512xf32>
    %2 = tpu.matmul %0, %1, %cst {dimension_numbers = #tpu.dot_dimension_numbers<[1], [0], [0], [1], [0, 0, 1, 1], [], []>} : vector<2x128xbf16>, vector<128x512xbf16>, vector<2x512xf32> -> vector<2x512xf32>
    %c0_3 = arith.constant 0 : index
    %c0_4 = arith.constant 0 : index
    %3 = vector.load %arg1[%c0_3, %c0_4] : memref<2x128xbf16, #tpu.memory_space<vmem>>, vector<2x128xbf16>
    %c0_5 = arith.constant 0 : index
    %c0_6 = arith.constant 0 : index
    %4 = vector.load %arg4[%c0_5, %c0_6] : memref<128x512xbf16, #tpu.memory_space<vmem>>, vector<128x512xbf16>
    %cst_7 = arith.constant dense<0.000000e+00> : vector<2x512xf32>
    %5 = tpu.matmul %3, %4, %cst_7 {dimension_numbers = #tpu.dot_dimension_numbers<[1], [0], [0], [1], [0, 0, 1, 1], [], []>} : vector<2x128xbf16>, vector<128x512xbf16>, vector<2x512xf32> -> vector<2x512xf32>
    %6 = arith.addf %2, %5 : vector<2x512xf32>
    %c0_8 = arith.constant 0 : index
    %c0_9 = arith.constant 0 : index
    %7 = vector.load %arg2[%c0_8, %c0_9] : memref<2x4xf32, #tpu.memory_space<vmem>>, vector<2x4xf32>
    %c0_10 = arith.constant 0 : index
    %c0_11 = arith.constant 0 : index
    %8 = vector.load %arg5[%c0_10, %c0_11] : memref<4x512xf32, #tpu.memory_space<vmem>>, vector<4x512xf32>
    %cst_12 = arith.constant dense<0.000000e+00> : vector<2x512xf32>
    %9 = tpu.matmul %7, %8, %cst_12 {dimension_numbers = #tpu.dot_dimension_numbers<[1], [0], [0], [1], [0, 0, 1, 1], [], []>} : vector<2x4xf32>, vector<4x512xf32>, vector<2x512xf32> -> vector<2x512xf32>
    %10 = arith.addf %6, %9 : vector<2x512xf32>
    %c0_13 = arith.constant 0 : index
    %c0_14 = arith.constant 0 : index
    %11 = vector.load %arg6[%c0_13, %c0_14] : memref<1x512xf32, #tpu.memory_space<vmem>>, vector<1x512xf32>
    %12 = vector.broadcast %11 : vector<1x512xf32> to vector<2x512xf32>
    %13 = arith.addf %10, %12 : vector<2x512xf32>
    %cst_15 = arith.constant 0.000000e+00 : f32
    %14 = vector.broadcast %cst_15 : f32 to vector<2x512xf32>
    %15 = arith.maximumf %13, %14 : vector<2x512xf32>
    %16 = arith.truncf %15 : vector<2x512xf32> to vector<2x512xbf16>
    %c0_16 = arith.constant 0 : index
    %c0_17 = arith.constant 0 : index
    %17 = vector.load %arg7[%c0_16, %c0_17] : memref<512x256xbf16, #tpu.memory_space<vmem>>, vector<512x256xbf16>
    %cst_18 = arith.constant dense<0.000000e+00> : vector<2x256xf32>
    %18 = tpu.matmul %16, %17, %cst_18 {dimension_numbers = #tpu.dot_dimension_numbers<[1], [0], [0], [1], [0, 0, 1, 1], [], []>} : vector<2x512xbf16>, vector<512x256xbf16>, vector<2x256xf32> -> vector<2x256xf32>
    %c0_19 = arith.constant 0 : index
    %c0_20 = arith.constant 0 : index
    %19 = vector.load %arg8[%c0_19, %c0_20] : memref<1x256xf32, #tpu.memory_space<vmem>>, vector<1x256xf32>
    %20 = vector.broadcast %19 : vector<1x256xf32> to vector<2x256xf32>
    %21 = arith.addf %18, %20 : vector<2x256xf32>
    %cst_21 = arith.constant 0.000000e+00 : f32
    %22 = vector.broadcast %cst_21 : f32 to vector<2x256xf32>
    %23 = arith.maximumf %21, %22 : vector<2x256xf32>
    %24 = arith.truncf %23 : vector<2x256xf32> to vector<2x256xbf16>
    %c0_22 = arith.constant 0 : index
    %c0_23 = arith.constant 0 : index
    %25 = vector.load %arg9[%c0_22, %c0_23] : memref<256x6xbf16, #tpu.memory_space<vmem>>, vector<256x6xbf16>
    %cst_24 = arith.constant dense<0.000000e+00> : vector<2x6xf32>
    %26 = tpu.matmul %24, %25, %cst_24 {dimension_numbers = #tpu.dot_dimension_numbers<[1], [0], [0], [1], [0, 0, 1, 1], [], []>} : vector<2x256xbf16>, vector<256x6xbf16>, vector<2x6xf32> -> vector<2x6xf32>
    %c0_25 = arith.constant 0 : index
    %c0_26 = arith.constant 0 : index
    %27 = vector.load %arg10[%c0_25, %c0_26] : memref<1x6xf32, #tpu.memory_space<vmem>>, vector<1x6xf32>
    %28 = vector.broadcast %27 : vector<1x6xf32> to vector<2x6xf32>
    %29 = arith.addf %26, %28 : vector<2x6xf32>
    %c0_27 = arith.constant 0 : index
    %c0_28 = arith.constant 0 : index
    %30 = vector.load %arg11[%c0_27, %c0_28] : memref<2x6xf32, #tpu.memory_space<vmem>>, vector<2x6xf32>
    tpu.vector_store %arg11[%c0_27, %c0_28], %29 {strides = array<i32>} : memref<2x6xf32, #tpu.memory_space<vmem>>, vector<2x6xf32>,
    return
  }
}

</mosaic_0001>

<bundles_post_ra>
// kernel: dqn_forward.4
= control target key start
LH: loop header
LB: loop body
LE: loop exit
PB: predicated region body
PF: predicated region fallthrough
CT: control target
= control target key end

     0   :  { %s4853_s12 = smov 0   ;;  %s4855_s13 = smov 0   ;;  %s5819_s0 = inlined_call_operand.vmem [shape: bf16[2,4,648,100], index: 0, kind: input, shape index: {}]   ;;  %s5820_s1 = inlined_call_operand.vmem [shape: bf16[2,100,32], index: 1, kind: input, shape index: {}]   ;;  %s5821_s2 = inlined_call_operand.vmem [shape: f32[2,1,32], index: 2, kind: input, shape index: {}]   ;;  %s5822_s3 = inlined_call_operand.vmem [shape: bf16[2,648,32], index: 3, kind: output, shape index: {}]  }
   0x1   :  { %s4857_s14 = smov 0  }
   0x2 LB: > { %s25_s15 = sadd.s32 1, %s4827_s13  ;;  %p3750_p0 = scmp.ge.s32.totalorder %s4831_s14, 1  ;;  %s4831_s14 = sphi %s4857_s14, %s13_s14   ;;  %s4827_s13 = sphi %s4855_s13, %s5824_s13   ;;  %s4823_s12 = sphi %s4853_s12, %s5823_s12  }
   0x3   : > { %p27_p1 = scmp.ge.s32.totalorder %s25_s15, 2  ;;  %p176_p2 = scmp.lt.s32.totalorder %s4831_s14, 3 }
   0x5   : > { %s5826_s15 = smov (%p27_p1, %s25_s15), 0  ;;  %p177_p3 = pnand %p3750_p0, %p176_p2 }
   0x6   : > { %p217_p4 = scmp.lt.s32.totalorder (!%p177_p3), %s4823_s12, 1 }
   0x7   : > { %180 = sbr.rel (%p177_p3) target bundleno = 839 (0x347), region = 32 }
   0xc   : > { %s5828_s12 = smov (!%p217_p4, %s4823_s12), 1  ;;  %vm1918_vm0 = vcmask 1041408   ;;  %vm1431_vm1 = vcmask 818176   ;;  %vm2741_vm2 = vcmask 261120   ;;  %vm3556_vm3 = vcmask 257024  }
   0xd   : > { %s4780_s16 = smul.u32 52, %s5828_s12  ;;  %s4906_s26 = scalar_lea.vmem %s5821_s2, %s5828_s12 }
   0xe   : > { %s4779_s20 = smul.u32 1296, %s5828_s12 }
   0xf   : > { %s4877_s19 = scalar_lea.vmem %s5820_s1, %s4780_s16  ;;  %s4781_s27 = smul.u32 324, %s5828_s12 }
  0x10   : > { %v581_v0 = vld [vmem:[%s4877_s19 + $0x30] sm:$0x3]  ;;  %v4757_v4 = vld [vmem:[%s4877_s19 + $0x28] sm:$0xff]  ;;  %v4756_v5 = vld [vmem:[%s4877_s19 + $0x20] sm:$0xff]  ;;  %s4890_s23 = scalar_lea.vmem %s5819_s0, %s4779_s20 }
  0x11   : > { %v1417_v1 = vunpack.c.l.b16 %v581_v0  ;;  %v4755_v6 = vld [vmem:[%s4877_s19 + $0x18] sm:$0xff]  ;;  %v4754_v7 = vld [vmem:[%s4877_s19 + $0x10] sm:$0xff]  ;;  %v4753_v8 = vld [vmem:[%s4877_s19 + $0x8] sm:$0xff]  ;;  %s4999_s30 = scalar_lea.vmem %s5822_s3, %s4781_s27 }
  0x12   : > { %v4752_v9 = vld [vmem:[%s4877_s19] sm:$0xff]  ;;  %v4671_v11 = vld [vmem:[%s4890_s23 + $0x288] sm:$0xff]  ;;  %v4712_v13 = vld [vmem:[%s4890_s23 + $0x3d0] sm:$0xff] }
  0x13   : > { %v1424_v2 = vpack.c.b16 %v1417_v1, %v1417_v1  ;;  %v4630_v10 = vld [vmem:[%s4890_s23 + $0x140] sm:$0xff]  ;;  %v4631_v14 = vld [vmem:[%s4890_s23 + $0x148] sm:$0xff]  ;;  %v4672_v15 = vld [vmem:[%s4890_s23 + $0x290] sm:$0xff] }
  0x14   : > { %v4590_v12 = vld [vmem:[%s4890_s23] sm:$0xff]  ;;  %v4591_v16 = vld [vmem:[%s4890_s23 + $0x8] sm:$0xff]  ;;  %v4713_v17 = vld [vmem:[%s4890_s23 + $0x3d8] sm:$0xff] }
  0x15   : > { %v1920_v3 = vsel %vm1918_vm0, %v1424_v2, 0  ;;  %v4632_v18 = vld [vmem:[%s4890_s23 + $0x150] sm:$0xff]  ;;  %v4673_v19 = vld [vmem:[%s4890_s23 + $0x298] sm:$0xff]  ;;  %v4714_v21 = vld [vmem:[%s4890_s23 + $0x3e0] sm:$0xff] }
  0x16   : > { %4758 = vmatpush.bf16.msra.mxu1 %v1920_v3  ;;  %4759 = vmatpush.bf16.msra.mxu2 %v1920_v3  ;;  %v4592_v20 = vld [vmem:[%s4890_s23 + $0x10] sm:$0xff]  ;;  %v4633_v22 = vld [vmem:[%s4890_s23 + $0x158] sm:$0xff]  ;;  %v4674_v23 = vld [vmem:[%s4890_s23 + $0x2a0] sm:$0xff] }
  0x17   : > { %1923 = vmatpush.bf16.msra.mxu0 %v1920_v3  ;;  %4760 = vmatpush.bf16.msra.mxu3 %v1920_v3  ;;  %v4593_v24 = vld [vmem:[%s4890_s23 + $0x18] sm:$0xff]  ;;  %v4715_v25 = vld [vmem:[%s4890_s23 + $0x3e8] sm:$0xff]  ;;  %v4634_v26 = vld [vmem:[%s4890_s23 + $0x160] sm:$0xff] }
  0x18   : > { %v4675_v27 = vld [vmem:[%s4890_s23 + $0x2a8] sm:$0xff]  ;;  %v4594_v28 = vld [vmem:[%s4890_s23 + $0x20] sm:$0xff]  ;;  %v4716_v29 = vld [vmem:[%s4890_s23 + $0x3f0] sm:$0xff] }
  0x19   : > { %v4635_v30 = vld [vmem:[%s4890_s23 + $0x168] sm:$0xff]  ;;  %v4676_v31 = vld [vmem:[%s4890_s23 + $0x2b0] sm:$0xff]  ;;  %v4717_v33 = vld [vmem:[%s4890_s23 + $0x3f8] sm:$0xff] }
  0x1a   : > { %4761 = vmatpush.bf16.msra.mxu1 %v4757_v4  ;;  %4762 = vmatpush.bf16.msra.mxu2 %v4757_v4  ;;  %v4595_v32 = vld [vmem:[%s4890_s23 + $0x28] sm:$0xff]  ;;  %v4636_v34 = vld [vmem:[%s4890_s23 + $0x170] sm:$0xff]  ;;  %v4677_v35 = vld [vmem:[%s4890_s23 + $0x2b8] sm:$0xff] }
  0x1b   : > { %1924 = vmatpush.bf16.msra.mxu0 %v4757_v4  ;;  %4763 = vmatpush.bf16.msra.mxu3 %v4757_v4  ;;  %v4596_v36 = vld [vmem:[%s4890_s23 + $0x30] sm:$0xff]  ;;  %v4718_v37 = vld [vmem:[%s4890_s23 + $0x400] sm:$0xff]  ;;  %v4637_v38 = vld [vmem:[%s4890_s23 + $0x178] sm:$0xff] }
  0x1c   : > { %v4678_v39 = vld [vmem:[%s4890_s23 + $0x2c0] sm:$0xff]  ;;  %v4597_v40 = vld [vmem:[%s4890_s23 + $0x38] sm:$0xff]  ;;  %v4719_v41 = vld [vmem:[%s4890_s23 + $0x408] sm:$0xff] }
  0x1d   : > { %v4638_v42 = vld [vmem:[%s4890_s23 + $0x180] sm:$0xff]  ;;  %v4679_v43 = vld [vmem:[%s4890_s23 + $0x2c8] sm:$0xff]  ;;  %v4720_v46 = vld [vmem:[%s4890_s23 + $0x410] sm:$0xff] }
  0x1e   : > { %4764 = vmatpush.bf16.msra.mxu1 %v4756_v5  ;;  %4765 = vmatpush.bf16.msra.mxu2 %v4756_v5  ;;  %v4598_v45 = vld [vmem:[%s4890_s23 + $0x40] sm:$0xff]  ;;  %v4639_v59 = vld [vmem:[%s4890_s23 + $0x188] sm:$0xff]  ;;  %v4680_v60 = vld [vmem:[%s4890_s23 + $0x2d0] sm:$0xff] }
  0x1f   : > { %1925 = vmatpush.bf16.msra.mxu0 %v4756_v5  ;;  %4766 = vmatpush.bf16.msra.mxu3 %v4756_v5  ;;  %v4599_v63 = vld [vmem:[%s4890_s23 + $0x48] sm:$0xff]  ;;  %v4721_v0 = vld [vmem:[%s4890_s23 + $0x418] sm:$0xff] }
  0x22   : > { %4767 = vmatpush.bf16.msra.mxu1 %v4755_v6  ;;  %4768 = vmatpush.bf16.msra.mxu2 %v4755_v6 }
  0x23   : > { %1926 = vmatpush.bf16.msra.mxu0 %v4755_v6  ;;  %4769 = vmatpush.bf16.msra.mxu3 %v4755_v6 }
  0x26   : > { %4770 = vmatpush.bf16.msra.mxu1 %v4754_v7  ;;  %4771 = vmatpush.bf16.msra.mxu2 %v4754_v7 }
  0x27   : > { %1927 = vmatpush.bf16.msra.mxu0 %v4754_v7  ;;  %4772 = vmatpush.bf16.msra.mxu3 %v4754_v7  ;;  %v4988_v7 = vld [vmem:[%s4906_s26] ss:$0 sm:$0xff] }
  0x2a   : > { %4773 = vmatpush.bf16.msra.mxu1 %v4753_v8  ;;  %4774 = vmatpush.bf16.msra.mxu2 %v4753_v8 }
  0x2b   : > { %1928 = vmatpush.bf16.msra.mxu0 %v4753_v8  ;;  %4775 = vmatpush.bf16.msra.mxu3 %v4753_v8 }
  0x2e   : > { %4776 = vmatpush.bf16.msra.mxu1 %v4752_v9  ;;  %4777 = vmatpush.bf16.msra.mxu2 %v4752_v9 }
  0x2f   : > { %1929 = vmatpush.bf16.msra.mxu0 %v4752_v9  ;;  %4778 = vmatpush.bf16.msra.mxu3 %v4752_v9 }
  0x31   : > { %4466 = vmatmul.msk.bf16.vlgmr.msra.gmra.mxu1 %vm1431_vm1, %v4630_v10  ;;  %4507 = vmatmul.msk.bf16.vlgmr.msra.gmra.mxu2 %vm1431_vm1, %v4671_v11 }
  0x32   : > { %4426 = vmatmul.msk.bf16.vlgmr.msra.gmra.mxu0 %vm1431_vm1, %v4590_v12  ;;  %4548 = vmatmul.msk.bf16.vlgmr.msra.gmra.mxu3 %vm1431_vm1, %v4712_v13 }
  0x41   : > { %4467 = vmatmul.msk.bf16.gmra.mxu1 %vm1431_vm1, %v4631_v14  ;;  %4508 = vmatmul.msk.bf16.gmra.mxu2 %vm1431_vm1, %v4672_v15 }
  0x42   : > { %4427 = vmatmul.msk.bf16.gmra.mxu0 %vm1431_vm1, %v4591_v16  ;;  %4549 = vmatmul.msk.bf16.gmra.mxu3 %vm1431_vm1, %v4713_v17 }
  0x51   : > { %4468 = vmatmul.msk.bf16.gmra.mxu1 %vm1431_vm1, %v4632_v18  ;;  %4509 = vmatmul.msk.bf16.gmra.mxu2 %vm1431_vm1, %v4673_v19 }
  0x52   : > { %4428 = vmatmul.msk.bf16.gmra.mxu0 %vm1431_vm1, %v4592_v20  ;;  %4550 = vmatmul.msk.bf16.gmra.mxu3 %vm1431_vm1, %v4714_v21 }
  0x61   : > { %4469 = vmatmul.msk.bf16.gmra.mxu1 %vm1431_vm1, %v4633_v22  ;;  %4510 = vmatmul.msk.bf16.gmra.mxu2 %vm1431_vm1, %v4674_v23 }
  0x62   : > { %4429 = vmatmul.msk.bf16.gmra.mxu0 %vm1431_vm1, %v4593_v24  ;;  %4551 = vmatmul.msk.bf16.gmra.mxu3 %vm1431_vm1, %v4715_v25  ;;  %v4640_v25 = vld [vmem:[%s4890_s23 + $0x190] sm:$0xff] }
  0x71   : > { %4470 = vmatmul.msk.bf16.gmra.mxu1 %vm1431_vm1, %v4634_v26  ;;  %4511 = vmatmul.msk.bf16.gmra.mxu2 %vm1431_vm1, %v4675_v27  ;;  %v4681_v26 = vld [vmem:[%s4890_s23 + $0x2d8] sm:$0xff] }
  0x72   : > { %4430 = vmatmul.msk.bf16.gmra.mxu0 %vm1431_vm1, %v4594_v28  ;;  %4552 = vmatmul.msk.bf16.gmra.mxu3 %vm1431_vm1, %v4716_v29 }
  0x81   : > { %4471 = vmatmul.msk.bf16.gmra.mxu1 %vm1431_vm1, %v4635_v30  ;;  %4512 = vmatmul.msk.bf16.gmra.mxu2 %vm1431_vm1, %v4676_v31  ;;  %v4600_v30 = vld [vmem:[%s4890_s23 + $0x50] sm:$0xff]  ;;  %v4722_v31 = vld [vmem:[%s4890_s23 + $0x420] sm:$0xff] }
  0x82   : > { %4431 = vmatmul.msk.bf16.gmra.mxu0 %vm1431_vm1, %v4595_v32  ;;  %4553 = vmatmul.msk.bf16.gmra.mxu3 %vm1431_vm1, %v4717_v33 }
  0x91   : > { %4472 = vmatmul.msk.bf16.gmra.mxu1 %vm1431_vm1, %v4636_v34  ;;  %4513 = vmatmul.msk.bf16.gmra.mxu2 %vm1431_vm1, %v4677_v35 }
  0x92   : > { %4432 = vmatmul.msk.bf16.gmra.mxu0 %vm1431_vm1, %v4596_v36  ;;  %4554 = vmatmul.msk.bf16.gmra.mxu3 %vm1431_vm1, %v4718_v37 }
  0xa1   : > { %4473 = vmatmul.msk.bf16.gmra.mxu1 %vm1431_vm1, %v4637_v38  ;;  %4514 = vmatmul.msk.bf16.gmra.mxu2 %vm1431_vm1, %v4678_v39 }
  0xa2   : > { %4433 = vmatmul.msk.bf16.gmra.mxu0 %vm1431_vm1, %v4597_v40  ;;  %4555 = vmatmul.msk.bf16.gmra.mxu3 %vm1431_vm1, %v4719_v41 }
  0xae   : > { %v4964_v44 = vpop.f32.mrf.mxu1 }
  0xaf   : > { %v1931_v47 = vpop.f32.mrf.mxu0 }
  0xb0   : > { %v2742_v49 = vsel %vm2741_vm2, %v1931_v47, -inf }
  0xb1   : > { %4474 = vmatmul.msk.bf16.gmra.mxu1 %vm1431_vm1, %v4638_v42  ;;  %4515 = vmatmul.msk.bf16.gmra.mxu2 %vm1431_vm1, %v4679_v43 }
  0xb2   : > { %4434 = vmatmul.msk.bf16.gmra.mxu0 %vm1431_vm1, %v4598_v45  ;;  %4556 = vmatmul.msk.bf16.gmra.mxu3 %vm1431_vm1, %v4720_v46 }
  0xb4   : > { %v2336_v48 = vpop.f32.mrf.mxu2 }
  0xb5   : > { %v2541_v50 = vpop.f32.mrf.mxu3  ;;  %v2745_v55 = vsel %vm2741_vm2, %v2336_v48, -inf }
  0xb6   : > { %v2133_v51 = vpop.f32.mrf.mxu1  ;;  %v2754_v5 = vsel %vm2741_vm2, %v2541_v50, -inf }
  0xb7   : > { %v2743_v52 = vsel %vm2741_vm2, %v2133_v51, -inf  ;;  %v1933_v53 = vpop.f32.mrf.mxu0 }
  0xb8   : > { %v2744_v54 = vmax.f32 %v2742_v49, %v2743_v52  ;;  %v2749_v58 = vsel %vm2741_vm2, %v1933_v53, -inf }
  0xba   : > { %v4975_v56 = vmax.f32 %v2744_v54, %v2745_v55 }
  0xbc   : > { %v2338_v57 = vpop.f32.mrf.mxu2 }
  0xbd   : > { %v2543_v61 = vpop.f32.mrf.mxu3  ;;  %v2752_v4 = vsel %vm2741_vm2, %v2338_v57, -inf }
  0xbe   : > { %v2136_v62 = vpop.f32.mrf.mxu1  ;;  %v2761_v21 = vsel %vm2741_vm2, %v2543_v61, -inf }
  0xbf   : > { %v2750_v1 = vsel %vm2741_vm2, %v2136_v62, -inf  ;;  %v1936_v2 = vpop.f32.mrf.mxu0 }
  0xc0   : > { %v2751_v3 = vmax.f32 %v2749_v58, %v2750_v1  ;;  %v2756_v10 = vsel %vm2741_vm2, %v1936_v2, -inf  ;;  %v4723_v1 = vld [vmem:[%s4890_s23 + $0x428] sm:$0xff] }
  0xc1   : > { %4475 = vmatmul.msk.bf16.gmra.mxu1 %vm1431_vm1, %v4639_v59  ;;  %4516 = vmatmul.msk.bf16.gmra.mxu2 %vm1431_vm1, %v4680_v60  ;;  %v4641_v59 = vld [vmem:[%s4890_s23 + $0x198] sm:$0xff]  ;;  %v4682_v60 = vld [vmem:[%s4890_s23 + $0x2e0] sm:$0xff] }
  0xc2   : > { %v2753_v6 = vmax.f32 %v2751_v3, %v2752_v4  ;;  %4435 = vmatmul.msk.bf16.gmra.mxu0 %vm1431_vm1, %v4599_v63  ;;  %4557 = vmatmul.msk.bf16.gmra.mxu3 %vm1431_vm1, %v4721_v0  ;;  %v4601_v0 = vld [vmem:[%s4890_s23 + $0x58] sm:$0xff] }
  0xc4   : > { %v2755_v8 = vmax.f32 %v2753_v6, %v2754_v5  ;;  %v2341_v9 = vpop.f32.mrf.mxu2 }
  0xc5   : > { %v2546_v11 = vpop.f32.mrf.mxu3  ;;  %v2759_v18 = vsel %vm2741_vm2, %v2341_v9, -inf }
  0xc6   : > { %v3314_v12 = vadd.f32 %v4988_v7, %v2755_v8  ;;  %v2138_v13 = vpop.f32.mrf.mxu1  ;;  %v2768_v37 = vsel %vm2741_vm2, %v2546_v11, -inf }
  0xc7   : > { %v2757_v14 = vsel %vm2741_vm2, %v2138_v13, -inf  ;;  %v1938_v15 = vpop.f32.mrf.mxu0 }
  0xc8   : > { %v3395_v16 = vmax.f32 %v3314_v12, 0.0  ;;  %v2758_v17 = vmax.f32 %v2756_v10, %v2757_v14  ;;  %v2763_v24 = vsel %vm2741_vm2, %v1938_v15, -inf }
  0xca   : > { %v3476_v19 = vpack.c.bf16 %v3395_v16, %v3395_v16  ;;  %v2760_v20 = vmax.f32 %v2758_v17, %v2759_v18 }
  0xcc   : > { %3558 = vst.msk [vmem:[%s4999_s30 + $0x4] sm:$0xf] %vm3556_vm3, %v3476_v19  ;;  %v2762_v22 = vmax.f32 %v2760_v20, %v2761_v21  ;;  %v2343_v23 = vpop.f32.mrf.mxu2 }
  0xcd   : > { %v2548_v27 = vpop.f32.mrf.mxu3  ;;  %v2766_v36 = vsel %vm2741_vm2, %v2343_v23, -inf }
  0xce   : > { %v3315_v28 = vadd.f32 %v4988_v7, %v2762_v22  ;;  %v2141_v29 = vpop.f32.mrf.mxu1  ;;  %v2775_v54 = vsel %vm2741_vm2, %v2548_v27, -inf }
  0xcf   : > { %v2764_v32 = vsel %vm2741_vm2, %v2141_v29, -inf  ;;  %v1941_v33 = vpop.f32.mrf.mxu0  ;;  %v4683_v29 = vld [vmem:[%s4890_s23 + $0x2e8] sm:$0xff] }
  0xd0   : > { %v3396_v34 = vmax.f32 %v3315_v28, 0.0  ;;  %v2765_v35 = vmax.f32 %v2763_v24, %v2764_v32  ;;  %v2770_v42 = vsel %vm2741_vm2, %v1941_v33, -inf  ;;  %v4642_v28 = vld [vmem:[%s4890_s23 + $0x1a0] sm:$0xff] }
  0xd1   : > { %4476 = vmatmul.msk.bf16.gmra.mxu1 %vm1431_vm1, %v4640_v25  ;;  %4517 = vmatmul.msk.bf16.gmra.mxu2 %vm1431_vm1, %v4681_v26  ;;  %v4602_v33 = vld [vmem:[%s4890_s23 + $0x60] sm:$0xff] }
  0xd2   : > { %v3477_v38 = vpack.c.bf16 %v3396_v34, %v3396_v34  ;;  %v2767_v39 = vmax.f32 %v2765_v35, %v2766_v36  ;;  %4436 = vmatmul.msk.bf16.gmra.mxu0 %vm1431_vm1, %v4600_v30  ;;  %4558 = vmatmul.msk.bf16.gmra.mxu3 %vm1431_vm1, %v4722_v31  ;;  %v4724_v34 = vld [vmem:[%s4890_s23 + $0x430] sm:$0xff] }
  0xd4   : > { %3559 = vst.msk [vmem:[%s4999_s30 + $0x8] sm:$0xf] %vm3556_vm3, %v3477_v38  ;;  %v2769_v40 = vmax.f32 %v2767_v39, %v2768_v37  ;;  %v2346_v41 = vpop.f32.mrf.mxu2 }
  0xd5   : > { %v2551_v43 = vpop.f32.mrf.mxu3  ;;  %v2773_v51 = vsel %vm2741_vm2, %v2346_v41, -inf }
  0xd6   : > { %v3316_v45 = vadd.f32 %v4988_v7, %v2769_v40  ;;  %v2143_v46 = vpop.f32.mrf.mxu1  ;;  %v2782_v8 = vsel %vm2741_vm2, %v2551_v43, -inf }
  0xd7   : > { %v2771_v47 = vsel %vm2741_vm2, %v2143_v46, -inf  ;;  %v1943_v48 = vpop.f32.mrf.mxu0 }
  0xd8   : > { %v3397_v49 = vmax.f32 %v3316_v45, 0.0  ;;  %v2772_v50 = vmax.f32 %v2770_v42, %v2771_v47  ;;  %v2777_v58 = vsel %vm2741_vm2, %v1943_v48, -inf }
  0xda   : > { %v3478_v52 = vpack.c.bf16 %v3397_v49, %v3397_v49  ;;  %v2774_v53 = vmax.f32 %v2772_v50, %v2773_v51 }
  0xdc   : > { %3560 = vst.msk [vmem:[%s4999_s30 + $0xc] sm:$0xf] %vm3556_vm3, %v3478_v52  ;;  %v2776_v55 = vmax.f32 %v2774_v53, %v2775_v54  ;;  %v2348_v57 = vpop.f32.mrf.mxu2 }
  0xdd   : > { %v2553_v61 = vpop.f32.mrf.mxu3  ;;  %v2780_v6 = vsel %vm2741_vm2, %v2348_v57, -inf }
  0xde   : > { %v3317_v62 = vadd.f32 %v4988_v7, %v2776_v55  ;;  %v2146_v63 = vpop.f32.mrf.mxu1  ;;  %v2789_v24 = vsel %vm2741_vm2, %v2553_v61, -inf }
  0xdf   : > { %v2778_v2 = vsel %vm2741_vm2, %v2146_v63, -inf  ;;  %v1946_v3 = vpop.f32.mrf.mxu0  ;;  %v4684_v63 = vld [vmem:[%s4890_s23 + $0x2f0] sm:$0xff] }
  0xe0   : > { %v3398_v4 = vmax.f32 %v3317_v62, 0.0  ;;  %v2779_v5 = vmax.f32 %v2777_v58, %v2778_v2  ;;  %v2784_v13 = vsel %vm2741_vm2, %v1946_v3, -inf  ;;  %v4643_v62 = vld [vmem:[%s4890_s23 + $0x1a8] sm:$0xff] }
  0xe1   : > { %4477 = vmatmul.msk.bf16.gmra.mxu1 %vm1431_vm1, %v4641_v59  ;;  %4518 = vmatmul.msk.bf16.gmra.mxu2 %vm1431_vm1, %v4682_v60  ;;  %v4603_v3 = vld [vmem:[%s4890_s23 + $0x68] sm:$0xff] }
  0xe2   : > { %v3479_v9 = vpack.c.bf16 %v3398_v4, %v3398_v4  ;;  %v2781_v10 = vmax.f32 %v2779_v5, %v2780_v6  ;;  %4437 = vmatmul.msk.bf16.gmra.mxu0 %vm1431_vm1, %v4601_v0  ;;  %4559 = vmatmul.msk.bf16.gmra.mxu3 %vm1431_vm1, %v4723_v1  ;;  %v4725_v4 = vld [vmem:[%s4890_s23 + $0x438] sm:$0xff] }
  0xe4   : > { %3561 = vst.msk [vmem:[%s4999_s30 + $0x10] sm:$0xf] %vm3556_vm3, %v3479_v9  ;;  %v2783_v11 = vmax.f32 %v2781_v10, %v2782_v8  ;;  %v2351_v12 = vpop.f32.mrf.mxu2 }
  0xe5   : > { %v2556_v14 = vpop.f32.mrf.mxu3  ;;  %v2787_v21 = vsel %vm2741_vm2, %v2351_v12, -inf }
  0xe6   : > { %v3318_v15 = vadd.f32 %v4988_v7, %v2783_v11  ;;  %v2148_v16 = vpop.f32.mrf.mxu1  ;;  %v2796_v40 = vsel %vm2741_vm2, %v2556_v14, -inf }
  0xe7   : > { %v2785_v17 = vsel %vm2741_vm2, %v2148_v16, -inf  ;;  %v1948_v18 = vpop.f32.mrf.mxu0 }
  0xe8   : > { %v3399_v19 = vmax.f32 %v3318_v15, 0.0  ;;  %v2786_v20 = vmax.f32 %v2784_v13, %v2785_v17  ;;  %v2791_v27 = vsel %vm2741_vm2, %v1948_v18, -inf }
  0xea   : > { %v3480_v22 = vpack.c.bf16 %v3399_v19, %v3399_v19  ;;  %v2788_v23 = vmax.f32 %v2786_v20, %v2787_v21 }
  0xec   : > { %3562 = vst.msk [vmem:[%s4999_s30 + $0x14] sm:$0xf] %vm3556_vm3, %v3480_v22  ;;  %v2790_v25 = vmax.f32 %v2788_v23, %v2789_v24  ;;  %v2353_v26 = vpop.f32.mrf.mxu2 }
  0xed   : > { %v2558_v30 = vpop.f32.mrf.mxu3  ;;  %v2794_v39 = vsel %vm2741_vm2, %v2353_v26, -inf }
  0xee   : > { %v3319_v31 = vadd.f32 %v4988_v7, %v2790_v25  ;;  %v2151_v32 = vpop.f32.mrf.mxu1  ;;  %v2803_v58 = vsel %vm2741_vm2, %v2558_v30, -inf }
  0xef   : > { %v2792_v35 = vsel %vm2741_vm2, %v2151_v32, -inf  ;;  %v1951_v36 = vpop.f32.mrf.mxu0  ;;  %v4685_v32 = vld [vmem:[%s4890_s23 + $0x2f8] sm:$0xff] }
  0xf0   : > { %v3400_v37 = vmax.f32 %v3319_v31, 0.0  ;;  %v2793_v38 = vmax.f32 %v2791_v27, %v2792_v35  ;;  %v2798_v46 = vsel %vm2741_vm2, %v1951_v36, -inf  ;;  %v4644_v31 = vld [vmem:[%s4890_s23 + $0x1b0] sm:$0xff] }
  0xf1   : > { %4478 = vmatmul.msk.bf16.gmra.mxu1 %vm1431_vm1, %v4642_v28  ;;  %4519 = vmatmul.msk.bf16.gmra.mxu2 %vm1431_vm1, %v4683_v29  ;;  %v4604_v36 = vld [vmem:[%s4890_s23 + $0x70] sm:$0xff] }
  0xf2   : > { %v3481_v41 = vpack.c.bf16 %v3400_v37, %v3400_v37  ;;  %v2795_v42 = vmax.f32 %v2793_v38, %v2794_v39  ;;  %4438 = vmatmul.msk.bf16.gmra.mxu0 %vm1431_vm1, %v4602_v33  ;;  %4560 = vmatmul.msk.bf16.gmra.mxu3 %vm1431_vm1, %v4724_v34  ;;  %v4726_v37 = vld [vmem:[%s4890_s23 + $0x440] sm:$0xff] }
  0xf4   : > { %3563 = vst.msk [vmem:[%s4999_s30 + $0x18] sm:$0xf] %vm3556_vm3, %v3481_v41  ;;  %v2797_v43 = vmax.f32 %v2795_v42, %v2796_v40  ;;  %v2356_v45 = vpop.f32.mrf.mxu2 }
  0xf5   : > { %v2561_v47 = vpop.f32.mrf.mxu3  ;;  %v2801_v54 = vsel %vm2741_vm2, %v2356_v45, -inf }
  0xf6   : > { %v3320_v48 = vadd.f32 %v4988_v7, %v2797_v43  ;;  %v2153_v49 = vpop.f32.mrf.mxu1  ;;  %v2810_v11 = vsel %vm2741_vm2, %v2561_v47, -inf }
  0xf7   : > { %v2799_v50 = vsel %vm2741_vm2, %v2153_v49, -inf  ;;  %v1953_v51 = vpop.f32.mrf.mxu0 }
  0xf8   : > { %v3401_v52 = vmax.f32 %v3320_v48, 0.0  ;;  %v2800_v53 = vmax.f32 %v2798_v46, %v2799_v50  ;;  %v2805_v61 = vsel %vm2741_vm2, %v1953_v51, -inf }
  0xfa   : > { %v3482_v55 = vpack.c.bf16 %v3401_v52, %v3401_v52  ;;  %v2802_v57 = vmax.f32 %v2800_v53, %v2801_v54 }
  0xfc   : > { %3564 = vst.msk [vmem:[%s4999_s30 + $0x1c] sm:$0xf] %vm3556_vm3, %v3482_v55  ;;  %v2804_v59 = vmax.f32 %v2802_v57, %v2803_v58  ;;  %v2358_v60 = vpop.f32.mrf.mxu2 }
  0xfd   : > { %v2563_v0 = vpop.f32.mrf.mxu3  ;;  %v2808_v10 = vsel %vm2741_vm2, %v2358_v60, -inf }
  0xfe   : > { %v3321_v1 = vadd.f32 %v4988_v7, %v2804_v59  ;;  %v2156_v2 = vpop.f32.mrf.mxu1  ;;  %v2817_v27 = vsel %vm2741_vm2, %v2563_v0, -inf }
  0xff   : > { %v2806_v5 = vsel %vm2741_vm2, %v2156_v2, -inf  ;;  %v1956_v6 = vpop.f32.mrf.mxu0  ;;  %v4686_v2 = vld [vmem:[%s4890_s23 + $0x300] sm:$0xff] }
 0x100   : > { %v3402_v8 = vmax.f32 %v3321_v1, 0.0  ;;  %v2807_v9 = vmax.f32 %v2805_v61, %v2806_v5  ;;  %v2812_v16 = vsel %vm2741_vm2, %v1956_v6, -inf  ;;  %v4645_v1 = vld [vmem:[%s4890_s23 + $0x1b8] sm:$0xff] }
 0x101   : > { %4479 = vmatmul.msk.bf16.gmra.mxu1 %vm1431_vm1, %v4643_v62  ;;  %4520 = vmatmul.msk.bf16.gmra.mxu2 %vm1431_vm1, %v4684_v63  ;;  %v4605_v6 = vld [vmem:[%s4890_s23 + $0x78] sm:$0xff] }
 0x102   : > { %v3483_v12 = vpack.c.bf16 %v3402_v8, %v3402_v8  ;;  %v2809_v13 = vmax.f32 %v2807_v9, %v2808_v10  ;;  %4439 = vmatmul.msk.bf16.gmra.mxu0 %vm1431_vm1, %v4603_v3  ;;  %4561 = vmatmul.msk.bf16.gmra.mxu3 %vm1431_vm1, %v4725_v4  ;;  %v4727_v8 = vld [vmem:[%s4890_s23 + $0x448] sm:$0xff] }
 0x104   : > { %3565 = vst.msk [vmem:[%s4999_s30 + $0x20] sm:$0xf] %vm3556_vm3, %v3483_v12  ;;  %v2811_v14 = vmax.f32 %v2809_v13, %v2810_v11  ;;  %v2361_v15 = vpop.f32.mrf.mxu2 }
 0x105   : > { %v2566_v17 = vpop.f32.mrf.mxu3  ;;  %v2815_v24 = vsel %vm2741_vm2, %v2361_v15, -inf }
 0x106   : > { %v3322_v18 = vadd.f32 %v4988_v7, %v2811_v14  ;;  %v2158_v19 = vpop.f32.mrf.mxu1  ;;  %v2824_v43 = vsel %vm2741_vm2, %v2566_v17, -inf }
 0x107   : > { %v2813_v20 = vsel %vm2741_vm2, %v2158_v19, -inf  ;;  %v1958_v21 = vpop.f32.mrf.mxu0 }
 0x108   : > { %v3403_v22 = vmax.f32 %v3322_v18, 0.0  ;;  %v2814_v23 = vmax.f32 %v2812_v16, %v2813_v20  ;;  %v2819_v30 = vsel %vm2741_vm2, %v1958_v21, -inf }
 0x10a   : > { %v3484_v25 = vpack.c.bf16 %v3403_v22, %v3403_v22  ;;  %v2816_v26 = vmax.f32 %v2814_v23, %v2815_v24 }
 0x10c   : > { %3566 = vst.msk [vmem:[%s4999_s30 + $0x24] sm:$0xf] %vm3556_vm3, %v3484_v25  ;;  %v2818_v28 = vmax.f32 %v2816_v26, %v2817_v27  ;;  %v2363_v29 = vpop.f32.mrf.mxu2 }
 0x10d   : > { %v2568_v33 = vpop.f32.mrf.mxu3  ;;  %v2822_v42 = vsel %vm2741_vm2, %v2363_v29, -inf }
 0x10e   : > { %v3323_v34 = vadd.f32 %v4988_v7, %v2818_v28  ;;  %v2161_v35 = vpop.f32.mrf.mxu1  ;;  %v2831_v61 = vsel %vm2741_vm2, %v2568_v33, -inf }
 0x10f   : > { %v2820_v38 = vsel %vm2741_vm2, %v2161_v35, -inf  ;;  %v1961_v39 = vpop.f32.mrf.mxu0  ;;  %v4687_v35 = vld [vmem:[%s4890_s23 + $0x308] sm:$0xff] }
 0x110   : > { %v3404_v40 = vmax.f32 %v3323_v34, 0.0  ;;  %v2821_v41 = vmax.f32 %v2819_v30, %v2820_v38  ;;  %v2826_v49 = vsel %vm2741_vm2, %v1961_v39, -inf  ;;  %v4646_v34 = vld [vmem:[%s4890_s23 + $0x1c0] sm:$0xff] }
 0x111   : > { %4480 = vmatmul.msk.bf16.gmra.mxu1 %vm1431_vm1, %v4644_v31  ;;  %4521 = vmatmul.msk.bf16.gmra.mxu2 %vm1431_vm1, %v4685_v32  ;;  %v4606_v39 = vld [vmem:[%s4890_s23 + $0x80] sm:$0xff] }
 0x112   : > { %v3485_v45 = vpack.c.bf16 %v3404_v40, %v3404_v40  ;;  %v2823_v46 = vmax.f32 %v2821_v41, %v2822_v42  ;;  %4440 = vmatmul.msk.bf16.gmra.mxu0 %vm1431_vm1, %v4604_v36  ;;  %4562 = vmatmul.msk.bf16.gmra.mxu3 %vm1431_vm1, %v4726_v37  ;;  %v4728_v40 = vld [vmem:[%s4890_s23 + $0x450] sm:$0xff] }
 0x114   : > { %3567 = vst.msk [vmem:[%s4999_s30 + $0x28] sm:$0xf] %vm3556_vm3, %v3485_v45  ;;  %v2825_v47 = vmax.f32 %v2823_v46, %v2824_v43  ;;  %v2366_v48 = vpop.f32.mrf.mxu2 }
 0x115   : > { %v2571_v50 = vpop.f32.mrf.mxu3  ;;  %v2829_v58 = vsel %vm2741_vm2, %v2366_v48, -inf }
 0x116   : > { %v3324_v51 = vadd.f32 %v4988_v7, %v2825_v47  ;;  %v2163_v52 = vpop.f32.mrf.mxu1  ;;  %v2838_v14 = vsel %vm2741_vm2, %v2571_v50, -inf }
 0x117   : > { %v2827_v53 = vsel %vm2741_vm2, %v2163_v52, -inf  ;;  %v1963_v54 = vpop.f32.mrf.mxu0 }
 0x118   : > { %v3405_v55 = vmax.f32 %v3324_v51, 0.0  ;;  %v2828_v57 = vmax.f32 %v2826_v49, %v2827_v53  ;;  %v2833_v0 = vsel %vm2741_vm2, %v1963_v54, -inf }
 0x11a   : > { %v3486_v59 = vpack.c.bf16 %v3405_v55, %v3405_v55  ;;  %v2830_v60 = vmax.f32 %v2828_v57, %v2829_v58 }
 0x11c   : > { %3568 = vst.msk [vmem:[%s4999_s30 + $0x2c] sm:$0xf] %vm3556_vm3, %v3486_v59  ;;  %v2832_v62 = vmax.f32 %v2830_v60, %v2831_v61  ;;  %v2368_v63 = vpop.f32.mrf.mxu2 }
 0x11d   : > { %v2573_v3 = vpop.f32.mrf.mxu3  ;;  %v2836_v13 = vsel %vm2741_vm2, %v2368_v63, -inf }
 0x11e   : > { %v3325_v4 = vadd.f32 %v4988_v7, %v2832_v62  ;;  %v2166_v5 = vpop.f32.mrf.mxu1  ;;  %v2845_v30 = vsel %vm2741_vm2, %v2573_v3, -inf }
 0x11f   : > { %v2834_v9 = vsel %vm2741_vm2, %v2166_v5, -inf  ;;  %v1966_v10 = vpop.f32.mrf.mxu0  ;;  %v4688_v5 = vld [vmem:[%s4890_s23 + $0x310] sm:$0xff] }
 0x120   : > { %v3406_v11 = vmax.f32 %v3325_v4, 0.0  ;;  %v2835_v12 = vmax.f32 %v2833_v0, %v2834_v9  ;;  %v2840_v19 = vsel %vm2741_vm2, %v1966_v10, -inf  ;;  %v4647_v4 = vld [vmem:[%s4890_s23 + $0x1c8] sm:$0xff] }
 0x121   : > { %4481 = vmatmul.msk.bf16.gmra.mxu1 %vm1431_vm1, %v4645_v1  ;;  %4522 = vmatmul.msk.bf16.gmra.mxu2 %vm1431_vm1, %v4686_v2  ;;  %v4607_v10 = vld [vmem:[%s4890_s23 + $0x88] sm:$0xff] }
 0x122   : > { %v3487_v15 = vpack.c.bf16 %v3406_v11, %v3406_v11  ;;  %v2837_v16 = vmax.f32 %v2835_v12, %v2836_v13  ;;  %4441 = vmatmul.msk.bf16.gmra.mxu0 %vm1431_vm1, %v4605_v6  ;;  %4563 = vmatmul.msk.bf16.gmra.mxu3 %vm1431_vm1, %v4727_v8  ;;  %v4729_v11 = vld [vmem:[%s4890_s23 + $0x458] sm:$0xff] }
 0x124   : > { %3569 = vst.msk [vmem:[%s4999_s30 + $0x30] sm:$0xf] %vm3556_vm3, %v3487_v15  ;;  %v2839_v17 = vmax.f32 %v2837_v16, %v2838_v14  ;;  %v2371_v18 = vpop.f32.mrf.mxu2 }
 0x125   : > { %v2576_v20 = vpop.f32.mrf.mxu3  ;;  %v2843_v27 = vsel %vm2741_vm2, %v2371_v18, -inf }
 0x126   : > { %v3326_v21 = vadd.f32 %v4988_v7, %v2839_v17  ;;  %v2168_v22 = vpop.f32.mrf.mxu1  ;;  %v2852_v47 = vsel %vm2741_vm2, %v2576_v20, -inf }
 0x127   : > { %v2841_v23 = vsel %vm2741_vm2, %v2168_v22, -inf  ;;  %v1968_v24 = vpop.f32.mrf.mxu0 }
 0x128   : > { %v3407_v25 = vmax.f32 %v3326_v21, 0.0  ;;  %v2842_v26 = vmax.f32 %v2840_v19, %v2841_v23  ;;  %v2847_v33 = vsel %vm2741_vm2, %v1968_v24, -inf }
 0x12a   : > { %v3488_v28 = vpack.c.bf16 %v3407_v25, %v3407_v25  ;;  %v2844_v29 = vmax.f32 %v2842_v26, %v2843_v27 }
 0x12c   : > { %3570 = vst.msk [vmem:[%s4999_s30 + $0x34] sm:$0xf] %vm3556_vm3, %v3488_v28  ;;  %v2846_v31 = vmax.f32 %v2844_v29, %v2845_v30  ;;  %v2373_v32 = vpop.f32.mrf.mxu2 }
 0x12d   : > { %v2578_v36 = vpop.f32.mrf.mxu3  ;;  %v2850_v46 = vsel %vm2741_vm2, %v2373_v32, -inf }
 0x12e   : > { %v3327_v37 = vadd.f32 %v4988_v7, %v2846_v31  ;;  %v2171_v38 = vpop.f32.mrf.mxu1  ;;  %v2859_v0 = vsel %vm2741_vm2, %v2578_v36, -inf }
 0x12f   : > { %v2848_v41 = vsel %vm2741_vm2, %v2171_v38, -inf  ;;  %v1971_v42 = vpop.f32.mrf.mxu0  ;;  %v4689_v38 = vld [vmem:[%s4890_s23 + $0x318] sm:$0xff] }
 0x130   : > { %v3408_v43 = vmax.f32 %v3327_v37, 0.0  ;;  %v2849_v45 = vmax.f32 %v2847_v33, %v2848_v41  ;;  %v2854_v52 = vsel %vm2741_vm2, %v1971_v42, -inf  ;;  %v4648_v37 = vld [vmem:[%s4890_s23 + $0x1d0] sm:$0xff] }
 0x131   : > { %4482 = vmatmul.msk.bf16.gmra.mxu1 %vm1431_vm1, %v4646_v34  ;;  %4523 = vmatmul.msk.bf16.gmra.mxu2 %vm1431_vm1, %v4687_v35  ;;  %v4608_v42 = vld [vmem:[%s4890_s23 + $0x90] sm:$0xff] }
 0x132   : > { %v3489_v48 = vpack.c.bf16 %v3408_v43, %v3408_v43  ;;  %v2851_v49 = vmax.f32 %v2849_v45, %v2850_v46  ;;  %4442 = vmatmul.msk.bf16.gmra.mxu0 %vm1431_vm1, %v4606_v39  ;;  %4564 = vmatmul.msk.bf16.gmra.mxu3 %vm1431_vm1, %v4728_v40  ;;  %v4730_v43 = vld [vmem:[%s4890_s23 + $0x460] sm:$0xff] }
 0x134   : > { %3571 = vst.msk [vmem:[%s4999_s30 + $0x38] sm:$0xf] %vm3556_vm3, %v3489_v48  ;;  %v2853_v50 = vmax.f32 %v2851_v49, %v2852_v47  ;;  %v2376_v51 = vpop.f32.mrf.mxu2 }
 0x135   : > { %v2581_v53 = vpop.f32.mrf.mxu3  ;;  %v2857_v61 = vsel %vm2741_vm2, %v2376_v51, -inf }
 0x136   : > { %v3328_v54 = vadd.f32 %v4988_v7, %v2853_v50  ;;  %v2173_v55 = vpop.f32.mrf.mxu1  ;;  %v2866_v17 = vsel %vm2741_vm2, %v2581_v53, -inf }
 0x137   : > { %v2855_v57 = vsel %vm2741_vm2, %v2173_v55, -inf  ;;  %v1973_v58 = vpop.f32.mrf.mxu0 }
 0x138   : > { %v3409_v59 = vmax.f32 %v3328_v54, 0.0  ;;  %v2856_v60 = vmax.f32 %v2854_v52, %v2855_v57  ;;  %v2861_v3 = vsel %vm2741_vm2, %v1973_v58, -inf }
 0x13a   : > { %v3490_v62 = vpack.c.bf16 %v3409_v59, %v3409_v59  ;;  %v2858_v63 = vmax.f32 %v2856_v60, %v2857_v61 }
 0x13c   : > { %3572 = vst.msk [vmem:[%s4999_s30 + $0x3c] sm:$0xf] %vm3556_vm3, %v3490_v62  ;;  %v2860_v1 = vmax.f32 %v2858_v63, %v2859_v0  ;;  %v2378_v2 = vpop.f32.mrf.mxu2 }
 0x13d   : > { %v2583_v6 = vpop.f32.mrf.mxu3  ;;  %v2864_v16 = vsel %vm2741_vm2, %v2378_v2, -inf }
 0x13e   : > { %v3329_v8 = vadd.f32 %v4988_v7, %v2860_v1  ;;  %v2176_v9 = vpop.f32.mrf.mxu1  ;;  %v2873_v33 = vsel %vm2741_vm2, %v2583_v6, -inf }
 0x13f   : > { %v2862_v12 = vsel %vm2741_vm2, %v2176_v9, -inf  ;;  %v1976_v13 = vpop.f32.mrf.mxu0  ;;  %v4690_v9 = vld [vmem:[%s4890_s23 + $0x320] sm:$0xff] }
 0x140   : > { %v3410_v14 = vmax.f32 %v3329_v8, 0.0  ;;  %v2863_v15 = vmax.f32 %v2861_v3, %v2862_v12  ;;  %v2868_v22 = vsel %vm2741_vm2, %v1976_v13, -inf  ;;  %v4649_v8 = vld [vmem:[%s4890_s23 + $0x1d8] sm:$0xff] }
 0x141   : > { %4483 = vmatmul.msk.bf16.gmra.mxu1 %vm1431_vm1, %v4647_v4  ;;  %4524 = vmatmul.msk.bf16.gmra.mxu2 %vm1431_vm1, %v4688_v5  ;;  %v4609_v13 = vld [vmem:[%s4890_s23 + $0x98] sm:$0xff] }
 0x142   : > { %v3491_v18 = vpack.c.bf16 %v3410_v14, %v3410_v14  ;;  %v2865_v19 = vmax.f32 %v2863_v15, %v2864_v16  ;;  %4443 = vmatmul.msk.bf16.gmra.mxu0 %vm1431_vm1, %v4607_v10  ;;  %4565 = vmatmul.msk.bf16.gmra.mxu3 %vm1431_vm1, %v4729_v11  ;;  %v4731_v14 = vld [vmem:[%s4890_s23 + $0x468] sm:$0xff] }
 0x144   : > { %3573 = vst.msk [vmem:[%s4999_s30 + $0x40] sm:$0xf] %vm3556_vm3, %v3491_v18  ;;  %v2867_v20 = vmax.f32 %v2865_v19, %v2866_v17  ;;  %v2381_v21 = vpop.f32.mrf.mxu2 }
 0x145   : > { %v2586_v23 = vpop.f32.mrf.mxu3  ;;  %v2871_v30 = vsel %vm2741_vm2, %v2381_v21, -inf }
 0x146   : > { %v3330_v24 = vadd.f32 %v4988_v7, %v2867_v20  ;;  %v2178_v25 = vpop.f32.mrf.mxu1  ;;  %v2880_v50 = vsel %vm2741_vm2, %v2586_v23, -inf }
 0x147   : > { %v2869_v26 = vsel %vm2741_vm2, %v2178_v25, -inf  ;;  %v1978_v27 = vpop.f32.mrf.mxu0 }
 0x148   : > { %v3411_v28 = vmax.f32 %v3330_v24, 0.0  ;;  %v2870_v29 = vmax.f32 %v2868_v22, %v2869_v26  ;;  %v2875_v36 = vsel %vm2741_vm2, %v1978_v27, -inf }
 0x14a   : > { %v3492_v31 = vpack.c.bf16 %v3411_v28, %v3411_v28  ;;  %v2872_v32 = vmax.f32 %v2870_v29, %v2871_v30 }
 0x14c   : > { %3574 = vst.msk [vmem:[%s4999_s30 + $0x44] sm:$0xf] %vm3556_vm3, %v3492_v31  ;;  %v2874_v34 = vmax.f32 %v2872_v32, %v2873_v33  ;;  %v2383_v35 = vpop.f32.mrf.mxu2 }
 0x14d   : > { %v2588_v39 = vpop.f32.mrf.mxu3  ;;  %v2878_v49 = vsel %vm2741_vm2, %v2383_v35, -inf }
 0x14e   : > { %v3331_v40 = vadd.f32 %v4988_v7, %v2874_v34  ;;  %v2181_v41 = vpop.f32.mrf.mxu1  ;;  %v2887_v3 = vsel %vm2741_vm2, %v2588_v39, -inf }
 0x14f   : > { %v2876_v45 = vsel %vm2741_vm2, %v2181_v41, -inf  ;;  %v1981_v46 = vpop.f32.mrf.mxu0  ;;  %v4691_v41 = vld [vmem:[%s4890_s23 + $0x328] sm:$0xff] }
 0x150   : > { %v3412_v47 = vmax.f32 %v3331_v40, 0.0  ;;  %v2877_v48 = vmax.f32 %v2875_v36, %v2876_v45  ;;  %v2882_v55 = vsel %vm2741_vm2, %v1981_v46, -inf  ;;  %v4650_v40 = vld [vmem:[%s4890_s23 + $0x1e0] sm:$0xff] }
 0x151   : > { %4484 = vmatmul.msk.bf16.gmra.mxu1 %vm1431_vm1, %v4648_v37  ;;  %4525 = vmatmul.msk.bf16.gmra.mxu2 %vm1431_vm1, %v4689_v38  ;;  %v4610_v46 = vld [vmem:[%s4890_s23 + $0xa0] sm:$0xff] }
 0x152   : > { %v3493_v51 = vpack.c.bf16 %v3412_v47, %v3412_v47  ;;  %v2879_v52 = vmax.f32 %v2877_v48, %v2878_v49  ;;  %4444 = vmatmul.msk.bf16.gmra.mxu0 %vm1431_vm1, %v4608_v42  ;;  %4566 = vmatmul.msk.bf16.gmra.mxu3 %vm1431_vm1, %v4730_v43  ;;  %v4732_v47 = vld [vmem:[%s4890_s23 + $0x470] sm:$0xff] }
 0x154   : > { %3575 = vst.msk [vmem:[%s4999_s30 + $0x48] sm:$0xf] %vm3556_vm3, %v3493_v51  ;;  %v2881_v53 = vmax.f32 %v2879_v52, %v2880_v50  ;;  %v2386_v54 = vpop.f32.mrf.mxu2 }
 0x155   : > { %v2591_v57 = vpop.f32.mrf.mxu3  ;;  %v2885_v0 = vsel %vm2741_vm2, %v2386_v54, -inf }
 0x156   : > { %v3332_v58 = vadd.f32 %v4988_v7, %v2881_v53  ;;  %v2183_v59 = vpop.f32.mrf.mxu1  ;;  %v2894_v20 = vsel %vm2741_vm2, %v2591_v57, -inf }
 0x157   : > { %v2883_v60 = vsel %vm2741_vm2, %v2183_v59, -inf  ;;  %v1983_v61 = vpop.f32.mrf.mxu0 }
 0x158   : > { %v3413_v62 = vmax.f32 %v3332_v58, 0.0  ;;  %v2884_v63 = vmax.f32 %v2882_v55, %v2883_v60  ;;  %v2889_v6 = vsel %vm2741_vm2, %v1983_v61, -inf }
 0x15a   : > { %v3494_v1 = vpack.c.bf16 %v3413_v62, %v3413_v62  ;;  %v2886_v2 = vmax.f32 %v2884_v63, %v2885_v0 }
 0x15c   : > { %3576 = vst.msk [vmem:[%s4999_s30 + $0x4c] sm:$0xf] %vm3556_vm3, %v3494_v1  ;;  %v2888_v4 = vmax.f32 %v2886_v2, %v2887_v3  ;;  %v2388_v5 = vpop.f32.mrf.mxu2 }
 0x15d   : > { %v2593_v10 = vpop.f32.mrf.mxu3  ;;  %v2892_v19 = vsel %vm2741_vm2, %v2388_v5, -inf }
 0x15e   : > { %v3333_v11 = vadd.f32 %v4988_v7, %v2888_v4  ;;  %v2186_v12 = vpop.f32.mrf.mxu1  ;;  %v2901_v36 = vsel %vm2741_vm2, %v2593_v10, -inf }
 0x15f   : > { %v2890_v15 = vsel %vm2741_vm2, %v2186_v12, -inf  ;;  %v1986_v16 = vpop.f32.mrf.mxu0  ;;  %v4692_v12 = vld [vmem:[%s4890_s23 + $0x330] sm:$0xff] }
 0x160   : > { %v3414_v17 = vmax.f32 %v3333_v11, 0.0  ;;  %v2891_v18 = vmax.f32 %v2889_v6, %v2890_v15  ;;  %v2896_v25 = vsel %vm2741_vm2, %v1986_v16, -inf  ;;  %v4651_v11 = vld [vmem:[%s4890_s23 + $0x1e8] sm:$0xff] }
 0x161   : > { %4485 = vmatmul.msk.bf16.gmra.mxu1 %vm1431_vm1, %v4649_v8  ;;  %4526 = vmatmul.msk.bf16.gmra.mxu2 %vm1431_vm1, %v4690_v9  ;;  %v4611_v16 = vld [vmem:[%s4890_s23 + $0xa8] sm:$0xff] }
 0x162   : > { %v3495_v21 = vpack.c.bf16 %v3414_v17, %v3414_v17  ;;  %v2893_v22 = vmax.f32 %v2891_v18, %v2892_v19  ;;  %4445 = vmatmul.msk.bf16.gmra.mxu0 %vm1431_vm1, %v4609_v13  ;;  %4567 = vmatmul.msk.bf16.gmra.mxu3 %vm1431_vm1, %v4731_v14  ;;  %v4733_v17 = vld [vmem:[%s4890_s23 + $0x478] sm:$0xff] }
 0x164   : > { %3577 = vst.msk [vmem:[%s4999_s30 + $0x50] sm:$0xf] %vm3556_vm3, %v3495_v21  ;;  %v2895_v23 = vmax.f32 %v2893_v22, %v2894_v20  ;;  %v2391_v24 = vpop.f32.mrf.mxu2 }
 0x165   : > { %v2596_v26 = vpop.f32.mrf.mxu3  ;;  %v2899_v33 = vsel %vm2741_vm2, %v2391_v24, -inf }
 0x166   : > { %v3334_v27 = vadd.f32 %v4988_v7, %v2895_v23  ;;  %v2188_v28 = vpop.f32.mrf.mxu1  ;;  %v2908_v53 = vsel %vm2741_vm2, %v2596_v26, -inf }
 0x167   : > { %v2897_v29 = vsel %vm2741_vm2, %v2188_v28, -inf  ;;  %v1988_v30 = vpop.f32.mrf.mxu0 }
 0x168   : > { %v3415_v31 = vmax.f32 %v3334_v27, 0.0  ;;  %v2898_v32 = vmax.f32 %v2896_v25, %v2897_v29  ;;  %v2903_v39 = vsel %vm2741_vm2, %v1988_v30, -inf }
 0x16a   : > { %v3496_v34 = vpack.c.bf16 %v3415_v31, %v3415_v31  ;;  %v2900_v35 = vmax.f32 %v2898_v32, %v2899_v33 }
 0x16c   : > { %3578 = vst.msk [vmem:[%s4999_s30 + $0x54] sm:$0xf] %vm3556_vm3, %v3496_v34  ;;  %v2902_v37 = vmax.f32 %v2900_v35, %v2901_v36  ;;  %v2393_v38 = vpop.f32.mrf.mxu2 }
 0x16d   : > { %v2598_v42 = vpop.f32.mrf.mxu3  ;;  %v2906_v52 = vsel %vm2741_vm2, %v2393_v38, -inf }
 0x16e   : > { %v3335_v43 = vadd.f32 %v4988_v7, %v2902_v37  ;;  %v2191_v45 = vpop.f32.mrf.mxu1  ;;  %v2915_v6 = vsel %vm2741_vm2, %v2598_v42, -inf }
 0x16f   : > { %v2904_v48 = vsel %vm2741_vm2, %v2191_v45, -inf  ;;  %v1991_v49 = vpop.f32.mrf.mxu0  ;;  %v4693_v45 = vld [vmem:[%s4890_s23 + $0x338] sm:$0xff] }
 0x170   : > { %v3416_v50 = vmax.f32 %v3335_v43, 0.0  ;;  %v2905_v51 = vmax.f32 %v2903_v39, %v2904_v48  ;;  %v2910_v59 = vsel %vm2741_vm2, %v1991_v49, -inf  ;;  %v4652_v43 = vld [vmem:[%s4890_s23 + $0x1f0] sm:$0xff] }
 0x171   : > { %4486 = vmatmul.msk.bf16.gmra.mxu1 %vm1431_vm1, %v4650_v40  ;;  %4527 = vmatmul.msk.bf16.gmra.mxu2 %vm1431_vm1, %v4691_v41  ;;  %v4612_v49 = vld [vmem:[%s4890_s23 + $0xb0] sm:$0xff] }
 0x172   : > { %v3497_v54 = vpack.c.bf16 %v3416_v50, %v3416_v50  ;;  %v2907_v55 = vmax.f32 %v2905_v51, %v2906_v52  ;;  %4446 = vmatmul.msk.bf16.gmra.mxu0 %vm1431_vm1, %v4610_v46  ;;  %4568 = vmatmul.msk.bf16.gmra.mxu3 %vm1431_vm1, %v4732_v47  ;;  %v4734_v50 = vld [vmem:[%s4890_s23 + $0x480] sm:$0xff] }
 0x174   : > { %3579 = vst.msk [vmem:[%s4999_s30 + $0x58] sm:$0xf] %vm3556_vm3, %v3497_v54  ;;  %v2909_v57 = vmax.f32 %v2907_v55, %v2908_v53  ;;  %v2396_v58 = vpop.f32.mrf.mxu2 }
 0x175   : > { %v2601_v60 = vpop.f32.mrf.mxu3  ;;  %v2913_v3 = vsel %vm2741_vm2, %v2396_v58, -inf }
 0x176   : > { %v3336_v61 = vadd.f32 %v4988_v7, %v2909_v57  ;;  %v2193_v62 = vpop.f32.mrf.mxu1  ;;  %v2922_v23 = vsel %vm2741_vm2, %v2601_v60, -inf }
 0x177   : > { %v2911_v63 = vsel %vm2741_vm2, %v2193_v62, -inf  ;;  %v1993_v0 = vpop.f32.mrf.mxu0 }
 0x178   : > { %v3417_v1 = vmax.f32 %v3336_v61, 0.0  ;;  %v2912_v2 = vmax.f32 %v2910_v59, %v2911_v63  ;;  %v2917_v10 = vsel %vm2741_vm2, %v1993_v0, -inf }
 0x17a   : > { %v3498_v4 = vpack.c.bf16 %v3417_v1, %v3417_v1  ;;  %v2914_v5 = vmax.f32 %v2912_v2, %v2913_v3 }
 0x17c   : > { %3580 = vst.msk [vmem:[%s4999_s30 + $0x5c] sm:$0xf] %vm3556_vm3, %v3498_v4  ;;  %v2916_v8 = vmax.f32 %v2914_v5, %v2915_v6  ;;  %v2398_v9 = vpop.f32.mrf.mxu2 }
 0x17d   : > { %v2603_v13 = vpop.f32.mrf.mxu3  ;;  %v2920_v22 = vsel %vm2741_vm2, %v2398_v9, -inf }
 0x17e   : > { %v3337_v14 = vadd.f32 %v4988_v7, %v2916_v8  ;;  %v2196_v15 = vpop.f32.mrf.mxu1  ;;  %v2929_v39 = vsel %vm2741_vm2, %v2603_v13, -inf  ;;  %v4653_v13 = vld [vmem:[%s4890_s23 + $0x1f8] sm:$0xff] }
 0x17f   : > { %v2918_v18 = vsel %vm2741_vm2, %v2196_v15, -inf  ;;  %v1996_v19 = vpop.f32.mrf.mxu0 }
 0x180   : > { %v3418_v20 = vmax.f32 %v3337_v14, 0.0  ;;  %v2919_v21 = vmax.f32 %v2917_v10, %v2918_v18  ;;  %v2924_v28 = vsel %vm2741_vm2, %v1996_v19, -inf  ;;  %v4694_v14 = vld [vmem:[%s4890_s23 + $0x340] sm:$0xff]  ;;  %v4613_v19 = vld [vmem:[%s4890_s23 + $0xb8] sm:$0xff] }
 0x181   : > { %4487 = vmatmul.msk.bf16.gmra.mxu1 %vm1431_vm1, %v4651_v11  ;;  %4528 = vmatmul.msk.bf16.gmra.mxu2 %vm1431_vm1, %v4692_v12 }
 0x182   : > { %v3499_v24 = vpack.c.bf16 %v3418_v20, %v3418_v20  ;;  %v2921_v25 = vmax.f32 %v2919_v21, %v2920_v22  ;;  %4447 = vmatmul.msk.bf16.gmra.mxu0 %vm1431_vm1, %v4611_v16  ;;  %4569 = vmatmul.msk.bf16.gmra.mxu3 %vm1431_vm1, %v4733_v17  ;;  %v5295_v16 = vld [vmem:[%s4906_s26] ss:$0 sm:$0xff]  ;;  %v4735_v20 = vld [vmem:[%s4890_s23 + $0x488] sm:$0xff] }
 0x184   : > { %3581 = vst.msk [vmem:[%s4999_s30 + $0x60] sm:$0xf] %vm3556_vm3, %v3499_v24  ;;  %v2923_v26 = vmax.f32 %v2921_v25, %v2922_v23  ;;  %v2401_v27 = vpop.f32.mrf.mxu2 }
 0x185   : > { %v2606_v29 = vpop.f32.mrf.mxu3  ;;  %v2927_v36 = vsel %vm2741_vm2, %v2401_v27, -inf }
 0x186   : > { %v3338_v30 = vadd.f32 %v4988_v7, %v2923_v26  ;;  %v2198_v31 = vpop.f32.mrf.mxu1  ;;  %v2936_v57 = vsel %vm2741_vm2, %v2606_v29, -inf }
 0x187   : > { %v2925_v32 = vsel %vm2741_vm2, %v2198_v31, -inf  ;;  %v1998_v33 = vpop.f32.mrf.mxu0 }
 0x188   : > { %v3419_v34 = vmax.f32 %v3338_v30, 0.0  ;;  %v2926_v35 = vmax.f32 %v2924_v28, %v2925_v32  ;;  %v2931_v42 = vsel %vm2741_vm2, %v1998_v33, -inf }
 0x18a   : > { %v3500_v37 = vpack.c.bf16 %v3419_v34, %v3419_v34  ;;  %v2928_v38 = vmax.f32 %v2926_v35, %v2927_v36 }
 0x18c   : > { %3582 = vst.msk [vmem:[%s4999_s30 + $0x64] sm:$0xf] %vm3556_vm3, %v3500_v37  ;;  %v2930_v40 = vmax.f32 %v2928_v38, %v2929_v39  ;;  %v2403_v41 = vpop.f32.mrf.mxu2 }
 0x18d   : > { %v2608_v46 = vpop.f32.mrf.mxu3  ;;  %v2934_v55 = vsel %vm2741_vm2, %v2403_v41, -inf }
 0x18e   : > { %v3339_v47 = vadd.f32 %v4988_v7, %v2930_v40  ;;  %v2201_v48 = vpop.f32.mrf.mxu1  ;;  %v2943_v10 = vsel %vm2741_vm2, %v2608_v46, -inf }
 0x18f   : > { %v2932_v51 = vsel %vm2741_vm2, %v2201_v48, -inf  ;;  %v2001_v52 = vpop.f32.mrf.mxu0  ;;  %v4695_v48 = vld [vmem:[%s4890_s23 + $0x348] sm:$0xff] }
 0x190   : > { %v3420_v53 = vmax.f32 %v3339_v47, 0.0  ;;  %v2933_v54 = vmax.f32 %v2931_v42, %v2932_v51  ;;  %v2938_v62 = vsel %vm2741_vm2, %v2001_v52, -inf  ;;  %v4654_v47 = vld [vmem:[%s4890_s23 + $0x200] sm:$0xff] }
 0x191   : > { %4488 = vmatmul.msk.bf16.gmra.mxu1 %vm1431_vm1, %v4652_v43  ;;  %4529 = vmatmul.msk.bf16.gmra.mxu2 %vm1431_vm1, %v4693_v45  ;;  %v4614_v52 = vld [vmem:[%s4890_s23 + $0xc0] sm:$0xff] }
 0x192   : > { %v3501_v58 = vpack.c.bf16 %v3420_v53, %v3420_v53  ;;  %v2935_v59 = vmax.f32 %v2933_v54, %v2934_v55  ;;  %4448 = vmatmul.msk.bf16.gmra.mxu0 %vm1431_vm1, %v4612_v49  ;;  %4570 = vmatmul.msk.bf16.gmra.mxu3 %vm1431_vm1, %v4734_v50  ;;  %v4736_v53 = vld [vmem:[%s4890_s23 + $0x490] sm:$0xff] }
 0x194   : > { %3583 = vst.msk [vmem:[%s4999_s30 + $0x68] sm:$0xf] %vm3556_vm3, %v3501_v58  ;;  %v2937_v60 = vmax.f32 %v2935_v59, %v2936_v57  ;;  %v2406_v61 = vpop.f32.mrf.mxu2 }
 0x195   : > { %v2611_v63 = vpop.f32.mrf.mxu3  ;;  %v2941_v6 = vsel %vm2741_vm2, %v2406_v61, -inf }
 0x196   : > { %v3340_v0 = vadd.f32 %v4988_v7, %v2937_v60  ;;  %v2203_v1 = vpop.f32.mrf.mxu1  ;;  %v2950_v26 = vsel %vm2741_vm2, %v2611_v63, -inf }
 0x197   : > { %v2939_v2 = vsel %vm2741_vm2, %v2203_v1, -inf  ;;  %v2003_v3 = vpop.f32.mrf.mxu0 }
 0x198   : > { %v3421_v4 = vmax.f32 %v3340_v0, 0.0  ;;  %v2940_v5 = vmax.f32 %v2938_v62, %v2939_v2  ;;  %v2945_v7 = vsel %vm2741_vm2, %v2003_v3, -inf }
 0x19a   : > { %v3502_v8 = vpack.c.bf16 %v3421_v4, %v3421_v4  ;;  %v2942_v9 = vmax.f32 %v2940_v5, %v2941_v6 }
 0x19c   : > { %3584 = vst.msk [vmem:[%s4999_s30 + $0x6c] sm:$0xf] %vm3556_vm3, %v3502_v8  ;;  %v2944_v11 = vmax.f32 %v2942_v9, %v2943_v10  ;;  %v2408_v12 = vpop.f32.mrf.mxu2 }
 0x19d   : > { %v2613_v15 = vpop.f32.mrf.mxu3  ;;  %v2948_v25 = vsel %vm2741_vm2, %v2408_v12, -inf }
 0x19e   : > { %v3341_v17 = vadd.f32 %v5295_v16, %v2944_v11  ;;  %v2206_v18 = vpop.f32.mrf.mxu1  ;;  %v2957_v42 = vsel %vm2741_vm2, %v2613_v15, -inf }
 0x19f   : > { %v2946_v21 = vsel %vm2741_vm2, %v2206_v18, -inf  ;;  %v2006_v22 = vpop.f32.mrf.mxu0  ;;  %v4696_v18 = vld [vmem:[%s4890_s23 + $0x350] sm:$0xff] }
 0x1a0   : > { %v3422_v23 = vmax.f32 %v3341_v17, 0.0  ;;  %v2947_v24 = vmax.f32 %v2945_v7, %v2946_v21  ;;  %v2952_v31 = vsel %vm2741_vm2, %v2006_v22, -inf  ;;  %v4655_v17 = vld [vmem:[%s4890_s23 + $0x208] sm:$0xff] }
 0x1a1   : > { %4489 = vmatmul.msk.bf16.gmra.mxu1 %vm1431_vm1, %v4653_v13  ;;  %4530 = vmatmul.msk.bf16.gmra.mxu2 %vm1431_vm1, %v4694_v14  ;;  %v4615_v22 = vld [vmem:[%s4890_s23 + $0xc8] sm:$0xff] }
 0x1a2   : > { %v3503_v27 = vpack.c.bf16 %v3422_v23, %v3422_v23  ;;  %v2949_v28 = vmax.f32 %v2947_v24, %v2948_v25  ;;  %4449 = vmatmul.msk.bf16.gmra.mxu0 %vm1431_vm1, %v4613_v19  ;;  %4571 = vmatmul.msk.bf16.gmra.mxu3 %vm1431_vm1, %v4735_v20  ;;  %v4737_v23 = vld [vmem:[%s4890_s23 + $0x498] sm:$0xff] }
 0x1a4   : > { %3585 = vst.msk [vmem:[%s4999_s30 + $0x70] sm:$0xf] %vm3556_vm3, %v3503_v27  ;;  %v2951_v29 = vmax.f32 %v2949_v28, %v2950_v26  ;;  %v2411_v30 = vpop.f32.mrf.mxu2 }
 0x1a5   : > { %v2616_v32 = vpop.f32.mrf.mxu3  ;;  %v2955_v39 = vsel %vm2741_vm2, %v2411_v30, -inf }
 0x1a6   : > { %v3342_v33 = vadd.f32 %v5295_v16, %v2951_v29  ;;  %v2208_v34 = vpop.f32.mrf.mxu1  ;;  %v2964_v60 = vsel %vm2741_vm2, %v2616_v32, -inf }
 0x1a7   : > { %v2953_v35 = vsel %vm2741_vm2, %v2208_v34, -inf  ;;  %v2008_v36 = vpop.f32.mrf.mxu0 }
 0x1a8   : > { %v3423_v37 = vmax.f32 %v3342_v33, 0.0  ;;  %v2954_v38 = vmax.f32 %v2952_v31, %v2953_v35  ;;  %v2959_v46 = vsel %vm2741_vm2, %v2008_v36, -inf }
 0x1aa   : > { %v3504_v40 = vpack.c.bf16 %v3423_v37, %v3423_v37  ;;  %v2956_v41 = vmax.f32 %v2954_v38, %v2955_v39 }
 0x1ac   : > { %3586 = vst.msk [vmem:[%s4999_s30 + $0x74] sm:$0xf] %vm3556_vm3, %v3504_v40  ;;  %v2958_v43 = vmax.f32 %v2956_v41, %v2957_v42  ;;  %v2413_v45 = vpop.f32.mrf.mxu2 }
 0x1ad   : > { %v2618_v49 = vpop.f32.mrf.mxu3  ;;  %v2962_v59 = vsel %vm2741_vm2, %v2413_v45, -inf }
 0x1ae   : > { %v3343_v50 = vadd.f32 %v5295_v16, %v2958_v43  ;;  %v2211_v51 = vpop.f32.mrf.mxu1  ;;  %v2971_v7 = vsel %vm2741_vm2, %v2618_v49, -inf }
 0x1af   : > { %v2960_v54 = vsel %vm2741_vm2, %v2211_v51, -inf  ;;  %v2011_v55 = vpop.f32.mrf.mxu0  ;;  %v4697_v51 = vld [vmem:[%s4890_s23 + $0x358] sm:$0xff] }
 0x1b0   : > { %v3424_v57 = vmax.f32 %v3343_v50, 0.0  ;;  %v2961_v58 = vmax.f32 %v2959_v46, %v2960_v54  ;;  %v2966_v1 = vsel %vm2741_vm2, %v2011_v55, -inf  ;;  %v4656_v50 = vld [vmem:[%s4890_s23 + $0x210] sm:$0xff] }
 0x1b1   : > { %4490 = vmatmul.msk.bf16.gmra.mxu1 %vm1431_vm1, %v4654_v47  ;;  %4531 = vmatmul.msk.bf16.gmra.mxu2 %vm1431_vm1, %v4695_v48  ;;  %v4616_v55 = vld [vmem:[%s4890_s23 + $0xd0] sm:$0xff] }
 0x1b2   : > { %v3505_v61 = vpack.c.bf16 %v3424_v57, %v3424_v57  ;;  %v2963_v62 = vmax.f32 %v2961_v58, %v2962_v59  ;;  %4450 = vmatmul.msk.bf16.gmra.mxu0 %vm1431_vm1, %v4614_v52  ;;  %4572 = vmatmul.msk.bf16.gmra.mxu3 %vm1431_vm1, %v4736_v53  ;;  %v4738_v57 = vld [vmem:[%s4890_s23 + $0x4a0] sm:$0xff] }
 0x1b4   : > { %3587 = vst.msk [vmem:[%s4999_s30 + $0x78] sm:$0xf] %vm3556_vm3, %v3505_v61  ;;  %v2965_v63 = vmax.f32 %v2963_v62, %v2964_v60  ;;  %v2416_v0 = vpop.f32.mrf.mxu2 }
 0x1b5   : > { %v2621_v2 = vpop.f32.mrf.mxu3  ;;  %v2969_v10 = vsel %vm2741_vm2, %v2416_v0, -inf }
 0x1b6   : > { %v3344_v3 = vadd.f32 %v5295_v16, %v2965_v63  ;;  %v2213_v4 = vpop.f32.mrf.mxu1  ;;  %v2978_v29 = vsel %vm2741_vm2, %v2621_v2, -inf }
 0x1b7   : > { %v2967_v5 = vsel %vm2741_vm2, %v2213_v4, -inf  ;;  %v2013_v6 = vpop.f32.mrf.mxu0 }
 0x1b8   : > { %v3425_v8 = vmax.f32 %v3344_v3, 0.0  ;;  %v2968_v9 = vmax.f32 %v2966_v1, %v2967_v5  ;;  %v2973_v15 = vsel %vm2741_vm2, %v2013_v6, -inf }
 0x1ba   : > { %v3506_v11 = vpack.c.bf16 %v3425_v8, %v3425_v8  ;;  %v2970_v12 = vmax.f32 %v2968_v9, %v2969_v10 }
 0x1bc   : > { %3588 = vst.msk [vmem:[%s4999_s30 + $0x7c] sm:$0xf] %vm3556_vm3, %v3506_v11  ;;  %v2972_v13 = vmax.f32 %v2970_v12, %v2971_v7  ;;  %v2418_v14 = vpop.f32.mrf.mxu2 }
 0x1bd   : > { %v2623_v19 = vpop.f32.mrf.mxu3  ;;  %v2976_v28 = vsel %vm2741_vm2, %v2418_v14, -inf }
 0x1be   : > { %v3345_v20 = vadd.f32 %v5295_v16, %v2972_v13  ;;  %v2216_v21 = vpop.f32.mrf.mxu1  ;;  %v2985_v46 = vsel %vm2741_vm2, %v2623_v19, -inf }
 0x1bf   : > { %v2974_v24 = vsel %vm2741_vm2, %v2216_v21, -inf  ;;  %v2016_v25 = vpop.f32.mrf.mxu0  ;;  %v4698_v21 = vld [vmem:[%s4890_s23 + $0x360] sm:$0xff] }
 0x1c0   : > { %v3426_v26 = vmax.f32 %v3345_v20, 0.0  ;;  %v2975_v27 = vmax.f32 %v2973_v15, %v2974_v24  ;;  %v2980_v34 = vsel %vm2741_vm2, %v2016_v25, -inf  ;;  %v4657_v20 = vld [vmem:[%s4890_s23 + $0x218] sm:$0xff] }
 0x1c1   : > { %4491 = vmatmul.msk.bf16.gmra.mxu1 %vm1431_vm1, %v4655_v17  ;;  %4532 = vmatmul.msk.bf16.gmra.mxu2 %vm1431_vm1, %v4696_v18  ;;  %v4617_v25 = vld [vmem:[%s4890_s23 + $0xd8] sm:$0xff] }
 0x1c2   : > { %v3507_v30 = vpack.c.bf16 %v3426_v26, %v3426_v26  ;;  %v2977_v31 = vmax.f32 %v2975_v27, %v2976_v28  ;;  %4451 = vmatmul.msk.bf16.gmra.mxu0 %vm1431_vm1, %v4615_v22  ;;  %4573 = vmatmul.msk.bf16.gmra.mxu3 %vm1431_vm1, %v4737_v23  ;;  %v4739_v26 = vld [vmem:[%s4890_s23 + $0x4a8] sm:$0xff] }
 0x1c4   : > { %3589 = vst.msk [vmem:[%s4999_s30 + $0x80] sm:$0xf] %vm3556_vm3, %v3507_v30  ;;  %v2979_v32 = vmax.f32 %v2977_v31, %v2978_v29  ;;  %v2421_v33 = vpop.f32.mrf.mxu2 }
 0x1c5   : > { %v2626_v35 = vpop.f32.mrf.mxu3  ;;  %v2983_v42 = vsel %vm2741_vm2, %v2421_v33, -inf }
 0x1c6   : > { %v3346_v36 = vadd.f32 %v5295_v16, %v2979_v32  ;;  %v2218_v37 = vpop.f32.mrf.mxu1  ;;  %v2992_v63 = vsel %vm2741_vm2, %v2626_v35, -inf }
 0x1c7   : > { %v2981_v38 = vsel %vm2741_vm2, %v2218_v37, -inf  ;;  %v2018_v39 = vpop.f32.mrf.mxu0 }
 0x1c8   : > { %v3427_v40 = vmax.f32 %v3346_v36, 0.0  ;;  %v2982_v41 = vmax.f32 %v2980_v34, %v2981_v38  ;;  %v2987_v49 = vsel %vm2741_vm2, %v2018_v39, -inf }
 0x1ca   : > { %v3508_v43 = vpack.c.bf16 %v3427_v40, %v3427_v40  ;;  %v2984_v45 = vmax.f32 %v2982_v41, %v2983_v42 }
 0x1cc   : > { %3590 = vst.msk [vmem:[%s4999_s30 + $0x84] sm:$0xf] %vm3556_vm3, %v3508_v43  ;;  %v2986_v47 = vmax.f32 %v2984_v45, %v2985_v46  ;;  %v2423_v48 = vpop.f32.mrf.mxu2 }
 0x1cd   : > { %v2628_v52 = vpop.f32.mrf.mxu3  ;;  %v2990_v62 = vsel %vm2741_vm2, %v2423_v48, -inf }
 0x1ce   : > { %v3347_v53 = vadd.f32 %v5295_v16, %v2986_v47  ;;  %v2221_v54 = vpop.f32.mrf.mxu1  ;;  %v2999_v15 = vsel %vm2741_vm2, %v2628_v52, -inf }
 0x1cf   : > { %v2988_v58 = vsel %vm2741_vm2, %v2221_v54, -inf  ;;  %v2021_v59 = vpop.f32.mrf.mxu0  ;;  %v4699_v54 = vld [vmem:[%s4890_s23 + $0x368] sm:$0xff] }
 0x1d0   : > { %v3428_v60 = vmax.f32 %v3347_v53, 0.0  ;;  %v2989_v61 = vmax.f32 %v2987_v49, %v2988_v58  ;;  %v2994_v4 = vsel %vm2741_vm2, %v2021_v59, -inf  ;;  %v4658_v53 = vld [vmem:[%s4890_s23 + $0x220] sm:$0xff] }
 0x1d1   : > { %4492 = vmatmul.msk.bf16.gmra.mxu1 %vm1431_vm1, %v4656_v50  ;;  %4533 = vmatmul.msk.bf16.gmra.mxu2 %vm1431_vm1, %v4697_v51  ;;  %v4618_v59 = vld [vmem:[%s4890_s23 + $0xe0] sm:$0xff] }
 0x1d2   : > { %v3509_v0 = vpack.c.bf16 %v3428_v60, %v3428_v60  ;;  %v2991_v1 = vmax.f32 %v2989_v61, %v2990_v62  ;;  %4452 = vmatmul.msk.bf16.gmra.mxu0 %vm1431_vm1, %v4616_v55  ;;  %4574 = vmatmul.msk.bf16.gmra.mxu3 %vm1431_vm1, %v4738_v57  ;;  %v4740_v60 = vld [vmem:[%s4890_s23 + $0x4b0] sm:$0xff] }
 0x1d4   : > { %3591 = vst.msk [vmem:[%s4999_s30 + $0x88] sm:$0xf] %vm3556_vm3, %v3509_v0  ;;  %v2993_v2 = vmax.f32 %v2991_v1, %v2992_v63  ;;  %v2426_v3 = vpop.f32.mrf.mxu2 }
 0x1d5   : > { %v2631_v5 = vpop.f32.mrf.mxu3  ;;  %v2997_v7 = vsel %vm2741_vm2, %v2426_v3, -inf }
 0x1d6   : > { %v3348_v6 = vadd.f32 %v5295_v16, %v2993_v2  ;;  %v2223_v8 = vpop.f32.mrf.mxu1  ;;  %v3006_v32 = vsel %vm2741_vm2, %v2631_v5, -inf }
 0x1d7   : > { %v2995_v9 = vsel %vm2741_vm2, %v2223_v8, -inf  ;;  %v2023_v10 = vpop.f32.mrf.mxu0 }
 0x1d8   : > { %v3429_v11 = vmax.f32 %v3348_v6, 0.0  ;;  %v2996_v12 = vmax.f32 %v2994_v4, %v2995_v9  ;;  %v3001_v19 = vsel %vm2741_vm2, %v2023_v10, -inf }
 0x1da   : > { %v3510_v13 = vpack.c.bf16 %v3429_v11, %v3429_v11  ;;  %v2998_v14 = vmax.f32 %v2996_v12, %v2997_v7 }
 0x1dc   : > { %3592 = vst.msk [vmem:[%s4999_s30 + $0x8c] sm:$0xf] %vm3556_vm3, %v3510_v13  ;;  %v3000_v17 = vmax.f32 %v2998_v14, %v2999_v15  ;;  %v2428_v18 = vpop.f32.mrf.mxu2 }
 0x1dd   : > { %v2633_v22 = vpop.f32.mrf.mxu3  ;;  %v3004_v31 = vsel %vm2741_vm2, %v2428_v18, -inf }
 0x1de   : > { %v3349_v23 = vadd.f32 %v5295_v16, %v3000_v17  ;;  %v2226_v24 = vpop.f32.mrf.mxu1  ;;  %v3013_v49 = vsel %vm2741_vm2, %v2633_v22, -inf }
 0x1df   : > { %v3002_v27 = vsel %vm2741_vm2, %v2226_v24, -inf  ;;  %v2026_v28 = vpop.f32.mrf.mxu0  ;;  %v4700_v24 = vld [vmem:[%s4890_s23 + $0x370] sm:$0xff] }
 0x1e0   : > { %v3430_v29 = vmax.f32 %v3349_v23, 0.0  ;;  %v3003_v30 = vmax.f32 %v3001_v19, %v3002_v27  ;;  %v3008_v37 = vsel %vm2741_vm2, %v2026_v28, -inf  ;;  %v4659_v23 = vld [vmem:[%s4890_s23 + $0x228] sm:$0xff] }
 0x1e1   : > { %4493 = vmatmul.msk.bf16.gmra.mxu1 %vm1431_vm1, %v4657_v20  ;;  %4534 = vmatmul.msk.bf16.gmra.mxu2 %vm1431_vm1, %v4698_v21  ;;  %v4619_v28 = vld [vmem:[%s4890_s23 + $0xe8] sm:$0xff] }
 0x1e2   : > { %v3511_v33 = vpack.c.bf16 %v3430_v29, %v3430_v29  ;;  %v3005_v34 = vmax.f32 %v3003_v30, %v3004_v31  ;;  %4453 = vmatmul.msk.bf16.gmra.mxu0 %vm1431_vm1, %v4617_v25  ;;  %4575 = vmatmul.msk.bf16.gmra.mxu3 %vm1431_vm1, %v4739_v26  ;;  %v4741_v29 = vld [vmem:[%s4890_s23 + $0x4b8] sm:$0xff] }
 0x1e4   : > { %3593 = vst.msk [vmem:[%s4999_s30 + $0x90] sm:$0xf] %vm3556_vm3, %v3511_v33  ;;  %v3007_v35 = vmax.f32 %v3005_v34, %v3006_v32  ;;  %v2431_v36 = vpop.f32.mrf.mxu2 }
 0x1e5   : > { %v2636_v38 = vpop.f32.mrf.mxu3  ;;  %v3011_v46 = vsel %vm2741_vm2, %v2431_v36, -inf }
 0x1e6   : > { %v3350_v39 = vadd.f32 %v5295_v16, %v3007_v35  ;;  %v2228_v40 = vpop.f32.mrf.mxu1  ;;  %v3020_v2 = vsel %vm2741_vm2, %v2636_v38, -inf }
 0x1e7   : > { %v3009_v41 = vsel %vm2741_vm2, %v2228_v40, -inf  ;;  %v2028_v42 = vpop.f32.mrf.mxu0 }
 0x1e8   : > { %v3431_v43 = vmax.f32 %v3350_v39, 0.0  ;;  %v3010_v45 = vmax.f32 %v3008_v37, %v3009_v41  ;;  %v3015_v52 = vsel %vm2741_vm2, %v2028_v42, -inf }
 0x1ea   : > { %v3512_v47 = vpack.c.bf16 %v3431_v43, %v3431_v43  ;;  %v3012_v48 = vmax.f32 %v3010_v45, %v3011_v46 }
 0x1ec   : > { %3594 = vst.msk [vmem:[%s4999_s30 + $0x94] sm:$0xf] %vm3556_vm3, %v3512_v47  ;;  %v3014_v50 = vmax.f32 %v3012_v48, %v3013_v49  ;;  %v2433_v51 = vpop.f32.mrf.mxu2 }
 0x1ed   : > { %v2638_v55 = vpop.f32.mrf.mxu3  ;;  %v3018_v1 = vsel %vm2741_vm2, %v2433_v51, -inf }
 0x1ee   : > { %v3351_v57 = vadd.f32 %v5295_v16, %v3014_v50  ;;  %v2231_v58 = vpop.f32.mrf.mxu1  ;;  %v3027_v19 = vsel %vm2741_vm2, %v2638_v55, -inf }
 0x1ef   : > { %v3016_v61 = vsel %vm2741_vm2, %v2231_v58, -inf  ;;  %v2031_v62 = vpop.f32.mrf.mxu0  ;;  %v4701_v58 = vld [vmem:[%s4890_s23 + $0x378] sm:$0xff] }
 0x1f0   : > { %v3432_v63 = vmax.f32 %v3351_v57, 0.0  ;;  %v3017_v0 = vmax.f32 %v3015_v52, %v3016_v61  ;;  %v3022_v8 = vsel %vm2741_vm2, %v2031_v62, -inf  ;;  %v4660_v57 = vld [vmem:[%s4890_s23 + $0x230] sm:$0xff] }
 0x1f1   : > { %4494 = vmatmul.msk.bf16.gmra.mxu1 %vm1431_vm1, %v4658_v53  ;;  %4535 = vmatmul.msk.bf16.gmra.mxu2 %vm1431_vm1, %v4699_v54  ;;  %v4620_v62 = vld [vmem:[%s4890_s23 + $0xf0] sm:$0xff] }
 0x1f2   : > { %v3513_v3 = vpack.c.bf16 %v3432_v63, %v3432_v63  ;;  %v3019_v4 = vmax.f32 %v3017_v0, %v3018_v1  ;;  %4454 = vmatmul.msk.bf16.gmra.mxu0 %vm1431_vm1, %v4618_v59  ;;  %4576 = vmatmul.msk.bf16.gmra.mxu3 %vm1431_vm1, %v4740_v60  ;;  %v4742_v63 = vld [vmem:[%s4890_s23 + $0x4c0] sm:$0xff] }
 0x1f4   : > { %3595 = vst.msk [vmem:[%s4999_s30 + $0x98] sm:$0xf] %vm3556_vm3, %v3513_v3  ;;  %v3021_v5 = vmax.f32 %v3019_v4, %v3020_v2  ;;  %v2436_v6 = vpop.f32.mrf.mxu2 }
 0x1f5   : > { %v2641_v9 = vpop.f32.mrf.mxu3  ;;  %v3025_v15 = vsel %vm2741_vm2, %v2436_v6, -inf }
 0x1f6   : > { %v3352_v10 = vadd.f32 %v5295_v16, %v3021_v5  ;;  %v2233_v11 = vpop.f32.mrf.mxu1  ;;  %v3034_v35 = vsel %vm2741_vm2, %v2641_v9, -inf }
 0x1f7   : > { %v3023_v12 = vsel %vm2741_vm2, %v2233_v11, -inf  ;;  %v2033_v7 = vpop.f32.mrf.mxu0 }
 0x1f8   : > { %v3433_v13 = vmax.f32 %v3352_v10, 0.0  ;;  %v3024_v14 = vmax.f32 %v3022_v8, %v3023_v12  ;;  %v3029_v22 = vsel %vm2741_vm2, %v2033_v7, -inf }
 0x1fa   : > { %v3514_v17 = vpack.c.bf16 %v3433_v13, %v3433_v13  ;;  %v3026_v18 = vmax.f32 %v3024_v14, %v3025_v15 }
 0x1fc   : > { %3596 = vst.msk [vmem:[%s4999_s30 + $0x9c] sm:$0xf] %vm3556_vm3, %v3514_v17  ;;  %v3028_v20 = vmax.f32 %v3026_v18, %v3027_v19  ;;  %v2438_v21 = vpop.f32.mrf.mxu2 }
 0x1fd   : > { %v2643_v25 = vpop.f32.mrf.mxu3  ;;  %v3032_v34 = vsel %vm2741_vm2, %v2438_v21, -inf }
 0x1fe   : > { %v3353_v26 = vadd.f32 %v5295_v16, %v3028_v20  ;;  %v2236_v27 = vpop.f32.mrf.mxu1  ;;  %v3041_v52 = vsel %vm2741_vm2, %v2643_v25, -inf }
 0x1ff   : > { %v3030_v30 = vsel %vm2741_vm2, %v2236_v27, -inf  ;;  %v2036_v31 = vpop.f32.mrf.mxu0  ;;  %v4702_v27 = vld [vmem:[%s4890_s23 + $0x380] sm:$0xff] }
 0x200   : > { %v3434_v32 = vmax.f32 %v3353_v26, 0.0  ;;  %v3031_v33 = vmax.f32 %v3029_v22, %v3030_v30  ;;  %v3036_v40 = vsel %vm2741_vm2, %v2036_v31, -inf  ;;  %v4661_v26 = vld [vmem:[%s4890_s23 + $0x238] sm:$0xff] }
 0x201   : > { %4495 = vmatmul.msk.bf16.gmra.mxu1 %vm1431_vm1, %v4659_v23  ;;  %4536 = vmatmul.msk.bf16.gmra.mxu2 %vm1431_vm1, %v4700_v24  ;;  %v4621_v31 = vld [vmem:[%s4890_s23 + $0xf8] sm:$0xff] }
 0x202   : > { %v3515_v36 = vpack.c.bf16 %v3434_v32, %v3434_v32  ;;  %v3033_v37 = vmax.f32 %v3031_v33, %v3032_v34  ;;  %4455 = vmatmul.msk.bf16.gmra.mxu0 %vm1431_vm1, %v4619_v28  ;;  %4577 = vmatmul.msk.bf16.gmra.mxu3 %vm1431_vm1, %v4741_v29  ;;  %v4743_v32 = vld [vmem:[%s4890_s23 + $0x4c8] sm:$0xff] }
 0x204   : > { %3597 = vst.msk [vmem:[%s4999_s30 + $0xa0] sm:$0xf] %vm3556_vm3, %v3515_v36  ;;  %v3035_v38 = vmax.f32 %v3033_v37, %v3034_v35  ;;  %v2441_v39 = vpop.f32.mrf.mxu2 }
 0x205   : > { %v2646_v41 = vpop.f32.mrf.mxu3  ;;  %v3039_v49 = vsel %vm2741_vm2, %v2441_v39, -inf }
 0x206   : > { %v3354_v42 = vadd.f32 %v5295_v16, %v3035_v38  ;;  %v2238_v43 = vpop.f32.mrf.mxu1  ;;  %v3048_v5 = vsel %vm2741_vm2, %v2646_v41, -inf }
 0x207   : > { %v3037_v45 = vsel %vm2741_vm2, %v2238_v43, -inf  ;;  %v2038_v46 = vpop.f32.mrf.mxu0 }
 0x208   : > { %v3435_v47 = vmax.f32 %v3354_v42, 0.0  ;;  %v3038_v48 = vmax.f32 %v3036_v40, %v3037_v45  ;;  %v3043_v55 = vsel %vm2741_vm2, %v2038_v46, -inf }
 0x20a   : > { %v3516_v50 = vpack.c.bf16 %v3435_v47, %v3435_v47  ;;  %v3040_v51 = vmax.f32 %v3038_v48, %v3039_v49 }
 0x20c   : > { %3598 = vst.msk [vmem:[%s4999_s30 + $0xa4] sm:$0xf] %vm3556_vm3, %v3516_v50  ;;  %v3042_v53 = vmax.f32 %v3040_v51, %v3041_v52  ;;  %v2443_v54 = vpop.f32.mrf.mxu2 }
 0x20d   : > { %v2648_v59 = vpop.f32.mrf.mxu3  ;;  %v3046_v4 = vsel %vm2741_vm2, %v2443_v54, -inf }
 0x20e   : > { %v3355_v60 = vadd.f32 %v5295_v16, %v3042_v53  ;;  %v2241_v61 = vpop.f32.mrf.mxu1  ;;  %v3055_v22 = vsel %vm2741_vm2, %v2648_v59, -inf }
 0x20f   : > { %v3044_v0 = vsel %vm2741_vm2, %v2241_v61, -inf  ;;  %v2041_v1 = vpop.f32.mrf.mxu0  ;;  %v4703_v61 = vld [vmem:[%s4890_s23 + $0x388] sm:$0xff] }
 0x210   : > { %v3436_v2 = vmax.f32 %v3355_v60, 0.0  ;;  %v3045_v3 = vmax.f32 %v3043_v55, %v3044_v0  ;;  %v3050_v11 = vsel %vm2741_vm2, %v2041_v1, -inf  ;;  %v4662_v60 = vld [vmem:[%s4890_s23 + $0x240] sm:$0xff] }
 0x211   : > { %4496 = vmatmul.msk.bf16.gmra.mxu1 %vm1431_vm1, %v4660_v57  ;;  %4537 = vmatmul.msk.bf16.gmra.mxu2 %vm1431_vm1, %v4701_v58  ;;  %v4622_v1 = vld [vmem:[%s4890_s23 + $0x100] sm:$0xff] }
 0x212   : > { %v3517_v6 = vpack.c.bf16 %v3436_v2, %v3436_v2  ;;  %v3047_v8 = vmax.f32 %v3045_v3, %v3046_v4  ;;  %4456 = vmatmul.msk.bf16.gmra.mxu0 %vm1431_vm1, %v4620_v62  ;;  %4578 = vmatmul.msk.bf16.gmra.mxu3 %vm1431_vm1, %v4742_v63  ;;  %v4744_v2 = vld [vmem:[%s4890_s23 + $0x4d0] sm:$0xff] }
 0x214   : > { %3599 = vst.msk [vmem:[%s4999_s30 + $0xa8] sm:$0xf] %vm3556_vm3, %v3517_v6  ;;  %v3049_v9 = vmax.f32 %v3047_v8, %v3048_v5  ;;  %v2446_v10 = vpop.f32.mrf.mxu2 }
 0x215   : > { %v2651_v12 = vpop.f32.mrf.mxu3  ;;  %v3053_v19 = vsel %vm2741_vm2, %v2446_v10, -inf }
 0x216   : > { %v3356_v7 = vadd.f32 %v5295_v16, %v3049_v9  ;;  %v2243_v13 = vpop.f32.mrf.mxu1  ;;  %v3062_v38 = vsel %vm2741_vm2, %v2651_v12, -inf }
 0x217   : > { %v3051_v14 = vsel %vm2741_vm2, %v2243_v13, -inf  ;;  %v2043_v15 = vpop.f32.mrf.mxu0 }
 0x218   : > { %v3437_v17 = vmax.f32 %v3356_v7, 0.0  ;;  %v3052_v18 = vmax.f32 %v3050_v11, %v3051_v14  ;;  %v3057_v25 = vsel %vm2741_vm2, %v2043_v15, -inf }
 0x21a   : > { %v3518_v20 = vpack.c.bf16 %v3437_v17, %v3437_v17  ;;  %v3054_v21 = vmax.f32 %v3052_v18, %v3053_v19 }
 0x21c   : > { %3600 = vst.msk [vmem:[%s4999_s30 + $0xac] sm:$0xf] %vm3556_vm3, %v3518_v20  ;;  %v3056_v23 = vmax.f32 %v3054_v21, %v3055_v22  ;;  %v2448_v24 = vpop.f32.mrf.mxu2 }
 0x21d   : > { %v2653_v28 = vpop.f32.mrf.mxu3  ;;  %v3060_v37 = vsel %vm2741_vm2, %v2448_v24, -inf }
 0x21e   : > { %v3357_v29 = vadd.f32 %v5295_v16, %v3056_v23  ;;  %v2246_v30 = vpop.f32.mrf.mxu1  ;;  %v3069_v55 = vsel %vm2741_vm2, %v2653_v28, -inf }
 0x21f   : > { %v3058_v33 = vsel %vm2741_vm2, %v2246_v30, -inf  ;;  %v2046_v34 = vpop.f32.mrf.mxu0  ;;  %v4704_v30 = vld [vmem:[%s4890_s23 + $0x390] sm:$0xff] }
 0x220   : > { %v3438_v35 = vmax.f32 %v3357_v29, 0.0  ;;  %v3059_v36 = vmax.f32 %v3057_v25, %v3058_v33  ;;  %v3064_v43 = vsel %vm2741_vm2, %v2046_v34, -inf  ;;  %v4663_v29 = vld [vmem:[%s4890_s23 + $0x248] sm:$0xff] }
 0x221   : > { %4497 = vmatmul.msk.bf16.gmra.mxu1 %vm1431_vm1, %v4661_v26  ;;  %4538 = vmatmul.msk.bf16.gmra.mxu2 %vm1431_vm1, %v4702_v27  ;;  %v4623_v34 = vld [vmem:[%s4890_s23 + $0x108] sm:$0xff] }
 0x222   : > { %v3519_v39 = vpack.c.bf16 %v3438_v35, %v3438_v35  ;;  %v3061_v40 = vmax.f32 %v3059_v36, %v3060_v37  ;;  %4457 = vmatmul.msk.bf16.gmra.mxu0 %vm1431_vm1, %v4621_v31  ;;  %4579 = vmatmul.msk.bf16.gmra.mxu3 %vm1431_vm1, %v4743_v32  ;;  %v4745_v35 = vld [vmem:[%s4890_s23 + $0x4d8] sm:$0xff] }
 0x224   : > { %3601 = vst.msk [vmem:[%s4999_s30 + $0xb0] sm:$0xf] %vm3556_vm3, %v3519_v39  ;;  %v3063_v41 = vmax.f32 %v3061_v40, %v3062_v38  ;;  %v2451_v42 = vpop.f32.mrf.mxu2 }
 0x225   : > { %v2656_v45 = vpop.f32.mrf.mxu3  ;;  %v3067_v52 = vsel %vm2741_vm2, %v2451_v42, -inf }
 0x226   : > { %v3358_v46 = vadd.f32 %v5295_v16, %v3063_v41  ;;  %v2248_v47 = vpop.f32.mrf.mxu1  ;;  %v3076_v9 = vsel %vm2741_vm2, %v2656_v45, -inf }
 0x227   : > { %v3065_v48 = vsel %vm2741_vm2, %v2248_v47, -inf  ;;  %v2048_v49 = vpop.f32.mrf.mxu0 }
 0x228   : > { %v3439_v50 = vmax.f32 %v3358_v46, 0.0  ;;  %v3066_v51 = vmax.f32 %v3064_v43, %v3065_v48  ;;  %v3071_v59 = vsel %vm2741_vm2, %v2048_v49, -inf }
 0x22a   : > { %v3520_v53 = vpack.c.bf16 %v3439_v50, %v3439_v50  ;;  %v3068_v54 = vmax.f32 %v3066_v51, %v3067_v52 }
 0x22c   : > { %3602 = vst.msk [vmem:[%s4999_s30 + $0xb4] sm:$0xf] %vm3556_vm3, %v3520_v53  ;;  %v3070_v57 = vmax.f32 %v3068_v54, %v3069_v55  ;;  %v2453_v58 = vpop.f32.mrf.mxu2 }
 0x22d   : > { %v2658_v62 = vpop.f32.mrf.mxu3  ;;  %v3074_v8 = vsel %vm2741_vm2, %v2453_v58, -inf }
 0x22e   : > { %v3359_v63 = vadd.f32 %v5295_v16, %v3070_v57  ;;  %v2251_v0 = vpop.f32.mrf.mxu1  ;;  %v3083_v25 = vsel %vm2741_vm2, %v2658_v62, -inf }
 0x22f   : > { %v3072_v3 = vsel %vm2741_vm2, %v2251_v0, -inf  ;;  %v2051_v4 = vpop.f32.mrf.mxu0  ;;  %v4705_v0 = vld [vmem:[%s4890_s23 + $0x398] sm:$0xff] }
 0x230   : > { %v3440_v5 = vmax.f32 %v3359_v63, 0.0  ;;  %v3073_v6 = vmax.f32 %v3071_v59, %v3072_v3  ;;  %v3078_v13 = vsel %vm2741_vm2, %v2051_v4, -inf  ;;  %v4664_v63 = vld [vmem:[%s4890_s23 + $0x250] sm:$0xff] }
 0x231   : > { %4498 = vmatmul.msk.bf16.gmra.mxu1 %vm1431_vm1, %v4662_v60  ;;  %4539 = vmatmul.msk.bf16.gmra.mxu2 %vm1431_vm1, %v4703_v61  ;;  %v4624_v4 = vld [vmem:[%s4890_s23 + $0x110] sm:$0xff] }
 0x232   : > { %v3521_v10 = vpack.c.bf16 %v3440_v5, %v3440_v5  ;;  %v3075_v11 = vmax.f32 %v3073_v6, %v3074_v8  ;;  %4458 = vmatmul.msk.bf16.gmra.mxu0 %vm1431_vm1, %v4622_v1  ;;  %4580 = vmatmul.msk.bf16.gmra.mxu3 %vm1431_vm1, %v4744_v2  ;;  %v4746_v5 = vld [vmem:[%s4890_s23 + $0x4e0] sm:$0xff] }
 0x234   : > { %3603 = vst.msk [vmem:[%s4999_s30 + $0xb8] sm:$0xf] %vm3556_vm3, %v3521_v10  ;;  %v3077_v12 = vmax.f32 %v3075_v11, %v3076_v9  ;;  %v2456_v7 = vpop.f32.mrf.mxu2 }
 0x235   : > { %v2661_v14 = vpop.f32.mrf.mxu3  ;;  %v3081_v22 = vsel %vm2741_vm2, %v2456_v7, -inf }
 0x236   : > { %v3360_v15 = vadd.f32 %v5295_v16, %v3077_v12  ;;  %v2253_v17 = vpop.f32.mrf.mxu1  ;;  %v3090_v41 = vsel %vm2741_vm2, %v2661_v14, -inf }
 0x237   : > { %v3079_v18 = vsel %vm2741_vm2, %v2253_v17, -inf  ;;  %v2053_v19 = vpop.f32.mrf.mxu0 }
 0x238   : > { %v3441_v20 = vmax.f32 %v3360_v15, 0.0  ;;  %v3080_v21 = vmax.f32 %v3078_v13, %v3079_v18  ;;  %v3085_v28 = vsel %vm2741_vm2, %v2053_v19, -inf }
 0x23a   : > { %v3522_v23 = vpack.c.bf16 %v3441_v20, %v3441_v20  ;;  %v3082_v24 = vmax.f32 %v3080_v21, %v3081_v22 }
 0x23c   : > { %3604 = vst.msk [vmem:[%s4999_s30 + $0xbc] sm:$0xf] %vm3556_vm3, %v3522_v23  ;;  %v3084_v26 = vmax.f32 %v3082_v24, %v3083_v25  ;;  %v2458_v27 = vpop.f32.mrf.mxu2 }
 0x23d   : > { %v2663_v31 = vpop.f32.mrf.mxu3  ;;  %v3088_v40 = vsel %vm2741_vm2, %v2458_v27, -inf }
 0x23e   : > { %v3361_v32 = vadd.f32 %v5295_v16, %v3084_v26  ;;  %v2256_v33 = vpop.f32.mrf.mxu1  ;;  %v3097_v59 = vsel %vm2741_vm2, %v2663_v31, -inf }
 0x23f   : > { %v3086_v36 = vsel %vm2741_vm2, %v2256_v33, -inf  ;;  %v2056_v37 = vpop.f32.mrf.mxu0  ;;  %v4706_v33 = vld [vmem:[%s4890_s23 + $0x3a0] sm:$0xff] }
 0x240   : > { %v3442_v38 = vmax.f32 %v3361_v32, 0.0  ;;  %v3087_v39 = vmax.f32 %v3085_v28, %v3086_v36  ;;  %v3092_v47 = vsel %vm2741_vm2, %v2056_v37, -inf  ;;  %v4665_v32 = vld [vmem:[%s4890_s23 + $0x258] sm:$0xff] }
 0x241   : > { %4499 = vmatmul.msk.bf16.gmra.mxu1 %vm1431_vm1, %v4663_v29  ;;  %4540 = vmatmul.msk.bf16.gmra.mxu2 %vm1431_vm1, %v4704_v30  ;;  %v4625_v37 = vld [vmem:[%s4890_s23 + $0x118] sm:$0xff] }
 0x242   : > { %v3523_v42 = vpack.c.bf16 %v3442_v38, %v3442_v38  ;;  %v3089_v43 = vmax.f32 %v3087_v39, %v3088_v40  ;;  %4459 = vmatmul.msk.bf16.gmra.mxu0 %vm1431_vm1, %v4623_v34  ;;  %4581 = vmatmul.msk.bf16.gmra.mxu3 %vm1431_vm1, %v4745_v35  ;;  %v4747_v38 = vld [vmem:[%s4890_s23 + $0x4e8] sm:$0xff] }
 0x244   : > { %3605 = vst.msk [vmem:[%s4999_s30 + $0xc0] sm:$0xf] %vm3556_vm3, %v3523_v42  ;;  %v3091_v45 = vmax.f32 %v3089_v43, %v3090_v41  ;;  %v2461_v46 = vpop.f32.mrf.mxu2 }
 0x245   : > { %v2666_v48 = vpop.f32.mrf.mxu3  ;;  %v3095_v55 = vsel %vm2741_vm2, %v2461_v46, -inf }
 0x246   : > { %v3362_v49 = vadd.f32 %v5295_v16, %v3091_v45  ;;  %v2258_v50 = vpop.f32.mrf.mxu1  ;;  %v3104_v12 = vsel %vm2741_vm2, %v2666_v48, -inf }
 0x247   : > { %v3093_v51 = vsel %vm2741_vm2, %v2258_v50, -inf  ;;  %v2058_v52 = vpop.f32.mrf.mxu0 }
 0x248   : > { %v3443_v53 = vmax.f32 %v3362_v49, 0.0  ;;  %v3094_v54 = vmax.f32 %v3092_v47, %v3093_v51  ;;  %v3099_v62 = vsel %vm2741_vm2, %v2058_v52, -inf }
 0x24a   : > { %v3524_v57 = vpack.c.bf16 %v3443_v53, %v3443_v53  ;;  %v3096_v58 = vmax.f32 %v3094_v54, %v3095_v55 }
 0x24c   : > { %3606 = vst.msk [vmem:[%s4999_s30 + $0xc4] sm:$0xf] %vm3556_vm3, %v3524_v57  ;;  %v3098_v60 = vmax.f32 %v3096_v58, %v3097_v59  ;;  %v2463_v61 = vpop.f32.mrf.mxu2 }
 0x24d   : > { %v2668_v1 = vpop.f32.mrf.mxu3  ;;  %v3102_v11 = vsel %vm2741_vm2, %v2463_v61, -inf }
 0x24e   : > { %v3363_v2 = vadd.f32 %v5295_v16, %v3098_v60  ;;  %v2261_v3 = vpop.f32.mrf.mxu1  ;;  %v3111_v28 = vsel %vm2741_vm2, %v2668_v1, -inf }
 0x24f   : > { %v3100_v6 = vsel %vm2741_vm2, %v2261_v3, -inf  ;;  %v2061_v8 = vpop.f32.mrf.mxu0  ;;  %v4707_v3 = vld [vmem:[%s4890_s23 + $0x3a8] sm:$0xff] }
 0x250   : > { %v3444_v9 = vmax.f32 %v3363_v2, 0.0  ;;  %v3101_v10 = vmax.f32 %v3099_v62, %v3100_v6  ;;  %v3106_v17 = vsel %vm2741_vm2, %v2061_v8, -inf  ;;  %v4666_v2 = vld [vmem:[%s4890_s23 + $0x260] sm:$0xff] }
 0x251   : > { %4500 = vmatmul.msk.bf16.gmra.mxu1 %vm1431_vm1, %v4664_v63  ;;  %4541 = vmatmul.msk.bf16.gmra.mxu2 %vm1431_vm1, %v4705_v0  ;;  %v4626_v8 = vld [vmem:[%s4890_s23 + $0x120] sm:$0xff] }
 0x252   : > { %v3525_v7 = vpack.c.bf16 %v3444_v9, %v3444_v9  ;;  %v3103_v13 = vmax.f32 %v3101_v10, %v3102_v11  ;;  %4460 = vmatmul.msk.bf16.gmra.mxu0 %vm1431_vm1, %v4624_v4  ;;  %4582 = vmatmul.msk.bf16.gmra.mxu3 %vm1431_vm1, %v4746_v5  ;;  %v4748_v9 = vld [vmem:[%s4890_s23 + $0x4f0] sm:$0xff] }
 0x254   : > { %3607 = vst.msk [vmem:[%s4999_s30 + $0xc8] sm:$0xf] %vm3556_vm3, %v3525_v7  ;;  %v3105_v14 = vmax.f32 %v3103_v13, %v3104_v12  ;;  %v2466_v15 = vpop.f32.mrf.mxu2 }
 0x255   : > { %v2671_v18 = vpop.f32.mrf.mxu3  ;;  %v3109_v25 = vsel %vm2741_vm2, %v2466_v15, -inf }
 0x256   : > { %v3364_v19 = vadd.f32 %v5295_v16, %v3105_v14  ;;  %v2263_v20 = vpop.f32.mrf.mxu1  ;;  %v3118_v45 = vsel %vm2741_vm2, %v2671_v18, -inf }
 0x257   : > { %v3107_v21 = vsel %vm2741_vm2, %v2263_v20, -inf  ;;  %v2063_v22 = vpop.f32.mrf.mxu0 }
 0x258   : > { %v3445_v23 = vmax.f32 %v3364_v19, 0.0  ;;  %v3108_v24 = vmax.f32 %v3106_v17, %v3107_v21  ;;  %v3113_v31 = vsel %vm2741_vm2, %v2063_v22, -inf  ;;  %v5597_v21 = vld [vmem:[%s4906_s26] ss:$0 sm:$0xff] }
 0x25a   : > { %v3526_v26 = vpack.c.bf16 %v3445_v23, %v3445_v23  ;;  %v3110_v27 = vmax.f32 %v3108_v24, %v3109_v25 }
 0x25c   : > { %3608 = vst.msk [vmem:[%s4999_s30 + $0xcc] sm:$0xf] %vm3556_vm3, %v3526_v26  ;;  %v3112_v29 = vmax.f32 %v3110_v27, %v3111_v28  ;;  %v2468_v30 = vpop.f32.mrf.mxu2 }
 0x25d   : > { %v2673_v34 = vpop.f32.mrf.mxu3  ;;  %v3116_v43 = vsel %vm2741_vm2, %v2468_v30, -inf }
 0x25e   : > { %v3365_v35 = vadd.f32 %v5295_v16, %v3112_v29  ;;  %v2266_v36 = vpop.f32.mrf.mxu1  ;;  %v3125_v62 = vsel %vm2741_vm2, %v2673_v34, -inf }
 0x25f   : > { %v3114_v39 = vsel %vm2741_vm2, %v2266_v36, -inf  ;;  %v2066_v40 = vpop.f32.mrf.mxu0  ;;  %v4708_v36 = vld [vmem:[%s4890_s23 + $0x3b0] sm:$0xff] }
 0x260   : > { %v3446_v41 = vmax.f32 %v3365_v35, 0.0  ;;  %v3115_v42 = vmax.f32 %v3113_v31, %v3114_v39  ;;  %v3120_v50 = vsel %vm2741_vm2, %v2066_v40, -inf  ;;  %v4667_v35 = vld [vmem:[%s4890_s23 + $0x268] sm:$0xff] }
 0x261   : > { %4501 = vmatmul.msk.bf16.gmra.mxu1 %vm1431_vm1, %v4665_v32  ;;  %4542 = vmatmul.msk.bf16.gmra.mxu2 %vm1431_vm1, %v4706_v33  ;;  %v4627_v40 = vld [vmem:[%s4890_s23 + $0x128] sm:$0xff] }
 0x262   : > { %v3527_v46 = vpack.c.bf16 %v3446_v41, %v3446_v41  ;;  %v3117_v47 = vmax.f32 %v3115_v42, %v3116_v43  ;;  %4461 = vmatmul.msk.bf16.gmra.mxu0 %vm1431_vm1, %v4625_v37  ;;  %4583 = vmatmul.msk.bf16.gmra.mxu3 %vm1431_vm1, %v4747_v38  ;;  %v4749_v41 = vld [vmem:[%s4890_s23 + $0x4f8] sm:$0xff] }
 0x264   : > { %3609 = vst.msk [vmem:[%s4999_s30 + $0xd0] sm:$0xf] %vm3556_vm3, %v3527_v46  ;;  %v3119_v48 = vmax.f32 %v3117_v47, %v3118_v45  ;;  %v2471_v49 = vpop.f32.mrf.mxu2 }
 0x265   : > { %v2676_v51 = vpop.f32.mrf.mxu3  ;;  %v3123_v59 = vsel %vm2741_vm2, %v2471_v49, -inf }
 0x266   : > { %v3366_v52 = vadd.f32 %v5295_v16, %v3119_v48  ;;  %v2268_v53 = vpop.f32.mrf.mxu1  ;;  %v3132_v14 = vsel %vm2741_vm2, %v2676_v51, -inf }
 0x267   : > { %v3121_v54 = vsel %vm2741_vm2, %v2268_v53, -inf  ;;  %v2068_v55 = vpop.f32.mrf.mxu0 }
 0x268   : > { %v3447_v57 = vmax.f32 %v3366_v52, 0.0  ;;  %v3122_v58 = vmax.f32 %v3120_v50, %v3121_v54  ;;  %v3127_v1 = vsel %vm2741_vm2, %v2068_v55, -inf }
 0x26a   : > { %v3528_v60 = vpack.c.bf16 %v3447_v57, %v3447_v57  ;;  %v3124_v61 = vmax.f32 %v3122_v58, %v3123_v59 }
 0x26c   : > { %3610 = vst.msk [vmem:[%s4999_s30 + $0xd4] sm:$0xf] %vm3556_vm3, %v3528_v60  ;;  %v3126_v63 = vmax.f32 %v3124_v61, %v3125_v62  ;;  %v2473_v0 = vpop.f32.mrf.mxu2 }
 0x26d   : > { %v2678_v4 = vpop.f32.mrf.mxu3  ;;  %v3130_v13 = vsel %vm2741_vm2, %v2473_v0, -inf }
 0x26e   : > { %v3367_v5 = vadd.f32 %v5295_v16, %v3126_v63  ;;  %v2271_v6 = vpop.f32.mrf.mxu1  ;;  %v3139_v31 = vsel %vm2741_vm2, %v2678_v4, -inf }
 0x26f   : > { %v3128_v10 = vsel %vm2741_vm2, %v2271_v6, -inf  ;;  %v2071_v11 = vpop.f32.mrf.mxu0  ;;  %v4709_v6 = vld [vmem:[%s4890_s23 + $0x3b8] sm:$0xff] }
 0x270   : > { %v3448_v12 = vmax.f32 %v3367_v5, 0.0  ;;  %v3129_v7 = vmax.f32 %v3127_v1, %v3128_v10  ;;  %v3134_v19 = vsel %vm2741_vm2, %v2071_v11, -inf  ;;  %v4668_v5 = vld [vmem:[%s4890_s23 + $0x270] sm:$0xff] }
 0x271   : > { %4502 = vmatmul.msk.bf16.gmra.mxu1 %vm1431_vm1, %v4666_v2  ;;  %4543 = vmatmul.msk.bf16.gmra.mxu2 %vm1431_vm1, %v4707_v3  ;;  %v4628_v11 = vld [vmem:[%s4890_s23 + $0x130] sm:$0xff] }
 0x272   : > { %v3529_v15 = vpack.c.bf16 %v3448_v12, %v3448_v12  ;;  %v3131_v16 = vmax.f32 %v3129_v7, %v3130_v13  ;;  %4462 = vmatmul.msk.bf16.gmra.mxu0 %vm1431_vm1, %v4626_v8  ;;  %4584 = vmatmul.msk.bf16.gmra.mxu3 %vm1431_vm1, %v4748_v9  ;;  %v4750_v12 = vld [vmem:[%s4890_s23 + $0x500] sm:$0xff] }
 0x274   : > { %3611 = vst.msk [vmem:[%s4999_s30 + $0xd8] sm:$0xf] %vm3556_vm3, %v3529_v15  ;;  %v3133_v17 = vmax.f32 %v3131_v16, %v3132_v14  ;;  %v2476_v18 = vpop.f32.mrf.mxu2 }
 0x275   : > { %v2681_v20 = vpop.f32.mrf.mxu3  ;;  %v3137_v28 = vsel %vm2741_vm2, %v2476_v18, -inf }
 0x276   : > { %v3368_v22 = vadd.f32 %v5597_v21, %v3133_v17  ;;  %v2273_v23 = vpop.f32.mrf.mxu1  ;;  %v3146_v48 = vsel %vm2741_vm2, %v2681_v20, -inf }
 0x277   : > { %v3135_v24 = vsel %vm2741_vm2, %v2273_v23, -inf  ;;  %v2073_v25 = vpop.f32.mrf.mxu0 }
 0x278   : > { %v3449_v26 = vmax.f32 %v3368_v22, 0.0  ;;  %v3136_v27 = vmax.f32 %v3134_v19, %v3135_v24  ;;  %v3141_v34 = vsel %vm2741_vm2, %v2073_v25, -inf }
 0x27a   : > { %v3530_v29 = vpack.c.bf16 %v3449_v26, %v3449_v26  ;;  %v3138_v30 = vmax.f32 %v3136_v27, %v3137_v28 }
 0x27c   : > { %3612 = vst.msk [vmem:[%s4999_s30 + $0xdc] sm:$0xf] %vm3556_vm3, %v3530_v29  ;;  %v3140_v32 = vmax.f32 %v3138_v30, %v3139_v31  ;;  %v2478_v33 = vpop.f32.mrf.mxu2 }
 0x27d   : > { %v2683_v37 = vpop.f32.mrf.mxu3  ;;  %v3144_v47 = vsel %vm2741_vm2, %v2478_v33, -inf }
 0x27e   : > { %v3369_v38 = vadd.f32 %v5597_v21, %v3140_v32  ;;  %v2276_v39 = vpop.f32.mrf.mxu1  ;;  %v3153_v1 = vsel %vm2741_vm2, %v2683_v37, -inf }
 0x27f   : > { %v3142_v42 = vsel %vm2741_vm2, %v2276_v39, -inf  ;;  %v2076_v43 = vpop.f32.mrf.mxu0  ;;  %v4710_v39 = vld [vmem:[%s4890_s23 + $0x3c0] sm:$0xff] }
 0x280   : > { %v3450_v45 = vmax.f32 %v3369_v38, 0.0  ;;  %v3143_v46 = vmax.f32 %v3141_v34, %v3142_v42  ;;  %v3148_v53 = vsel %vm2741_vm2, %v2076_v43, -inf  ;;  %v4669_v38 = vld [vmem:[%s4890_s23 + $0x278] sm:$0xff] }
 0x281   : > { %4503 = vmatmul.msk.bf16.gmra.mxu1 %vm1431_vm1, %v4667_v35  ;;  %4544 = vmatmul.msk.bf16.gmra.mxu2 %vm1431_vm1, %v4708_v36  ;;  %v4629_v43 = vld [vmem:[%s4890_s23 + $0x138] sm:$0xff] }
 0x282   : > { %v3531_v49 = vpack.c.bf16 %v3450_v45, %v3450_v45  ;;  %v3145_v50 = vmax.f32 %v3143_v46, %v3144_v47  ;;  %4463 = vmatmul.msk.bf16.gmra.mxu0 %vm1431_vm1, %v4627_v40  ;;  %4585 = vmatmul.msk.bf16.gmra.mxu3 %vm1431_vm1, %v4749_v41  ;;  %v4751_v45 = vld [vmem:[%s4890_s23 + $0x508] sm:$0xff] }
 0x284   : > { %3613 = vst.msk [vmem:[%s4999_s30 + $0xe0] sm:$0xf] %vm3556_vm3, %v3531_v49  ;;  %v3147_v51 = vmax.f32 %v3145_v50, %v3146_v48  ;;  %v2481_v52 = vpop.f32.mrf.mxu2 }
 0x285   : > { %v2686_v54 = vpop.f32.mrf.mxu3  ;;  %v3151_v62 = vsel %vm2741_vm2, %v2481_v52, -inf }
 0x286   : > { %v3370_v55 = vadd.f32 %v5597_v21, %v3147_v51  ;;  %v2278_v57 = vpop.f32.mrf.mxu1  ;;  %v3160_v17 = vsel %vm2741_vm2, %v2686_v54, -inf }
 0x287   : > { %v3149_v58 = vsel %vm2741_vm2, %v2278_v57, -inf  ;;  %v2078_v59 = vpop.f32.mrf.mxu0 }
 0x288   : > { %v3451_v60 = vmax.f32 %v3370_v55, 0.0  ;;  %v3150_v61 = vmax.f32 %v3148_v53, %v3149_v58  ;;  %v3155_v4 = vsel %vm2741_vm2, %v2078_v59, -inf }
 0x28a   : > { %v3532_v63 = vpack.c.bf16 %v3451_v60, %v3451_v60  ;;  %v3152_v0 = vmax.f32 %v3150_v61, %v3151_v62 }
 0x28c   : > { %3614 = vst.msk [vmem:[%s4999_s30 + $0xe4] sm:$0xf] %vm3556_vm3, %v3532_v63  ;;  %v3154_v2 = vmax.f32 %v3152_v0, %v3153_v1  ;;  %v2483_v3 = vpop.f32.mrf.mxu2 }
 0x28d   : > { %v2688_v8 = vpop.f32.mrf.mxu3  ;;  %v3158_v16 = vsel %vm2741_vm2, %v2483_v3, -inf }
 0x28e   : > { %v3371_v9 = vadd.f32 %v5597_v21, %v3154_v2  ;;  %v2281_v10 = vpop.f32.mrf.mxu1  ;;  %v3167_v34 = vsel %vm2741_vm2, %v2688_v8, -inf }
 0x28f   : > { %v3156_v7 = vsel %vm2741_vm2, %v2281_v10, -inf  ;;  %v2081_v13 = vpop.f32.mrf.mxu0  ;;  %v4711_v10 = vld [vmem:[%s4890_s23 + $0x3c8] sm:$0xff] }
 0x290   : > { %v3452_v14 = vmax.f32 %v3371_v9, 0.0  ;;  %v3157_v15 = vmax.f32 %v3155_v4, %v3156_v7  ;;  %v3162_v23 = vsel %vm2741_vm2, %v2081_v13, -inf  ;;  %v4670_v9 = vld [vmem:[%s4890_s23 + $0x280] sm:$0xff] }
 0x291   : > { %4504 = vmatmul.msk.bf16.gmra.mxu1 %vm1431_vm1, %v4668_v5  ;;  %4545 = vmatmul.msk.bf16.gmra.mxu2 %vm1431_vm1, %v4709_v6 }
 0x292   : > { %v3533_v18 = vpack.c.bf16 %v3452_v14, %v3452_v14  ;;  %v3159_v19 = vmax.f32 %v3157_v15, %v3158_v16  ;;  %4464 = vmatmul.msk.bf16.gmra.mxu0 %vm1431_vm1, %v4628_v11  ;;  %4586 = vmatmul.msk.bf16.gmra.mxu3 %vm1431_vm1, %v4750_v12 }
 0x294   : > { %3615 = vst.msk [vmem:[%s4999_s30 + $0xe8] sm:$0xf] %vm3556_vm3, %v3533_v18  ;;  %v3161_v20 = vmax.f32 %v3159_v19, %v3160_v17  ;;  %v2486_v22 = vpop.f32.mrf.mxu2 }
 0x295   : > { %v2691_v24 = vpop.f32.mrf.mxu3  ;;  %v3165_v31 = vsel %vm2741_vm2, %v2486_v22, -inf }
 0x296   : > { %v3372_v25 = vadd.f32 %v5597_v21, %v3161_v20  ;;  %v2283_v26 = vpop.f32.mrf.mxu1  ;;  %v3174_v51 = vsel %vm2741_vm2, %v2691_v24, -inf }
 0x297   : > { %v3163_v27 = vsel %vm2741_vm2, %v2283_v26, -inf  ;;  %v2083_v28 = vpop.f32.mrf.mxu0 }
 0x298   : > { %v3453_v29 = vmax.f32 %v3372_v25, 0.0  ;;  %v3164_v30 = vmax.f32 %v3162_v23, %v3163_v27  ;;  %v3169_v37 = vsel %vm2741_vm2, %v2083_v28, -inf }
 0x29a   : > { %v3534_v32 = vpack.c.bf16 %v3453_v29, %v3453_v29  ;;  %v3166_v33 = vmax.f32 %v3164_v30, %v3165_v31 }
 0x29c   : > { %3616 = vst.msk [vmem:[%s4999_s30 + $0xec] sm:$0xf] %vm3556_vm3, %v3534_v32  ;;  %v3168_v35 = vmax.f32 %v3166_v33, %v3167_v34  ;;  %v2488_v36 = vpop.f32.mrf.mxu2 }
 0x29d   : > { %v2693_v40 = vpop.f32.mrf.mxu3  ;;  %v3172_v50 = vsel %vm2741_vm2, %v2488_v36, -inf }
 0x29e   : > { %v3373_v41 = vadd.f32 %v5597_v21, %v3168_v35  ;;  %v2286_v42 = vpop.f32.mrf.mxu1  ;;  %v3181_v4 = vsel %vm2741_vm2, %v2693_v40, -inf }
 0x29f   : > { %v3170_v46 = vsel %vm2741_vm2, %v2286_v42, -inf  ;;  %v2086_v47 = vpop.f32.mrf.mxu0 }
 0x2a0   : > { %v3454_v48 = vmax.f32 %v3373_v41, 0.0  ;;  %v3171_v49 = vmax.f32 %v3169_v37, %v3170_v46  ;;  %v3176_v57 = vsel %vm2741_vm2, %v2086_v47, -inf }
 0x2a1   : > { %4505 = vmatmul.msk.bf16.gmra.mxu1 %vm1431_vm1, %v4669_v38  ;;  %4546 = vmatmul.msk.bf16.gmra.mxu2 %vm1431_vm1, %v4710_v39 }
 0x2a2   : > { %v3535_v52 = vpack.c.bf16 %v3454_v48, %v3454_v48  ;;  %v3173_v53 = vmax.f32 %v3171_v49, %v3172_v50  ;;  %4465 = vmatmul.msk.bf16.gmra.mxu0 %vm1431_vm1, %v4629_v43  ;;  %4587 = vmatmul.msk.bf16.gmra.mxu3 %vm1431_vm1, %v4751_v45 }
 0x2a4   : > { %3617 = vst.msk [vmem:[%s4999_s30 + $0xf0] sm:$0xf] %vm3556_vm3, %v3535_v52  ;;  %v3175_v54 = vmax.f32 %v3173_v53, %v3174_v51  ;;  %v2491_v55 = vpop.f32.mrf.mxu2 }
 0x2a5   : > { %v2696_v58 = vpop.f32.mrf.mxu3  ;;  %v3179_v1 = vsel %vm2741_vm2, %v2491_v55, -inf }
 0x2a6   : > { %v3374_v59 = vadd.f32 %v5597_v21, %v3175_v54  ;;  %v2288_v60 = vpop.f32.mrf.mxu1  ;;  %v3188_v18 = vsel %vm2741_vm2, %v2696_v58, -inf }
 0x2a7   : > { %v3177_v61 = vsel %vm2741_vm2, %v2288_v60, -inf  ;;  %v2088_v62 = vpop.f32.mrf.mxu0 }
 0x2a8   : > { %v3455_v63 = vmax.f32 %v3374_v59, 0.0  ;;  %v3178_v0 = vmax.f32 %v3176_v57, %v3177_v61  ;;  %v3183_v8 = vsel %vm2741_vm2, %v2088_v62, -inf }
 0x2aa   : > { %v3536_v2 = vpack.c.bf16 %v3455_v63, %v3455_v63  ;;  %v3180_v3 = vmax.f32 %v3178_v0, %v3179_v1 }
 0x2ac   : > { %3618 = vst.msk [vmem:[%s4999_s30 + $0xf4] sm:$0xf] %vm3556_vm3, %v3536_v2  ;;  %v3182_v5 = vmax.f32 %v3180_v3, %v3181_v4  ;;  %v2493_v6 = vpop.f32.mrf.mxu2 }
 0x2ad   : > { %v2698_v11 = vpop.f32.mrf.mxu3  ;;  %v3186_v17 = vsel %vm2741_vm2, %v2493_v6, -inf }
 0x2ae   : > { %v3375_v12 = vadd.f32 %v5597_v21, %v3182_v5  ;;  %v2291_v7 = vpop.f32.mrf.mxu1  ;;  %v3195_v35 = vsel %vm2741_vm2, %v2698_v11, -inf }
 0x2af   : > { %v3184_v13 = vsel %vm2741_vm2, %v2291_v7, -inf  ;;  %v2091_v14 = vpop.f32.mrf.mxu0 }
 0x2b0   : > { %v3456_v15 = vmax.f32 %v3375_v12, 0.0  ;;  %v3185_v16 = vmax.f32 %v3183_v8, %v3184_v13  ;;  %v3190_v24 = vsel %vm2741_vm2, %v2091_v14, -inf }
 0x2b1   : > { %4506 = vmatmul.msk.bf16.gmra.mxu1 %vm1431_vm1, %v4670_v9  ;;  %4547 = vmatmul.msk.bf16.gmra.mxu2 %vm1431_vm1, %v4711_v10 }
 0x2b2   : > { %v3537_v19 = vpack.c.bf16 %v3456_v15, %v3456_v15  ;;  %v3187_v20 = vmax.f32 %v3185_v16, %v3186_v17 }
 0x2b4   : > { %3619 = vst.msk [vmem:[%s4999_s30 + $0xf8] sm:$0xf] %vm3556_vm3, %v3537_v19  ;;  %v3189_v22 = vmax.f32 %v3187_v20, %v3188_v18  ;;  %v2496_v23 = vpop.f32.mrf.mxu2 }
 0x2b5   : > { %v2701_v25 = vpop.f32.mrf.mxu3  ;;  %v3193_v32 = vsel %vm2741_vm2, %v2496_v23, -inf }
 0x2b6   : > { %v3376_v26 = vadd.f32 %v5597_v21, %v3189_v22  ;;  %v2293_v27 = vpop.f32.mrf.mxu1  ;;  %v3202_v48 = vsel %vm2741_vm2, %v2701_v25, -inf }
 0x2b7   : > { %v3191_v28 = vsel %vm2741_vm2, %v2293_v27, -inf  ;;  %v2093_v29 = vpop.f32.mrf.mxu0 }
 0x2b8   : > { %v3457_v30 = vmax.f32 %v3376_v26, 0.0  ;;  %v3192_v31 = vmax.f32 %v3190_v24, %v3191_v28  ;;  %v3197_v38 = vsel %vm2741_vm2, %v2093_v29, -inf }
 0x2ba   : > { %v3538_v33 = vpack.c.bf16 %v3457_v30, %v3457_v30  ;;  %v3194_v34 = vmax.f32 %v3192_v31, %v3193_v32 }
 0x2bc   : > { %3620 = vst.msk [vmem:[%s4999_s30 + $0xfc] sm:$0xf] %vm3556_vm3, %v3538_v33  ;;  %v3196_v36 = vmax.f32 %v3194_v34, %v3195_v35  ;;  %v2498_v37 = vpop.f32.mrf.mxu2 }
 0x2bd   : > { %v2703_v39 = vpop.f32.mrf.mxu3  ;;  %v3200_v47 = vsel %vm2741_vm2, %v2498_v37, -inf }
 0x2be   : > { %v3377_v40 = vadd.f32 %v5597_v21, %v3196_v36  ;;  %v2296_v41 = vpop.f32.mrf.mxu1  ;;  %v3209_v1 = vsel %vm2741_vm2, %v2703_v39, -inf }
 0x2bf   : > { %v3198_v42 = vsel %vm2741_vm2, %v2296_v41, -inf  ;;  %v2096_v43 = vpop.f32.mrf.mxu0 }
 0x2c0   : > { %v3458_v45 = vmax.f32 %v3377_v40, 0.0  ;;  %v3199_v46 = vmax.f32 %v3197_v38, %v3198_v42  ;;  %v3204_v53 = vsel %vm2741_vm2, %v2096_v43, -inf }
 0x2c2   : > { %v3539_v49 = vpack.c.bf16 %v3458_v45, %v3458_v45  ;;  %v3201_v50 = vmax.f32 %v3199_v46, %v3200_v47 }
 0x2c4   : > { %3621 = vst.msk [vmem:[%s4999_s30 + $0x100] sm:$0xf] %vm3556_vm3, %v3539_v49  ;;  %v3203_v51 = vmax.f32 %v3201_v50, %v3202_v48  ;;  %v2501_v52 = vpop.f32.mrf.mxu2 }
 0x2c5   : > { %v2706_v54 = vpop.f32.mrf.mxu3  ;;  %v3207_v62 = vsel %vm2741_vm2, %v2501_v52, -inf }
 0x2c6   : > { %v3378_v55 = vadd.f32 %v5597_v21, %v3203_v51  ;;  %v2298_v57 = vpop.f32.mrf.mxu1  ;;  %v3216_v13 = vsel %vm2741_vm2, %v2706_v54, -inf }
 0x2c7   : > { %v3205_v58 = vsel %vm2741_vm2, %v2298_v57, -inf  ;;  %v2098_v59 = vpop.f32.mrf.mxu0 }
 0x2c8   : > { %v3459_v60 = vmax.f32 %v3378_v55, 0.0  ;;  %v3206_v61 = vmax.f32 %v3204_v53, %v3205_v58  ;;  %v3211_v4 = vsel %vm2741_vm2, %v2098_v59, -inf }
 0x2ca   : > { %v3540_v63 = vpack.c.bf16 %v3459_v60, %v3459_v60  ;;  %v3208_v0 = vmax.f32 %v3206_v61, %v3207_v62 }
 0x2cc   : > { %3622 = vst.msk [vmem:[%s4999_s30 + $0x104] sm:$0xf] %vm3556_vm3, %v3540_v63  ;;  %v3210_v2 = vmax.f32 %v3208_v0, %v3209_v1  ;;  %v2503_v3 = vpop.f32.mrf.mxu2 }
 0x2cd   : > { %v2708_v5 = vpop.f32.mrf.mxu3  ;;  %v3214_v7 = vsel %vm2741_vm2, %v2503_v3, -inf }
 0x2ce   : > { %v3379_v6 = vadd.f32 %v5597_v21, %v3210_v2  ;;  %v2301_v8 = vpop.f32.mrf.mxu1  ;;  %v3223_v30 = vsel %vm2741_vm2, %v2708_v5, -inf }
 0x2cf   : > { %v3212_v9 = vsel %vm2741_vm2, %v2301_v8, -inf  ;;  %v2101_v10 = vpop.f32.mrf.mxu0 }
 0x2d0   : > { %v3460_v11 = vmax.f32 %v3379_v6, 0.0  ;;  %v3213_v12 = vmax.f32 %v3211_v4, %v3212_v9  ;;  %v3218_v18 = vsel %vm2741_vm2, %v2101_v10, -inf }
 0x2d2   : > { %v3541_v14 = vpack.c.bf16 %v3460_v11, %v3460_v11  ;;  %v3215_v15 = vmax.f32 %v3213_v12, %v3214_v7 }
 0x2d4   : > { %3623 = vst.msk [vmem:[%s4999_s30 + $0x108] sm:$0xf] %vm3556_vm3, %v3541_v14  ;;  %v3217_v16 = vmax.f32 %v3215_v15, %v3216_v13  ;;  %v2506_v17 = vpop.f32.mrf.mxu2 }
 0x2d5   : > { %v2711_v19 = vpop.f32.mrf.mxu3  ;;  %v3221_v27 = vsel %vm2741_vm2, %v2506_v17, -inf }
 0x2d6   : > { %v3380_v20 = vadd.f32 %v5597_v21, %v3217_v16  ;;  %v2303_v22 = vpop.f32.mrf.mxu1  ;;  %v3230_v42 = vsel %vm2741_vm2, %v2711_v19, -inf }
 0x2d7   : > { %v3219_v23 = vsel %vm2741_vm2, %v2303_v22, -inf  ;;  %v2103_v24 = vpop.f32.mrf.mxu0 }
 0x2d8   : > { %v3461_v25 = vmax.f32 %v3380_v20, 0.0  ;;  %v3220_v26 = vmax.f32 %v3218_v18, %v3219_v23  ;;  %v3225_v33 = vsel %vm2741_vm2, %v2103_v24, -inf }
 0x2da   : > { %v3542_v28 = vpack.c.bf16 %v3461_v25, %v3461_v25  ;;  %v3222_v29 = vmax.f32 %v3220_v26, %v3221_v27 }
 0x2dc   : > { %3624 = vst.msk [vmem:[%s4999_s30 + $0x10c] sm:$0xf] %vm3556_vm3, %v3542_v28  ;;  %v3224_v31 = vmax.f32 %v3222_v29, %v3223_v30  ;;  %v2508_v32 = vpop.f32.mrf.mxu2 }
 0x2dd   : > { %v2713_v34 = vpop.f32.mrf.mxu3  ;;  %v3228_v41 = vsel %vm2741_vm2, %v2508_v32, -inf }
 0x2de   : > { %v3381_v35 = vadd.f32 %v5597_v21, %v3224_v31  ;;  %v2306_v36 = vpop.f32.mrf.mxu1  ;;  %v3237_v60 = vsel %vm2741_vm2, %v2713_v34, -inf }
 0x2df   : > { %v3226_v37 = vsel %vm2741_vm2, %v2306_v36, -inf  ;;  %v2106_v38 = vpop.f32.mrf.mxu0 }
 0x2e0   : > { %v3462_v39 = vmax.f32 %v3381_v35, 0.0  ;;  %v3227_v40 = vmax.f32 %v3225_v33, %v3226_v37  ;;  %v3232_v48 = vsel %vm2741_vm2, %v2106_v38, -inf }
 0x2e2   : > { %v3543_v43 = vpack.c.bf16 %v3462_v39, %v3462_v39  ;;  %v3229_v45 = vmax.f32 %v3227_v40, %v3228_v41 }
 0x2e4   : > { %3625 = vst.msk [vmem:[%s4999_s30 + $0x110] sm:$0xf] %vm3556_vm3, %v3543_v43  ;;  %v3231_v46 = vmax.f32 %v3229_v45, %v3230_v42  ;;  %v2511_v47 = vpop.f32.mrf.mxu2 }
 0x2e5   : > { %v2716_v49 = vpop.f32.mrf.mxu3  ;;  %v3235_v57 = vsel %vm2741_vm2, %v2511_v47, -inf }
 0x2e6   : > { %v3382_v50 = vadd.f32 %v5597_v21, %v3231_v46  ;;  %v2308_v51 = vpop.f32.mrf.mxu1  ;;  %v3244_v9 = vsel %vm2741_vm2, %v2716_v49, -inf }
 0x2e7   : > { %v3233_v52 = vsel %vm2741_vm2, %v2308_v51, -inf  ;;  %v2108_v53 = vpop.f32.mrf.mxu0 }
 0x2e8   : > { %v3463_v54 = vmax.f32 %v3382_v50, 0.0  ;;  %v3234_v55 = vmax.f32 %v3232_v48, %v3233_v52  ;;  %v3239_v63 = vsel %vm2741_vm2, %v2108_v53, -inf }
 0x2ea   : > { %v3544_v58 = vpack.c.bf16 %v3463_v54, %v3463_v54  ;;  %v3236_v59 = vmax.f32 %v3234_v55, %v3235_v57 }
 0x2ec   : > { %3626 = vst.msk [vmem:[%s4999_s30 + $0x114] sm:$0xf] %vm3556_vm3, %v3544_v58  ;;  %v3238_v61 = vmax.f32 %v3236_v59, %v3237_v60  ;;  %v2513_v62 = vpop.f32.mrf.mxu2 }
 0x2ed   : > { %v2718_v0 = vpop.f32.mrf.mxu3  ;;  %v3242_v8 = vsel %vm2741_vm2, %v2513_v62, -inf }
 0x2ee   : > { %v3383_v1 = vadd.f32 %v5597_v21, %v3238_v61  ;;  %v2311_v2 = vpop.f32.mrf.mxu1  ;;  %v3251_v25 = vsel %vm2741_vm2, %v2718_v0, -inf }
 0x2ef   : > { %v3240_v3 = vsel %vm2741_vm2, %v2311_v2, -inf  ;;  %v2111_v4 = vpop.f32.mrf.mxu0 }
 0x2f0   : > { %v3464_v5 = vmax.f32 %v3383_v1, 0.0  ;;  %v3241_v6 = vmax.f32 %v3239_v63, %v3240_v3  ;;  %v3246_v13 = vsel %vm2741_vm2, %v2111_v4, -inf }
 0x2f2   : > { %v3545_v10 = vpack.c.bf16 %v3464_v5, %v3464_v5  ;;  %v3243_v11 = vmax.f32 %v3241_v6, %v3242_v8 }
 0x2f4   : > { %3627 = vst.msk [vmem:[%s4999_s30 + $0x118] sm:$0xf] %vm3556_vm3, %v3545_v10  ;;  %v3245_v12 = vmax.f32 %v3243_v11, %v3244_v9  ;;  %v2516_v7 = vpop.f32.mrf.mxu2 }
 0x2f5   : > { %v2721_v14 = vpop.f32.mrf.mxu3  ;;  %v3249_v22 = vsel %vm2741_vm2, %v2516_v7, -inf }
 0x2f6   : > { %v3384_v15 = vadd.f32 %v5597_v21, %v3245_v12  ;;  %v2313_v16 = vpop.f32.mrf.mxu1  ;;  %v3258_v37 = vsel %vm2741_vm2, %v2721_v14, -inf }
 0x2f7   : > { %v3247_v17 = vsel %vm2741_vm2, %v2313_v16, -inf  ;;  %v2113_v18 = vpop.f32.mrf.mxu0 }
 0x2f8   : > { %v3465_v19 = vmax.f32 %v3384_v15, 0.0  ;;  %v3248_v20 = vmax.f32 %v3246_v13, %v3247_v17  ;;  %v3253_v28 = vsel %vm2741_vm2, %v2113_v18, -inf }
 0x2fa   : > { %v3546_v23 = vpack.c.bf16 %v3465_v19, %v3465_v19  ;;  %v3250_v24 = vmax.f32 %v3248_v20, %v3249_v22 }
 0x2fc   : > { %3628 = vst.msk [vmem:[%s4999_s30 + $0x11c] sm:$0xf] %vm3556_vm3, %v3546_v23  ;;  %v3252_v26 = vmax.f32 %v3250_v24, %v3251_v25  ;;  %v2518_v27 = vpop.f32.mrf.mxu2 }
 0x2fd   : > { %v2723_v29 = vpop.f32.mrf.mxu3  ;;  %v3256_v36 = vsel %vm2741_vm2, %v2518_v27, -inf }
 0x2fe   : > { %v3385_v30 = vadd.f32 %v5597_v21, %v3252_v26  ;;  %v2316_v31 = vpop.f32.mrf.mxu1  ;;  %v3265_v54 = vsel %vm2741_vm2, %v2723_v29, -inf }
 0x2ff   : > { %v3254_v32 = vsel %vm2741_vm2, %v2316_v31, -inf  ;;  %v2116_v33 = vpop.f32.mrf.mxu0 }
 0x300   : > { %v3466_v34 = vmax.f32 %v3385_v30, 0.0  ;;  %v3255_v35 = vmax.f32 %v3253_v28, %v3254_v32  ;;  %v3260_v42 = vsel %vm2741_vm2, %v2116_v33, -inf }
 0x302   : > { %v3547_v38 = vpack.c.bf16 %v3466_v34, %v3466_v34  ;;  %v3257_v39 = vmax.f32 %v3255_v35, %v3256_v36 }
 0x304   : > { %3629 = vst.msk [vmem:[%s4999_s30 + $0x120] sm:$0xf] %vm3556_vm3, %v3547_v38  ;;  %v3259_v40 = vmax.f32 %v3257_v39, %v3258_v37  ;;  %v2521_v41 = vpop.f32.mrf.mxu2 }
 0x305   : > { %v2726_v46 = vpop.f32.mrf.mxu3  ;;  %v3263_v51 = vsel %vm2741_vm2, %v2521_v41, -inf }
 0x306   : > { %v3386_v43 = vadd.f32 %v5597_v21, %v3259_v40  ;;  %v2318_v45 = vpop.f32.mrf.mxu1  ;;  %v3272_v3 = vsel %vm2741_vm2, %v2726_v46, -inf }
 0x307   : > { %v3261_v47 = vsel %vm2741_vm2, %v2318_v45, -inf  ;;  %v2118_v48 = vpop.f32.mrf.mxu0 }
 0x308   : > { %v3467_v49 = vmax.f32 %v3386_v43, 0.0  ;;  %v3262_v50 = vmax.f32 %v3260_v42, %v3261_v47  ;;  %v3267_v58 = vsel %vm2741_vm2, %v2118_v48, -inf }
 0x30a   : > { %v3548_v52 = vpack.c.bf16 %v3467_v49, %v3467_v49  ;;  %v3264_v53 = vmax.f32 %v3262_v50, %v3263_v51 }
 0x30c   : > { %3630 = vst.msk [vmem:[%s4999_s30 + $0x124] sm:$0xf] %vm3556_vm3, %v3548_v52  ;;  %v3266_v55 = vmax.f32 %v3264_v53, %v3265_v54  ;;  %v2523_v57 = vpop.f32.mrf.mxu2 }
 0x30d   : > { %v2728_v1 = vpop.f32.mrf.mxu3  ;;  %v3270_v2 = vsel %vm2741_vm2, %v2523_v57, -inf }
 0x30e   : > { %v3387_v59 = vadd.f32 %v5597_v21, %v3266_v55  ;;  %v2321_v60 = vpop.f32.mrf.mxu1  ;;  %v3279_v19 = vsel %vm2741_vm2, %v2728_v1, -inf }
 0x30f   : > { %v3268_v61 = vsel %vm2741_vm2, %v2321_v60, -inf  ;;  %v2121_v62 = vpop.f32.mrf.mxu0 }
 0x310   : > { %v3468_v63 = vmax.f32 %v3387_v59, 0.0  ;;  %v3269_v0 = vmax.f32 %v3267_v58, %v3268_v61  ;;  %v3274_v9 = vsel %vm2741_vm2, %v2121_v62, -inf }
 0x312   : > { %v3549_v4 = vpack.c.bf16 %v3468_v63, %v3468_v63  ;;  %v3271_v5 = vmax.f32 %v3269_v0, %v3270_v2 }
 0x314   : > { %3631 = vst.msk [vmem:[%s4999_s30 + $0x128] sm:$0xf] %vm3556_vm3, %v3549_v4  ;;  %v3273_v6 = vmax.f32 %v3271_v5, %v3272_v3  ;;  %v2526_v8 = vpop.f32.mrf.mxu2  ;;  %v3302_v3 = vsel %vm2741_vm2, %v4964_v44, -inf }
 0x315   : > { %v3277_v15 = vsel %vm2741_vm2, %v2526_v8, -inf  ;;  %v2731_v18 = vpop.f32.mrf.mxu3 }
 0x316   : > { %v3388_v10 = vadd.f32 %v5597_v21, %v3273_v6  ;;  %v2323_v11 = vpop.f32.mrf.mxu1  ;;  %v3286_v31 = vsel %vm2741_vm2, %v2731_v18, -inf }
 0x317   : > { %v3275_v12 = vsel %vm2741_vm2, %v2323_v11, -inf  ;;  %v2123_v7 = vpop.f32.mrf.mxu0 }
 0x318   : > { %v3469_v13 = vmax.f32 %v3388_v10, 0.0  ;;  %v3276_v14 = vmax.f32 %v3274_v9, %v3275_v12  ;;  %v3281_v23 = vsel %vm2741_vm2, %v2123_v7, -inf }
 0x31a   : > { %v3550_v16 = vpack.c.bf16 %v3469_v13, %v3469_v13  ;;  %v3278_v17 = vmax.f32 %v3276_v14, %v3277_v15 }
 0x31c   : > { %3632 = vst.msk [vmem:[%s4999_s30 + $0x12c] sm:$0xf] %vm3556_vm3, %v3550_v16  ;;  %v3280_v20 = vmax.f32 %v3278_v17, %v3279_v19  ;;  %v2528_v22 = vpop.f32.mrf.mxu2 }
 0x31d   : > { %v3284_v30 = vsel %vm2741_vm2, %v2528_v22, -inf  ;;  %v2733_v36 = vpop.f32.mrf.mxu3 }
 0x31e   : > { %v3389_v24 = vadd.f32 %v5597_v21, %v3280_v20  ;;  %v2326_v25 = vpop.f32.mrf.mxu1  ;;  %v3293_v48 = vsel %vm2741_vm2, %v2733_v36, -inf }
 0x31f   : > { %v3282_v26 = vsel %vm2741_vm2, %v2326_v25, -inf  ;;  %v2126_v29 = vpop.f32.mrf.mxu0 }
 0x320   : > { %v3470_v27 = vmax.f32 %v3389_v24, 0.0  ;;  %v3283_v28 = vmax.f32 %v3281_v23, %v3282_v26  ;;  %v3288_v37 = vsel %vm2741_vm2, %v2126_v29, -inf }
 0x322   : > { %v3551_v32 = vpack.c.bf16 %v3470_v27, %v3470_v27  ;;  %v3285_v33 = vmax.f32 %v3283_v28, %v3284_v30 }
 0x324   : > { %3633 = vst.msk [vmem:[%s4999_s30 + $0x130] sm:$0xf] %vm3556_vm3, %v3551_v32  ;;  %v3287_v34 = vmax.f32 %v3285_v33, %v3286_v31  ;;  %v2531_v35 = vpop.f32.mrf.mxu2 }
 0x325   : > { %v3291_v43 = vsel %vm2741_vm2, %v2531_v35, -inf  ;;  %v2736_v53 = vpop.f32.mrf.mxu3 }
 0x326   : > { %v3390_v38 = vadd.f32 %v5597_v21, %v3287_v34  ;;  %v2328_v39 = vpop.f32.mrf.mxu1  ;;  %v3300_v60 = vsel %vm2741_vm2, %v2736_v53, -inf }
 0x327   : > { %v3289_v40 = vsel %vm2741_vm2, %v2328_v39, -inf  ;;  %v2128_v47 = vpop.f32.mrf.mxu0 }
 0x328   : > { %v3471_v41 = vmax.f32 %v3390_v38, 0.0  ;;  %v3290_v42 = vmax.f32 %v3288_v37, %v3289_v40  ;;  %v3295_v51 = vsel %vm2741_vm2, %v2128_v47, -inf }
 0x32a   : > { %v3552_v45 = vpack.c.bf16 %v3471_v41, %v3471_v41  ;;  %v3292_v46 = vmax.f32 %v3290_v42, %v3291_v43 }
 0x32c   : > { %3634 = vst.msk [vmem:[%s4999_s30 + $0x134] sm:$0xf] %vm3556_vm3, %v3552_v45  ;;  %v3294_v49 = vmax.f32 %v3292_v46, %v3293_v48  ;;  %v2533_v50 = vpop.f32.mrf.mxu2 }
 0x32d   : > { %v3298_v59 = vsel %vm2741_vm2, %v2533_v50, -inf  ;;  %v2738_v6 = vpop.f32.mrf.mxu3 }
 0x32e   : > { %v3391_v52 = vadd.f32 %v5597_v21, %v3294_v49  ;;  %v2331_v54 = vpop.f32.mrf.mxu1  ;;  %v3307_v12 = vsel %vm2741_vm2, %v2738_v6, -inf }
 0x32f   : > { %v3296_v55 = vsel %vm2741_vm2, %v2331_v54, -inf }
 0x330   : > { %v3472_v57 = vmax.f32 %v3391_v52, 0.0  ;;  %v3297_v58 = vmax.f32 %v3295_v51, %v3296_v55 }
 0x332   : > { %v3553_v61 = vpack.c.bf16 %v3472_v57, %v3472_v57  ;;  %v3299_v62 = vmax.f32 %v3297_v58, %v3298_v59 }
 0x334   : > { %3635 = vst.msk [vmem:[%s4999_s30 + $0x138] sm:$0xf] %vm3556_vm3, %v3553_v61  ;;  %v3301_v63 = vmax.f32 %v3299_v62, %v3300_v60  ;;  %v2536_v0 = vpop.f32.mrf.mxu2 }
 0x335   : > { %v3305_v9 = vsel %vm2741_vm2, %v2536_v0, -inf }
 0x336   : > { %v3392_v1 = vadd.f32 %v5597_v21, %v3301_v63  ;;  %v2333_v2 = vpop.f32.mrf.mxu1 }
 0x337   : > { %v3303_v4 = vsel %vm2741_vm2, %v2333_v2, -inf }
 0x338   : > { %v3473_v5 = vmax.f32 %v3392_v1, 0.0  ;;  %v3304_v8 = vmax.f32 %v3302_v3, %v3303_v4 }
 0x33a   : > { %v3554_v10 = vpack.c.bf16 %v3473_v5, %v3473_v5  ;;  %v3306_v11 = vmax.f32 %v3304_v8, %v3305_v9 }
 0x33c   : > { %3636 = vst.msk [vmem:[%s4999_s30 + $0x13c] sm:$0xf] %vm3556_vm3, %v3554_v10  ;;  %v3308_v7 = vmax.f32 %v3306_v11, %v3307_v12  ;;  %v2538_v13 = vpop.f32.mrf.mxu2 }
 0x33d   : > { %v2747_v14 = vsel %vm2741_vm2, %v2538_v13, -inf }
 0x33e   : > { %v3393_v44 = vadd.f32 %v5597_v21, %v3308_v7  ;;  %v2748_v15 = vmax.f32 %v4975_v56, %v2747_v14 }
 0x340   : > { %v3474_v16 = vmax.f32 %v3393_v44, 0.0  ;;  %v3313_v17 = vadd.f32 %v5597_v21, %v2748_v15 }
 0x342   : > { %v3555_v18 = vpack.c.bf16 %v3474_v16, %v3474_v16  ;;  %v3394_v19 = vmax.f32 %v3313_v17, 0.0 }
 0x344   : > { %3637 = vst.msk [vmem:[%s4999_s30 + $0x140] sm:$0xf] %vm3556_vm3, %v3555_v18  ;;  %v3475_v20 = vpack.c.bf16 %v3394_v19, %v3394_v19 }
 0x346   : > { %3557 = vst.msk [vmem:[%s4999_s30] sm:$0xf] %vm3556_vm3, %v3475_v20 }
 0x347 PF: > { %s13_s14 = sadd.s32 1, %s4831_s14   ;;  %s5823_s12 = smov %s4827_s13 }
 0x348   : > { %p10_p5 = scmp.ge.s32.totalorder %s13_s14, 4   ;;  %s5824_s13 = smov %s5826_s15 }
 0x34a   :  { %12 = sbr.rel (!%p10_p5) target bundleno = 2 (0x2), region = 68 }

// kernel: dqn_forward.5
= control target key start
LH: loop header
LB: loop body
LE: loop exit
PB: predicated region body
PF: predicated region fallthrough
CT: control target
= control target key end

     0   :  { %s4370_s12 = smov 0   ;;  %s4372_s13 = smov 0   ;;  %s5467_s0 = inlined_call_operand.vmem [shape: bf16[2,4,104,800], index: 0, kind: input, shape index: {}]   ;;  %s5468_s1 = inlined_call_operand.vmem [shape: bf16[2,800,64], index: 1, kind: input, shape index: {}]   ;;  %s5469_s2 = inlined_call_operand.vmem [shape: f32[2,1,64], index: 2, kind: input, shape index: {}]   ;;  %s5470_s3 = inlined_call_operand.vmem [shape: bf16[2,104,64], index: 3, kind: output, shape index: {}]  }
   0x1   :  { %s4374_s14 = smov 0  }
   0x2 LB: > { %s25_s15 = sadd.s32 1, %s4344_s13  ;;  %p3082_p0 = scmp.ge.s32.totalorder %s4348_s14, 1  ;;  %s4348_s14 = sphi %s4374_s14, %s13_s14   ;;  %s4344_s13 = sphi %s4372_s13, %s5511_s13   ;;  %s4340_s12 = sphi %s4370_s12, %s5510_s12  }
   0x3   : > { %p27_p1 = scmp.ge.s32.totalorder %s25_s15, 2  ;;  %p177_p2 = scmp.lt.s32.totalorder %s4348_s14, 3 }
   0x5   : > { %s5513_s15 = smov (%p27_p1, %s25_s15), 0  ;;  %p178_p3 = pnand %p3082_p0, %p177_p2 }
   0x7   : > { %181 = sbr.rel (%p178_p3) target bundleno = 924 (0x39c), region = 32 }
   0xc   : > { %p219_p4 = scmp.lt.s32.totalorder %s4340_s12, 1  ;;  %vm1766_vm0 = vcmask 261120   ;;  %vm2818_vm1 = vcmask 523264   ;;  %vm2953_vm2 = vcmask 519168  }
   0xe   : > { %s5515_s12 = smov (!%p219_p4, %s4340_s12), 1 }
   0xf   : > { %s4299_s16 = smul.u32 400, %s5515_s12  ;;  %s236_s26 = scalar_lea.vmem %s5469_s2, %s5515_s12 }
  0x10   : > { %s4298_s20 = smul.u32 1456, %s5515_s12 }
  0x11   : > { %s4394_s19 = scalar_lea.vmem %s5468_s1, %s4299_s16  ;;  %s4300_s29 = smul.u32 52, %s5515_s12 }
  0x12   : > { %v4231_v0 = vld [vmem:[%s4394_s19 + $0x38] sm:$0xff]  ;;  %v4230_v3 = vld [vmem:[%s4394_s19 + $0x30] sm:$0xff]  ;;  %v4229_v6 = vld [vmem:[%s4394_s19 + $0x28] sm:$0xff]  ;;  %s4452_s23 = scalar_lea.vmem %s5467_s0, %s4298_s20 }
  0x13   : > { %v4398_v1 = vld [vmem:[%s4394_s19 + $0x78] sm:$0xff]  ;;  %1845 = vmatpush.bf16.msra.mxu0 %v4231_v0  ;;  %4274 = vmatpush.bf16.msra.mxu3 %v4231_v0  ;;  %v4407_v4 = vld [vmem:[%s4394_s19 + $0x70] sm:$0xff]  ;;  %v4416_v7 = vld [vmem:[%s4394_s19 + $0x68] sm:$0xff]  ;;  %s5384_s5 = scalar_lea.vmem %s5470_s3, %s4300_s29 }
  0x14   : > { %v4401_v2 = vld [vmem:[%s4394_s19 + $0xb8] sm:$0xff]  ;;  %1984 = vmatpush.bf16.msra.mxu1 %v4398_v1  ;;  %v4410_v5 = vld [vmem:[%s4394_s19 + $0xb0] sm:$0xff]  ;;  %v4419_v8 = vld [vmem:[%s4394_s19 + $0xa8] sm:$0xff] }
  0x15   : > { %2123 = vmatpush.bf16.msra.mxu2 %v4401_v2  ;;  %v4228_v9 = vld [vmem:[%s4394_s19 + $0x20] sm:$0xff]  ;;  %v4227_v12 = vld [vmem:[%s4394_s19 + $0x18] sm:$0xff]  ;;  %v4226_v15 = vld [vmem:[%s4394_s19 + $0x10] sm:$0xff] }
  0x16   : > { %v4425_v10 = vld [vmem:[%s4394_s19 + $0x60] sm:$0xff]  ;;  %v4434_v13 = vld [vmem:[%s4394_s19 + $0x58] sm:$0xff]  ;;  %v4444_v16 = vld [vmem:[%s4394_s19 + $0x50] sm:$0xff] }
  0x17   : > { %1846 = vmatpush.bf16.msra.mxu0 %v4230_v3  ;;  %4275 = vmatpush.bf16.msra.mxu3 %v4230_v3  ;;  %v4428_v11 = vld [vmem:[%s4394_s19 + $0xa0] sm:$0xff]  ;;  %v4437_v14 = vld [vmem:[%s4394_s19 + $0x98] sm:$0xff]  ;;  %v4447_v17 = vld [vmem:[%s4394_s19 + $0x90] sm:$0xff] }
  0x18   : > { %1985 = vmatpush.bf16.msra.mxu1 %v4407_v4  ;;  %v4225_v18 = vld [vmem:[%s4394_s19 + $0x8] sm:$0xff]  ;;  %v3088_v21 = vld [vmem:[%s4452_s23] sm:$0xf]  ;;  %v4045_v22 = vld [vmem:[%s4452_s23 + $0x18] sm:$0xf0] }
  0x19   : > { %2124 = vmatpush.bf16.msra.mxu2 %v4410_v5  ;;  %v4458_v19 = vld [vmem:[%s4394_s19 + $0x48] sm:$0xff]  ;;  %v4224_v23 = vld [vmem:[%s4394_s19] sm:$0xff]  ;;  %v4185_v27 = vld [vmem:[%s4452_s23 + $0x478] sm:$0xf0]  ;;  %v3089_v34 = vor.u32 %v4045_v22, %v3088_v21 }
  0x1a   : > { %v4461_v20 = vld [vmem:[%s4394_s19 + $0x88] sm:$0xff]  ;;  %v4467_v24 = vld [vmem:[%s4394_s19 + $0x40] sm:$0xff]  ;;  %v4263_v33 = vld [vmem:[%s4394_s19 + $0x138] sm:$0xff] }
  0x1b   : > { %1847 = vmatpush.bf16.msra.mxu0 %v4229_v6  ;;  %4276 = vmatpush.bf16.msra.mxu3 %v4229_v6  ;;  %v3648_v25 = vld [vmem:[%s4452_s23 + $0x460] sm:$0xf]  ;;  %v4042_v28 = vld [vmem:[%s4452_s23 + $0x4] sm:$0xf]  ;;  %v3096_v30 = vld [vmem:[%s4452_s23 + $0x8] sm:$0xf] }
  0x1c   : > { %1986 = vmatpush.bf16.msra.mxu1 %v4416_v7  ;;  %v4471_v26 = vld [vmem:[%s4394_s19 + $0x80] sm:$0xff]  ;;  %v4273_v32 = vld [vmem:[%s4394_s19 + $0x188] sm:$0xff]  ;;  %v3649_v35 = vor.u32 %v4185_v27, %v3648_v25  ;;  %v4271_v38 = vld [vmem:[%s4394_s19 + $0x178] sm:$0xff] }
  0x1d   : > { %2125 = vmatpush.bf16.msra.mxu2 %v4419_v8  ;;  %v3090_v29 = vld [vmem:[%s4452_s23 + $0x1c] sm:$0xf0]  ;;  %v4046_v31 = vld [vmem:[%s4452_s23 + $0x20] sm:$0xf0]  ;;  %v4262_v39 = vld [vmem:[%s4394_s19 + $0x130] sm:$0xff] }
  0x1e   : > { %v3093_v36 = vor.u32 %v4042_v28, %v3090_v29  ;;  %v3097_v37 = vor.u32 %v4046_v31, %v3096_v30  ;;  %v4270_v40 = vld [vmem:[%s4394_s19 + $0x170] sm:$0xff]  ;;  %v3116_v41 = vld [vmem:[%s4452_s23 + $0x38] sm:$0xf]  ;;  %v4049_v45 = vld [vmem:[%s4452_s23 + $0x3c] sm:$0xf] }
  0x1f   : > { %1848 = vmatpush.bf16.msra.mxu0 %v4228_v9  ;;  %4277 = vmatpush.bf16.msra.mxu3 %v4228_v9  ;;  %v4052_v42 = vld [vmem:[%s4452_s23 + $0x50] sm:$0xf0]  ;;  %v3676_v43 = vld [vmem:[%s4452_s23 + $0x498] sm:$0xf]  ;;  %v3124_v47 = vld [vmem:[%s4452_s23 + $0x40] sm:$0xf] }
  0x20   : > { %1987 = vmatpush.bf16.msra.mxu1 %v4425_v10  ;;  %v4192_v44 = vld [vmem:[%s4452_s23 + $0x4b0] sm:$0xf0]  ;;  %v3118_v46 = vld [vmem:[%s4452_s23 + $0x54] sm:$0xf0]  ;;  %v4053_v48 = vld [vmem:[%s4452_s23 + $0x58] sm:$0xf0]  ;;  %v3117_v49 = vor.u32 %v4052_v42, %v3116_v41 }
  0x21   : > { %2126 = vmatpush.bf16.msra.mxu2 %v4428_v11  ;;  %v3677_v50 = vor.u32 %v4192_v44, %v3676_v43  ;;  %v3121_v51 = vor.u32 %v4049_v45, %v3118_v46  ;;  %v3125_v52 = vor.u32 %v4053_v48, %v3124_v47  ;;  %v3144_v53 = vld [vmem:[%s4452_s23 + $0x70] sm:$0xf]  ;;  %v4059_v54 = vld [vmem:[%s4452_s23 + $0x88] sm:$0xf0]  ;;  %v4056_v57 = vld [vmem:[%s4452_s23 + $0x74] sm:$0xf] }
  0x22   : > { %v3704_v55 = vld [vmem:[%s4452_s23 + $0x4d0] sm:$0xf]  ;;  %v4199_v56 = vld [vmem:[%s4452_s23 + $0x4e8] sm:$0xf0]  ;;  %v3152_v59 = vld [vmem:[%s4452_s23 + $0x78] sm:$0xf]  ;;  %v3145_v61 = vor.u32 %v4059_v54, %v3144_v53 }
  0x23   : > { %1849 = vmatpush.bf16.msra.mxu0 %v4227_v12  ;;  %4278 = vmatpush.bf16.msra.mxu3 %v4227_v12  ;;  %v3146_v58 = vld [vmem:[%s4452_s23 + $0x8c] sm:$0xf0]  ;;  %v4060_v60 = vld [vmem:[%s4452_s23 + $0x90] sm:$0xf0]  ;;  %v3705_v62 = vor.u32 %v4199_v56, %v3704_v55  ;;  %v4066_v3 = vld [vmem:[%s4452_s23 + $0xc0] sm:$0xf0] }
  0x24   : > { %1988 = vmatpush.bf16.msra.mxu1 %v4434_v13  ;;  %v3149_v63 = vor.u32 %v4056_v57, %v3146_v58  ;;  %v3153_v0 = vor.u32 %v4060_v60, %v3152_v59  ;;  %v4206_v6 = vld [vmem:[%s4452_s23 + $0x520] sm:$0xf0]  ;;  %v3174_v9 = vld [vmem:[%s4452_s23 + $0xc4] sm:$0xf0]  ;;  %v4067_v12 = vld [vmem:[%s4452_s23 + $0xc8] sm:$0xf0] }
  0x25   : > { %2127 = vmatpush.bf16.msra.mxu2 %v4437_v14  ;;  %v4070_v21 = vld [vmem:[%s4452_s23 + $0xe4] sm:$0xf]  ;;  %v3202_v22 = vld [vmem:[%s4452_s23 + $0xfc] sm:$0xf0]  ;;  %v3228_v28 = vld [vmem:[%s4452_s23 + $0x118] sm:$0xf] }
  0x26   : > { %v3205_v27 = vor.u32 %v4070_v21, %v3202_v22  ;;  %v4080_v29 = vld [vmem:[%s4452_s23 + $0x130] sm:$0xf0]  ;;  %v3788_v30 = vld [vmem:[%s4452_s23 + $0x578] sm:$0xf]  ;;  %v3256_v41 = vld [vmem:[%s4452_s23 + $0x150] sm:$0xf] }
  0x27   : > { %1850 = vmatpush.bf16.msra.mxu0 %v4226_v15  ;;  %4279 = vmatpush.bf16.msra.mxu3 %v4226_v15  ;;  %v4261_v15 = vld [vmem:[%s4394_s19 + $0x128] sm:$0xff]  ;;  %v4220_v31 = vld [vmem:[%s4452_s23 + $0x590] sm:$0xf0]  ;;  %v4182_v44 = vld [vmem:[%s4452_s23 + $0x464] sm:$0xf] }
  0x28   : > { %1989 = vmatpush.bf16.msra.mxu1 %v4444_v16  ;;  %v4087_v42 = vld [vmem:[%s4452_s23 + $0x168] sm:$0xf0]  ;;  %v4084_v43 = vld [vmem:[%s4452_s23 + $0x154] sm:$0xf]  ;;  %v3650_v45 = vld [vmem:[%s4452_s23 + $0x47c] sm:$0xf0] }
  0x29   : > { %2128 = vmatpush.bf16.msra.mxu2 %v4447_v17  ;;  %v3258_v46 = vld [vmem:[%s4452_s23 + $0x16c] sm:$0xf0]  ;;  %v3264_v47 = vld [vmem:[%s4452_s23 + $0x158] sm:$0xf]  ;;  %v4088_v48 = vld [vmem:[%s4452_s23 + $0x170] sm:$0xf0] }
  0x2a   : > { %v3284_v53 = vld [vmem:[%s4452_s23 + $0x188] sm:$0xf]  ;;  %v4094_v54 = vld [vmem:[%s4452_s23 + $0x1a0] sm:$0xf0]  ;;  %v4091_v55 = vld [vmem:[%s4452_s23 + $0x18c] sm:$0xf] }
  0x2b   : > { %1851 = vmatpush.bf16.msra.mxu0 %v4225_v18  ;;  %4280 = vmatpush.bf16.msra.mxu3 %v4225_v18  ;;  %v4073_v18 = vld [vmem:[%s4452_s23 + $0xf8] sm:$0xf0]  ;;  %v3678_v57 = vld [vmem:[%s4452_s23 + $0x4b4] sm:$0xf0]  ;;  %v3286_v58 = vld [vmem:[%s4452_s23 + $0x1a4] sm:$0xf0] }
  0x2c   : > { %1990 = vmatpush.bf16.msra.mxu1 %v4458_v19  ;;  %v4189_v56 = vld [vmem:[%s4452_s23 + $0x49c] sm:$0xf]  ;;  %v3292_v59 = vld [vmem:[%s4452_s23 + $0x190] sm:$0xf]  ;;  %v4095_v60 = vld [vmem:[%s4452_s23 + $0x1a8] sm:$0xf0] }
  0x2d   : > { %2129 = vmatpush.bf16.msra.mxu2 %v4461_v20 }
  0x2f   : > { %1852 = vmatpush.bf16.msra.mxu0 %v4224_v23  ;;  %4281 = vmatpush.bf16.msra.mxu3 %v4224_v23  ;;  %v3208_v23 = vld [vmem:[%s4452_s23 + $0xe8] sm:$0xf] }
  0x30   : > { %1991 = vmatpush.bf16.msra.mxu1 %v4467_v24 }
  0x31   : > { %2130 = vmatpush.bf16.msra.mxu2 %v4471_v26 }
  0x32   : > { %1853 = vmatmul.bf16.vlgmr.msra.gmra.mxu0 %v3089_v34  ;;  %1953 = vmatmul.bf16.vlgmr.msra.gmra.mxu3 %v3649_v35  ;;  %v3236_v34 = vld [vmem:[%s4452_s23 + $0x120] sm:$0xf]  ;;  %v4081_v35 = vld [vmem:[%s4452_s23 + $0x138] sm:$0xf0] }
  0x33   : > { %2401 = vmatpush.bf16.msrb.mxu0 %v4263_v33  ;;  %1992 = vmatmul.bf16.vlgmr.msra.gmra.mxu1 %v3093_v36  ;;  %v3230_v33 = vld [vmem:[%s4452_s23 + $0x134] sm:$0xf0]  ;;  %v3789_v36 = vor.u32 %v4220_v31, %v3788_v30  ;;  %v3734_v30 = vld [vmem:[%s4452_s23 + $0x524] sm:$0xf0] }
  0x34   : > { %2131 = vmatmul.bf16.vlgmr.msra.gmra.mxu2 %v3097_v37  ;;  %2540 = vmatpush.bf16.msrb.mxu1 %v4271_v38  ;;  %v3237_v38 = vor.u32 %v4081_v35, %v3236_v34  ;;  %v3342_v31 = vld [vmem:[%s4452_s23 + $0x214] sm:$0xf0] }
  0x35   : > { %2685 = vmatpush.bf16.msrb.mxu2 %v4273_v32  ;;  %4282 = vmatpush.bf16.msrb.mxu3 %v4398_v1  ;;  %v3172_v1 = vld [vmem:[%s4452_s23 + $0xa8] sm:$0xf]  ;;  %v4077_v32 = vld [vmem:[%s4452_s23 + $0x11c] sm:$0xf] }
  0x36   : > { %v3233_v37 = vor.u32 %v4077_v32, %v3230_v33  ;;  %v3348_v32 = vld [vmem:[%s4452_s23 + $0x200] sm:$0xf]  ;;  %v4109_v33 = vld [vmem:[%s4452_s23 + $0x218] sm:$0xf0] }
  0x37   : > { %2402 = vmatpush.bf16.msrb.mxu0 %v4262_v39  ;;  %v4260_v39 = vld [vmem:[%s4394_s19 + $0x120] sm:$0xff] }
  0x38   : > { %2541 = vmatpush.bf16.msrb.mxu1 %v4270_v40  ;;  %v4268_v40 = vld [vmem:[%s4394_s19 + $0x160] sm:$0xff] }
  0x39   : > { %4283 = vmatpush.bf16.msrb.mxu3 %v4407_v4  ;;  %v3732_v4 = vld [vmem:[%s4452_s23 + $0x508] sm:$0xf] }
  0x3b   : > { %2403 = vmatpush.bf16.msrb.mxu0 %v4261_v15 }
  0x3d   : > { %4284 = vmatpush.bf16.msrb.mxu3 %v4416_v7  ;;  %v4063_v7 = vld [vmem:[%s4452_s23 + $0xac] sm:$0xf] }
  0x3f   : > { %2404 = vmatpush.bf16.msrb.mxu0 %v4260_v39 }
  0x41   : > { %4285 = vmatpush.bf16.msrb.mxu3 %v4425_v10  ;;  %v3180_v10 = vld [vmem:[%s4452_s23 + $0xb0] sm:$0xf] }
  0x42   : > { %1858 = vmatmul.bf16.gmra.mxu0 %v3117_v49  ;;  %1958 = vmatmul.bf16.gmra.mxu3 %v3677_v50  ;;  %v3257_v49 = vor.u32 %v4087_v42, %v3256_v41  ;;  %v3653_v50 = vor.u32 %v4182_v44, %v3650_v45 }
  0x43   : > { %1997 = vmatmul.bf16.gmra.mxu1 %v3121_v51  ;;  %v3261_v51 = vor.u32 %v4084_v43, %v3258_v46 }
  0x44   : > { %2136 = vmatmul.bf16.gmra.mxu2 %v3125_v52  ;;  %v3265_v52 = vor.u32 %v4088_v48, %v3264_v47 }
  0x45   : > { %4286 = vmatpush.bf16.msrb.mxu3 %v4434_v13  ;;  %v3733_v13 = vor.u32 %v4206_v6, %v3732_v4  ;;  %v4098_v4 = vld [vmem:[%s4452_s23 + $0x1c4] sm:$0xf]  ;;  %v4196_v6 = vld [vmem:[%s4452_s23 + $0x4d4] sm:$0xf] }
  0x49   : > { %4287 = vmatpush.bf16.msrb.mxu3 %v4444_v16  ;;  %v4269_v16 = vld [vmem:[%s4394_s19 + $0x168] sm:$0xff] }
  0x4a   : > { %2542 = vmatpush.bf16.msrb.mxu1 %v4269_v16 }
  0x4d   : > { %4288 = vmatpush.bf16.msrb.mxu3 %v4458_v19  ;;  %v3760_v19 = vld [vmem:[%s4452_s23 + $0x540] sm:$0xf] }
  0x4e   : > { %2543 = vmatpush.bf16.msrb.mxu1 %v4268_v40  ;;  %v3349_v40 = vor.u32 %v4109_v33, %v3348_v32 }
  0x51   : > { %4289 = vmatpush.bf16.msrb.mxu3 %v4467_v24  ;;  %v4074_v24 = vld [vmem:[%s4452_s23 + $0x100] sm:$0xf0] }
  0x52   : > { %1863 = vmatmul.bf16.gmra.mxu0 %v3145_v61  ;;  %1963 = vmatmul.bf16.gmra.mxu3 %v3705_v62  ;;  %v3285_v61 = vor.u32 %v4094_v54, %v3284_v53  ;;  %v3681_v62 = vor.u32 %v4189_v56, %v3678_v57  ;;  %v3762_v53 = vld [vmem:[%s4452_s23 + $0x55c] sm:$0xf0]  ;;  %v3370_v54 = vld [vmem:[%s4452_s23 + $0x24c] sm:$0xf0]  ;;  %v4116_v56 = vld [vmem:[%s4452_s23 + $0x250] sm:$0xf0] }
  0x53   : > { %2002 = vmatmul.bf16.gmra.mxu1 %v3149_v63  ;;  %v3289_v63 = vor.u32 %v4091_v55, %v3286_v58  ;;  %v3376_v55 = vld [vmem:[%s4452_s23 + $0x238] sm:$0xf] }
  0x54   : > { %2141 = vmatmul.bf16.gmra.mxu2 %v3153_v0  ;;  %v3293_v0 = vor.u32 %v4095_v60, %v3292_v59 }
  0x55   : > { %4290 = vmatpush.bf16.msra.mxu3 %v4401_v2  ;;  %v3173_v2 = vor.u32 %v4066_v3, %v3172_v1  ;;  %v3312_v1 = vld [vmem:[%s4452_s23 + $0x1c0] sm:$0xf]  ;;  %v4101_v3 = vld [vmem:[%s4452_s23 + $0x1d8] sm:$0xf0] }
  0x59   : > { %4291 = vmatpush.bf16.msra.mxu3 %v4410_v5  ;;  %v3177_v5 = vor.u32 %v4063_v7, %v3174_v9  ;;  %v3706_v7 = vld [vmem:[%s4452_s23 + $0x4ec] sm:$0xf0]  ;;  %v3314_v9 = vld [vmem:[%s4452_s23 + $0x1dc] sm:$0xf0] }
  0x5d   : > { %4292 = vmatpush.bf16.msra.mxu3 %v4419_v8  ;;  %v3181_v8 = vor.u32 %v4067_v12, %v3180_v10  ;;  %v3320_v10 = vld [vmem:[%s4452_s23 + $0x1c8] sm:$0xf]  ;;  %v4102_v12 = vld [vmem:[%s4452_s23 + $0x1e0] sm:$0xf0] }
  0x5e   : > { %v3321_v15 = vor.u32 %v4102_v12, %v3320_v10 }
  0x61   : > { %4293 = vmatpush.bf16.msra.mxu3 %v4428_v11  ;;  %v3200_v11 = vld [vmem:[%s4452_s23 + $0xe0] sm:$0xf] }
  0x62   : > { %1868 = vmatmul.bf16.gmra.mxu0 %v3173_v2  ;;  %1968 = vmatmul.bf16.gmra.mxu3 %v3733_v13  ;;  %v3201_v25 = vor.u32 %v4073_v18, %v3200_v11  ;;  %v3313_v2 = vor.u32 %v4101_v3, %v3312_v1  ;;  %v3709_v13 = vor.u32 %v4196_v6, %v3706_v7  ;;  %v4272_v18 = vld [vmem:[%s4394_s19 + $0x180] sm:$0xff] }
  0x63   : > { %2007 = vmatmul.bf16.gmra.mxu1 %v3177_v5  ;;  %2686 = vmatpush.bf16.msrb.mxu2 %v4272_v18  ;;  %v3404_v18 = vld [vmem:[%s4452_s23 + $0x270] sm:$0xf] }
  0x64   : > { %2146 = vmatmul.bf16.gmra.mxu2 %v3181_v8  ;;  %v3317_v8 = vor.u32 %v4098_v4, %v3314_v9 }
  0x65   : > { %4294 = vmatpush.bf16.msra.mxu3 %v4437_v14  ;;  %v4213_v14 = vld [vmem:[%s4452_s23 + $0x558] sm:$0xf0] }
  0x69   : > { %4295 = vmatpush.bf16.msra.mxu3 %v4447_v17  ;;  %v3761_v17 = vor.u32 %v4213_v14, %v3760_v19  ;;  %v4259_v19 = vld [vmem:[%s4394_s19 + $0x118] sm:$0xff] }
  0x6a   : > { %2405 = vmatpush.bf16.msrb.mxu0 %v4259_v19  ;;  %v4123_v19 = vld [vmem:[%s4452_s23 + $0x288] sm:$0xf0] }
  0x6d   : > { %4296 = vmatpush.bf16.msra.mxu3 %v4461_v20  ;;  %v3209_v20 = vor.u32 %v4074_v24, %v3208_v23  ;;  %v4267_v24 = vld [vmem:[%s4394_s19 + $0x158] sm:$0xff] }
  0x6e   : > { %2544 = vmatpush.bf16.msrb.mxu1 %v4267_v24 }
  0x71   : > { %4297 = vmatpush.bf16.msra.mxu3 %v4471_v26  ;;  %v3229_v26 = vor.u32 %v4080_v29, %v3228_v28  ;;  %v4105_v28 = vld [vmem:[%s4452_s23 + $0x1fc] sm:$0xf]  ;;  %v4203_v29 = vld [vmem:[%s4452_s23 + $0x50c] sm:$0xf] }
  0x72   : > { %1873 = vmatmul.bf16.gmra.mxu0 %v3201_v25  ;;  %1973 = vmatmul.bf16.gmra.mxu3 %v3761_v17  ;;  %v3345_v39 = vor.u32 %v4105_v28, %v3342_v31  ;;  %v3405_v28 = vor.u32 %v4123_v19, %v3404_v18 }
  0x73   : > { %2012 = vmatmul.bf16.gmra.mxu1 %v3205_v27  ;;  %v3340_v27 = vld [vmem:[%s4452_s23 + $0x1f8] sm:$0xf] }
  0x74   : > { %2151 = vmatmul.bf16.gmra.mxu2 %v3209_v20  ;;  %v4108_v20 = vld [vmem:[%s4452_s23 + $0x210] sm:$0xf0] }
  0x82   : > { %1878 = vmatmul.bf16.gmra.mxu0 %v3229_v26  ;;  %1978 = vmatmul.bf16.gmra.mxu3 %v3789_v36  ;;  %v3341_v26 = vor.u32 %v4108_v20, %v3340_v27  ;;  %v3737_v36 = vor.u32 %v4203_v29, %v3734_v30  ;;  %v4266_v29 = vld [vmem:[%s4394_s19 + $0x150] sm:$0xff] }
  0x83   : > { %2017 = vmatmul.bf16.gmra.mxu1 %v3233_v37 }
  0x84   : > { %2156 = vmatmul.bf16.gmra.mxu2 %v3237_v38  ;;  %2545 = vmatpush.bf16.msrb.mxu1 %v4266_v29 }
  0x92   : > { %1883 = vmatmul.bf16.gmra.mxu0 %v3257_v49  ;;  %2092 = vmatmul.bf16.vlgmr.msrb.gmra.mxu3 %v3653_v50  ;;  %v3368_v49 = vld [vmem:[%s4452_s23 + $0x230] sm:$0xf]  ;;  %v4115_v50 = vld [vmem:[%s4452_s23 + $0x248] sm:$0xf0] }
  0x93   : > { %2022 = vmatmul.bf16.gmra.mxu1 %v3261_v51  ;;  %v4112_v51 = vld [vmem:[%s4452_s23 + $0x234] sm:$0xf]  ;;  %v3369_v59 = vor.u32 %v4115_v50, %v3368_v49  ;;  %v4130_v49 = vld [vmem:[%s4452_s23 + $0x2c0] sm:$0xf0] }
  0x94   : > { %2161 = vmatmul.bf16.gmra.mxu2 %v3265_v52  ;;  %v4210_v52 = vld [vmem:[%s4452_s23 + $0x544] sm:$0xf] }
  0x95   : > { %v3765_v60 = vor.u32 %v4210_v52, %v3762_v53 }
  0xa2   : > { %1888 = vmatmul.bf16.gmra.mxu0 %v3285_v61  ;;  %2097 = vmatmul.bf16.gmra.mxu3 %v3681_v62 }
  0xa3   : > { %2027 = vmatmul.bf16.gmra.mxu1 %v3289_v63  ;;  %v3373_v63 = vor.u32 %v4112_v51, %v3370_v54 }
  0xa4   : > { %2166 = vmatmul.bf16.gmra.mxu2 %v3293_v0  ;;  %v3377_v0 = vor.u32 %v4116_v56, %v3376_v55 }
  0xaf   : > { %v1854_v5 = vpop.f32.mrf.mxu0 }
  0xb0   : > { %v1993_v16 = vpop.f32.mrf.mxu1 }
  0xb1   : > { %v1994_v11 = vadd.f32 %v1993_v16, %v1854_v5  ;;  %v4122_v5 = vld [vmem:[%s4452_s23 + $0x280] sm:$0xf0]  ;;  %v3790_v16 = vld [vmem:[%s4452_s23 + $0x594] sm:$0xf0] }
  0xb2   : > { %1893 = vmatmul.bf16.gmra.mxu0 %v3313_v2  ;;  %2102 = vmatmul.bf16.gmra.mxu3 %v3709_v13  ;;  %v4258_v2 = vld [vmem:[%s4394_s19 + $0x110] sm:$0xff]  ;;  %v3396_v13 = vld [vmem:[%s4452_s23 + $0x268] sm:$0xf] }
  0xb3   : > { %2032 = vmatmul.bf16.gmra.mxu1 %v3317_v8  ;;  %v4119_v8 = vld [vmem:[%s4452_s23 + $0x26c] sm:$0xf]  ;;  %2406 = vmatpush.bf16.msrb.mxu0 %v4258_v2  ;;  %v3397_v24 = vor.u32 %v4122_v5, %v3396_v13  ;;  %v4133_v2 = vld [vmem:[%s4452_s23 + $0x2dc] sm:$0xf]  ;;  %v3684_v13 = vld [vmem:[%s4452_s23 + $0x4a0] sm:$0xf] }
  0xb4   : > { %2171 = vmatmul.bf16.gmra.mxu2 %v3321_v15  ;;  %v4217_v15 = vld [vmem:[%s4452_s23 + $0x57c] sm:$0xf] }
  0xb5   : > { %v4573_v14 = vpop.f32.mrf.mxu3  ;;  %v4193_v5 = vld [vmem:[%s4452_s23 + $0x4b8] sm:$0xf0] }
  0xb7   : > { %v2132_v21 = vpop.f32.mrf.mxu2  ;;  %v1856_v23 = vpop.f32.mrf.mxu0 }
  0xb8   : > { %v4575_v22 = vadd.f32 %v2132_v21, %v1994_v11  ;;  %v1995_v25 = vpop.f32.mrf.mxu1  ;;  %v3398_v11 = vld [vmem:[%s4452_s23 + $0x284] sm:$0xf0] }
  0xb9   : > { %v1996_v17 = vadd.f32 %v1995_v25, %v1856_v23  ;;  %v3793_v25 = vor.u32 %v4217_v15, %v3790_v16  ;;  %v3401_v20 = vor.u32 %v4119_v8, %v3398_v11  ;;  %v3454_v8 = vld [vmem:[%s4452_s23 + $0x2f4] sm:$0xf0]  ;;  %v3460_v15 = vld [vmem:[%s4452_s23 + $0x2e0] sm:$0xf]  ;;  %v4137_v16 = vld [vmem:[%s4452_s23 + $0x2f8] sm:$0xf0] }
  0xbd   : > { %v4586_v34 = vpop.f32.mrf.mxu3 }
  0xbf   : > { %v2134_v35 = vpop.f32.mrf.mxu2  ;;  %v1859_v38 = vpop.f32.mrf.mxu0 }
  0xc0   : > { %v4588_v37 = vadd.f32 %v2134_v35, %v1996_v17  ;;  %v1998_v41 = vpop.f32.mrf.mxu1 }
  0xc1   : > { %v1999_v42 = vadd.f32 %v1998_v41, %v1859_v38  ;;  %v4129_v41 = vld [vmem:[%s4452_s23 + $0x2b8] sm:$0xf0] }
  0xc2   : > { %1898 = vmatmul.bf16.gmra.mxu0 %v3341_v26  ;;  %2107 = vmatmul.bf16.gmra.mxu3 %v3737_v36 }
  0xc3   : > { %2037 = vmatmul.bf16.gmra.mxu1 %v3345_v39  ;;  %v4255_v39 = vld [vmem:[%s4394_s19 + $0xf8] sm:$0xff] }
  0xc4   : > { %2176 = vmatmul.bf16.gmra.mxu2 %v3349_v40  ;;  %v3424_v40 = vld [vmem:[%s4452_s23 + $0x2a0] sm:$0xf]  ;;  %2262 = vmatpush.bf16.msrb.mxu3 %v4255_v39  ;;  %v4265_v39 = vld [vmem:[%s4394_s19 + $0x148] sm:$0xff] }
  0xc5   : > { %v4590_v43 = vpop.f32.mrf.mxu3  ;;  %v3425_v52 = vor.u32 %v4129_v41, %v3424_v40  ;;  %2546 = vmatpush.bf16.msrb.mxu1 %v4265_v39 }
  0xc7   : > { %v2137_v44 = vpop.f32.mrf.mxu2  ;;  %v1861_v46 = vpop.f32.mrf.mxu0 }
  0xc8   : > { %v4592_v45 = vadd.f32 %v2137_v44, %v1999_v42  ;;  %v2000_v47 = vpop.f32.mrf.mxu1  ;;  %v4126_v42 = vld [vmem:[%s4452_s23 + $0x2a4] sm:$0xf]  ;;  %v3656_v44 = vld [vmem:[%s4452_s23 + $0x468] sm:$0xf] }
  0xc9   : > { %v2001_v48 = vadd.f32 %v2000_v47, %v1861_v46  ;;  %v4186_v46 = vld [vmem:[%s4452_s23 + $0x480] sm:$0xf0]  ;;  %v3426_v47 = vld [vmem:[%s4452_s23 + $0x2bc] sm:$0xf0] }
  0xca   : > { %v3657_v53 = vor.u32 %v4186_v46, %v3656_v44  ;;  %v3429_v56 = vor.u32 %v4126_v42, %v3426_v47  ;;  %v3480_v42 = vld [vmem:[%s4452_s23 + $0x310] sm:$0xf]  ;;  %v4143_v44 = vld [vmem:[%s4452_s23 + $0x328] sm:$0xf0]  ;;  %v4140_v46 = vld [vmem:[%s4452_s23 + $0x314] sm:$0xf] }
  0xcb   : > { %v3712_v47 = vld [vmem:[%s4452_s23 + $0x4d8] sm:$0xf] }
  0xcd   : > { %v4602_v57 = vpop.f32.mrf.mxu3 }
  0xcf   : > { %v2139_v58 = vpop.f32.mrf.mxu2  ;;  %v1864_v62 = vpop.f32.mrf.mxu0 }
  0xd0   : > { %v4604_v61 = vadd.f32 %v2139_v58, %v2001_v48  ;;  %v2003_v1 = vpop.f32.mrf.mxu1  ;;  %v3432_v48 = vld [vmem:[%s4452_s23 + $0x2a8] sm:$0xf] }
  0xd1   : > { %v2004_v3 = vadd.f32 %v2003_v1, %v1864_v62  ;;  %v3433_v58 = vor.u32 %v4130_v49, %v3432_v48  ;;  %v4200_v48 = vld [vmem:[%s4452_s23 + $0x4f0] sm:$0xf0]  ;;  %v3482_v49 = vld [vmem:[%s4452_s23 + $0x32c] sm:$0xf0] }
  0xd2   : > { %1903 = vmatmul.bf16.gmra.mxu0 %v3369_v59  ;;  %2112 = vmatmul.bf16.gmra.mxu3 %v3765_v60 }
  0xd3   : > { %2042 = vmatmul.bf16.gmra.mxu1 %v3373_v63 }
  0xd4   : > { %2181 = vmatmul.bf16.gmra.mxu2 %v3377_v0 }
  0xd5   : > { %v4606_v4 = vpop.f32.mrf.mxu3 }
  0xd7   : > { %v2142_v6 = vpop.f32.mrf.mxu2  ;;  %v1866_v9 = vpop.f32.mrf.mxu0 }
  0xd8   : > { %v4608_v7 = vadd.f32 %v2142_v6, %v2004_v3  ;;  %v2005_v10 = vpop.f32.mrf.mxu1 }
  0xd9   : > { %v2006_v12 = vadd.f32 %v2005_v10, %v1866_v9  ;;  %v4254_v9 = vld [vmem:[%s4394_s19 + $0xf0] sm:$0xff]  ;;  %v3452_v10 = vld [vmem:[%s4452_s23 + $0x2d8] sm:$0xf] }
  0xda   : > { %2263 = vmatpush.bf16.msrb.mxu3 %v4254_v9  ;;  %v4252_v9 = vld [vmem:[%s4394_s19 + $0xe0] sm:$0xff] }
  0xdd   : > { %v4619_v21 = vpop.f32.mrf.mxu3 }
  0xdf   : > { %v2144_v23 = vpop.f32.mrf.mxu2  ;;  %v1869_v27 = vpop.f32.mrf.mxu0 }
  0xe0   : > { %v4621_v17 = vadd.f32 %v2144_v23, %v2006_v12  ;;  %v2008_v30 = vpop.f32.mrf.mxu1  ;;  %v4136_v12 = vld [vmem:[%s4452_s23 + $0x2f0] sm:$0xf0]  ;;  %v3685_v23 = vor.u32 %v4193_v5, %v3684_v13 }
  0xe1   : > { %v2009_v31 = vadd.f32 %v2008_v30, %v1869_v27  ;;  %v3453_v19 = vor.u32 %v4136_v12, %v3452_v10  ;;  %v3457_v27 = vor.u32 %v4133_v2, %v3454_v8  ;;  %v4253_v30 = vld [vmem:[%s4394_s19 + $0xe8] sm:$0xff] }
  0xe2   : > { %1908 = vmatmul.bf16.gmra.mxu0 %v3397_v24  ;;  %2117 = vmatmul.bf16.gmra.mxu3 %v3793_v25 }
  0xe3   : > { %2047 = vmatmul.bf16.gmra.mxu1 %v3401_v20  ;;  %v3461_v20 = vor.u32 %v4137_v16, %v3460_v15  ;;  %2264 = vmatpush.bf16.msrb.mxu3 %v4253_v30  ;;  %v4251_v15 = vld [vmem:[%s4394_s19 + $0xd8] sm:$0xff]  ;;  %v3508_v16 = vld [vmem:[%s4452_s23 + $0x348] sm:$0xf] }
  0xe4   : > { %2186 = vmatmul.bf16.gmra.mxu2 %v3405_v28 }
  0xe5   : > { %v4624_v32 = vpop.f32.mrf.mxu3 }
  0xe7   : > { %v2147_v33 = vpop.f32.mrf.mxu2  ;;  %v1871_v26 = vpop.f32.mrf.mxu0  ;;  %2265 = vmatpush.bf16.msrb.mxu3 %v4252_v9  ;;  %v3538_v9 = vld [vmem:[%s4452_s23 + $0x39c] sm:$0xf0] }
  0xe8   : > { %v4626_v35 = vadd.f32 %v2147_v33, %v2009_v31  ;;  %v2010_v36 = vpop.f32.mrf.mxu1  ;;  %v4257_v31 = vld [vmem:[%s4394_s19 + $0x108] sm:$0xff] }
  0xe9   : > { %v2011_v38 = vadd.f32 %v2010_v36, %v1871_v26  ;;  %2407 = vmatpush.bf16.msrb.mxu0 %v4257_v31 }
  0xeb   : > { %2266 = vmatpush.bf16.msrb.mxu3 %v4251_v15 }
  0xed   : > { %v4637_v50 = vpop.f32.mrf.mxu3 }
  0xef   : > { %v2149_v51 = vpop.f32.mrf.mxu2  ;;  %v1874_v55 = vpop.f32.mrf.mxu0 }
  0xf0   : > { %v4639_v54 = vadd.f32 %v2149_v51, %v2011_v38  ;;  %v2013_v59 = vpop.f32.mrf.mxu1  ;;  %v3488_v51 = vld [vmem:[%s4452_s23 + $0x318] sm:$0xf] }
  0xf1   : > { %v2014_v60 = vadd.f32 %v2013_v59, %v1874_v55 }
  0xf2   : > { %1913 = vmatmul.bf16.gmra.mxu0 %v3425_v52  ;;  %2231 = vmatmul.bf16.vlgmr.msra.gmra.mxu3 %v3657_v53  ;;  %v4144_v52 = vld [vmem:[%s4452_s23 + $0x330] sm:$0xf0] }
  0xf3   : > { %2052 = vmatmul.bf16.gmra.mxu1 %v3429_v56  ;;  %v3481_v56 = vor.u32 %v4143_v44, %v3480_v42 }
  0xf4   : > { %2191 = vmatmul.bf16.gmra.mxu2 %v3433_v58  ;;  %v3713_v58 = vor.u32 %v4200_v48, %v3712_v47  ;;  %v4250_v48 = vld [vmem:[%s4394_s19 + $0xd0] sm:$0xff] }
  0xf5   : > { %v4641_v62 = vpop.f32.mrf.mxu3  ;;  %2267 = vmatpush.bf16.msrb.mxu3 %v4250_v48  ;;  %v4161_v48 = vld [vmem:[%s4452_s23 + $0x3bc] sm:$0xf] }
  0xf7   : > { %v2152_v63 = vpop.f32.mrf.mxu2  ;;  %v1876_v1 = vpop.f32.mrf.mxu0 }
  0xf8   : > { %v4643_v0 = vadd.f32 %v2152_v63, %v2014_v60  ;;  %v2015_v3 = vpop.f32.mrf.mxu1  ;;  %v3485_v63 = vor.u32 %v4140_v46, %v3482_v49 }
  0xf9   : > { %v2016_v6 = vadd.f32 %v2015_v3, %v1876_v1  ;;  %v3489_v1 = vor.u32 %v4144_v52, %v3488_v51 }
  0xfd   : > { %v4654_v11 = vpop.f32.mrf.mxu3 }
  0xff   : > { %v2154_v18 = vpop.f32.mrf.mxu2  ;;  %v1879_v25 = vpop.f32.mrf.mxu0 }
 0x100   : > { %v4656_v24 = vadd.f32 %v2154_v18, %v2016_v6  ;;  %v2018_v28 = vpop.f32.mrf.mxu1  ;;  %v4150_v18 = vld [vmem:[%s4452_s23 + $0x360] sm:$0xf0] }
 0x101   : > { %v2019_v29 = vadd.f32 %v2018_v28, %v1879_v25  ;;  %v4207_v25 = vld [vmem:[%s4452_s23 + $0x528] sm:$0xf0]  ;;  %v3509_v31 = vor.u32 %v4150_v18, %v3508_v16  ;;  %v4248_v18 = vld [vmem:[%s4394_s19 + $0xc0] sm:$0xff] }
 0x102   : > { %1918 = vmatmul.bf16.gmra.mxu0 %v3453_v19  ;;  %2236 = vmatmul.bf16.gmra.mxu3 %v3685_v23  ;;  %v4147_v19 = vld [vmem:[%s4452_s23 + $0x34c] sm:$0xf]  ;;  %v3740_v23 = vld [vmem:[%s4452_s23 + $0x510] sm:$0xf] }
 0x103   : > { %2057 = vmatmul.bf16.gmra.mxu1 %v3457_v27  ;;  %v3510_v27 = vld [vmem:[%s4452_s23 + $0x364] sm:$0xf0]  ;;  %v4151_v28 = vld [vmem:[%s4452_s23 + $0x368] sm:$0xf0] }
 0x104   : > { %2196 = vmatmul.bf16.gmra.mxu2 %v3461_v20  ;;  %v3516_v20 = vld [vmem:[%s4452_s23 + $0x350] sm:$0xf] }
 0x105   : > { %v4660_v33 = vpop.f32.mrf.mxu3 }
 0x107   : > { %v2157_v26 = vpop.f32.mrf.mxu2  ;;  %v1881_v38 = vpop.f32.mrf.mxu0 }
 0x108   : > { %v4662_v36 = vadd.f32 %v2157_v26, %v2019_v29  ;;  %v2020_v40 = vpop.f32.mrf.mxu1  ;;  %v3741_v26 = vor.u32 %v4207_v25, %v3740_v23 }
 0x109   : > { %v2021_v41 = vadd.f32 %v2020_v40, %v1881_v38  ;;  %v3513_v40 = vor.u32 %v4147_v19, %v3510_v27 }
 0x10d   : > { %v4673_v53 = vpop.f32.mrf.mxu3 }
 0x10f   : > { %v2159_v55 = vpop.f32.mrf.mxu2  ;;  %v1884_v60 = vpop.f32.mrf.mxu0 }
 0x110   : > { %v4675_v59 = vadd.f32 %v2159_v55, %v2021_v41  ;;  %v2023_v3 = vpop.f32.mrf.mxu1  ;;  %v3517_v41 = vor.u32 %v4151_v28, %v3516_v20  ;;  %v4264_v20 = vld [vmem:[%s4394_s19 + $0x140] sm:$0xff] }
 0x111   : > { %v2024_v6 = vadd.f32 %v2023_v3, %v1884_v60  ;;  %v3536_v60 = vld [vmem:[%s4452_s23 + $0x380] sm:$0xf]  ;;  %v3768_v3 = vld [vmem:[%s4452_s23 + $0x548] sm:$0xf]  ;;  %2547 = vmatpush.bf16.msrb.mxu1 %v4264_v20 }
 0x112   : > { %1923 = vmatmul.bf16.gmra.mxu0 %v3481_v56  ;;  %2241 = vmatmul.bf16.gmra.mxu3 %v3713_v58  ;;  %v4249_v56 = vld [vmem:[%s4394_s19 + $0xc8] sm:$0xff]  ;;  %v4256_v58 = vld [vmem:[%s4394_s19 + $0x100] sm:$0xff] }
 0x113   : > { %2062 = vmatmul.bf16.gmra.mxu1 %v3485_v63  ;;  %v4157_v63 = vld [vmem:[%s4452_s23 + $0x398] sm:$0xf0]  ;;  %2408 = vmatpush.bf16.msrb.mxu0 %v4256_v58 }
 0x114   : > { %2201 = vmatmul.bf16.gmra.mxu2 %v3489_v1  ;;  %v4154_v1 = vld [vmem:[%s4452_s23 + $0x384] sm:$0xf]  ;;  %2268 = vmatpush.bf16.msrb.mxu3 %v4249_v56  ;;  %v3537_v15 = vor.u32 %v4157_v63, %v3536_v60  ;;  %v3572_v56 = vld [vmem:[%s4452_s23 + $0x3c0] sm:$0xf]  ;;  %v4165_v58 = vld [vmem:[%s4452_s23 + $0x3d8] sm:$0xf0] }
 0x115   : > { %v4678_v10 = vpop.f32.mrf.mxu3  ;;  %v3541_v25 = vor.u32 %v4154_v1, %v3538_v9 }
 0x117   : > { %v2162_v12 = vpop.f32.mrf.mxu2  ;;  %v1886_v13 = vpop.f32.mrf.mxu0 }
 0x118   : > { %v4680_v2 = vadd.f32 %v2162_v12, %v2024_v6  ;;  %v2025_v5 = vpop.f32.mrf.mxu1  ;;  %v4214_v6 = vld [vmem:[%s4452_s23 + $0x560] sm:$0xf0]  ;;  %v3544_v12 = vld [vmem:[%s4452_s23 + $0x388] sm:$0xf]  ;;  %2269 = vmatpush.bf16.msrb.mxu3 %v4248_v18 }
 0x119   : > { %v2026_v8 = vadd.f32 %v2025_v5, %v1886_v13  ;;  %v4158_v13 = vld [vmem:[%s4452_s23 + $0x3a0] sm:$0xf0]  ;;  %v3769_v16 = vor.u32 %v4214_v6, %v3768_v3 }
 0x11a   : > { %v3545_v27 = vor.u32 %v4158_v13, %v3544_v12  ;;  %v3573_v13 = vor.u32 %v4165_v58, %v3572_v56 }
 0x11d   : > { %v4691_v29 = vpop.f32.mrf.mxu3 }
 0x11f   : > { %v2164_v30 = vpop.f32.mrf.mxu2  ;;  %v1889_v39 = vpop.f32.mrf.mxu0 }
 0x120   : > { %v4693_v38 = vadd.f32 %v2164_v30, %v2026_v8  ;;  %v2028_v42 = vpop.f32.mrf.mxu1 }
 0x121   : > { %v2029_v44 = vadd.f32 %v2028_v42, %v1889_v39 }
 0x122   : > { %1928 = vmatmul.bf16.gmra.mxu0 %v3509_v31  ;;  %2246 = vmatmul.bf16.gmra.mxu3 %v3741_v26 }
 0x123   : > { %2067 = vmatmul.bf16.gmra.mxu1 %v3513_v40 }
 0x124   : > { %2206 = vmatmul.bf16.gmra.mxu2 %v3517_v41 }
 0x125   : > { %v4695_v46 = vpop.f32.mrf.mxu3 }
 0x127   : > { %v2167_v47 = vpop.f32.mrf.mxu2  ;;  %v1891_v51 = vpop.f32.mrf.mxu0 }
 0x128   : > { %v4698_v49 = vadd.f32 %v2167_v47, %v2029_v44  ;;  %v2030_v52 = vpop.f32.mrf.mxu1  ;;  %v3564_v44 = vld [vmem:[%s4452_s23 + $0x3b8] sm:$0xf]  ;;  %v4164_v47 = vld [vmem:[%s4452_s23 + $0x3d0] sm:$0xf0] }
 0x129   : > { %v2031_v55 = vadd.f32 %v2030_v52, %v1891_v51  ;;  %v3796_v51 = vld [vmem:[%s4452_s23 + $0x580] sm:$0xf]  ;;  %v4221_v52 = vld [vmem:[%s4452_s23 + $0x598] sm:$0xf0]  ;;  %v3565_v1 = vor.u32 %v4164_v47, %v3564_v44  ;;  %v3600_v44 = vld [vmem:[%s4452_s23 + $0x3f8] sm:$0xf] }
 0x12a   : > { %v3797_v3 = vor.u32 %v4221_v52, %v3796_v51  ;;  %v4172_v47 = vld [vmem:[%s4452_s23 + $0x410] sm:$0xf0] }
 0x12d   : > { %v4710_v5 = vpop.f32.mrf.mxu3 }
 0x12f   : > { %v2169_v8 = vpop.f32.mrf.mxu2  ;;  %v1894_v23 = vpop.f32.mrf.mxu0 }
 0x130   : > { %v4713_v19 = vadd.f32 %v2169_v8, %v2031_v55  ;;  %v2033_v28 = vpop.f32.mrf.mxu1  ;;  %v3566_v55 = vld [vmem:[%s4452_s23 + $0x3d4] sm:$0xf0] }
 0x131   : > { %v2034_v30 = vadd.f32 %v2033_v28, %v1894_v23  ;;  %v3569_v12 = vor.u32 %v4161_v48, %v3566_v55  ;;  %v3592_v28 = vld [vmem:[%s4452_s23 + $0x3f0] sm:$0xf] }
 0x132   : > { %1933 = vmatmul.bf16.gmra.mxu0 %v3537_v15  ;;  %2251 = vmatmul.bf16.gmra.mxu3 %v3769_v16 }
 0x133   : > { %2072 = vmatmul.bf16.gmra.mxu1 %v3541_v25 }
 0x134   : > { %2211 = vmatmul.bf16.gmra.mxu2 %v3545_v27 }
 0x135   : > { %v4716_v31 = vpop.f32.mrf.mxu3 }
 0x137   : > { %v2172_v26 = vpop.f32.mrf.mxu2  ;;  %v1896_v40 = vpop.f32.mrf.mxu0 }
 0x138   : > { %v4718_v39 = vadd.f32 %v2172_v26, %v2034_v30  ;;  %v2035_v41 = vpop.f32.mrf.mxu1  ;;  %v4171_v30 = vld [vmem:[%s4452_s23 + $0x408] sm:$0xf0]  ;;  %v4168_v26 = vld [vmem:[%s4452_s23 + $0x3f4] sm:$0xf] }
 0x139   : > { %v2036_v42 = vadd.f32 %v2035_v41, %v1896_v40  ;;  %v4043_v40 = vld [vmem:[%s4452_s23 + $0xc] sm:$0xf]  ;;  %v3098_v41 = vld [vmem:[%s4452_s23 + $0x24] sm:$0xf0]  ;;  %v3593_v52 = vor.u32 %v4171_v30, %v3592_v28  ;;  %v4050_v30 = vld [vmem:[%s4452_s23 + $0x44] sm:$0xf] }
 0x13a   : > { %v3101_v55 = vor.u32 %v4043_v40, %v3098_v41  ;;  %v4175_v28 = vld [vmem:[%s4452_s23 + $0x42c] sm:$0xf]  ;;  %v3622_v40 = vld [vmem:[%s4452_s23 + $0x444] sm:$0xf0]  ;;  %v3628_v41 = vld [vmem:[%s4452_s23 + $0x430] sm:$0xf] }
 0x13d   : > { %v4728_v60 = vpop.f32.mrf.mxu3 }
 0x13f   : > { %v2174_v63 = vpop.f32.mrf.mxu2  ;;  %v1899_v9 = vpop.f32.mrf.mxu0 }
 0x140   : > { %v4730_v6 = vadd.f32 %v2174_v63, %v2036_v42  ;;  %v2038_v8 = vpop.f32.mrf.mxu1  ;;  %v3594_v42 = vld [vmem:[%s4452_s23 + $0x40c] sm:$0xf0] }
 0x141   : > { %v2039_v15 = vadd.f32 %v2038_v8, %v1899_v9  ;;  %v3597_v63 = vor.u32 %v4168_v26, %v3594_v42  ;;  %v3126_v26 = vld [vmem:[%s4452_s23 + $0x5c] sm:$0xf0]  ;;  %v4179_v42 = vld [vmem:[%s4452_s23 + $0x448] sm:$0xf0] }
 0x142   : > { %1938 = vmatmul.bf16.gmra.mxu0 %v3565_v1  ;;  %2256 = vmatmul.bf16.gmra.mxu3 %v3797_v3  ;;  %v3601_v1 = vor.u32 %v4172_v47, %v3600_v44 }
 0x143   : > { %2077 = vmatmul.bf16.gmra.mxu1 %v3569_v12 }
 0x144   : > { %2216 = vmatmul.bf16.gmra.mxu2 %v3573_v13 }
 0x145   : > { %v4732_v16 = vpop.f32.mrf.mxu3 }
 0x147   : > { %v2177_v18 = vpop.f32.mrf.mxu2  ;;  %v1901_v25 = vpop.f32.mrf.mxu0 }
 0x148   : > { %v4734_v23 = vadd.f32 %v2177_v18, %v2039_v15  ;;  %v2040_v27 = vpop.f32.mrf.mxu1 }
 0x149   : > { %v2041_v20 = vadd.f32 %v2040_v27, %v1901_v25  ;;  %v3620_v27 = vld [vmem:[%s4452_s23 + $0x428] sm:$0xf] }
 0x14d   : > { %v4744_v48 = vpop.f32.mrf.mxu3 }
 0x14f   : > { %v2179_v51 = vpop.f32.mrf.mxu2  ;;  %v1904_v58 = vpop.f32.mrf.mxu0 }
 0x150   : > { %v4746_v56 = vadd.f32 %v2179_v51, %v2041_v20  ;;  %v2043_v3 = vpop.f32.mrf.mxu1  ;;  %v4178_v20 = vld [vmem:[%s4452_s23 + $0x440] sm:$0xf0] }
 0x151   : > { %v2044_v9 = vadd.f32 %v2043_v3, %v1904_v58  ;;  %v3621_v51 = vor.u32 %v4178_v20, %v3620_v27 }
 0x152   : > { %1943 = vmatmul.bf16.gmra.mxu0 %v3593_v52  ;;  %2270 = vmatmul.bf16.vlgmr.msrb.gmra.mxu3 %v3101_v55  ;;  %v3129_v52 = vor.u32 %v4050_v30, %v3126_v26  ;;  %v3154_v30 = vld [vmem:[%s4452_s23 + $0x94] sm:$0xf0]  ;;  %v3104_v26 = vld [vmem:[%s4452_s23 + $0x10] sm:$0xf] }
 0x153   : > { %2082 = vmatmul.bf16.gmra.mxu1 %v3597_v63  ;;  %v3625_v63 = vor.u32 %v4175_v28, %v3622_v40  ;;  %v4057_v28 = vld [vmem:[%s4452_s23 + $0x7c] sm:$0xf]  ;;  %v4047_v40 = vld [vmem:[%s4452_s23 + $0x28] sm:$0xf0] }
 0x154   : > { %2221 = vmatmul.bf16.gmra.mxu2 %v3601_v1  ;;  %v3629_v1 = vor.u32 %v4179_v42, %v3628_v41  ;;  %v4044_v41 = vld [vmem:[%s4452_s23 + $0x14] sm:$0xf]  ;;  %v3106_v42 = vld [vmem:[%s4452_s23 + $0x2c] sm:$0xf0] }
 0x155   : > { %v4748_v12 = vpop.f32.mrf.mxu3 }
 0x157   : > { %v2182_v13 = vpop.f32.mrf.mxu2  ;;  %v1906_v15 = vpop.f32.mrf.mxu0 }
 0x158   : > { %v4750_v8 = vadd.f32 %v2182_v13, %v2044_v9  ;;  %v2045_v18 = vpop.f32.mrf.mxu1 }
 0x159   : > { %v2046_v25 = vadd.f32 %v2045_v18, %v1906_v15 }
 0x15d   : > { %v4760_v44 = vpop.f32.mrf.mxu3 }
 0x15f   : > { %v2184_v47 = vpop.f32.mrf.mxu2  ;;  %v1909_v58 = vpop.f32.mrf.mxu0 }
 0x160   : > { %v4762_v55 = vadd.f32 %v2184_v47, %v2046_v25  ;;  %v2048_v3 = vpop.f32.mrf.mxu1  ;;  %v3112_v47 = vld [vmem:[%s4452_s23 + $0x18] sm:$0xf] }
 0x161   : > { %v2049_v9 = vadd.f32 %v2048_v3, %v1909_v58 }
 0x162   : > { %5471 = vst [vmem:[#allocation2_spill] sm:$0xff] %v4762_v55  ;;  %1948 = vmatmul.bf16.gmra.mxu0 %v3621_v51  ;;  %2275 = vmatmul.bf16.gmra.mxu3 %v3129_v52  ;;  %v4048_v51 = vld [vmem:[%s4452_s23 + $0x30] sm:$0xf0] }
 0x163   : > { %2087 = vmatmul.bf16.gmra.mxu1 %v3625_v63  ;;  %v3157_v63 = vor.u32 %v4057_v28, %v3154_v30 }
 0x164   : > { %2226 = vmatmul.bf16.gmra.mxu2 %v3629_v1  ;;  %v3105_v1 = vor.u32 %v4047_v40, %v3104_v26 }
 0x165   : > { %v4764_v13 = vpop.f32.mrf.mxu3 }
 0x167   : > { %v2187_v15 = vpop.f32.mrf.mxu2  ;;  %v1911_v25 = vpop.f32.mrf.mxu0 }
 0x168   : > { %v4766_v18 = vadd.f32 %v2187_v15, %v2049_v9  ;;  %v2050_v27 = vpop.f32.mrf.mxu1  ;;  %v3109_v15 = vor.u32 %v4044_v41, %v3106_v42 }
 0x169   : > { %v2051_v20 = vadd.f32 %v2050_v27, %v1911_v25 }
 0x16a   : > { %5472 = vst [vmem:[#allocation3_spill] sm:$0xff] %v4766_v18  ;;  %v3113_v18 = vor.u32 %v4048_v51, %v3112_v47  ;;  %v4064_v51 = vld [vmem:[%s4452_s23 + $0xb4] sm:$0xf] }
 0x16d   : > { %v4776_v52 = vpop.f32.mrf.mxu3 }
 0x16f   : > { %v2189_v58 = vpop.f32.mrf.mxu2  ;;  %v1914_v9 = vpop.f32.mrf.mxu0 }
 0x170   : > { %v4778_v3 = vadd.f32 %v2189_v58, %v2051_v20  ;;  %v2053_v25 = vpop.f32.mrf.mxu1  ;;  %v2094_v20 = vadd.f32 %v4678_v10, %v4573_v14  ;;  %v3182_v58 = vld [vmem:[%s4452_s23 + $0xcc] sm:$0xf0]  ;;  %v4055_v10 = vld [vmem:[%s4452_s23 + $0x68] sm:$0xf0] }
 0x171   : > { %v2054_v27 = vadd.f32 %v2053_v25, %v1914_v9  ;;  %v4051_v9 = vld [vmem:[%s4452_s23 + $0x4c] sm:$0xf]  ;;  %v3140_v14 = vld [vmem:[%s4452_s23 + $0x50] sm:$0xf] }
 0x172   : > { %5473 = vst [vmem:[#allocation4_spill] sm:$0xff] %v4778_v3  ;;  %2280 = vmatmul.bf16.gmra.mxu3 %v3157_v63  ;;  %2409 = vmatmul.bf16.vlgmr.msrb.gmra.mxu0 %v3105_v1  ;;  %v3132_v63 = vld [vmem:[%s4452_s23 + $0x48] sm:$0xf]  ;;  %v4054_v1 = vld [vmem:[%s4452_s23 + $0x60] sm:$0xf0] }
 0x173   : > { %2548 = vmatmul.bf16.vlgmr.msrb.gmra.mxu1 %v3109_v15  ;;  %v3134_v15 = vld [vmem:[%s4452_s23 + $0x64] sm:$0xf0] }
 0x174   : > { %4014 = vmatmul.msk.bf16.vlgmr.msrb.gmra.mxu2 %vm1766_vm0, %v3113_v18  ;;  %v2096_v18 = vadd.f32 %v4691_v29, %v4586_v34  ;;  %v2099_v34 = vadd.f32 %v4695_v46, %v4590_v43  ;;  %v3168_v43 = vld [vmem:[%s4452_s23 + $0x88] sm:$0xf]  ;;  %v4062_v46 = vld [vmem:[%s4452_s23 + $0xa0] sm:$0xf0] }
 0x175   : > { %v2232_v28 = vpop.f32.mrf.mxu3 }
 0x176   : > { %v4783_v26 = vadd.f32 %v2232_v28, %v2094_v20  ;;  %v3133_v28 = vor.u32 %v4054_v1, %v3132_v63  ;;  %v4071_v1 = vld [vmem:[%s4452_s23 + $0xec] sm:$0xf] }
 0x177   : > { %v2192_v30 = vpop.f32.mrf.mxu2  ;;  %v1916_v41 = vpop.f32.mrf.mxu0 }
 0x178   : > { %5474 = vst [vmem:[#allocation5_spill] sm:$0xff] %v4783_v26  ;;  %v4785_v40 = vadd.f32 %v2192_v30, %v2054_v27  ;;  %v2055_v42 = vpop.f32.mrf.mxu1  ;;  %v3185_v27 = vor.u32 %v4064_v51, %v3182_v58  ;;  %v3141_v26 = vor.u32 %v4055_v10, %v3140_v14  ;;  %v4058_v14 = vld [vmem:[%s4452_s23 + $0x84] sm:$0xf]  ;;  %v3162_v10 = vld [vmem:[%s4452_s23 + $0x9c] sm:$0xf0] }
 0x179   : > { %v2056_v47 = vadd.f32 %v2055_v42, %v1916_v41  ;;  %v3137_v42 = vor.u32 %v4051_v9, %v3134_v15  ;;  %v3210_v9 = vld [vmem:[%s4452_s23 + $0x104] sm:$0xf0]  ;;  %v4061_v15 = vld [vmem:[%s4452_s23 + $0x98] sm:$0xf0] }
 0x17a   : > { %5475 = vst [vmem:[#allocation6_spill] sm:$0xff] %v4785_v40 }
 0x17d   : > { %v2234_v25 = vpop.f32.mrf.mxu3 }
 0x17e   : > { %v4797_v20 = vadd.f32 %v2234_v25, %v2096_v18  ;;  %v3160_v18 = vld [vmem:[%s4452_s23 + $0x80] sm:$0xf] }
 0x17f   : > { %v2194_v3 = vpop.f32.mrf.mxu2  ;;  %v1919_v41 = vpop.f32.mrf.mxu0 }
 0x180   : > { %v4799_v30 = vadd.f32 %v2194_v3, %v2056_v47  ;;  %v2058_v40 = vpop.f32.mrf.mxu1 }
 0x181   : > { %v2059_v55 = vadd.f32 %v2058_v40, %v1919_v41  ;;  %v3161_v41 = vor.u32 %v4061_v15, %v3160_v18 }
 0x182   : > { %2285 = vmatmul.bf16.gmra.mxu3 %v3185_v27  ;;  %2414 = vmatmul.bf16.gmra.mxu0 %v3133_v28 }
 0x183   : > { %2553 = vmatmul.bf16.gmra.mxu1 %v3137_v42 }
 0x184   : > { %4015 = vmatmul.msk.bf16.gmra.mxu2 %vm1766_vm0, %v3141_v26  ;;  %v2101_v26 = vadd.f32 %v4710_v5, %v4602_v57  ;;  %v2104_v57 = vadd.f32 %v4716_v31, %v4606_v4  ;;  %v3196_v4 = vld [vmem:[%s4452_s23 + $0xc0] sm:$0xf]  ;;  %v4069_v31 = vld [vmem:[%s4452_s23 + $0xd8] sm:$0xf0] }
 0x185   : > { %v2237_v29 = vpop.f32.mrf.mxu3 }
 0x186   : > { %v4804_v47 = vadd.f32 %v2237_v29, %v2099_v34  ;;  %v3165_v29 = vor.u32 %v4058_v14, %v3162_v10  ;;  %v3238_v10 = vld [vmem:[%s4452_s23 + $0x13c] sm:$0xf0] }
 0x187   : > { %v2197_v3 = vpop.f32.mrf.mxu2  ;;  %v1921_v40 = vpop.f32.mrf.mxu0 }
 0x188   : > { %v4806_v51 = vadd.f32 %v2197_v3, %v2059_v55  ;;  %v2060_v58 = vpop.f32.mrf.mxu1  ;;  %v3213_v55 = vor.u32 %v4071_v1, %v3210_v9  ;;  %v3169_v3 = vor.u32 %v4062_v46, %v3168_v43  ;;  %v3188_v43 = vld [vmem:[%s4452_s23 + $0xb8] sm:$0xf]  ;;  %v4068_v46 = vld [vmem:[%s4452_s23 + $0xd0] sm:$0xf0] }
 0x189   : > { %v2061_v63 = vadd.f32 %v2060_v58, %v1921_v40 }
 0x18d   : > { %v2239_v25 = vpop.f32.mrf.mxu3 }
 0x18e   : > { %v4818_v28 = vadd.f32 %v2239_v25, %v2101_v26  ;;  %v4078_v26 = vld [vmem:[%s4452_s23 + $0x124] sm:$0xf]  ;;  %v4065_v25 = vld [vmem:[%s4452_s23 + $0xbc] sm:$0xf] }
 0x18f   : > { %v2199_v27 = vpop.f32.mrf.mxu2  ;;  %v1924_v34 = vpop.f32.mrf.mxu0 }
 0x190   : > { %v4820_v42 = vadd.f32 %v2199_v27, %v2061_v63  ;;  %v2063_v40 = vpop.f32.mrf.mxu1  ;;  %v2106_v27 = vadd.f32 %v4728_v60, %v4619_v21  ;;  %v2109_v21 = vadd.f32 %v4732_v16, %v4624_v32  ;;  %v3224_v32 = vld [vmem:[%s4452_s23 + $0xf8] sm:$0xf]  ;;  %v4076_v16 = vld [vmem:[%s4452_s23 + $0x110] sm:$0xf0] }
 0x191   : > { %v2064_v58 = vadd.f32 %v2063_v40, %v1924_v34  ;;  %v3189_v40 = vor.u32 %v4068_v46, %v3188_v43 }
 0x192   : > { %2290 = vmatmul.bf16.gmra.mxu3 %v3213_v55  ;;  %2419 = vmatmul.bf16.gmra.mxu0 %v3161_v41  ;;  %v3190_v55 = vld [vmem:[%s4452_s23 + $0xd4] sm:$0xf0] }
 0x193   : > { %2558 = vmatmul.bf16.gmra.mxu1 %v3165_v29 }
 0x194   : > { %4016 = vmatmul.msk.bf16.gmra.mxu2 %vm1766_vm0, %v3169_v3  ;;  %v3241_v3 = vor.u32 %v4078_v26, %v3238_v10 }
 0x195   : > { %v2242_v5 = vpop.f32.mrf.mxu3 }
 0x196   : > { %v4825_v1 = vadd.f32 %v2242_v5, %v2104_v57  ;;  %v3193_v5 = vor.u32 %v4065_v25, %v3190_v55  ;;  %v3266_v55 = vld [vmem:[%s4452_s23 + $0x174] sm:$0xf0] }
 0x197   : > { %v2202_v63 = vpop.f32.mrf.mxu2  ;;  %v1926_v18 = vpop.f32.mrf.mxu0 }
 0x198   : > { %5476 = vst [vmem:[#allocation7_spill] sm:$0xff] %v4825_v1  ;;  %v4827_v9 = vadd.f32 %v2202_v63, %v2064_v58  ;;  %v2065_v15 = vpop.f32.mrf.mxu1  ;;  %v3197_v63 = vor.u32 %v4069_v31, %v3196_v4  ;;  %v3216_v4 = vld [vmem:[%s4452_s23 + $0xf0] sm:$0xf]  ;;  %v4075_v31 = vld [vmem:[%s4452_s23 + $0x108] sm:$0xf0] }
 0x199   : > { %v2066_v14 = vadd.f32 %v2065_v15, %v1926_v18 }
 0x19d   : > { %v2244_v41 = vpop.f32.mrf.mxu3 }
 0x19e   : > { %v4839_v29 = vadd.f32 %v2244_v41, %v2106_v27  ;;  %v4085_v27 = vld [vmem:[%s4452_s23 + $0x15c] sm:$0xf]  ;;  %v4072_v41 = vld [vmem:[%s4452_s23 + $0xf4] sm:$0xf] }
 0x19f   : > { %v2204_v34 = vpop.f32.mrf.mxu2  ;;  %v1929_v57 = vpop.f32.mrf.mxu0 }
 0x1a0   : > { %5477 = vst [vmem:[#allocation8_spill] sm:$0xff] %v4839_v29  ;;  %v4841_v58 = vadd.f32 %v2204_v34, %v2066_v14  ;;  %v2068_v18 = vpop.f32.mrf.mxu1  ;;  %v2111_v34 = vadd.f32 %v4744_v48, %v4637_v50  ;;  %v2114_v50 = vadd.f32 %v4748_v12, %v4641_v62  ;;  %v3252_v62 = vld [vmem:[%s4452_s23 + $0x130] sm:$0xf]  ;;  %v4083_v12 = vld [vmem:[%s4452_s23 + $0x148] sm:$0xf0] }
 0x1a1   : > { %v2069_v15 = vadd.f32 %v2068_v18, %v1929_v57  ;;  %v3217_v18 = vor.u32 %v4075_v31, %v3216_v4 }
 0x1a2   : > { %2295 = vmatmul.bf16.gmra.mxu3 %v3241_v3  ;;  %2424 = vmatmul.bf16.gmra.mxu0 %v3189_v40  ;;  %v3218_v3 = vld [vmem:[%s4452_s23 + $0x10c] sm:$0xf0] }
 0x1a3   : > { %2563 = vmatmul.bf16.gmra.mxu1 %v3193_v5 }
 0x1a4   : > { %4017 = vmatmul.msk.bf16.gmra.mxu2 %vm1766_vm0, %v3197_v63  ;;  %v3269_v63 = vor.u32 %v4085_v27, %v3266_v55 }
 0x1a5   : > { %v2247_v60 = vpop.f32.mrf.mxu3 }
 0x1a6   : > { %v4846_v26 = vadd.f32 %v2247_v60, %v2109_v21  ;;  %v3221_v60 = vor.u32 %v4072_v41, %v3218_v3  ;;  %v3294_v3 = vld [vmem:[%s4452_s23 + $0x1ac] sm:$0xf0] }
 0x1a7   : > { %v2207_v14 = vpop.f32.mrf.mxu2  ;;  %v1931_v43 = vpop.f32.mrf.mxu0 }
 0x1a8   : > { %5478 = vst [vmem:[#allocation9_spill] sm:$0xff] %v4846_v26  ;;  %v4848_v10 = vadd.f32 %v2207_v14, %v2069_v15  ;;  %v2070_v46 = vpop.f32.mrf.mxu1  ;;  %v3225_v14 = vor.u32 %v4076_v16, %v3224_v32  ;;  %v3244_v32 = vld [vmem:[%s4452_s23 + $0x128] sm:$0xf]  ;;  %v4082_v16 = vld [vmem:[%s4452_s23 + $0x140] sm:$0xf0] }
 0x1a9   : > { %v2071_v25 = vadd.f32 %v2070_v46, %v1931_v43 }
 0x1ad   : > { %v2249_v40 = vpop.f32.mrf.mxu3 }
 0x1ae   : > { %v4860_v5 = vadd.f32 %v2249_v40, %v2111_v34  ;;  %v4092_v34 = vld [vmem:[%s4452_s23 + $0x194] sm:$0xf]  ;;  %v4079_v40 = vld [vmem:[%s4452_s23 + $0x12c] sm:$0xf] }
 0x1af   : > { %v2209_v57 = vpop.f32.mrf.mxu2  ;;  %v1934_v21 = vpop.f32.mrf.mxu0 }
 0x1b0   : > { %5479 = vst [vmem:[#allocation10_spill] sm:$0xff] %v4860_v5  ;;  %v4862_v15 = vadd.f32 %v2209_v57, %v2071_v25  ;;  %v2073_v43 = vpop.f32.mrf.mxu1  ;;  %v2116_v57 = vadd.f32 %v4760_v44, %v4654_v11  ;;  %v2119_v11 = vadd.f32 %v4764_v13, %v4660_v33  ;;  %v3280_v33 = vld [vmem:[%s4452_s23 + $0x168] sm:$0xf]  ;;  %v4090_v13 = vld [vmem:[%s4452_s23 + $0x180] sm:$0xf0] }
 0x1b1   : > { %v2074_v46 = vadd.f32 %v2073_v43, %v1934_v21  ;;  %v3245_v43 = vor.u32 %v4082_v16, %v3244_v32 }
 0x1b2   : > { %2300 = vmatmul.bf16.gmra.mxu3 %v3269_v63  ;;  %2429 = vmatmul.bf16.gmra.mxu0 %v3217_v18  ;;  %v3246_v63 = vld [vmem:[%s4452_s23 + $0x144] sm:$0xf0] }
 0x1b3   : > { %2568 = vmatmul.bf16.gmra.mxu1 %v3221_v60 }
 0x1b4   : > { %4018 = vmatmul.msk.bf16.gmra.mxu2 %vm1766_vm0, %v3225_v14  ;;  %v3297_v14 = vor.u32 %v4092_v34, %v3294_v3 }
 0x1b5   : > { %v2252_v48 = vpop.f32.mrf.mxu3 }
 0x1b6   : > { %v4867_v27 = vadd.f32 %v2252_v48, %v2114_v50  ;;  %v3249_v48 = vor.u32 %v4079_v40, %v3246_v63  ;;  %v3322_v63 = vld [vmem:[%s4452_s23 + $0x1e4] sm:$0xf0] }
 0x1b7   : > { %v2212_v25 = vpop.f32.mrf.mxu2  ;;  %v1936_v4 = vpop.f32.mrf.mxu0 }
 0x1b8   : > { %5480 = vst [vmem:[#allocation11_spill] sm:$0xff] %v4867_v27  ;;  %v4869_v55 = vadd.f32 %v2212_v25, %v2074_v46  ;;  %v2075_v31 = vpop.f32.mrf.mxu1  ;;  %v3253_v25 = vor.u32 %v4083_v12, %v3252_v62  ;;  %v3272_v62 = vld [vmem:[%s4452_s23 + $0x160] sm:$0xf]  ;;  %v4089_v12 = vld [vmem:[%s4452_s23 + $0x178] sm:$0xf0] }
 0x1b9   : > { %v2076_v41 = vadd.f32 %v2075_v31, %v1936_v4 }
 0x1bd   : > { %v2254_v18 = vpop.f32.mrf.mxu3 }
 0x1be   : > { %v4881_v60 = vadd.f32 %v2254_v18, %v2116_v57  ;;  %v4099_v57 = vld [vmem:[%s4452_s23 + $0x1cc] sm:$0xf]  ;;  %v4086_v18 = vld [vmem:[%s4452_s23 + $0x164] sm:$0xf] }
 0x1bf   : > { %v2214_v21 = vpop.f32.mrf.mxu2  ;;  %v1939_v50 = vpop.f32.mrf.mxu0 }
 0x1c0   : > { %5481 = vst [vmem:[#allocation12_spill] sm:$0xff] %v4881_v60  ;;  %v4883_v46 = vadd.f32 %v2214_v21, %v2076_v41  ;;  %v2078_v4 = vpop.f32.mrf.mxu1  ;;  %v2121_v21 = vadd.f32 %v4776_v52, %v4673_v53 }
 0x1c1   : > { %v2079_v31 = vadd.f32 %v2078_v4, %v1939_v50  ;;  %v3273_v4 = vor.u32 %v4089_v12, %v3272_v62 }
 0x1c2   : > { %2305 = vmatmul.bf16.gmra.mxu3 %v3297_v14  ;;  %2434 = vmatmul.bf16.gmra.mxu0 %v3245_v43  ;;  %v3274_v14 = vld [vmem:[%s4452_s23 + $0x17c] sm:$0xf0] }
 0x1c3   : > { %2573 = vmatmul.bf16.gmra.mxu1 %v3249_v48 }
 0x1c4   : > { %4019 = vmatmul.msk.bf16.gmra.mxu2 %vm1766_vm0, %v3253_v25  ;;  %v3325_v25 = vor.u32 %v4099_v57, %v3322_v63 }
 0x1c5   : > { %v2257_v44 = vpop.f32.mrf.mxu3 }
 0x1c6   : > { %v4888_v34 = vadd.f32 %v2257_v44, %v2119_v11  ;;  %v3277_v44 = vor.u32 %v4086_v18, %v3274_v14  ;;  %v4106_v18 = vld [vmem:[%s4452_s23 + $0x204] sm:$0xf]  ;;  %v3300_v14 = vld [vmem:[%s4452_s23 + $0x198] sm:$0xf] }
 0x1c7   : > { %v2217_v41 = vpop.f32.mrf.mxu2  ;;  %v1941_v32 = vpop.f32.mrf.mxu0 }
 0x1c8   : > { %5482 = vst [vmem:[#allocation13_spill] sm:$0xff] %v4888_v34  ;;  %v4890_v3 = vadd.f32 %v2217_v41, %v2079_v31  ;;  %v2080_v16 = vpop.f32.mrf.mxu1  ;;  %v3281_v41 = vor.u32 %v4090_v13, %v3280_v33  ;;  %v4096_v33 = vld [vmem:[%s4452_s23 + $0x1b0] sm:$0xf0]  ;;  %v4093_v13 = vld [vmem:[%s4452_s23 + $0x19c] sm:$0xf] }
 0x1c9   : > { %v2081_v40 = vadd.f32 %v2080_v16, %v1941_v32 }
 0x1cd   : > { %v2259_v43 = vpop.f32.mrf.mxu3 }
 0x1ce   : > { %v4902_v48 = vadd.f32 %v2259_v43, %v2121_v21  ;;  %v3350_v21 = vld [vmem:[%s4452_s23 + $0x21c] sm:$0xf0]  ;;  %v3302_v43 = vld [vmem:[%s4452_s23 + $0x1b4] sm:$0xf0] }
 0x1cf   : > { %v2219_v50 = vpop.f32.mrf.mxu2  ;;  %v1944_v11 = vpop.f32.mrf.mxu0 }
 0x1d0   : > { %5483 = vst [vmem:[#allocation14_spill] sm:$0xff] %v4902_v48  ;;  %v4904_v31 = vadd.f32 %v2219_v50, %v2081_v40  ;;  %v2083_v32 = vpop.f32.mrf.mxu1  ;;  %v3308_v50 = vld [vmem:[%s4452_s23 + $0x1a0] sm:$0xf] }
 0x1d1   : > { %v2084_v53 = vadd.f32 %v2083_v32, %v1944_v11  ;;  %v3301_v32 = vor.u32 %v4096_v33, %v3300_v14 }
 0x1d2   : > { %2310 = vmatmul.bf16.gmra.mxu3 %v3325_v25  ;;  %2439 = vmatmul.bf16.gmra.mxu0 %v3273_v4  ;;  %v4097_v25 = vld [vmem:[%s4452_s23 + $0x1b8] sm:$0xf0] }
 0x1d3   : > { %2578 = vmatmul.bf16.gmra.mxu1 %v3277_v44 }
 0x1d4   : > { %4020 = vmatmul.msk.bf16.gmra.mxu2 %vm1766_vm0, %v3281_v41  ;;  %v3353_v41 = vor.u32 %v4106_v18, %v3350_v21 }
 0x1d5   : > { %v2271_v52 = vpop.f32.mrf.mxu3 }
 0x1d6   : > { %v2272_v40 = vadd.f32 %v2271_v52, %v4575_v22  ;;  %v3305_v52 = vor.u32 %v4093_v13, %v3302_v43  ;;  %v4113_v43 = vld [vmem:[%s4452_s23 + $0x23c] sm:$0xf] }
 0x1d7   : > { %v2222_v16 = vpop.f32.mrf.mxu2  ;;  %v1946_v63 = vpop.f32.mrf.mxu0 }
 0x1d8   : > { %v4908_v57 = vadd.f32 %v2222_v16, %v2084_v53  ;;  %v2085_v62 = vpop.f32.mrf.mxu1  ;;  %v3309_v16 = vor.u32 %v4097_v25, %v3308_v50  ;;  %v3378_v50 = vld [vmem:[%s4452_s23 + $0x254] sm:$0xf0]  ;;  %v3328_v25 = vld [vmem:[%s4452_s23 + $0x1d0] sm:$0xf] }
 0x1d9   : > { %v2086_v12 = vadd.f32 %v2085_v62, %v1946_v63  ;;  %v3381_v48 = vor.u32 %v4113_v43, %v3378_v50 }
 0x1dd   : > { %v2273_v4 = vpop.f32.mrf.mxu3 }
 0x1de   : > { %v2274_v44 = vadd.f32 %v2273_v4, %v4588_v37  ;;  %v4103_v4 = vld [vmem:[%s4452_s23 + $0x1e8] sm:$0xf0] }
 0x1df   : > { %v2224_v11 = vpop.f32.mrf.mxu2  ;;  %v1949_v53 = vpop.f32.mrf.mxu0  ;;  %v3329_v34 = vor.u32 %v4103_v4, %v3328_v25 }
 0x1e0   : > { %v4919_v22 = vadd.f32 %v2224_v11, %v2086_v12  ;;  %v2088_v63 = vpop.f32.mrf.mxu1  ;;  %v4100_v11 = vld [vmem:[%s4452_s23 + $0x1d4] sm:$0xf] }
 0x1e1   : > { %v2089_v62 = vadd.f32 %v2088_v63, %v1949_v53  ;;  %v4104_v53 = vld [vmem:[%s4452_s23 + $0x1f0] sm:$0xf0] }
 0x1e2   : > { %2315 = vmatmul.bf16.gmra.mxu3 %v3353_v41  ;;  %2444 = vmatmul.bf16.gmra.mxu0 %v3301_v32  ;;  %v3330_v41 = vld [vmem:[%s4452_s23 + $0x1ec] sm:$0xf0]  ;;  %v3336_v32 = vld [vmem:[%s4452_s23 + $0x1d8] sm:$0xf] }
 0x1e3   : > { %2583 = vmatmul.bf16.gmra.mxu1 %v3305_v52 }
 0x1e4   : > { %4021 = vmatmul.msk.bf16.gmra.mxu2 %vm1766_vm0, %v3309_v16 }
 0x1e5   : > { %v2276_v37 = vpop.f32.mrf.mxu3 }
 0x1e6   : > { %v2277_v18 = vadd.f32 %v2276_v37, %v4592_v45  ;;  %v3333_v37 = vor.u32 %v4100_v11, %v3330_v41  ;;  %v4120_v41 = vld [vmem:[%s4452_s23 + $0x274] sm:$0xf] }
 0x1e7   : > { %v2227_v12 = vpop.f32.mrf.mxu2  ;;  %v1951_v14 = vpop.f32.mrf.mxu0 }
 0x1e8   : > { %v4923_v21 = vadd.f32 %v2227_v12, %v2089_v62  ;;  %v2090_v33 = vpop.f32.mrf.mxu1  ;;  %v3337_v12 = vor.u32 %v4104_v53, %v3336_v32  ;;  %v3356_v32 = vld [vmem:[%s4452_s23 + $0x208] sm:$0xf]  ;;  %v4107_v53 = vld [vmem:[%s4452_s23 + $0x20c] sm:$0xf] }
 0x1e9   : > { %v2091_v13 = vadd.f32 %v2090_v33, %v1951_v14 }
 0x1ed   : > { %v2278_v52 = vpop.f32.mrf.mxu3 }
 0x1ee   : > { %v2279_v16 = vadd.f32 %v2278_v52, %v4604_v61  ;;  %v3358_v52 = vld [vmem:[%s4452_s23 + $0x224] sm:$0xf0] }
 0x1ef   : > { %v2229_v63 = vpop.f32.mrf.mxu2  ;;  %v2410_v62 = vpop.f32.mrf.mxu0 }
 0x1f0   : > { %v4934_v45 = vadd.f32 %v2229_v63, %v2091_v13  ;;  %v2411_v14 = vadd.f32 %v2410_v62, %v2272_v40  ;;  %v2549_v33 = vpop.f32.mrf.mxu1  ;;  %v3364_v63 = vld [vmem:[%s4452_s23 + $0x210] sm:$0xf]  ;;  %v4111_v62 = vld [vmem:[%s4452_s23 + $0x228] sm:$0xf0] }
 0x1f2   : > { %v2550_v60 = vadd.f32 %v2549_v33, %v2411_v14  ;;  %2320 = vmatmul.bf16.gmra.mxu3 %v3381_v48  ;;  %2449 = vmatmul.bf16.gmra.mxu0 %v3329_v34  ;;  %v3406_v48 = vld [vmem:[%s4452_s23 + $0x28c] sm:$0xf0]  ;;  %v4110_v34 = vld [vmem:[%s4452_s23 + $0x220] sm:$0xf0] }
 0x1f3   : > { %2588 = vmatmul.bf16.gmra.mxu1 %v3333_v37  ;;  %v3357_v33 = vor.u32 %v4110_v34, %v3356_v32 }
 0x1f4   : > { %4022 = vmatmul.msk.bf16.gmra.mxu2 %vm1766_vm0, %v3337_v12 }
 0x1f5   : > { %v2281_v61 = vpop.f32.mrf.mxu3 }
 0x1f6   : > { %v2282_v13 = vadd.f32 %v2281_v61, %v4608_v7  ;;  %v3409_v7 = vor.u32 %v4120_v41, %v3406_v48 }
 0x1f7   : > { %v2688_v43 = vpop.f32.mrf.mxu2  ;;  %v2412_v40 = vpop.f32.mrf.mxu0 }
 0x1f8   : > { %v4938_v50 = vadd.f32 %v2688_v43, %v2550_v60  ;;  %v2413_v25 = vadd.f32 %v2412_v40, %v2274_v44  ;;  %v2551_v4 = vpop.f32.mrf.mxu1  ;;  %v3361_v44 = vor.u32 %v4107_v53, %v3358_v52  ;;  %v3365_v43 = vor.u32 %v4111_v62, %v3364_v63  ;;  %v4127_v52 = vld [vmem:[%s4452_s23 + $0x2ac] sm:$0xf]  ;;  %v3434_v63 = vld [vmem:[%s4452_s23 + $0x2c4] sm:$0xf0]  ;;  %v3384_v62 = vld [vmem:[%s4452_s23 + $0x240] sm:$0xf] }
 0x1fa   : > { %v2552_v11 = vadd.f32 %v2551_v4, %v2413_v25 }
 0x1fd   : > { %v2283_v37 = vpop.f32.mrf.mxu3 }
 0x1fe   : > { %v2284_v12 = vadd.f32 %v2283_v37, %v4621_v17  ;;  %v4117_v37 = vld [vmem:[%s4452_s23 + $0x258] sm:$0xf0] }
 0x1ff   : > { %v2690_v14 = vpop.f32.mrf.mxu2  ;;  %v2415_v61 = vpop.f32.mrf.mxu0 }
 0x200   : > { %v4949_v60 = vadd.f32 %v2690_v14, %v2552_v11  ;;  %v2416_v40 = vadd.f32 %v2415_v61, %v2277_v18  ;;  %v2554_v25 = vpop.f32.mrf.mxu1  ;;  %v4114_v14 = vld [vmem:[%s4452_s23 + $0x244] sm:$0xf] }
 0x201   : > { %v4118_v61 = vld [vmem:[%s4452_s23 + $0x260] sm:$0xf0] }
 0x202   : > { %v2555_v4 = vadd.f32 %v2554_v25, %v2416_v40  ;;  %2325 = vmatmul.bf16.gmra.mxu3 %v3409_v7  ;;  %2454 = vmatmul.bf16.gmra.mxu0 %v3357_v33  ;;  %v3386_v7 = vld [vmem:[%s4452_s23 + $0x25c] sm:$0xf0]  ;;  %v3392_v33 = vld [vmem:[%s4452_s23 + $0x248] sm:$0xf]  ;;  %v3385_v25 = vor.u32 %v4117_v37, %v3384_v62 }
 0x203   : > { %2593 = vmatmul.bf16.gmra.mxu1 %v3361_v44 }
 0x204   : > { %4023 = vmatmul.msk.bf16.gmra.mxu2 %vm1766_vm0, %v3365_v43 }
 0x205   : > { %v2286_v17 = vpop.f32.mrf.mxu3 }
 0x206   : > { %v2287_v11 = vadd.f32 %v2286_v17, %v4626_v35  ;;  %v3437_v35 = vor.u32 %v4127_v52, %v3434_v63 }
 0x207   : > { %v2693_v41 = vpop.f32.mrf.mxu2  ;;  %v2417_v18 = vpop.f32.mrf.mxu0 }
 0x208   : > { %v4953_v48 = vadd.f32 %v2693_v41, %v2555_v4  ;;  %v2418_v32 = vadd.f32 %v2417_v18, %v2279_v16  ;;  %v2556_v34 = vpop.f32.mrf.mxu1  ;;  %v3389_v16 = vor.u32 %v4114_v14, %v3386_v7  ;;  %v3393_v41 = vor.u32 %v4118_v61, %v3392_v33  ;;  %v4134_v7 = vld [vmem:[%s4452_s23 + $0x2e4] sm:$0xf]  ;;  %v3462_v33 = vld [vmem:[%s4452_s23 + $0x2fc] sm:$0xf0]  ;;  %v3412_v61 = vld [vmem:[%s4452_s23 + $0x278] sm:$0xf] }
 0x20a   : > { %v2557_v53 = vadd.f32 %v2556_v34, %v2418_v32 }
 0x20d   : > { %v2288_v44 = vpop.f32.mrf.mxu3 }
 0x20e   : > { %v2289_v43 = vadd.f32 %v2288_v44, %v4639_v54  ;;  %v4124_v44 = vld [vmem:[%s4452_s23 + $0x290] sm:$0xf0] }
 0x20f   : > { %v2695_v40 = vpop.f32.mrf.mxu2  ;;  %v2420_v17 = vpop.f32.mrf.mxu0 }
 0x210   : > { %v4964_v4 = vadd.f32 %v2695_v40, %v2557_v53  ;;  %v2421_v18 = vadd.f32 %v2420_v17, %v2282_v13  ;;  %v2559_v32 = vpop.f32.mrf.mxu1  ;;  %v4121_v40 = vld [vmem:[%s4452_s23 + $0x27c] sm:$0xf] }
 0x211   : > { %v4125_v17 = vld [vmem:[%s4452_s23 + $0x298] sm:$0xf0] }
 0x212   : > { %v2560_v34 = vadd.f32 %v2559_v32, %v2421_v18  ;;  %2330 = vmatmul.bf16.gmra.mxu3 %v3437_v35  ;;  %2459 = vmatmul.bf16.gmra.mxu0 %v3385_v25  ;;  %v3414_v35 = vld [vmem:[%s4452_s23 + $0x294] sm:$0xf0]  ;;  %v3420_v25 = vld [vmem:[%s4452_s23 + $0x280] sm:$0xf]  ;;  %v3413_v32 = vor.u32 %v4124_v44, %v3412_v61 }
 0x213   : > { %2598 = vmatmul.bf16.gmra.mxu1 %v3389_v16 }
 0x214   : > { %4024 = vmatmul.msk.bf16.gmra.mxu2 %vm1766_vm0, %v3393_v41 }
 0x215   : > { %v2291_v54 = vpop.f32.mrf.mxu3 }
 0x216   : > { %v2292_v53 = vadd.f32 %v2291_v54, %v4643_v0  ;;  %v3465_v0 = vor.u32 %v4134_v7, %v3462_v33 }
 0x217   : > { %v2698_v52 = vpop.f32.mrf.mxu2  ;;  %v2422_v13 = vpop.f32.mrf.mxu0 }
 0x218   : > { %v4968_v63 = vadd.f32 %v2698_v52, %v2560_v34  ;;  %v2423_v62 = vadd.f32 %v2422_v13, %v2284_v12  ;;  %v2561_v37 = vpop.f32.mrf.mxu1  ;;  %v3417_v12 = vor.u32 %v4121_v40, %v3414_v35  ;;  %v3421_v52 = vor.u32 %v4125_v17, %v3420_v25  ;;  %v4141_v35 = vld [vmem:[%s4452_s23 + $0x31c] sm:$0xf]  ;;  %v3490_v25 = vld [vmem:[%s4452_s23 + $0x334] sm:$0xf0]  ;;  %v3440_v17 = vld [vmem:[%s4452_s23 + $0x2b0] sm:$0xf] }
 0x21a   : > { %v2562_v14 = vadd.f32 %v2561_v37, %v2423_v62 }
 0x21d   : > { %v2293_v16 = vpop.f32.mrf.mxu3 }
 0x21e   : > { %v2294_v41 = vadd.f32 %v2293_v16, %v4656_v24  ;;  %v4131_v16 = vld [vmem:[%s4452_s23 + $0x2c8] sm:$0xf0] }
 0x21f   : > { %v2700_v18 = vpop.f32.mrf.mxu2  ;;  %v2425_v54 = vpop.f32.mrf.mxu0 }
 0x220   : > { %v4979_v34 = vadd.f32 %v2700_v18, %v2562_v14  ;;  %v2426_v13 = vadd.f32 %v2425_v54, %v2287_v11  ;;  %v2564_v62 = vpop.f32.mrf.mxu1  ;;  %v4128_v18 = vld [vmem:[%s4452_s23 + $0x2b4] sm:$0xf] }
 0x221   : > { %v4132_v54 = vld [vmem:[%s4452_s23 + $0x2d0] sm:$0xf0] }
 0x222   : > { %v2565_v37 = vadd.f32 %v2564_v62, %v2426_v13  ;;  %2335 = vmatmul.bf16.gmra.mxu3 %v3465_v0  ;;  %2464 = vmatmul.bf16.gmra.mxu0 %v3413_v32  ;;  %v3442_v0 = vld [vmem:[%s4452_s23 + $0x2cc] sm:$0xf0]  ;;  %v3448_v32 = vld [vmem:[%s4452_s23 + $0x2b8] sm:$0xf]  ;;  %v3441_v62 = vor.u32 %v4131_v16, %v3440_v17 }
 0x223   : > { %2603 = vmatmul.bf16.gmra.mxu1 %v3417_v12 }
 0x224   : > { %4025 = vmatmul.msk.bf16.gmra.mxu2 %vm1766_vm0, %v3421_v52 }
 0x225   : > { %v2296_v24 = vpop.f32.mrf.mxu3 }
 0x226   : > { %v2297_v14 = vadd.f32 %v2296_v24, %v4662_v36  ;;  %v3493_v36 = vor.u32 %v4141_v35, %v3490_v25 }
 0x227   : > { %v2703_v7 = vpop.f32.mrf.mxu2  ;;  %v2427_v11 = vpop.f32.mrf.mxu0 }
 0x228   : > { %v4983_v33 = vadd.f32 %v2703_v7, %v2565_v37  ;;  %v2428_v61 = vadd.f32 %v2427_v11, %v2289_v43  ;;  %v2566_v44 = vpop.f32.mrf.mxu1  ;;  %v3445_v43 = vor.u32 %v4128_v18, %v3442_v0  ;;  %v3449_v7 = vor.u32 %v4132_v54, %v3448_v32  ;;  %v4148_v0 = vld [vmem:[%s4452_s23 + $0x354] sm:$0xf]  ;;  %v3518_v32 = vld [vmem:[%s4452_s23 + $0x36c] sm:$0xf0]  ;;  %v3468_v54 = vld [vmem:[%s4452_s23 + $0x2e8] sm:$0xf] }
 0x22a   : > { %v2567_v40 = vadd.f32 %v2566_v44, %v2428_v61 }
 0x22d   : > { %v2298_v12 = vpop.f32.mrf.mxu3 }
 0x22e   : > { %v2299_v52 = vadd.f32 %v2298_v12, %v4675_v59  ;;  %v4138_v12 = vld [vmem:[%s4452_s23 + $0x300] sm:$0xf0] }
 0x22f   : > { %v2705_v13 = vpop.f32.mrf.mxu2  ;;  %v2430_v24 = vpop.f32.mrf.mxu0 }
 0x230   : > { %v4994_v37 = vadd.f32 %v2705_v13, %v2567_v40  ;;  %v2431_v11 = vadd.f32 %v2430_v24, %v2292_v53  ;;  %v2569_v61 = vpop.f32.mrf.mxu1  ;;  %v4135_v13 = vld [vmem:[%s4452_s23 + $0x2ec] sm:$0xf] }
 0x231   : > { %v4139_v24 = vld [vmem:[%s4452_s23 + $0x308] sm:$0xf0] }
 0x232   : > { %v2570_v44 = vadd.f32 %v2569_v61, %v2431_v11  ;;  %2340 = vmatmul.bf16.gmra.mxu3 %v3493_v36  ;;  %2469 = vmatmul.bf16.gmra.mxu0 %v3441_v62  ;;  %v3470_v36 = vld [vmem:[%s4452_s23 + $0x304] sm:$0xf0]  ;;  %v3476_v62 = vld [vmem:[%s4452_s23 + $0x2f0] sm:$0xf]  ;;  %v3469_v61 = vor.u32 %v4138_v12, %v3468_v54 }
 0x233   : > { %2608 = vmatmul.bf16.gmra.mxu1 %v3445_v43 }
 0x234   : > { %4026 = vmatmul.msk.bf16.gmra.mxu2 %vm1766_vm0, %v3449_v7 }
 0x235   : > { %v2301_v59 = vpop.f32.mrf.mxu3 }
 0x236   : > { %v2302_v40 = vadd.f32 %v2301_v59, %v4680_v2  ;;  %v3521_v2 = vor.u32 %v4148_v0, %v3518_v32 }
 0x237   : > { %v2708_v35 = vpop.f32.mrf.mxu2  ;;  %v2432_v53 = vpop.f32.mrf.mxu0 }
 0x238   : > { %v4998_v25 = vadd.f32 %v2708_v35, %v2570_v44  ;;  %v2433_v17 = vadd.f32 %v2432_v53, %v2294_v41  ;;  %v2571_v16 = vpop.f32.mrf.mxu1  ;;  %v3473_v41 = vor.u32 %v4135_v13, %v3470_v36  ;;  %v3477_v35 = vor.u32 %v4139_v24, %v3476_v62  ;;  %v4155_v36 = vld [vmem:[%s4452_s23 + $0x38c] sm:$0xf]  ;;  %v3546_v62 = vld [vmem:[%s4452_s23 + $0x3a4] sm:$0xf0]  ;;  %v3496_v24 = vld [vmem:[%s4452_s23 + $0x320] sm:$0xf] }
 0x23a   : > { %v2572_v18 = vadd.f32 %v2571_v16, %v2433_v17 }
 0x23d   : > { %v2303_v43 = vpop.f32.mrf.mxu3 }
 0x23e   : > { %v2304_v7 = vadd.f32 %v2303_v43, %v4693_v38  ;;  %v4145_v43 = vld [vmem:[%s4452_s23 + $0x338] sm:$0xf0] }
 0x23f   : > { %v2710_v11 = vpop.f32.mrf.mxu2  ;;  %v2435_v59 = vpop.f32.mrf.mxu0 }
 0x240   : > { %v5009_v44 = vadd.f32 %v2710_v11, %v2572_v18  ;;  %v2436_v53 = vadd.f32 %v2435_v59, %v2297_v14  ;;  %v2574_v17 = vpop.f32.mrf.mxu1  ;;  %v4142_v11 = vld [vmem:[%s4452_s23 + $0x324] sm:$0xf] }
 0x241   : > { %v4146_v59 = vld [vmem:[%s4452_s23 + $0x340] sm:$0xf0] }
 0x242   : > { %v2575_v16 = vadd.f32 %v2574_v17, %v2436_v53  ;;  %2345 = vmatmul.bf16.gmra.mxu3 %v3521_v2  ;;  %2474 = vmatmul.bf16.gmra.mxu0 %v3469_v61  ;;  %v3498_v2 = vld [vmem:[%s4452_s23 + $0x33c] sm:$0xf0]  ;;  %v3504_v61 = vld [vmem:[%s4452_s23 + $0x328] sm:$0xf]  ;;  %v3497_v17 = vor.u32 %v4145_v43, %v3496_v24 }
 0x243   : > { %2613 = vmatmul.bf16.gmra.mxu1 %v3473_v41 }
 0x244   : > { %4027 = vmatmul.msk.bf16.gmra.mxu2 %vm1766_vm0, %v3477_v35 }
 0x245   : > { %v2306_v38 = vpop.f32.mrf.mxu3 }
 0x246   : > { %v2307_v18 = vadd.f32 %v2306_v38, %v4698_v49  ;;  %v3549_v49 = vor.u32 %v4155_v36, %v3546_v62 }
 0x247   : > { %v2713_v0 = vpop.f32.mrf.mxu2  ;;  %v2437_v14 = vpop.f32.mrf.mxu0 }
 0x248   : > { %v5013_v32 = vadd.f32 %v2713_v0, %v2575_v16  ;;  %v2438_v54 = vadd.f32 %v2437_v14, %v2299_v52  ;;  %v2576_v12 = vpop.f32.mrf.mxu1  ;;  %v3501_v52 = vor.u32 %v4142_v11, %v3498_v2  ;;  %v3505_v0 = vor.u32 %v4146_v59, %v3504_v61  ;;  %v4162_v2 = vld [vmem:[%s4452_s23 + $0x3c4] sm:$0xf]  ;;  %v3574_v61 = vld [vmem:[%s4452_s23 + $0x3dc] sm:$0xf0]  ;;  %v3524_v59 = vld [vmem:[%s4452_s23 + $0x358] sm:$0xf] }
 0x24a   : > { %v2577_v13 = vadd.f32 %v2576_v12, %v2438_v54 }
 0x24d   : > { %v2308_v41 = vpop.f32.mrf.mxu3 }
 0x24e   : > { %v2309_v35 = vadd.f32 %v2308_v41, %v4713_v19  ;;  %v4152_v41 = vld [vmem:[%s4452_s23 + $0x370] sm:$0xf0] }
 0x24f   : > { %v2715_v53 = vpop.f32.mrf.mxu2  ;;  %v2440_v38 = vpop.f32.mrf.mxu0 }
 0x250   : > { %v5024_v16 = vadd.f32 %v2715_v53, %v2577_v13  ;;  %v2441_v14 = vadd.f32 %v2440_v38, %v2302_v40  ;;  %v2579_v54 = vpop.f32.mrf.mxu1  ;;  %v4149_v53 = vld [vmem:[%s4452_s23 + $0x35c] sm:$0xf] }
 0x251   : > { %v4153_v38 = vld [vmem:[%s4452_s23 + $0x378] sm:$0xf0] }
 0x252   : > { %v2580_v12 = vadd.f32 %v2579_v54, %v2441_v14  ;;  %2350 = vmatmul.bf16.gmra.mxu3 %v3549_v49  ;;  %2479 = vmatmul.bf16.gmra.mxu0 %v3497_v17  ;;  %v3526_v49 = vld [vmem:[%s4452_s23 + $0x374] sm:$0xf0]  ;;  %v3532_v17 = vld [vmem:[%s4452_s23 + $0x360] sm:$0xf]  ;;  %v3577_v14 = vor.u32 %v4162_v2, %v3574_v61  ;;  %v3525_v54 = vor.u32 %v4152_v41, %v3524_v59 }
 0x253   : > { %2618 = vmatmul.bf16.gmra.mxu1 %v3501_v52 }
 0x254   : > { %4028 = vmatmul.msk.bf16.gmra.mxu2 %vm1766_vm0, %v3505_v0 }
 0x255   : > { %v2311_v19 = vpop.f32.mrf.mxu3 }
 0x256   : > { %v5028_v13 = vadd.f32 %v2311_v19, %v4718_v39 }
 0x257   : > { %v2718_v36 = vpop.f32.mrf.mxu2  ;;  %v2442_v62 = vpop.f32.mrf.mxu0 }
 0x258   : > { %v5030_v40 = vadd.f32 %v2718_v36, %v2580_v12  ;;  %v2443_v24 = vadd.f32 %v2442_v62, %v2304_v7  ;;  %v2581_v43 = vpop.f32.mrf.mxu1  ;;  %v3529_v7 = vor.u32 %v4149_v53, %v3526_v49  ;;  %v3533_v36 = vor.u32 %v4153_v38, %v3532_v17 }
 0x259   : > { %v5056_v53 = vsel %vm2818_vm1, %v4949_v60, -inf }
 0x25a   : > { %v2582_v11 = vadd.f32 %v2581_v43, %v2443_v24  ;;  %v5043_v43 = vsel %vm2818_vm1, %v4938_v50, -inf }
 0x25d   : > { %v2313_v52 = vpop.f32.mrf.mxu3 }
 0x25e   : > { %v2314_v39 = vadd.f32 %v2313_v52, %v4730_v6  ;;  %v3602_v52 = vld [vmem:[%s4452_s23 + $0x414] sm:$0xf0] }
 0x25f   : > { %v2720_v0 = vpop.f32.mrf.mxu2  ;;  %v2445_v19 = vpop.f32.mrf.mxu0 }
 0x260   : > { %v2721_v12 = vadd.f32 %v2720_v0, %v2582_v11  ;;  %v2446_v62 = vadd.f32 %v2445_v19, %v2307_v18  ;;  %v2584_v24 = vpop.f32.mrf.mxu1  ;;  %v3552_v0 = vld [vmem:[%s4452_s23 + $0x390] sm:$0xf]  ;;  %v3560_v19 = vld [vmem:[%s4452_s23 + $0x398] sm:$0xf] }
 0x262   : > { %v5046_v27 = vsel %vm2818_vm1, %v2721_v12, -inf  ;;  %v2585_v6 = vadd.f32 %v2584_v24, %v2446_v62  ;;  %2355 = vmatmul.bf16.gmra.mxu3 %v3577_v14  ;;  %2484 = vmatmul.bf16.gmra.mxu0 %v3525_v54  ;;  %v4159_v14 = vld [vmem:[%s4452_s23 + $0x3a8] sm:$0xf0]  ;;  %v4156_v54 = vld [vmem:[%s4452_s23 + $0x394] sm:$0xf] }
 0x263   : > { %2623 = vmatmul.bf16.gmra.mxu1 %v3529_v7  ;;  %v3554_v12 = vld [vmem:[%s4452_s23 + $0x3ac] sm:$0xf0]  ;;  %v3553_v24 = vor.u32 %v4159_v14, %v3552_v0 }
 0x264   : > { %4029 = vmatmul.msk.bf16.gmra.mxu2 %vm1766_vm0, %v3533_v36 }
 0x265   : > { %v2316_v18 = vpop.f32.mrf.mxu3 }
 0x266   : > { %v5052_v50 = vadd.f32 %v2316_v18, %v4734_v23  ;;  %v4169_v23 = vld [vmem:[%s4452_s23 + $0x3fc] sm:$0xf] }
 0x267   : > { %v2723_v11 = vpop.f32.mrf.mxu2  ;;  %v2447_v61 = vpop.f32.mrf.mxu0  ;;  %v3605_v62 = vor.u32 %v4169_v23, %v3602_v52 }
 0x268   : > { %v2724_v2 = vadd.f32 %v2723_v11, %v2585_v6  ;;  %v2448_v59 = vadd.f32 %v2447_v61, %v2309_v35  ;;  %v2586_v41 = vpop.f32.mrf.mxu1  ;;  %v4160_v35 = vld [vmem:[%s4452_s23 + $0x3b0] sm:$0xf0]  ;;  %v3557_v11 = vor.u32 %v4156_v54, %v3554_v12  ;;  %v5088_v54 = vsel %vm2818_vm1, %v4964_v4, -inf }
 0x26a   : > { %v5059_v49 = vsel %vm2818_vm1, %v2724_v2, -inf  ;;  %v2587_v38 = vadd.f32 %v2586_v41, %v2448_v59  ;;  %v3561_v2 = vor.u32 %v4160_v35, %v3560_v19  ;;  %v5075_v41 = vsel %vm2818_vm1, %v4953_v48, -inf }
 0x26b   : > { %v5107_v19 = vsel %vm2818_vm1, %v4968_v63, -inf  ;;  %v5485_v63 = vld [vmem:[#allocation3_spill] sm:$0xff] }
 0x26d   : > { %v2318_v7 = vpop.f32.mrf.mxu3 }
 0x26e   : > { %v2319_v36 = vadd.f32 %v2318_v7, %v4746_v56 }
 0x26f   : > { %v2725_v60 = vpop.f32.mrf.mxu2  ;;  %v2450_v18 = vpop.f32.mrf.mxu0 }
 0x270   : > { %v2726_v6 = vadd.f32 %v2725_v60, %v2587_v38  ;;  %v2451_v61 = vadd.f32 %v2450_v18, %v5028_v13  ;;  %v2589_v59 = vpop.f32.mrf.mxu1  ;;  %v3630_v60 = vld [vmem:[%s4452_s23 + $0x44c] sm:$0xf0]  ;;  %v3582_v18 = vld [vmem:[%s4452_s23 + $0x3e4] sm:$0xf0] }
 0x272   : > { %v5078_v17 = vsel %vm2818_vm1, %v2726_v6, -inf  ;;  %v2590_v7 = vadd.f32 %v2589_v59, %v2451_v61  ;;  %2360 = vmatmul.bf16.gmra.mxu3 %v3605_v62  ;;  %2489 = vmatmul.bf16.gmra.mxu0 %v3553_v24  ;;  %v3580_v62 = vld [vmem:[%s4452_s23 + $0x3c8] sm:$0xf]  ;;  %v4166_v24 = vld [vmem:[%s4452_s23 + $0x3e0] sm:$0xf0] }
 0x273   : > { %2628 = vmatmul.bf16.gmra.mxu1 %v3557_v11  ;;  %v4163_v6 = vld [vmem:[%s4452_s23 + $0x3cc] sm:$0xf]  ;;  %v3588_v11 = vld [vmem:[%s4452_s23 + $0x3d0] sm:$0xf]  ;;  %v5484_v61 = vld [vmem:[#allocation2_spill] sm:$0xff] }
 0x274   : > { %4030 = vmatmul.msk.bf16.gmra.mxu2 %vm1766_vm0, %v3561_v2 }
 0x275   : > { %v2321_v13 = vpop.f32.mrf.mxu3 }
 0x276   : > { %v5084_v48 = vadd.f32 %v2321_v13, %v4750_v8  ;;  %v4176_v8 = vld [vmem:[%s4452_s23 + $0x434] sm:$0xf]  ;;  %v3581_v13 = vor.u32 %v4166_v24, %v3580_v62 }
 0x277   : > { %v2728_v38 = vpop.f32.mrf.mxu2  ;;  %v2452_v52 = vpop.f32.mrf.mxu0 }
 0x278   : > { %v2729_v23 = vadd.f32 %v2728_v38, %v2590_v7  ;;  %v2453_v0 = vadd.f32 %v2452_v52, %v2314_v39  ;;  %v2591_v14 = vpop.f32.mrf.mxu1  ;;  %v4167_v39 = vld [vmem:[%s4452_s23 + $0x3e8] sm:$0xf0]  ;;  %v3633_v7 = vor.u32 %v4176_v8, %v3630_v60  ;;  %v3585_v52 = vor.u32 %v4163_v6, %v3582_v18 }
 0x279   : > { %v3589_v56 = vor.u32 %v4167_v39, %v3588_v11  ;;  %v5120_v18 = vsel %vm2818_vm1, %v4979_v34, -inf }
 0x27a   : > { %v5091_v12 = vsel %vm2818_vm1, %v2729_v23, -inf  ;;  %v2592_v35 = vadd.f32 %v2591_v14, %v2453_v0 }
 0x27d   : > { %v2323_v2 = vpop.f32.mrf.mxu3 }
 0x27e   : > { %v2324_v59 = vadd.f32 %v2323_v2, %v5484_v61 }
 0x27f   : > { %v2730_v4 = vpop.f32.mrf.mxu2  ;;  %v2455_v23 = vpop.f32.mrf.mxu0 }
 0x280   : > { %v2731_v38 = vadd.f32 %v2730_v4, %v2592_v35  ;;  %v2456_v0 = vadd.f32 %v2455_v23, %v5052_v50  ;;  %v2594_v14 = vpop.f32.mrf.mxu1  ;;  %v4183_v4 = vld [vmem:[%s4452_s23 + $0x46c] sm:$0xf]  ;;  %v4170_v23 = vld [vmem:[%s4452_s23 + $0x404] sm:$0xf] }
 0x282   : > { %v5110_v5 = vsel %vm2818_vm1, %v2731_v38, -inf  ;;  %v2595_v61 = vadd.f32 %v2594_v14, %v2456_v0  ;;  %2365 = vmatmul.bf16.gmra.mxu3 %v3633_v7  ;;  %2494 = vmatmul.bf16.gmra.mxu0 %v3581_v13  ;;  %v3658_v7 = vld [vmem:[%s4452_s23 + $0x484] sm:$0xf0]  ;;  %v3608_v13 = vld [vmem:[%s4452_s23 + $0x400] sm:$0xf] }
 0x283   : > { %2633 = vmatmul.bf16.gmra.mxu1 %v3585_v52  ;;  %v4173_v38 = vld [vmem:[%s4452_s23 + $0x418] sm:$0xf0]  ;;  %v3610_v52 = vld [vmem:[%s4452_s23 + $0x41c] sm:$0xf0]  ;;  %v3616_v0 = vld [vmem:[%s4452_s23 + $0x408] sm:$0xf] }
 0x284   : > { %4031 = vmatmul.msk.bf16.gmra.mxu2 %vm1766_vm0, %v3589_v56  ;;  %v3613_v2 = vor.u32 %v4170_v23, %v3610_v52  ;;  %v5139_v56 = vsel %vm2818_vm1, %v4983_v33, -inf  ;;  %v5487_v33 = vld [vmem:[#allocation6_spill] sm:$0xff]  ;;  %v5152_v52 = vsel %vm2818_vm1, %v4994_v37, -inf }
 0x285   : > { %v2326_v50 = vpop.f32.mrf.mxu3 }
 0x286   : > { %v5116_v35 = vadd.f32 %v2326_v50, %v5485_v63  ;;  %v3661_v63 = vor.u32 %v4183_v4, %v3658_v7 }
 0x287   : > { %v2733_v8 = vpop.f32.mrf.mxu2  ;;  %v2457_v62 = vpop.f32.mrf.mxu0 }
 0x288   : > { %v2734_v60 = vadd.f32 %v2733_v8, %v2595_v61  ;;  %v2458_v24 = vadd.f32 %v2457_v62, %v2319_v36  ;;  %v2596_v6 = vpop.f32.mrf.mxu1  ;;  %v4174_v36 = vld [vmem:[%s4452_s23 + $0x420] sm:$0xf0]  ;;  %v5486_v61 = vld [vmem:[#allocation4_spill] sm:$0xff]  ;;  %v3609_v8 = vor.u32 %v4173_v38, %v3608_v13 }
 0x289   : > { %v3617_v26 = vor.u32 %v4174_v36, %v3616_v0  ;;  %v4190_v36 = vld [vmem:[%s4452_s23 + $0x4a4] sm:$0xf] }
 0x28a   : > { %v5123_v11 = vsel %vm2818_vm1, %v2734_v60, -inf  ;;  %v2597_v39 = vadd.f32 %v2596_v6, %v2458_v24 }
 0x28d   : > { %v2328_v14 = vpop.f32.mrf.mxu3 }
 0x28e   : > { %v2329_v50 = vadd.f32 %v2328_v14, %v5486_v61 }
 0x28f   : > { %v2735_v34 = vpop.f32.mrf.mxu2  ;;  %v2460_v62 = vpop.f32.mrf.mxu0 }
 0x290   : > { %v2736_v60 = vadd.f32 %v2735_v34, %v2597_v39  ;;  %v2461_v24 = vadd.f32 %v2460_v62, %v5084_v48  ;;  %v2599_v6 = vpop.f32.mrf.mxu1  ;;  %v3686_v34 = vld [vmem:[%s4452_s23 + $0x4bc] sm:$0xf0]  ;;  %v3638_v62 = vld [vmem:[%s4452_s23 + $0x454] sm:$0xf0] }
 0x292   : > { %v5142_v29 = vsel %vm2818_vm1, %v2736_v60, -inf  ;;  %v2600_v61 = vadd.f32 %v2599_v6, %v2461_v24  ;;  %2370 = vmatmul.bf16.gmra.mxu3 %v3661_v63  ;;  %2499 = vmatmul.bf16.gmra.mxu0 %v3609_v8  ;;  %v3636_v63 = vld [vmem:[%s4452_s23 + $0x438] sm:$0xf]  ;;  %v4180_v8 = vld [vmem:[%s4452_s23 + $0x450] sm:$0xf0] }
 0x293   : > { %2638 = vmatmul.bf16.gmra.mxu1 %v3613_v2  ;;  %v4177_v60 = vld [vmem:[%s4452_s23 + $0x43c] sm:$0xf]  ;;  %v3644_v24 = vld [vmem:[%s4452_s23 + $0x440] sm:$0xf] }
 0x294   : > { %4032 = vmatmul.msk.bf16.gmra.mxu2 %vm1766_vm0, %v3617_v26  ;;  %v5171_v26 = vsel %vm2818_vm1, %v4998_v25, -inf }
 0x295   : > { %v2331_v48 = vpop.f32.mrf.mxu3 }
 0x296   : > { %v5148_v39 = vadd.f32 %v2331_v48, %v5487_v33  ;;  %v3689_v48 = vor.u32 %v4190_v36, %v3686_v34  ;;  %v3637_v33 = vor.u32 %v4180_v8, %v3636_v63 }
 0x297   : > { %v2738_v4 = vpop.f32.mrf.mxu2  ;;  %v2462_v13 = vpop.f32.mrf.mxu0 }
 0x298   : > { %v2739_v7 = vadd.f32 %v2738_v4, %v2600_v61  ;;  %v2463_v38 = vadd.f32 %v2462_v13, %v2324_v59  ;;  %v2601_v23 = vpop.f32.mrf.mxu1  ;;  %v4181_v59 = vld [vmem:[%s4452_s23 + $0x458] sm:$0xf0]  ;;  %v3641_v13 = vor.u32 %v4177_v60, %v3638_v62  ;;  %v5184_v60 = vsel %vm2818_vm1, %v5009_v44, -inf }
 0x299   : > { %v3645_v14 = vor.u32 %v4181_v59, %v3644_v24  ;;  %v4197_v24 = vld [vmem:[%s4452_s23 + $0x4dc] sm:$0xf]  ;;  %v3714_v59 = vld [vmem:[%s4452_s23 + $0x4f4] sm:$0xf0] }
 0x29a   : > { %v5155_v2 = vsel %vm2818_vm1, %v2739_v7, -inf  ;;  %v2602_v0 = vadd.f32 %v2601_v23, %v2463_v38 }
 0x29d   : > { %v2333_v6 = vpop.f32.mrf.mxu3 }
 0x29e   : > { %v2334_v61 = vadd.f32 %v2333_v6, %v4799_v30 }
 0x29f   : > { %v2740_v37 = vpop.f32.mrf.mxu2  ;;  %v2465_v7 = vpop.f32.mrf.mxu0 }
 0x2a0   : > { %v2741_v4 = vadd.f32 %v2740_v37, %v2602_v0  ;;  %v2466_v38 = vadd.f32 %v2465_v7, %v5116_v35  ;;  %v2604_v23 = vpop.f32.mrf.mxu1  ;;  %v3664_v37 = vld [vmem:[%s4452_s23 + $0x470] sm:$0xf]  ;;  %v4188_v7 = vld [vmem:[%s4452_s23 + $0x490] sm:$0xf0] }
 0x2a2   : > { %v5174_v1 = vsel %vm2818_vm1, %v2741_v4, -inf  ;;  %v2605_v6 = vadd.f32 %v2604_v23, %v2466_v38  ;;  %2375 = vmatmul.bf16.gmra.mxu3 %v3689_v48  ;;  %2504 = vmatmul.bf16.gmra.mxu0 %v3637_v33  ;;  %v4187_v48 = vld [vmem:[%s4452_s23 + $0x488] sm:$0xf0]  ;;  %v4184_v33 = vld [vmem:[%s4452_s23 + $0x474] sm:$0xf]  ;;  %v3717_v23 = vor.u32 %v4197_v24, %v3714_v59 }
 0x2a3   : > { %2643 = vmatmul.bf16.gmra.mxu1 %v3641_v13  ;;  %v3666_v4 = vld [vmem:[%s4452_s23 + $0x48c] sm:$0xf0] }
 0x2a4   : > { %4033 = vmatmul.msk.bf16.gmra.mxu2 %vm1766_vm0, %v3645_v14  ;;  %v5207_v14 = vsel %vm2818_vm1, %v5013_v32, -inf }
 0x2a5   : > { %v2336_v35 = vpop.f32.mrf.mxu3 }
 0x2a6   : > { %v5180_v25 = vadd.f32 %v2336_v35, %v4806_v51 }
 0x2a7   : > { %v2743_v0 = vpop.f32.mrf.mxu2  ;;  %v2467_v34 = vpop.f32.mrf.mxu0 }
 0x2a8   : > { %v2744_v36 = vadd.f32 %v2743_v0, %v2605_v6  ;;  %v2468_v63 = vadd.f32 %v2467_v34, %v2329_v50  ;;  %v2606_v8 = vpop.f32.mrf.mxu1  ;;  %v3672_v50 = vld [vmem:[%s4452_s23 + $0x478] sm:$0xf]  ;;  %v3665_v6 = vor.u32 %v4187_v48, %v3664_v37 }
 0x2a9   : > { %v3673_v34 = vor.u32 %v4188_v7, %v3672_v50  ;;  %v5220_v50 = vsel %vm2818_vm1, %v5024_v16, -inf }
 0x2aa   : > { %v5187_v62 = vsel %vm2818_vm1, %v2744_v36, -inf  ;;  %v2607_v51 = vadd.f32 %v2606_v8, %v2468_v63  ;;  %v3669_v36 = vor.u32 %v4184_v33, %v3666_v4 }
 0x2ad   : > { %v2338_v13 = vpop.f32.mrf.mxu3 }
 0x2ae   : > { %v2339_v44 = vadd.f32 %v2338_v13, %v4820_v42  ;;  %v5239_v13 = vsel %vm2818_vm1, %v5030_v40, -inf }
 0x2af   : > { %v2745_v38 = vpop.f32.mrf.mxu2  ;;  %v2470_v0 = vpop.f32.mrf.mxu0 }
 0x2b0   : > { %v2746_v35 = vadd.f32 %v2745_v38, %v2607_v51  ;;  %v2471_v63 = vadd.f32 %v2470_v0, %v5148_v39  ;;  %v2609_v8 = vpop.f32.mrf.mxu1  ;;  %v4191_v0 = vld [vmem:[%s4452_s23 + $0x4ac] sm:$0xf] }
 0x2b2   : > { %v5210_v42 = vsel %vm2818_vm1, %v2746_v35, -inf  ;;  %v2610_v59 = vadd.f32 %v2609_v8, %v2471_v63  ;;  %2380 = vmatmul.bf16.gmra.mxu3 %v3717_v23  ;;  %2509 = vmatmul.bf16.gmra.mxu0 %v3665_v6  ;;  %v3742_v23 = vld [vmem:[%s4452_s23 + $0x52c] sm:$0xf0]  ;;  %v3692_v6 = vld [vmem:[%s4452_s23 + $0x4a8] sm:$0xf] }
 0x2b3   : > { %2648 = vmatmul.bf16.gmra.mxu1 %v3669_v36  ;;  %v4194_v35 = vld [vmem:[%s4452_s23 + $0x4c0] sm:$0xf0]  ;;  %v3694_v36 = vld [vmem:[%s4452_s23 + $0x4c4] sm:$0xf0] }
 0x2b4   : > { %4034 = vmatmul.msk.bf16.gmra.mxu2 %vm1766_vm0, %v3673_v34  ;;  %v3700_v34 = vld [vmem:[%s4452_s23 + $0x4b0] sm:$0xf] }
 0x2b5   : > { %v2341_v39 = vpop.f32.mrf.mxu3 }
 0x2b6   : > { %v5216_v32 = vadd.f32 %v2341_v39, %v4827_v9  ;;  %v4204_v9 = vld [vmem:[%s4452_s23 + $0x514] sm:$0xf]  ;;  %v3693_v39 = vor.u32 %v4194_v35, %v3692_v6 }
 0x2b7   : > { %v2748_v51 = vpop.f32.mrf.mxu2  ;;  %v2472_v48 = vpop.f32.mrf.mxu0 }
 0x2b8   : > { %v2749_v37 = vadd.f32 %v2748_v51, %v2610_v59  ;;  %v2473_v33 = vadd.f32 %v2472_v48, %v2334_v61  ;;  %v2611_v4 = vpop.f32.mrf.mxu1  ;;  %v4195_v61 = vld [vmem:[%s4452_s23 + $0x4c8] sm:$0xf0]  ;;  %v3745_v59 = vor.u32 %v4204_v9, %v3742_v23  ;;  %v3697_v48 = vor.u32 %v4191_v0, %v3694_v36 }
 0x2b9   : > { %v3701_v24 = vor.u32 %v4195_v61, %v3700_v34  ;;  %v5488_v34 = vmax.f32 %v5043_v43, %v5046_v27 }
 0x2ba   : > { %v5223_v7 = vsel %vm2818_vm1, %v2749_v37, -inf  ;;  %v2612_v38 = vadd.f32 %v2611_v4, %v2473_v33 }
 0x2bd   : > { %v2343_v63 = vpop.f32.mrf.mxu3 }
 0x2be   : > { %v2344_v8 = vadd.f32 %v2343_v63, %v4841_v58 }
 0x2bf   : > { %v2750_v16 = vpop.f32.mrf.mxu2  ;;  %v2475_v37 = vpop.f32.mrf.mxu0 }
 0x2c0   : > { %v2751_v51 = vadd.f32 %v2750_v16, %v2612_v38  ;;  %v2476_v33 = vadd.f32 %v2475_v37, %v5180_v25  ;;  %v2614_v4 = vpop.f32.mrf.mxu1  ;;  %v3770_v16 = vld [vmem:[%s4452_s23 + $0x564] sm:$0xf0] }
 0x2c1   : > { %v3728_v37 = vld [vmem:[%s4452_s23 + $0x4e8] sm:$0xf] }
 0x2c2   : > { %v5242_v30 = vsel %vm2818_vm1, %v2751_v51, -inf  ;;  %v2615_v9 = vadd.f32 %v2614_v4, %v2476_v33  ;;  %2385 = vmatmul.bf16.gmra.mxu3 %v3745_v59  ;;  %2514 = vmatmul.bf16.gmra.mxu0 %v3693_v39  ;;  %v3720_v59 = vld [vmem:[%s4452_s23 + $0x4e0] sm:$0xf]  ;;  %v4201_v39 = vld [vmem:[%s4452_s23 + $0x4f8] sm:$0xf0] }
 0x2c3   : > { %2653 = vmatmul.bf16.gmra.mxu1 %v3697_v48  ;;  %v4198_v51 = vld [vmem:[%s4452_s23 + $0x4e4] sm:$0xf] }
 0x2c4   : > { %4035 = vmatmul.msk.bf16.gmra.mxu2 %vm1766_vm0, %v3701_v24  ;;  %v4211_v24 = vld [vmem:[%s4452_s23 + $0x54c] sm:$0xf]  ;;  %v4202_v48 = vld [vmem:[%s4452_s23 + $0x500] sm:$0xf0] }
 0x2c5   : > { %v2346_v40 = vpop.f32.mrf.mxu3  ;;  %v3729_v43 = vor.u32 %v4202_v48, %v3728_v37  ;;  %v4218_v37 = vld [vmem:[%s4452_s23 + $0x584] sm:$0xf]  ;;  %v3798_v48 = vld [vmem:[%s4452_s23 + $0x59c] sm:$0xf0] }
 0x2c6   : > { %v2347_v25 = vadd.f32 %v2346_v40, %v4848_v10  ;;  %v3722_v10 = vld [vmem:[%s4452_s23 + $0x4fc] sm:$0xf0]  ;;  %v3721_v40 = vor.u32 %v4201_v39, %v3720_v59  ;;  %v5490_v39 = vmax.f32 %v5075_v41, %v5078_v17 }
 0x2c7   : > { %v2753_v38 = vpop.f32.mrf.mxu2  ;;  %v2477_v6 = vpop.f32.mrf.mxu0  ;;  %v3725_v27 = vor.u32 %v4198_v51, %v3722_v10 }
 0x2c8   : > { %v2754_v23 = vadd.f32 %v2753_v38, %v2615_v9  ;;  %v2478_v35 = vadd.f32 %v2477_v6, %v2339_v44  ;;  %v2616_v0 = vpop.f32.mrf.mxu1  ;;  %v3773_v9 = vor.u32 %v4211_v24, %v3770_v16 }
 0x2ca   : > { %v2822_v36 = vsel %vm2818_vm1, %v2754_v23, -inf  ;;  %v2617_v63 = vadd.f32 %v2616_v0, %v2478_v35 }
 0x2cb   : > { %v5252_v61 = vmax.f32 %v5488_v34, %v2822_v36  ;;  %v5489_v36 = vmax.f32 %v5056_v53, %v5059_v49 }
 0x2cd   : > { %v2348_v33 = vpop.f32.mrf.mxu3 }
 0x2ce   : > { %v2349_v44 = vadd.f32 %v2348_v33, %v4862_v15  ;;  %v3748_v33 = vld [vmem:[%s4452_s23 + $0x518] sm:$0xf] }
 0x2cf   : > { %v2755_v4 = vpop.f32.mrf.mxu2  ;;  %v2480_v23 = vpop.f32.mrf.mxu0 }
 0x2d0   : > { %v2756_v38 = vadd.f32 %v2755_v4, %v2617_v63  ;;  %v2481_v6 = vadd.f32 %v2480_v23, %v5216_v32  ;;  %v2619_v35 = vpop.f32.mrf.mxu1  ;;  %v4208_v4 = vld [vmem:[%s4452_s23 + $0x530] sm:$0xf0] }
 0x2d2   : > { %v2829_v0 = vsel %vm2818_vm1, %v2756_v38, -inf  ;;  %v2620_v58 = vadd.f32 %v2619_v35, %v2481_v6  ;;  %2390 = vmatmul.bf16.gmra.mxu3 %v3773_v9  ;;  %2519 = vmatmul.bf16.gmra.mxu0 %v3721_v40  ;;  %v4205_v9 = vld [vmem:[%s4452_s23 + $0x51c] sm:$0xf]  ;;  %v3756_v40 = vld [vmem:[%s4452_s23 + $0x520] sm:$0xf] }
 0x2d3   : > { %v5268_v34 = vmax.f32 %v5489_v36, %v2829_v0  ;;  %2658 = vmatmul.bf16.gmra.mxu1 %v3725_v27  ;;  %v4209_v38 = vld [vmem:[%s4452_s23 + $0x538] sm:$0xf0]  ;;  %v3801_v27 = vor.u32 %v4218_v37, %v3798_v48 }
 0x2d4   : > { %4036 = vmatmul.msk.bf16.gmra.mxu2 %vm1766_vm0, %v3729_v43  ;;  %v3749_v43 = vor.u32 %v4208_v4, %v3748_v33  ;;  %v3757_v41 = vor.u32 %v4209_v38, %v3756_v40  ;;  %v3776_v33 = vld [vmem:[%s4452_s23 + $0x550] sm:$0xf]  ;;  %v4215_v4 = vld [vmem:[%s4452_s23 + $0x568] sm:$0xf0]  ;;  %v3784_v40 = vld [vmem:[%s4452_s23 + $0x558] sm:$0xf] }
 0x2d5   : > { %v2351_v15 = vpop.f32.mrf.mxu3  ;;  %v4216_v38 = vld [vmem:[%s4452_s23 + $0x570] sm:$0xf0] }
 0x2d6   : > { %v2352_v32 = vadd.f32 %v2351_v15, %v4869_v55  ;;  %v3750_v55 = vld [vmem:[%s4452_s23 + $0x534] sm:$0xf0] }
 0x2d7   : > { %v2758_v53 = vpop.f32.mrf.mxu2  ;;  %v2482_v63 = vpop.f32.mrf.mxu0  ;;  %v3753_v17 = vor.u32 %v4205_v9, %v3750_v55  ;;  %v4212_v9 = vld [vmem:[%s4452_s23 + $0x554] sm:$0xf]  ;;  %v3778_v55 = vld [vmem:[%s4452_s23 + $0x56c] sm:$0xf0] }
 0x2d8   : > { %v2759_v49 = vadd.f32 %v2758_v53, %v2620_v58  ;;  %v2483_v24 = vadd.f32 %v2482_v63, %v2344_v8  ;;  %v2621_v16 = vpop.f32.mrf.mxu1  ;;  %v5491_v53 = vmax.f32 %v5088_v54, %v5091_v12 }
 0x2da   : > { %v2836_v59 = vsel %vm2818_vm1, %v2759_v49, -inf  ;;  %v2622_v10 = vadd.f32 %v2621_v16, %v2483_v24 }
 0x2db   : > { %v5276_v51 = vmax.f32 %v5490_v39, %v2836_v59 }
 0x2dd   : > { %v2353_v58 = vpop.f32.mrf.mxu3 }
 0x2de   : > { %v2354_v8 = vadd.f32 %v2353_v58, %v4883_v46 }
 0x2df   : > { %v2760_v23 = vpop.f32.mrf.mxu2  ;;  %v2485_v35 = vpop.f32.mrf.mxu0 }
 0x2e0   : > { %v2761_v6 = vadd.f32 %v2760_v23, %v2622_v10  ;;  %v2486_v0 = vadd.f32 %v2485_v35, %v2347_v25  ;;  %v2624_v36 = vpop.f32.mrf.mxu1  ;;  %v5492_v10 = vmax.f32 %v5107_v19, %v5110_v5  ;;  %v3785_v35 = vor.u32 %v4216_v38, %v3784_v40 }
 0x2e2   : > { %v2843_v15 = vsel %vm2818_vm1, %v2761_v6, -inf  ;;  %v2625_v63 = vadd.f32 %v2624_v36, %v2486_v0  ;;  %2395 = vmatmul.bf16.gmra.mxu3 %v3801_v27  ;;  %2524 = vmatmul.bf16.gmra.mxu0 %v3749_v43  ;;  %v3781_v6 = vor.u32 %v4212_v9, %v3778_v55 }
 0x2e3   : > { %v5291_v49 = vmax.f32 %v5491_v53, %v2843_v15  ;;  %2663 = vmatmul.bf16.gmra.mxu1 %v3753_v17 }
 0x2e4   : > { %4037 = vmatmul.msk.bf16.gmra.mxu2 %vm1766_vm0, %v3757_v41  ;;  %v5493_v41 = vmax.f32 %v5120_v18, %v5123_v11 }
 0x2e5   : > { %v2356_v46 = vpop.f32.mrf.mxu3 }
 0x2e6   : > { %v2357_v25 = vadd.f32 %v2356_v46, %v4890_v3 }
 0x2e7   : > { %v2763_v24 = vpop.f32.mrf.mxu2  ;;  %v2487_v54 = vpop.f32.mrf.mxu0 }
 0x2e8   : > { %v2764_v16 = vadd.f32 %v2763_v24, %v2625_v63  ;;  %v2488_v12 = vadd.f32 %v2487_v54, %v2349_v44  ;;  %v2626_v59 = vpop.f32.mrf.mxu1  ;;  %v3777_v44 = vor.u32 %v4215_v4, %v3776_v33  ;;  %v5494_v24 = vmax.f32 %v5139_v56, %v5142_v29  ;;  %v4223_v33 = vld [vmem:[%s4452_s23 + $0x5a8] sm:$0xf0] }
 0x2ea   : > { %v2850_v39 = vsel %vm2818_vm1, %v2764_v16, -inf  ;;  %v2627_v48 = vadd.f32 %v2626_v59, %v2488_v12  ;;  %v3804_v12 = vld [vmem:[%s4452_s23 + $0x588] sm:$0xf]  ;;  %v4222_v59 = vld [vmem:[%s4452_s23 + $0x5a0] sm:$0xf0] }
 0x2eb   : > { %v5299_v37 = vmax.f32 %v5492_v10, %v2850_v39  ;;  %v4219_v39 = vld [vmem:[%s4452_s23 + $0x58c] sm:$0xf]  ;;  %v3806_v10 = vld [vmem:[%s4452_s23 + $0x5a4] sm:$0xf0] }
 0x2ec   : > { %v3809_v38 = vor.u32 %v4219_v39, %v3806_v10 }
 0x2ed   : > { %v2358_v3 = vpop.f32.mrf.mxu3 }
 0x2ee   : > { %v2359_v58 = vadd.f32 %v2358_v3, %v4904_v31 }
 0x2ef   : > { %v2765_v23 = vpop.f32.mrf.mxu2  ;;  %v2490_v43 = vpop.f32.mrf.mxu0 }
 0x2f0   : > { %v2766_v27 = vadd.f32 %v2765_v23, %v2627_v48  ;;  %v2491_v17 = vadd.f32 %v2490_v43, %v2352_v32  ;;  %v2629_v5 = vpop.f32.mrf.mxu1  ;;  %v3812_v48 = vld [vmem:[%s4452_s23 + $0x590] sm:$0xf] }
 0x2f1   : > { %v3813_v3 = vor.u32 %v4223_v33, %v3812_v48 }
 0x2f2   : > { %v2857_v19 = vsel %vm2818_vm1, %v2766_v27, -inf  ;;  %v2630_v36 = vadd.f32 %v2629_v5, %v2491_v17  ;;  %2529 = vmatmul.bf16.gmra.mxu0 %v3777_v44  ;;  %v5495_v44 = vmax.f32 %v5152_v52, %v5155_v2  ;;  %v5496_v52 = vmax.f32 %v5171_v26, %v5174_v1 }
 0x2f3   : > { %v5312_v0 = vmax.f32 %v5493_v41, %v2857_v19  ;;  %2668 = vmatmul.bf16.gmra.mxu1 %v3781_v6 }
 0x2f4   : > { %4038 = vmatmul.msk.bf16.gmra.mxu2 %vm1766_vm0, %v3785_v35 }
 0x2f5   : > { %v2361_v31 = vpop.f32.mrf.mxu3 }
 0x2f6   : > { %v2362_v32 = vadd.f32 %v2361_v31, %v4908_v57 }
 0x2f7   : > { %v2768_v15 = vpop.f32.mrf.mxu2  ;;  %v2492_v63 = vpop.f32.mrf.mxu0 }
 0x2f8   : > { %v2769_v53 = vadd.f32 %v2768_v15, %v2630_v36  ;;  %v2493_v18 = vadd.f32 %v2492_v63, %v2354_v8  ;;  %v2631_v11 = vpop.f32.mrf.mxu1  ;;  %v3805_v8 = vor.u32 %v4222_v59, %v3804_v12 }
 0x2fa   : > { %v2864_v46 = vsel %vm2818_vm1, %v2769_v53, -inf  ;;  %v2632_v54 = vadd.f32 %v2631_v11, %v2493_v18 }
 0x2fb   : > { %v5320_v16 = vmax.f32 %v5494_v24, %v2864_v46 }
 0x2fd   : > { %v2363_v57 = vpop.f32.mrf.mxu3 }
 0x2fe   : > { %v2364_v4 = vadd.f32 %v2363_v57, %v4919_v22 }
 0x2ff   : > { %v2770_v9 = vpop.f32.mrf.mxu2  ;;  %v2495_v40 = vpop.f32.mrf.mxu0 }
 0x300   : > { %v2771_v55 = vadd.f32 %v2770_v9, %v2632_v54  ;;  %v2496_v23 = vadd.f32 %v2495_v40, %v2357_v25  ;;  %v2634_v29 = vpop.f32.mrf.mxu1 }
 0x302   : > { %v2871_v56 = vsel %vm2818_vm1, %v2771_v55, -inf  ;;  %v2635_v43 = vadd.f32 %v2634_v29, %v2496_v23  ;;  %2534 = vmatmul.bf16.gmra.mxu0 %v3805_v8 }
 0x303   : > { %v5333_v27 = vmax.f32 %v5495_v44, %v2871_v56  ;;  %2673 = vmatmul.bf16.gmra.mxu1 %v3809_v38 }
 0x304   : > { %4039 = vmatmul.msk.bf16.gmra.mxu2 %vm1766_vm0, %v3813_v3 }
 0x305   : > { %v2366_v22 = vpop.f32.mrf.mxu3 }
 0x306   : > { %v2367_v6 = vadd.f32 %v2366_v22, %v4923_v21 }
 0x307   : > { %v2773_v35 = vpop.f32.mrf.mxu2  ;;  %v2497_v5 = vpop.f32.mrf.mxu0 }
 0x308   : > { %v2774_v17 = vadd.f32 %v2773_v35, %v2635_v43  ;;  %v2498_v25 = vadd.f32 %v2497_v5, %v2359_v58  ;;  %v2636_v19 = vpop.f32.mrf.mxu1  ;;  %v5497_v58 = vmax.f32 %v5184_v60, %v5187_v62 }
 0x30a   : > { %v2878_v41 = vsel %vm2818_vm1, %v2774_v17, -inf  ;;  %v2637_v36 = vadd.f32 %v2636_v19, %v2498_v25  ;;  %v5501_v17 = vld [vmem:[#allocation5_spill] sm:$0xff] }
 0x30b   : > { %v5341_v2 = vmax.f32 %v5496_v52, %v2878_v41 }
 0x30d   : > { %v2368_v31 = vpop.f32.mrf.mxu3 }
 0x30f   : > { %v2775_v15 = vpop.f32.mrf.mxu2  ;;  %v2500_v63 = vpop.f32.mrf.mxu0 }
 0x310   : > { %v2776_v53 = vadd.f32 %v2775_v15, %v2637_v36  ;;  %v2501_v18 = vadd.f32 %v2500_v63, %v2362_v32  ;;  %v2639_v11 = vpop.f32.mrf.mxu1  ;;  %v5498_v32 = vmax.f32 %v5207_v14, %v5210_v42  ;;  %v2369_v14 = vadd.f32 %v2368_v31, %v4934_v45  ;;  %v5374_v45 = vld [vmem:[%s236_s26] ss:$0 sm:$0xff] }
 0x312   : > { %v2885_v21 = vsel %vm2818_vm1, %v2776_v53, -inf  ;;  %v2640_v24 = vadd.f32 %v2639_v11, %v2501_v18 }
 0x313   : > { %v5347_v46 = vmax.f32 %v5497_v58, %v2885_v21 }
 0x315   : > { %v2371_v54 = vpop.f32.mrf.mxu3 }
 0x316   : > { %v2372_v5 = vadd.f32 %v2371_v54, %v5501_v17 }
 0x317   : > { %v2778_v12 = vpop.f32.mrf.mxu2  ;;  %v2502_v26 = vpop.f32.mrf.mxu0 }
 0x318   : > { %v2779_v1 = vadd.f32 %v2778_v12, %v2640_v24  ;;  %v2503_v59 = vadd.f32 %v2502_v26, %v2364_v4  ;;  %v2641_v39 = vpop.f32.mrf.mxu1  ;;  %v5499_v4 = vmax.f32 %v5220_v50, %v5223_v7 }
 0x31a   : > { %v2892_v10 = vsel %vm2818_vm1, %v2779_v1, -inf  ;;  %v2642_v33 = vadd.f32 %v2641_v39, %v2503_v59 }
 0x31b   : > { %v5353_v48 = vmax.f32 %v5498_v32, %v2892_v10 }
 0x31d   : > { %v2373_v62 = vpop.f32.mrf.mxu3 }
 0x31e   : > { %v2374_v18 = vadd.f32 %v2373_v62, %v4797_v20 }
 0x31f   : > { %v2780_v57 = vpop.f32.mrf.mxu2  ;;  %v2505_v60 = vpop.f32.mrf.mxu0 }
 0x320   : > { %v2781_v9 = vadd.f32 %v2780_v57, %v2642_v33  ;;  %v2506_v8 = vadd.f32 %v2505_v60, %v2367_v6  ;;  %v2644_v55 = vpop.f32.mrf.mxu1  ;;  %v5500_v6 = vmax.f32 %v5239_v13, %v5242_v30 }
 0x322   : > { %v2899_v40 = vsel %vm2818_vm1, %v2781_v9, -inf  ;;  %v2645_v3 = vadd.f32 %v2644_v55, %v2506_v8 }
 0x323   : > { %v5359_v38 = vmax.f32 %v5499_v4, %v2899_v40 }
 0x325   : > { %v2376_v22 = vpop.f32.mrf.mxu3 }
 0x326   : > { %v2377_v10 = vadd.f32 %v2376_v22, %v4804_v47 }
 0x327   : > { %v2783_v23 = vpop.f32.mrf.mxu2  ;;  %v2507_v29 = vpop.f32.mrf.mxu0 }
 0x328   : > { %v2784_v42 = vadd.f32 %v2783_v23, %v2645_v3  ;;  %v2646_v56 = vpop.f32.mrf.mxu1  ;;  %v2508_v43 = vadd.f32 %v2507_v29, %v2369_v14 }
 0x32a   : > { %v2906_v44 = vsel %vm2818_vm1, %v2784_v42, -inf  ;;  %v2647_v50 = vadd.f32 %v2646_v56, %v2508_v43 }
 0x32b   : > { %v5366_v35 = vmax.f32 %v5500_v6, %v2906_v44 }
 0x32d   : > { %v2378_v13 = vpop.f32.mrf.mxu3 }
 0x32e   : > { %v2379_v3 = vadd.f32 %v2378_v13, %v4818_v28 }
 0x32f   : > { %v2785_v7 = vpop.f32.mrf.mxu2  ;;  %v2510_v19 = vpop.f32.mrf.mxu0 }
 0x330   : > { %v2786_v25 = vadd.f32 %v2785_v7, %v2647_v50  ;;  %v2649_v41 = vpop.f32.mrf.mxu1  ;;  %v2511_v36 = vadd.f32 %v2510_v19, %v2372_v5  ;;  %v5502_v7 = vld [vmem:[#allocation7_spill] sm:$0xff] }
 0x332   : > { %v2824_v52 = vsel %vm2818_vm1, %v2786_v25, -inf  ;;  %v2650_v15 = vadd.f32 %v2649_v41, %v2511_v36 }
 0x333   : > { %v2825_v30 = vmax.f32 %v5252_v61, %v2824_v52 }
 0x335   : > { %v2914_v31 = vadd.f32 %v5374_v45, %v2825_v30  ;;  %v2381_v26 = vpop.f32.mrf.mxu3 }
 0x336   : > { %v2382_v28 = vadd.f32 %v2381_v26, %v5502_v7 }
 0x337   : > { %v2927_v53 = vmax.f32 %v2914_v31, 0.0  ;;  %v2788_v63 = vpop.f32.mrf.mxu2  ;;  %v2512_v21 = vpop.f32.mrf.mxu0 }
 0x338   : > { %v2789_v11 = vadd.f32 %v2788_v63, %v2650_v15  ;;  %v2651_v61 = vpop.f32.mrf.mxu1  ;;  %v2513_v54 = vadd.f32 %v2512_v21, %v2374_v18 }
 0x339   : > { %v2940_v58 = vpack.c.bf16 %v2927_v53, %v2927_v53  ;;  %v5503_v53 = vld [vmem:[#allocation8_spill] sm:$0xff] }
 0x33a   : > { %v2831_v24 = vsel %vm2818_vm1, %v2789_v11, -inf  ;;  %v2652_v1 = vadd.f32 %v2651_v61, %v2513_v54 }
 0x33b   : > { %2954 = vst.msk [vmem:[%s5384_s5] sm:$0xf] %vm2953_vm2, %v2940_v58  ;;  %v2832_v12 = vmax.f32 %v5268_v34, %v2831_v24 }
 0x33d   : > { %v2915_v20 = vadd.f32 %v5374_v45, %v2832_v12  ;;  %v2383_v14 = vpop.f32.mrf.mxu3 }
 0x33e   : > { %v2384_v63 = vadd.f32 %v2383_v14, %v5503_v53 }
 0x33f   : > { %v2928_v59 = vmax.f32 %v2915_v20, 0.0  ;;  %v2790_v39 = vpop.f32.mrf.mxu2  ;;  %v2515_v33 = vpop.f32.mrf.mxu0 }
 0x340   : > { %v2791_v32 = vadd.f32 %v2790_v39, %v2652_v1  ;;  %v2654_v9 = vpop.f32.mrf.mxu1  ;;  %v2516_v62 = vadd.f32 %v2515_v33, %v2377_v10 }
 0x341   : > { %v2941_v57 = vpack.c.bf16 %v2928_v59, %v2928_v59  ;;  %v5504_v59 = vld [vmem:[#allocation9_spill] sm:$0xff] }
 0x342   : > { %v2838_v60 = vsel %vm2818_vm1, %v2791_v32, -inf  ;;  %v2655_v55 = vadd.f32 %v2654_v9, %v2516_v62 }
 0x343   : > { %2955 = vst.msk [vmem:[%s5384_s5 + $0x4] sm:$0xf] %vm2953_vm2, %v2941_v57  ;;  %v2839_v34 = vmax.f32 %v5276_v51, %v2838_v60 }
 0x345   : > { %v2916_v8 = vadd.f32 %v5374_v45, %v2839_v34  ;;  %v2386_v36 = vpop.f32.mrf.mxu3 }
 0x346   : > { %v2387_v39 = vadd.f32 %v2386_v36, %v5504_v59 }
 0x347   : > { %v2929_v40 = vmax.f32 %v2916_v8, 0.0  ;;  %v2793_v4 = vpop.f32.mrf.mxu2  ;;  %v2517_v23 = vpop.f32.mrf.mxu0 }
 0x348   : > { %v2794_v47 = vadd.f32 %v2793_v4, %v2655_v55  ;;  %v2656_v29 = vpop.f32.mrf.mxu1  ;;  %v2518_v44 = vadd.f32 %v2517_v23, %v2379_v3  ;;  %v5505_v4 = vld [vmem:[#allocation10_spill] sm:$0xff] }
 0x349   : > { %v2942_v42 = vpack.c.bf16 %v2929_v40, %v2929_v40 }
 0x34a   : > { %v2845_v56 = vsel %vm2818_vm1, %v2794_v47, -inf  ;;  %v2657_v22 = vadd.f32 %v2656_v29, %v2518_v44 }
 0x34b   : > { %2956 = vst.msk [vmem:[%s5384_s5 + $0x8] sm:$0xf] %vm2953_vm2, %v2942_v42  ;;  %v2846_v51 = vmax.f32 %v5291_v49, %v2845_v56 }
 0x34d   : > { %v2917_v43 = vadd.f32 %v5374_v45, %v2846_v51 }
 0x34f   : > { %v2930_v6 = vmax.f32 %v2917_v43, 0.0  ;;  %v2795_v50 = vpop.f32.mrf.mxu2  ;;  %v2520_v5 = vpop.f32.mrf.mxu0 }
 0x350   : > { %v2796_v17 = vadd.f32 %v2795_v50, %v2657_v22  ;;  %v2659_v19 = vpop.f32.mrf.mxu1  ;;  %v2521_v52 = vadd.f32 %v2520_v5, %v2382_v28 }
 0x351   : > { %v2943_v25 = vpack.c.bf16 %v2930_v6, %v2930_v6  ;;  %v5506_v6 = vld [vmem:[#allocation11_spill] sm:$0xff] }
 0x352   : > { %v2852_v41 = vsel %vm2818_vm1, %v2796_v17, -inf  ;;  %v2660_v13 = vadd.f32 %v2659_v19, %v2521_v52 }
 0x353   : > { %2957 = vst.msk [vmem:[%s5384_s5 + $0xc] sm:$0xf] %vm2953_vm2, %v2943_v25  ;;  %v2853_v49 = vmax.f32 %v5299_v37, %v2852_v41  ;;  %v2388_v37 = vpop.f32.mrf.mxu3 }
 0x354   : > { %v2389_v3 = vadd.f32 %v2388_v37, %v5505_v4 }
 0x355   : > { %v2918_v30 = vadd.f32 %v5374_v45, %v2853_v49 }
 0x357   : > { %v2931_v31 = vmax.f32 %v2918_v30, 0.0  ;;  %v2798_v15 = vpop.f32.mrf.mxu2  ;;  %v2522_v11 = vpop.f32.mrf.mxu0 }
 0x358   : > { %v2799_v18 = vadd.f32 %v2798_v15, %v2660_v13  ;;  %v2661_v58 = vpop.f32.mrf.mxu1  ;;  %v2523_v24 = vadd.f32 %v2522_v11, %v2384_v63  ;;  %v5507_v13 = vld [vmem:[#allocation12_spill] sm:$0xff] }
 0x359   : > { %v2944_v21 = vpack.c.bf16 %v2931_v31, %v2931_v31 }
 0x35a   : > { %v2859_v61 = vsel %vm2818_vm1, %v2799_v18, -inf  ;;  %v2662_v20 = vadd.f32 %v2661_v58, %v2523_v24 }
 0x35b   : > { %2958 = vst.msk [vmem:[%s5384_s5 + $0x10] sm:$0xf] %vm2953_vm2, %v2944_v21  ;;  %v2860_v54 = vmax.f32 %v5312_v0, %v2859_v61  ;;  %v2391_v8 = vpop.f32.mrf.mxu3 }
 0x35c   : > { %v2392_v50 = vadd.f32 %v2391_v8, %v5506_v6 }
 0x35d   : > { %v2919_v12 = vadd.f32 %v5374_v45, %v2860_v54 }
 0x35f   : > { %v2932_v1 = vmax.f32 %v2919_v12, 0.0  ;;  %v2800_v26 = vpop.f32.mrf.mxu2  ;;  %v2525_v32 = vpop.f32.mrf.mxu0  ;;  %v5508_v12 = vld [vmem:[#allocation13_spill] sm:$0xff] }
 0x360   : > { %v2801_v10 = vadd.f32 %v2800_v26, %v2662_v20  ;;  %v2664_v57 = vpop.f32.mrf.mxu1  ;;  %v2526_v60 = vadd.f32 %v2525_v32, %v2387_v39 }
 0x361   : > { %v2945_v33 = vpack.c.bf16 %v2932_v1, %v2932_v1 }
 0x362   : > { %v2866_v9 = vsel %vm2818_vm1, %v2801_v10, -inf  ;;  %v2665_v34 = vadd.f32 %v2664_v57, %v2526_v60 }
 0x363   : > { %2959 = vst.msk [vmem:[%s5384_s5 + $0x14] sm:$0xf] %vm2953_vm2, %v2945_v33  ;;  %v2867_v0 = vmax.f32 %v5320_v16, %v2866_v9  ;;  %v2393_v17 = vpop.f32.mrf.mxu3 }
 0x364   : > { %v2394_v31 = vadd.f32 %v2393_v17, %v5507_v13 }
 0x365   : > { %v2920_v62 = vadd.f32 %v5374_v45, %v2867_v0 }
 0x367   : > { %v2933_v55 = vmax.f32 %v2920_v62, 0.0  ;;  %v2803_v40 = vpop.f32.mrf.mxu2  ;;  %v2527_v23 = vpop.f32.mrf.mxu0  ;;  %v5509_v62 = vld [vmem:[#allocation14_spill] sm:$0xff] }
 0x368   : > { %v2804_v47 = vadd.f32 %v2803_v40, %v2665_v34  ;;  %v2666_v42 = vpop.f32.mrf.mxu1  ;;  %v2528_v56 = vadd.f32 %v2527_v23, %v2389_v3 }
 0x369   : > { %v2946_v14 = vpack.c.bf16 %v2933_v55, %v2933_v55 }
 0x36a   : > { %v2873_v29 = vsel %vm2818_vm1, %v2804_v47, -inf  ;;  %v2667_v51 = vadd.f32 %v2666_v42, %v2528_v56 }
 0x36b   : > { %2960 = vst.msk [vmem:[%s5384_s5 + $0x18] sm:$0xf] %vm2953_vm2, %v2946_v14  ;;  %v2874_v16 = vmax.f32 %v5333_v27, %v2873_v29  ;;  %v2396_v58 = vpop.f32.mrf.mxu3 }
 0x36c   : > { %v2397_v20 = vadd.f32 %v2396_v58, %v5508_v12 }
 0x36d   : > { %v2921_v44 = vadd.f32 %v5374_v45, %v2874_v16 }
 0x36f   : > { %v2934_v43 = vmax.f32 %v2921_v44, 0.0  ;;  %v2805_v22 = vpop.f32.mrf.mxu2  ;;  %v2530_v28 = vpop.f32.mrf.mxu0 }
 0x370   : > { %v2806_v7 = vadd.f32 %v2805_v22, %v2667_v51  ;;  %v2669_v25 = vpop.f32.mrf.mxu1  ;;  %v2531_v41 = vadd.f32 %v2530_v28, %v2392_v50 }
 0x371   : > { %v2947_v5 = vpack.c.bf16 %v2934_v43, %v2934_v43 }
 0x372   : > { %v2880_v19 = vsel %vm2818_vm1, %v2806_v7, -inf  ;;  %v2670_v36 = vadd.f32 %v2669_v25, %v2531_v41 }
 0x373   : > { %2961 = vst.msk [vmem:[%s5384_s5 + $0x1c] sm:$0xf] %vm2953_vm2, %v2947_v5  ;;  %v2881_v27 = vmax.f32 %v5341_v2, %v2880_v19 }
 0x375   : > { %v2922_v52 = vadd.f32 %v5374_v45, %v2881_v27 }
 0x377   : > { %v2935_v49 = vmax.f32 %v2922_v52, 0.0  ;;  %v2808_v30 = vpop.f32.mrf.mxu2  ;;  %v2532_v53 = vpop.f32.mrf.mxu0 }
 0x378   : > { %v2809_v15 = vadd.f32 %v2808_v30, %v2670_v36  ;;  %v2671_v18 = vpop.f32.mrf.mxu1  ;;  %v2533_v21 = vadd.f32 %v2532_v53, %v2394_v31 }
 0x379   : > { %v2948_v63 = vpack.c.bf16 %v2935_v49, %v2935_v49 }
 0x37a   : > { %v2887_v11 = vsel %vm2818_vm1, %v2809_v15, -inf  ;;  %v2672_v24 = vadd.f32 %v2671_v18, %v2533_v21 }
 0x37b   : > { %2962 = vst.msk [vmem:[%s5384_s5 + $0x20] sm:$0xf] %vm2953_vm2, %v2948_v63  ;;  %v2888_v2 = vmax.f32 %v5347_v46, %v2887_v11  ;;  %v2398_v46 = vpop.f32.mrf.mxu3 }
 0x37c   : > { %v2399_v34 = vadd.f32 %v2398_v46, %v5509_v62 }
 0x37d   : > { %v2923_v61 = vadd.f32 %v5374_v45, %v2888_v2 }
 0x37f   : > { %v2936_v54 = vmax.f32 %v2923_v61, 0.0  ;;  %v2810_v37 = vpop.f32.mrf.mxu2  ;;  %v2535_v26 = vpop.f32.mrf.mxu0 }
 0x380   : > { %v2811_v1 = vadd.f32 %v2810_v37, %v2672_v24  ;;  %v2536_v10 = vadd.f32 %v2535_v26, %v2397_v20  ;;  %v2674_v33 = vpop.f32.mrf.mxu1 }
 0x381   : > { %v2949_v59 = vpack.c.bf16 %v2936_v54, %v2936_v54 }
 0x382   : > { %v2894_v39 = vsel %vm2818_vm1, %v2811_v1, -inf  ;;  %v2675_v9 = vadd.f32 %v2674_v33, %v2536_v10 }
 0x383   : > { %2963 = vst.msk [vmem:[%s5384_s5 + $0x24] sm:$0xf] %vm2953_vm2, %v2949_v59  ;;  %v2895_v32 = vmax.f32 %v5353_v48, %v2894_v39 }
 0x385   : > { %v2924_v57 = vadd.f32 %v5374_v45, %v2895_v32 }
 0x387   : > { %v2937_v60 = vmax.f32 %v2924_v57, 0.0  ;;  %v2813_v0 = vpop.f32.mrf.mxu2  ;;  %v2537_v55 = vpop.f32.mrf.mxu0 }
 0x388   : > { %v2814_v8 = vadd.f32 %v2813_v0, %v2675_v9  ;;  %v2538_v3 = vadd.f32 %v2537_v55, %v2399_v34  ;;  %v2676_v23 = vpop.f32.mrf.mxu1 }
 0x389   : > { %v2950_v40 = vpack.c.bf16 %v2937_v60, %v2937_v60 }
 0x38a   : > { %v2901_v4 = vsel %vm2818_vm1, %v2814_v8, -inf  ;;  %v2677_v14 = vadd.f32 %v2676_v23, %v2538_v3 }
 0x38b   : > { %2964 = vst.msk [vmem:[%s5384_s5 + $0x28] sm:$0xf] %vm2953_vm2, %v2950_v40  ;;  %v2902_v48 = vmax.f32 %v5359_v38, %v2901_v4 }
 0x38d   : > { %v2925_v47 = vadd.f32 %v5374_v45, %v2902_v48 }
 0x38f   : > { %v2938_v42 = vmax.f32 %v2925_v47, 0.0  ;;  %v2815_v29 = vpop.f32.mrf.mxu2 }
 0x390   : > { %v2816_v56 = vadd.f32 %v2815_v29, %v2677_v14 }
 0x391   : > { %v2951_v16 = vpack.c.bf16 %v2938_v42, %v2938_v42 }
 0x392   : > { %v2908_v44 = vsel %vm2818_vm1, %v2816_v56, -inf }
 0x393   : > { %2965 = vst.msk [vmem:[%s5384_s5 + $0x2c] sm:$0xf] %vm2953_vm2, %v2951_v16  ;;  %v2909_v51 = vmax.f32 %v5366_v35, %v2908_v44 }
 0x395   : > { %v2926_v43 = vadd.f32 %v5374_v45, %v2909_v51 }
 0x397   : > { %v2939_v22 = vmax.f32 %v2926_v43, 0.0 }
 0x399   : > { %v2952_v6 = vpack.c.bf16 %v2939_v22, %v2939_v22 }
 0x39b   : > { %2966 = vst.msk [vmem:[%s5384_s5 + $0x30] sm:$0xf] %vm2953_vm2, %v2952_v6 }
 0x39c PF: > { %s13_s14 = sadd.s32 1, %s4348_s14   ;;  %s5510_s12 = smov %s4344_s13 }
 0x39d   : > { %p10_p5 = scmp.ge.s32.totalorder %s13_s14, 4   ;;  %s5511_s13 = smov %s5513_s15 }
 0x39f   :  { %12 = sbr.rel (!%p10_p5) target bundleno = 2 (0x2), region = 68 }

// kernel: dqn_forward.6
= control target key start
LH: loop header
LB: loop body
LE: loop exit
PB: predicated region body
PF: predicated region fallthrough
CT: control target
= control target key end

     0   :  { %s2279_s12 = smov 0   ;;  %s2281_s13 = smov 0   ;;  %s2485_s0 = inlined_call_operand.vmem [shape: bf16[2,4,8,1600], index: 0, kind: input, shape index: {}]   ;;  %s2486_s1 = inlined_call_operand.vmem [shape: bf16[2,1600,128], index: 1, kind: input, shape index: {}]   ;;  %s2487_s2 = inlined_call_operand.vmem [shape: f32[2,1,128], index: 2, kind: input, shape index: {}]   ;;  %s2488_s3 = inlined_call_operand.vmem [shape: bf16[2,8,128], index: 3, kind: output, shape index: {}]  }
   0x1   :  { %s2283_s14 = smov 0  }
   0x2 LB: > { %s25_s15 = sadd.s32 1, %s2253_s13  ;;  %p1566_p0 = scmp.ge.s32.totalorder %s2257_s14, 1  ;;  %s2257_s14 = sphi %s2283_s14, %s13_s14   ;;  %s2253_s13 = sphi %s2281_s13, %s2490_s13   ;;  %s2249_s12 = sphi %s2279_s12, %s2489_s12  }
   0x3   : > { %p27_p1 = scmp.ge.s32.totalorder %s25_s15, 2  ;;  %p175_p2 = scmp.lt.s32.totalorder %s2257_s14, 3 }
   0x5   : > { %s2492_s15 = smov (%p27_p1, %s25_s15), 0  ;;  %p176_p3 = pnand %p1566_p0, %p175_p2 }
   0x6   : > { %p213_p4 = scmp.lt.s32.totalorder (!%p176_p3), %s2249_s12, 1 }
   0x7   : > { %179 = sbr.rel (%p176_p3) target bundleno = 292 (0x124), region = 32 }
   0xc   : > { %s2494_s12 = smov (!%p213_p4, %s2249_s12), 1  ;;  %vm1196_vm0 = vcmask 523264  }
   0xd   : > { %s2209_s16 = smul.u32 800, %s2494_s12  ;;  %s229_s26 = scalar_lea.vmem %s2487_s2, %s2494_s12 }
   0xe   : > { %s2208_s20 = smul.u32 208, %s2494_s12  ;;  %s1569_s29 = sshll.u32 %s2494_s12, 2 }
   0xf   : > { %s2303_s19 = scalar_lea.vmem %s2486_s1, %s2209_s16  ;;  %s236_s5 = scalar_lea.vmem %s2488_s3, %s1569_s29 }
  0x10   : > { %v2111_v0 = vld [vmem:[%s2303_s19 + $0x38] sm:$0xff]  ;;  %v2110_v4 = vld [vmem:[%s2303_s19 + $0x30] sm:$0xff]  ;;  %v2109_v8 = vld [vmem:[%s2303_s19 + $0x28] sm:$0xff]  ;;  %s2335_s23 = scalar_lea.vmem %s2485_s0, %s2208_s20 }
  0x11   : > { %v2119_v1 = vld [vmem:[%s2303_s19 + $0x78] sm:$0xff]  ;;  %1203 = vmatpush.bf16.msra.mxu0 %v2111_v0  ;;  %v2118_v5 = vld [vmem:[%s2303_s19 + $0x70] sm:$0xff]  ;;  %v2117_v9 = vld [vmem:[%s2303_s19 + $0x68] sm:$0xff] }
  0x12   : > { %v2127_v2 = vld [vmem:[%s2303_s19 + $0xb8] sm:$0xff]  ;;  %1222 = vmatpush.bf16.msra.mxu1 %v2119_v1  ;;  %v2126_v6 = vld [vmem:[%s2303_s19 + $0xb0] sm:$0xff]  ;;  %v2125_v10 = vld [vmem:[%s2303_s19 + $0xa8] sm:$0xff] }
  0x13   : > { %v2135_v3 = vld [vmem:[%s2303_s19 + $0xf8] sm:$0xff]  ;;  %1241 = vmatpush.bf16.msra.mxu2 %v2127_v2  ;;  %v2134_v7 = vld [vmem:[%s2303_s19 + $0xf0] sm:$0xff]  ;;  %v2133_v11 = vld [vmem:[%s2303_s19 + $0xe8] sm:$0xff] }
  0x14   : > { %1260 = vmatpush.bf16.msra.mxu3 %v2135_v3  ;;  %v2108_v12 = vld [vmem:[%s2303_s19 + $0x20] sm:$0xff]  ;;  %v2107_v16 = vld [vmem:[%s2303_s19 + $0x18] sm:$0xff]  ;;  %v2106_v20 = vld [vmem:[%s2303_s19 + $0x10] sm:$0xff] }
  0x15   : > { %1204 = vmatpush.bf16.msra.mxu0 %v2110_v4  ;;  %v2116_v13 = vld [vmem:[%s2303_s19 + $0x60] sm:$0xff]  ;;  %v2115_v17 = vld [vmem:[%s2303_s19 + $0x58] sm:$0xff]  ;;  %v2114_v21 = vld [vmem:[%s2303_s19 + $0x50] sm:$0xff] }
  0x16   : > { %1223 = vmatpush.bf16.msra.mxu1 %v2118_v5  ;;  %v2124_v14 = vld [vmem:[%s2303_s19 + $0xa0] sm:$0xff]  ;;  %v2123_v18 = vld [vmem:[%s2303_s19 + $0x98] sm:$0xff]  ;;  %v2122_v22 = vld [vmem:[%s2303_s19 + $0x90] sm:$0xff] }
  0x17   : > { %1242 = vmatpush.bf16.msra.mxu2 %v2126_v6  ;;  %v2132_v15 = vld [vmem:[%s2303_s19 + $0xe0] sm:$0xff]  ;;  %v2131_v19 = vld [vmem:[%s2303_s19 + $0xd8] sm:$0xff]  ;;  %v2130_v23 = vld [vmem:[%s2303_s19 + $0xd0] sm:$0xff] }
  0x18   : > { %1261 = vmatpush.bf16.msra.mxu3 %v2134_v7  ;;  %v2105_v24 = vld [vmem:[%s2303_s19 + $0x8] sm:$0xff]  ;;  %v2104_v28 = vld [vmem:[%s2303_s19] sm:$0xff]  ;;  %v2084_v33 = vld [vmem:[%s2335_s23 + $0x30] sm:$0xf0] }
  0x19   : > { %1205 = vmatpush.bf16.msra.mxu0 %v2109_v8  ;;  %v2113_v25 = vld [vmem:[%s2303_s19 + $0x48] sm:$0xff]  ;;  %v2112_v29 = vld [vmem:[%s2303_s19 + $0x40] sm:$0xff]  ;;  %v1574_v35 = vld [vmem:[%s2335_s23 + $0x34] sm:$0xf0] }
  0x1a   : > { %1224 = vmatpush.bf16.msra.mxu1 %v2117_v9  ;;  %v2121_v26 = vld [vmem:[%s2303_s19 + $0x88] sm:$0xff]  ;;  %v2120_v30 = vld [vmem:[%s2303_s19 + $0x80] sm:$0xff]  ;;  %v2085_v37 = vld [vmem:[%s2335_s23 + $0x38] sm:$0xf0] }
  0x1b   : > { %1243 = vmatpush.bf16.msra.mxu2 %v2125_v10  ;;  %v2129_v27 = vld [vmem:[%s2303_s19 + $0xc8] sm:$0xff]  ;;  %v2128_v31 = vld [vmem:[%s2303_s19 + $0xc0] sm:$0xff]  ;;  %v2143_v40 = vld [vmem:[%s2303_s19 + $0x138] sm:$0xff] }
  0x1c   : > { %1262 = vmatpush.bf16.msra.mxu3 %v2133_v11  ;;  %v1572_v32 = vld [vmem:[%s2335_s23] sm:$0xf]  ;;  %v2078_v34 = vld [vmem:[%s2335_s23 + $0x4] sm:$0xf]  ;;  %v1580_v36 = vld [vmem:[%s2335_s23 + $0x8] sm:$0xf] }
  0x1d   : > { %1206 = vmatpush.bf16.msra.mxu0 %v2108_v12  ;;  %v2079_v38 = vld [vmem:[%s2335_s23 + $0xc] sm:$0xf]  ;;  %v1582_v39 = vld [vmem:[%s2335_s23 + $0x3c] sm:$0xf0]  ;;  %v2151_v41 = vld [vmem:[%s2303_s19 + $0x178] sm:$0xff]  ;;  %v1573_v42 = vor.u32 %v2084_v33, %v1572_v32  ;;  %v1577_v43 = vor.u32 %v2078_v34, %v1574_v35  ;;  %v1581_v44 = vor.u32 %v2085_v37, %v1580_v36 }
  0x1e   : > { %1225 = vmatpush.bf16.msra.mxu1 %v2116_v13  ;;  %v1585_v45 = vor.u32 %v2079_v38, %v1582_v39  ;;  %v2159_v46 = vld [vmem:[%s2303_s19 + $0x1b8] sm:$0xff]  ;;  %v2142_v48 = vld [vmem:[%s2303_s19 + $0x130] sm:$0xff]  ;;  %v2141_v52 = vld [vmem:[%s2303_s19 + $0x128] sm:$0xff] }
  0x1f   : > { %1244 = vmatpush.bf16.msra.mxu2 %v2124_v14  ;;  %v2167_v47 = vld [vmem:[%s2303_s19 + $0x1f8] sm:$0xff]  ;;  %v2150_v49 = vld [vmem:[%s2303_s19 + $0x170] sm:$0xff]  ;;  %v2149_v53 = vld [vmem:[%s2303_s19 + $0x168] sm:$0xff] }
  0x20   : > { %1263 = vmatpush.bf16.msra.mxu3 %v2132_v15  ;;  %v2158_v50 = vld [vmem:[%s2303_s19 + $0x1b0] sm:$0xff]  ;;  %v2157_v54 = vld [vmem:[%s2303_s19 + $0x1a8] sm:$0xff]  ;;  %v2140_v56 = vld [vmem:[%s2303_s19 + $0x120] sm:$0xff] }
  0x21   : > { %1207 = vmatpush.bf16.msra.mxu0 %v2107_v16  ;;  %v2166_v51 = vld [vmem:[%s2303_s19 + $0x1f0] sm:$0xff]  ;;  %v2165_v55 = vld [vmem:[%s2303_s19 + $0x1e8] sm:$0xff]  ;;  %v2148_v57 = vld [vmem:[%s2303_s19 + $0x160] sm:$0xff] }
  0x22   : > { %1226 = vmatpush.bf16.msra.mxu1 %v2115_v17  ;;  %v2156_v58 = vld [vmem:[%s2303_s19 + $0x1a0] sm:$0xff]  ;;  %v1624_v60 = vld [vmem:[%s2335_s23 + $0x68] sm:$0xf]  ;;  %v2097_v61 = vld [vmem:[%s2335_s23 + $0x98] sm:$0xf0] }
  0x23   : > { %1245 = vmatpush.bf16.msra.mxu2 %v2123_v18  ;;  %v2164_v59 = vld [vmem:[%s2303_s19 + $0x1e0] sm:$0xff]  ;;  %v2091_v62 = vld [vmem:[%s2335_s23 + $0x6c] sm:$0xf]  ;;  %v1632_v0 = vld [vmem:[%s2335_s23 + $0x70] sm:$0xf]  ;;  %v1625_v6 = vor.u32 %v2097_v61, %v1624_v60 }
  0x24   : > { %1264 = vmatpush.bf16.msra.mxu3 %v2131_v19  ;;  %v1626_v63 = vld [vmem:[%s2335_s23 + $0x9c] sm:$0xf0]  ;;  %v2098_v1 = vld [vmem:[%s2335_s23 + $0xa0] sm:$0xf0]  ;;  %v2092_v2 = vld [vmem:[%s2335_s23 + $0x74] sm:$0xf] }
  0x25   : > { %1208 = vmatpush.bf16.msra.mxu0 %v2106_v20  ;;  %v1634_v3 = vld [vmem:[%s2335_s23 + $0xa4] sm:$0xf0]  ;;  %v2139_v4 = vld [vmem:[%s2303_s19 + $0x118] sm:$0xff]  ;;  %v1629_v7 = vor.u32 %v2091_v62, %v1626_v63  ;;  %v1633_v8 = vor.u32 %v2098_v1, %v1632_v0  ;;  %v2138_v12 = vld [vmem:[%s2303_s19 + $0x110] sm:$0xff] }
  0x26   : > { %1227 = vmatpush.bf16.msra.mxu1 %v2114_v21  ;;  %v2147_v5 = vld [vmem:[%s2303_s19 + $0x158] sm:$0xff]  ;;  %v1637_v9 = vor.u32 %v2092_v2, %v1634_v3  ;;  %v2146_v13 = vld [vmem:[%s2303_s19 + $0x150] sm:$0xff]  ;;  %v2137_v16 = vld [vmem:[%s2303_s19 + $0x108] sm:$0xff] }
  0x27   : > { %1246 = vmatpush.bf16.msra.mxu2 %v2122_v22  ;;  %v2155_v10 = vld [vmem:[%s2303_s19 + $0x198] sm:$0xff]  ;;  %v2154_v14 = vld [vmem:[%s2303_s19 + $0x190] sm:$0xff]  ;;  %v2145_v17 = vld [vmem:[%s2303_s19 + $0x148] sm:$0xff] }
  0x28   : > { %1265 = vmatpush.bf16.msra.mxu3 %v2130_v23  ;;  %v2163_v11 = vld [vmem:[%s2303_s19 + $0x1d8] sm:$0xff]  ;;  %v2162_v15 = vld [vmem:[%s2303_s19 + $0x1d0] sm:$0xff]  ;;  %v2153_v18 = vld [vmem:[%s2303_s19 + $0x188] sm:$0xff] }
  0x29   : > { %1209 = vmatpush.bf16.msra.mxu0 %v2105_v24  ;;  %v2161_v19 = vld [vmem:[%s2303_s19 + $0x1c8] sm:$0xff]  ;;  %v2136_v20 = vld [vmem:[%s2303_s19 + $0x100] sm:$0xff]  ;;  %v1588_v22 = vld [vmem:[%s2335_s23 + $0x10] sm:$0xf] }
  0x2a   : > { %1228 = vmatpush.bf16.msra.mxu1 %v2113_v25  ;;  %v2144_v21 = vld [vmem:[%s2303_s19 + $0x140] sm:$0xff]  ;;  %v2081_v32 = vld [vmem:[%s2335_s23 + $0x1c] sm:$0xf]  ;;  %v1598_v33 = vld [vmem:[%s2335_s23 + $0x4c] sm:$0xf0] }
  0x2b   : > { %1247 = vmatpush.bf16.msra.mxu2 %v2121_v26  ;;  %v2152_v23 = vld [vmem:[%s2303_s19 + $0x180] sm:$0xff]  ;;  %v2175_v26 = vld [vmem:[%s2303_s19 + $0x238] sm:$0xff]  ;;  %v1601_v39 = vor.u32 %v2081_v32, %v1598_v33  ;;  %v1656_v32 = vld [vmem:[%s2335_s23 + $0x88] sm:$0xf] }
  0x2c   : > { %1266 = vmatpush.bf16.msra.mxu3 %v2129_v27  ;;  %v2160_v24 = vld [vmem:[%s2303_s19 + $0x1c0] sm:$0xff]  ;;  %v2183_v27 = vld [vmem:[%s2303_s19 + $0x278] sm:$0xff] }
  0x2d   : > { %1210 = vmatpush.bf16.msra.mxu0 %v2104_v28  ;;  %v2086_v25 = vld [vmem:[%s2335_s23 + $0x40] sm:$0xf0]  ;;  %v2080_v28 = vld [vmem:[%s2335_s23 + $0x14] sm:$0xf]  ;;  %v2191_v34 = vld [vmem:[%s2303_s19 + $0x2b8] sm:$0xff] }
  0x2e   : > { %1229 = vmatpush.bf16.msra.mxu1 %v2112_v29  ;;  %v1590_v29 = vld [vmem:[%s2335_s23 + $0x44] sm:$0xf0]  ;;  %v2199_v35 = vld [vmem:[%s2303_s19 + $0x2f8] sm:$0xff]  ;;  %v1589_v36 = vor.u32 %v2086_v25, %v1588_v22 }
  0x2f   : > { %1248 = vmatpush.bf16.msra.mxu2 %v2120_v30  ;;  %v1596_v30 = vld [vmem:[%s2335_s23 + $0x18] sm:$0xf]  ;;  %v1593_v37 = vor.u32 %v2080_v28, %v1590_v29  ;;  %v2089_v22 = vld [vmem:[%s2335_s23 + $0x58] sm:$0xf0]  ;;  %v2202_v29 = vld [vmem:[%s2303_s19 + $0x310] sm:$0xff] }
  0x30   : > { %1267 = vmatpush.bf16.msra.mxu3 %v2128_v31  ;;  %1211 = vmatmul.bf16.vlgmr.msra.gmra.mxu0 %v1573_v42  ;;  %v2087_v31 = vld [vmem:[%s2335_s23 + $0x48] sm:$0xf0]  ;;  %v2190_v42 = vld [vmem:[%s2303_s19 + $0x2b0] sm:$0xff]  ;;  %v2171_v60 = vld [vmem:[%s2303_s19 + $0x218] sm:$0xff] }
  0x31   : > { %1279 = vmatpush.bf16.msrb.mxu0 %v2143_v40  ;;  %1230 = vmatmul.bf16.vlgmr.msra.gmra.mxu1 %v1577_v43  ;;  %v1597_v38 = vor.u32 %v2087_v31, %v1596_v30  ;;  %v2174_v40 = vld [vmem:[%s2303_s19 + $0x230] sm:$0xff]  ;;  %v2179_v61 = vld [vmem:[%s2303_s19 + $0x258] sm:$0xff]  ;;  %v2201_v30 = vld [vmem:[%s2303_s19 + $0x308] sm:$0xff] }
  0x32   : > { %1298 = vmatpush.bf16.msrb.mxu1 %v2151_v41  ;;  %1249 = vmatmul.bf16.vlgmr.msra.gmra.mxu2 %v1581_v44  ;;  %v2182_v41 = vld [vmem:[%s2303_s19 + $0x270] sm:$0xff]  ;;  %v2173_v44 = vld [vmem:[%s2303_s19 + $0x228] sm:$0xff]  ;;  %v2187_v62 = vld [vmem:[%s2303_s19 + $0x298] sm:$0xff] }
  0x33   : > { %1268 = vmatmul.bf16.vlgmr.msra.gmra.mxu3 %v1585_v45  ;;  %1317 = vmatpush.bf16.msrb.mxu2 %v2159_v46  ;;  %v2198_v43 = vld [vmem:[%s2303_s19 + $0x2f0] sm:$0xff]  ;;  %v2181_v45 = vld [vmem:[%s2303_s19 + $0x268] sm:$0xff]  ;;  %v2195_v63 = vld [vmem:[%s2303_s19 + $0x2d8] sm:$0xff] }
  0x34   : > { %1336 = vmatpush.bf16.msrb.mxu3 %v2167_v47  ;;  %v2189_v46 = vld [vmem:[%s2303_s19 + $0x2a8] sm:$0xff]  ;;  %v2200_v31 = vld [vmem:[%s2303_s19 + $0x300] sm:$0xff]  ;;  %v2101_v33 = vld [vmem:[%s2335_s23 + $0xb8] sm:$0xf0] }
  0x35   : > { %1280 = vmatpush.bf16.msrb.mxu0 %v2142_v48  ;;  %v2197_v47 = vld [vmem:[%s2303_s19 + $0x2e8] sm:$0xff]  ;;  %v2172_v48 = vld [vmem:[%s2303_s19 + $0x220] sm:$0xff] }
  0x36   : > { %1299 = vmatpush.bf16.msrb.mxu1 %v2150_v49  ;;  %v2180_v49 = vld [vmem:[%s2303_s19 + $0x260] sm:$0xff] }
  0x37   : > { %1318 = vmatpush.bf16.msrb.mxu2 %v2158_v50  ;;  %v2188_v50 = vld [vmem:[%s2303_s19 + $0x2a0] sm:$0xff] }
  0x38   : > { %1337 = vmatpush.bf16.msrb.mxu3 %v2166_v51  ;;  %v2196_v51 = vld [vmem:[%s2303_s19 + $0x2e0] sm:$0xff] }
  0x39   : > { %1281 = vmatpush.bf16.msrb.mxu0 %v2141_v52  ;;  %v1640_v52 = vld [vmem:[%s2335_s23 + $0x78] sm:$0xf] }
  0x3a   : > { %1300 = vmatpush.bf16.msrb.mxu1 %v2149_v53  ;;  %v2099_v53 = vld [vmem:[%s2335_s23 + $0xa8] sm:$0xf0] }
  0x3b   : > { %1319 = vmatpush.bf16.msrb.mxu2 %v2157_v54  ;;  %v2093_v54 = vld [vmem:[%s2335_s23 + $0x7c] sm:$0xf]  ;;  %v1641_v0 = vor.u32 %v2099_v53, %v1640_v52 }
  0x3c   : > { %1338 = vmatpush.bf16.msrb.mxu3 %v2165_v55  ;;  %v1642_v55 = vld [vmem:[%s2335_s23 + $0xac] sm:$0xf0] }
  0x3d   : > { %1282 = vmatpush.bf16.msrb.mxu0 %v2140_v56  ;;  %v1648_v56 = vld [vmem:[%s2335_s23 + $0x80] sm:$0xf]  ;;  %v1645_v1 = vor.u32 %v2093_v54, %v1642_v55 }
  0x3e   : > { %1301 = vmatpush.bf16.msrb.mxu1 %v2148_v57  ;;  %v2100_v57 = vld [vmem:[%s2335_s23 + $0xb0] sm:$0xf0] }
  0x3f   : > { %1320 = vmatpush.bf16.msrb.mxu2 %v2156_v58  ;;  %v2094_v58 = vld [vmem:[%s2335_s23 + $0x84] sm:$0xf]  ;;  %v1649_v2 = vor.u32 %v2100_v57, %v1648_v56 }
  0x40   : > { %1339 = vmatpush.bf16.msrb.mxu3 %v2164_v59  ;;  %1216 = vmatmul.bf16.gmra.mxu0 %v1625_v6  ;;  %v1650_v59 = vld [vmem:[%s2335_s23 + $0xb4] sm:$0xf0]  ;;  %v2186_v6 = vld [vmem:[%s2303_s19 + $0x290] sm:$0xff] }
  0x41   : > { %1283 = vmatpush.bf16.msrb.mxu0 %v2139_v4  ;;  %1235 = vmatmul.bf16.gmra.mxu1 %v1629_v7  ;;  %v1653_v3 = vor.u32 %v2094_v58, %v1650_v59  ;;  %v2170_v4 = vld [vmem:[%s2303_s19 + $0x210] sm:$0xff] }
  0x42   : > { %1302 = vmatpush.bf16.msrb.mxu1 %v2147_v5  ;;  %1254 = vmatmul.bf16.gmra.mxu2 %v1633_v8  ;;  %v2178_v5 = vld [vmem:[%s2303_s19 + $0x250] sm:$0xff]  ;;  %v2169_v8 = vld [vmem:[%s2303_s19 + $0x208] sm:$0xff] }
  0x43   : > { %1273 = vmatmul.bf16.gmra.mxu3 %v1637_v9  ;;  %1321 = vmatpush.bf16.msrb.mxu2 %v2155_v10  ;;  %v2194_v7 = vld [vmem:[%s2303_s19 + $0x2d0] sm:$0xff]  ;;  %v2177_v9 = vld [vmem:[%s2303_s19 + $0x248] sm:$0xff] }
  0x44   : > { %1340 = vmatpush.bf16.msrb.mxu3 %v2163_v11  ;;  %v2185_v10 = vld [vmem:[%s2303_s19 + $0x288] sm:$0xff] }
  0x45   : > { %1284 = vmatpush.bf16.msrb.mxu0 %v2138_v12  ;;  %v2193_v11 = vld [vmem:[%s2303_s19 + $0x2c8] sm:$0xff]  ;;  %v2168_v12 = vld [vmem:[%s2303_s19 + $0x200] sm:$0xff] }
  0x46   : > { %1303 = vmatpush.bf16.msrb.mxu1 %v2146_v13  ;;  %v2176_v13 = vld [vmem:[%s2303_s19 + $0x240] sm:$0xff] }
  0x47   : > { %1322 = vmatpush.bf16.msrb.mxu2 %v2154_v14  ;;  %v2184_v14 = vld [vmem:[%s2303_s19 + $0x280] sm:$0xff] }
  0x48   : > { %1341 = vmatpush.bf16.msrb.mxu3 %v2162_v15  ;;  %v2192_v15 = vld [vmem:[%s2303_s19 + $0x2c0] sm:$0xff] }
  0x49   : > { %1285 = vmatpush.bf16.msrb.mxu0 %v2137_v16  ;;  %v1604_v16 = vld [vmem:[%s2335_s23 + $0x20] sm:$0xf] }
  0x4a   : > { %1304 = vmatpush.bf16.msrb.mxu1 %v2145_v17  ;;  %v2088_v17 = vld [vmem:[%s2335_s23 + $0x50] sm:$0xf0] }
  0x4b   : > { %1323 = vmatpush.bf16.msrb.mxu2 %v2153_v18  ;;  %v2203_v18 = vld [vmem:[%s2303_s19 + $0x318] sm:$0xff]  ;;  %v1605_v25 = vor.u32 %v2088_v17, %v1604_v16 }
  0x4c   : > { %1342 = vmatpush.bf16.msrb.mxu3 %v2161_v19  ;;  %v2082_v19 = vld [vmem:[%s2335_s23 + $0x24] sm:$0xf] }
  0x4d   : > { %1286 = vmatpush.bf16.msrb.mxu0 %v2136_v20  ;;  %v1606_v20 = vld [vmem:[%s2335_s23 + $0x54] sm:$0xf0] }
  0x4e   : > { %1305 = vmatpush.bf16.msrb.mxu1 %v2144_v21  ;;  %v1612_v21 = vld [vmem:[%s2335_s23 + $0x28] sm:$0xf] }
  0x4f   : > { %1324 = vmatpush.bf16.msrb.mxu2 %v2152_v23  ;;  %v2083_v23 = vld [vmem:[%s2335_s23 + $0x2c] sm:$0xf] }
  0x50   : > { %1343 = vmatpush.bf16.msrb.mxu3 %v2160_v24  ;;  %1287 = vmatmul.bf16.vlgmr.msrb.gmra.mxu0 %v1589_v36  ;;  %v1614_v24 = vld [vmem:[%s2335_s23 + $0x5c] sm:$0xf0]  ;;  %v1664_v36 = vld [vmem:[%s2335_s23 + $0x90] sm:$0xf] }
  0x51   : > { %1355 = vmatpush.bf16.msra.mxu0 %v2175_v26  ;;  %1306 = vmatmul.bf16.vlgmr.msrb.gmra.mxu1 %v1593_v37  ;;  %v1609_v26 = vor.u32 %v2082_v19, %v1606_v20  ;;  %v1617_v28 = vor.u32 %v2083_v23, %v1614_v24  ;;  %v2102_v37 = vld [vmem:[%s2335_s23 + $0xc0] sm:$0xf0] }
  0x52   : > { %1374 = vmatpush.bf16.msra.mxu1 %v2183_v27  ;;  %1325 = vmatmul.bf16.vlgmr.msrb.gmra.mxu2 %v1597_v38  ;;  %v1613_v27 = vor.u32 %v2089_v22, %v1612_v21  ;;  %v2096_v38 = vld [vmem:[%s2335_s23 + $0x94] sm:$0xf] }
  0x53   : > { %1393 = vmatpush.bf16.msra.mxu2 %v2191_v34  ;;  %1344 = vmatmul.bf16.vlgmr.msrb.gmra.mxu3 %v1601_v39  ;;  %v2095_v34 = vld [vmem:[%s2335_s23 + $0x8c] sm:$0xf]  ;;  %v1666_v39 = vld [vmem:[%s2335_s23 + $0xc4] sm:$0xf0] }
  0x54   : > { %1412 = vmatpush.bf16.msra.mxu3 %v2199_v35  ;;  %v1658_v35 = vld [vmem:[%s2335_s23 + $0xbc] sm:$0xf0] }
  0x55   : > { %1356 = vmatpush.bf16.msra.mxu0 %v2174_v40  ;;  %v1657_v40 = vor.u32 %v2101_v33, %v1656_v32 }
  0x56   : > { %1375 = vmatpush.bf16.msra.mxu1 %v2182_v41  ;;  %v1661_v41 = vor.u32 %v2095_v34, %v1658_v35 }
  0x57   : > { %1394 = vmatpush.bf16.msra.mxu2 %v2190_v42  ;;  %v1665_v42 = vor.u32 %v2102_v37, %v1664_v36 }
  0x58   : > { %1413 = vmatpush.bf16.msra.mxu3 %v2198_v43  ;;  %v1669_v43 = vor.u32 %v2096_v38, %v1666_v39 }
  0x59   : > { %1357 = vmatpush.bf16.msra.mxu0 %v2173_v44  ;;  %v1620_v44 = vld [vmem:[%s2335_s23 + $0x30] sm:$0xf] }
  0x5a   : > { %1376 = vmatpush.bf16.msra.mxu1 %v2181_v45  ;;  %v2090_v45 = vld [vmem:[%s2335_s23 + $0x60] sm:$0xf0] }
  0x5b   : > { %1395 = vmatpush.bf16.msra.mxu2 %v2189_v46  ;;  %v1672_v46 = vld [vmem:[%s2335_s23 + $0x98] sm:$0xf] }
  0x5c   : > { %1414 = vmatpush.bf16.msra.mxu3 %v2197_v47  ;;  %v2103_v47 = vld [vmem:[%s2335_s23 + $0xc8] sm:$0xf0] }
  0x5d   : > { %1358 = vmatpush.bf16.msra.mxu0 %v2172_v48  ;;  %v1621_v48 = vor.u32 %v2090_v45, %v1620_v44 }
  0x5e   : > { %1377 = vmatpush.bf16.msra.mxu1 %v2180_v49  ;;  %v1673_v49 = vor.u32 %v2103_v47, %v1672_v46 }
  0x5f   : > { %1396 = vmatpush.bf16.msra.mxu2 %v2188_v50 }
  0x60   : > { %1415 = vmatpush.bf16.msra.mxu3 %v2196_v51  ;;  %1292 = vmatmul.bf16.gmra.mxu0 %v1641_v0 }
  0x61   : > { %1359 = vmatpush.bf16.msra.mxu0 %v2171_v60  ;;  %1311 = vmatmul.bf16.gmra.mxu1 %v1645_v1 }
  0x62   : > { %1378 = vmatpush.bf16.msra.mxu1 %v2179_v61  ;;  %1330 = vmatmul.bf16.gmra.mxu2 %v1649_v2 }
  0x63   : > { %1397 = vmatpush.bf16.msra.mxu2 %v2187_v62  ;;  %1349 = vmatmul.bf16.gmra.mxu3 %v1653_v3 }
  0x64   : > { %1416 = vmatpush.bf16.msra.mxu3 %v2195_v63 }
  0x65   : > { %1360 = vmatpush.bf16.msra.mxu0 %v2170_v4 }
  0x66   : > { %1379 = vmatpush.bf16.msra.mxu1 %v2178_v5 }
  0x67   : > { %1398 = vmatpush.bf16.msra.mxu2 %v2186_v6 }
  0x68   : > { %1417 = vmatpush.bf16.msra.mxu3 %v2194_v7 }
  0x69   : > { %1361 = vmatpush.bf16.msra.mxu0 %v2169_v8 }
  0x6a   : > { %1380 = vmatpush.bf16.msra.mxu1 %v2177_v9 }
  0x6b   : > { %1399 = vmatpush.bf16.msra.mxu2 %v2185_v10 }
  0x6c   : > { %1418 = vmatpush.bf16.msra.mxu3 %v2193_v11 }
  0x6d   : > { %1362 = vmatpush.bf16.msra.mxu0 %v2168_v12 }
  0x6e   : > { %1381 = vmatpush.bf16.msra.mxu1 %v2176_v13 }
  0x6f   : > { %1400 = vmatpush.bf16.msra.mxu2 %v2184_v14 }
  0x70   : > { %1419 = vmatpush.bf16.msra.mxu3 %v2192_v15  ;;  %1363 = vmatmul.bf16.vlgmr.msra.gmra.mxu0 %v1605_v25 }
  0x71   : > { %1435 = vmatpush.bf16.msrb.mxu0 %v2203_v18  ;;  %1382 = vmatmul.bf16.vlgmr.msra.gmra.mxu1 %v1609_v26 }
  0x72   : > { %2204 = vmatpush.bf16.msrb.mxu1 %v2203_v18  ;;  %1401 = vmatmul.bf16.vlgmr.msra.gmra.mxu2 %v1613_v27 }
  0x73   : > { %1420 = vmatmul.bf16.vlgmr.msra.gmra.mxu3 %v1617_v28 }
  0x75   : > { %1436 = vmatpush.bf16.msrb.mxu0 %v2202_v29 }
  0x76   : > { %2205 = vmatpush.bf16.msrb.mxu1 %v2202_v29 }
  0x79   : > { %1437 = vmatpush.bf16.msrb.mxu0 %v2201_v30 }
  0x7a   : > { %2206 = vmatpush.bf16.msrb.mxu1 %v2201_v30 }
  0x7d   : > { %1438 = vmatpush.bf16.msrb.mxu0 %v2200_v31 }
  0x7e   : > { %2207 = vmatpush.bf16.msrb.mxu1 %v2200_v31 }
  0x80   : > { %1368 = vmatmul.bf16.gmra.mxu0 %v1657_v40 }
  0x81   : > { %1387 = vmatmul.bf16.gmra.mxu1 %v1661_v41 }
  0x82   : > { %1406 = vmatmul.bf16.gmra.mxu2 %v1665_v42 }
  0x83   : > { %1425 = vmatmul.bf16.gmra.mxu3 %v1669_v43 }
  0x90   : > { %2074 = vmatmul.msk.bf16.vlgmr.msrb.gmra.mxu0 %vm1196_vm0, %v1621_v48 }
  0x91   : > { %2075 = vmatmul.msk.bf16.vlgmr.msrb.gmra.mxu1 %vm1196_vm0, %v1673_v49 }
  0xad   : > { %v1212_v50 = vpop.f32.mrf.mxu0 }
  0xae   : > { %v1231_v51 = vpop.f32.mrf.mxu1 }
  0xaf   : > { %v1232_v52 = vadd.f32 %v1231_v51, %v1212_v50 }
  0xb5   : > { %v1250_v53 = vpop.f32.mrf.mxu2  ;;  %v1214_v56 = vpop.f32.mrf.mxu0 }
  0xb6   : > { %v1269_v54 = vpop.f32.mrf.mxu3  ;;  %v1251_v55 = vadd.f32 %v1250_v53, %v1232_v52  ;;  %v1233_v57 = vpop.f32.mrf.mxu1 }
  0xb7   : > { %v1234_v58 = vadd.f32 %v1233_v57, %v1214_v56 }
  0xb8   : > { %v1270_v59 = vadd.f32 %v1269_v54, %v1251_v55 }
  0xbd   : > { %v1252_v60 = vpop.f32.mrf.mxu2  ;;  %v1217_v63 = vpop.f32.mrf.mxu0 }
  0xbe   : > { %v1271_v61 = vpop.f32.mrf.mxu3  ;;  %v1253_v62 = vadd.f32 %v1252_v60, %v1234_v58  ;;  %v1236_v0 = vpop.f32.mrf.mxu1 }
  0xbf   : > { %v1237_v1 = vadd.f32 %v1236_v0, %v1217_v63 }
  0xc0   : > { %v1272_v2 = vadd.f32 %v1271_v61, %v1253_v62 }
  0xc5   : > { %v1255_v3 = vpop.f32.mrf.mxu2  ;;  %v1219_v5 = vpop.f32.mrf.mxu0 }
  0xc6   : > { %v1274_v4 = vpop.f32.mrf.mxu3  ;;  %v1238_v6 = vpop.f32.mrf.mxu1  ;;  %v1256_v32 = vadd.f32 %v1255_v3, %v1237_v1 }
  0xc7   : > { %v1239_v31 = vadd.f32 %v1238_v6, %v1219_v5 }
  0xc8   : > { %v1275_v34 = vadd.f32 %v1274_v4, %v1256_v32 }
  0xcd   : > { %v1257_v7 = vpop.f32.mrf.mxu2  ;;  %v1288_v9 = vpop.f32.mrf.mxu0 }
  0xce   : > { %v1276_v8 = vpop.f32.mrf.mxu3  ;;  %v1307_v10 = vpop.f32.mrf.mxu1  ;;  %v1258_v33 = vadd.f32 %v1257_v7, %v1239_v31  ;;  %v1289_v39 = vadd.f32 %v1288_v9, %v1270_v59 }
  0xd0   : > { %v1277_v35 = vadd.f32 %v1276_v8, %v1258_v33  ;;  %v1308_v44 = vadd.f32 %v1307_v10, %v1289_v39 }
  0xd5   : > { %v1326_v11 = vpop.f32.mrf.mxu2  ;;  %v1290_v13 = vpop.f32.mrf.mxu0 }
  0xd6   : > { %v1345_v12 = vpop.f32.mrf.mxu3  ;;  %v1309_v14 = vpop.f32.mrf.mxu1  ;;  %v1291_v40 = vadd.f32 %v1290_v13, %v1272_v2  ;;  %v1327_v48 = vadd.f32 %v1326_v11, %v1308_v44 }
  0xd8   : > { %v1310_v45 = vadd.f32 %v1309_v14, %v1291_v40  ;;  %v1346_v55 = vadd.f32 %v1345_v12, %v1327_v48 }
  0xdd   : > { %v1328_v15 = vpop.f32.mrf.mxu2  ;;  %v1293_v17 = vpop.f32.mrf.mxu0 }
  0xde   : > { %v1347_v16 = vpop.f32.mrf.mxu3  ;;  %v1312_v18 = vpop.f32.mrf.mxu1  ;;  %v1294_v41 = vadd.f32 %v1293_v17, %v1275_v34  ;;  %v1329_v49 = vadd.f32 %v1328_v15, %v1310_v45 }
  0xe0   : > { %v1313_v46 = vadd.f32 %v1312_v18, %v1294_v41  ;;  %v1348_v56 = vadd.f32 %v1347_v16, %v1329_v49 }
  0xe5   : > { %v1331_v19 = vpop.f32.mrf.mxu2  ;;  %v1295_v21 = vpop.f32.mrf.mxu0 }
  0xe6   : > { %v1350_v20 = vpop.f32.mrf.mxu3  ;;  %v1314_v22 = vpop.f32.mrf.mxu1  ;;  %v1296_v42 = vadd.f32 %v1295_v21, %v1277_v35  ;;  %v1332_v50 = vadd.f32 %v1331_v19, %v1313_v46 }
  0xe8   : > { %v1315_v47 = vadd.f32 %v1314_v22, %v1296_v42  ;;  %v1351_v57 = vadd.f32 %v1350_v20, %v1332_v50 }
  0xed   : > { %v1333_v23 = vpop.f32.mrf.mxu2  ;;  %v1364_v25 = vpop.f32.mrf.mxu0 }
  0xee   : > { %v1352_v24 = vpop.f32.mrf.mxu3  ;;  %v1383_v26 = vpop.f32.mrf.mxu1  ;;  %v1334_v51 = vadd.f32 %v1333_v23, %v1315_v47  ;;  %v1365_v60 = vadd.f32 %v1364_v25, %v1346_v55 }
  0xf0   : > { %v1353_v58 = vadd.f32 %v1352_v24, %v1334_v51  ;;  %v1384_v3 = vadd.f32 %v1383_v26, %v1365_v60  ;;  %v2234_v24 = vld [vmem:[%s229_s26] ss:$0 sm:$0xff] }
  0xf5   : > { %v1402_v27 = vpop.f32.mrf.mxu2  ;;  %v1366_v29 = vpop.f32.mrf.mxu0 }
  0xf6   : > { %v1421_v28 = vpop.f32.mrf.mxu3  ;;  %v1385_v30 = vpop.f32.mrf.mxu1  ;;  %v1367_v61 = vadd.f32 %v1366_v29, %v1348_v56  ;;  %v1403_v7 = vadd.f32 %v1402_v27, %v1384_v3 }
  0xf8   : > { %v1386_v4 = vadd.f32 %v1385_v30, %v1367_v61  ;;  %v1422_v12 = vadd.f32 %v1421_v28, %v1403_v7 }
  0xfd   : > { %v1404_v36 = vpop.f32.mrf.mxu2  ;;  %v1369_v37 = vpop.f32.mrf.mxu0 }
  0xfe   : > { %v1388_v38 = vpop.f32.mrf.mxu1  ;;  %v1423_v43 = vpop.f32.mrf.mxu3  ;;  %v1370_v62 = vadd.f32 %v1369_v37, %v1351_v57  ;;  %v1405_v8 = vadd.f32 %v1404_v36, %v1386_v4 }
 0x100   : > { %v1389_v5 = vadd.f32 %v1388_v38, %v1370_v62  ;;  %v1424_v13 = vadd.f32 %v1423_v43, %v1405_v8 }
 0x105   : > { %v1407_v52 = vpop.f32.mrf.mxu2  ;;  %v1371_v53 = vpop.f32.mrf.mxu0 }
 0x106   : > { %v1390_v54 = vpop.f32.mrf.mxu1  ;;  %v1426_v59 = vpop.f32.mrf.mxu3  ;;  %v1372_v63 = vadd.f32 %v1371_v53, %v1353_v58  ;;  %v1408_v9 = vadd.f32 %v1407_v52, %v1389_v5 }
 0x108   : > { %v1391_v6 = vadd.f32 %v1390_v54, %v1372_v63  ;;  %v1427_v14 = vadd.f32 %v1426_v59, %v1408_v9 }
 0x10d   : > { %v1409_v0 = vpop.f32.mrf.mxu2  ;;  %v1440_v1 = vpop.f32.mrf.mxu0 }
 0x10e   : > { %v1445_v2 = vpop.f32.mrf.mxu1  ;;  %v1410_v10 = vadd.f32 %v1409_v0, %v1391_v6  ;;  %v1428_v11 = vpop.f32.mrf.mxu3  ;;  %v1441_v18 = vadd.f32 %v1440_v1, %v1422_v12 }
 0x10f   : > { %v1446_v19 = vadd.f32 %v1445_v2, %v1427_v14 }
 0x110   : > { %v1429_v15 = vadd.f32 %v1428_v11, %v1410_v10 }
 0x115   : > { %v1442_v16 = vpop.f32.mrf.mxu0 }
 0x116   : > { %v1447_v17 = vpop.f32.mrf.mxu1  ;;  %v1443_v20 = vadd.f32 %v1442_v16, %v1424_v13 }
 0x117   : > { %v1448_v21 = vadd.f32 %v1447_v17, %v1429_v15 }
 0x118   : > { %v1450_v22 = vmax.f32 %v1441_v18, %v1443_v20 }
 0x119   : > { %v1451_v23 = vmax.f32 %v1446_v19, %v1448_v21 }
 0x11b   : > { %v1452_v25 = vmax.f32 %v1450_v22, %v1451_v23 }
 0x11d   : > { %v1457_v26 = vadd.f32 %v2234_v24, %v1452_v25 }
 0x11f   : > { %v1458_v27 = vmax.f32 %v1457_v26, 0.0 }
 0x121   : > { %v1459_v28 = vpack.c.bf16 %v1458_v27, %v1458_v27 }
 0x123   : > { %1460 = vst [vmem:[%s236_s5] sm:$0xf] %v1459_v28 }
 0x124 PF: > { %s13_s14 = sadd.s32 1, %s2257_s14   ;;  %s2489_s12 = smov %s2253_s13 }
 0x125   : > { %p10_p5 = scmp.ge.s32.totalorder %s13_s14, 4   ;;  %s2490_s13 = smov %s2492_s15 }
 0x127   :  { %12 = sbr.rel (!%p10_p5) target bundleno = 2 (0x2), region = 68 }

// kernel: dqn_forward.7
= control target key start
LH: loop header
LB: loop body
LE: loop exit
PB: predicated region body
PF: predicated region fallthrough
CT: control target
= control target key end

     0   :  { %s3016_s0 = inlined_call_operand.vmem [shape: bf16[2,128], index: 0, kind: input, shape index: {}]   ;;  %s3017_s1 = inlined_call_operand.vmem [shape: bf16[2,128], index: 1, kind: input, shape index: {}]   ;;  %s3018_s2 = inlined_call_operand.vmem [shape: f32[2,4], index: 2, kind: input, shape index: {}]   ;;  %s3019_s3 = inlined_call_operand.vmem [shape: bf16[128,512], index: 3, kind: input, shape index: {}]   ;;  %s3020_s4 = inlined_call_operand.vmem [shape: bf16[128,512], index: 4, kind: input, shape index: {}]   ;;  %s3021_s5 = inlined_call_operand.vmem [shape: f32[4,512], index: 5, kind: input, shape index: {}]   ;;  %s3022_s6 = inlined_call_operand.vmem [shape: f32[1,512], index: 6, kind: input, shape index: {}]   ;;  %s3023_s7 = inlined_call_operand.vmem [shape: bf16[512,256], index: 7, kind: input, shape index: {}]   ;;  %s3024_s8 = inlined_call_operand.vmem [shape: f32[1,256], index: 8, kind: input, shape index: {}]   ;;  %s3025_s9 = inlined_call_operand.vmem [shape: bf16[256,6], index: 9, kind: input, shape index: {}]   ;;  %s3026_s10 = inlined_call_operand.vmem [shape: f32[1,6], index: 10, kind: input, shape index: {}]   ;;  %s3027_s11 = inlined_call_operand.hbm [shape: f32[2,6], index: 11, kind: output, shape index: {}]  }
   0x1   :  { %v1456_v0 = vld [vmem:[%s3020_s4 + $0xe8] sm:$0xf]  ;;  %v1981_v1 = vld [vmem:[%s3020_s4 + $0xf4] sm:$0xf0]  ;;  %v1979_v2 = vld [vmem:[%s3020_s4 + $0xec] sm:$0xf] }
   0x2   :  { %v1457_v3 = vor.u32 %v1981_v1, %v1456_v0  ;;  %v1458_v4 = vld [vmem:[%s3020_s4 + $0xf8] sm:$0xf0]  ;;  %v1440_v5 = vld [vmem:[%s3020_s4 + $0xc8] sm:$0xf]  ;;  %v1977_v6 = vld [vmem:[%s3020_s4 + $0xd4] sm:$0xf0] }
   0x3   :  { %v1461_v7 = vor.u32 %v1979_v2, %v1458_v4  ;;  %v1975_v8 = vld [vmem:[%s3020_s4 + $0xcc] sm:$0xf]  ;;  %v1442_v9 = vld [vmem:[%s3020_s4 + $0xd8] sm:$0xf0]  ;;  %v1441_v10 = vor.u32 %v1977_v6, %v1440_v5  ;;  %v1424_v12 = vld [vmem:[%s3020_s4 + $0xa8] sm:$0xf] }
   0x4   :  { %291 = vmatpush.bf16.msra.mxu2 %v1457_v3  ;;  %v1445_v11 = vor.u32 %v1975_v8, %v1442_v9  ;;  %v1973_v13 = vld [vmem:[%s3020_s4 + $0xb4] sm:$0xf0]  ;;  %v1971_v14 = vld [vmem:[%s3020_s4 + $0xac] sm:$0xf]  ;;  %v1426_v15 = vld [vmem:[%s3020_s4 + $0xb8] sm:$0xf0] }
   0x5   :  { %304 = vmatpush.bf16.msra.mxu3 %v1461_v7  ;;  %v1448_v16 = vld [vmem:[%s3020_s4 + $0xe0] sm:$0xf]  ;;  %v1980_v17 = vld [vmem:[%s3020_s4 + $0xec] sm:$0xf0]  ;;  %v1978_v19 = vld [vmem:[%s3020_s4 + $0xe4] sm:$0xf]  ;;  %v1425_v21 = vor.u32 %v1973_v13, %v1424_v12  ;;  %v1429_v25 = vor.u32 %v1971_v14, %v1426_v15 }
   0x6   :  { %v1449_v18 = vor.u32 %v1980_v17, %v1448_v16  ;;  %v1450_v20 = vld [vmem:[%s3020_s4 + $0xf0] sm:$0xf0]  ;;  %v1408_v22 = vld [vmem:[%s3020_s4 + $0x88] sm:$0xf]  ;;  %v1969_v23 = vld [vmem:[%s3020_s4 + $0x94] sm:$0xf0] }
   0x7   :  { %v1453_v24 = vor.u32 %v1978_v19, %v1450_v20  ;;  %v1432_v26 = vld [vmem:[%s3020_s4 + $0xc0] sm:$0xf]  ;;  %v1976_v27 = vld [vmem:[%s3020_s4 + $0xcc] sm:$0xf0]  ;;  %v1974_v28 = vld [vmem:[%s3020_s4 + $0xc4] sm:$0xf]  ;;  %v1409_v35 = vor.u32 %v1969_v23, %v1408_v22 }
   0x8   :  { %292 = vmatpush.bf16.msra.mxu2 %v1441_v10  ;;  %265 = vmatpush.bf16.msra.mxu0 %v1449_v18  ;;  %v1967_v29 = vld [vmem:[%s3020_s4 + $0x8c] sm:$0xf]  ;;  %v1410_v30 = vld [vmem:[%s3020_s4 + $0x98] sm:$0xf0]  ;;  %v1433_v31 = vor.u32 %v1976_v27, %v1432_v26  ;;  %v1434_v32 = vld [vmem:[%s3020_s4 + $0xd0] sm:$0xf0] }
   0x9   :  { %305 = vmatpush.bf16.msra.mxu3 %v1445_v11  ;;  %278 = vmatpush.bf16.msra.mxu1 %v1453_v24  ;;  %v1437_v33 = vor.u32 %v1974_v28, %v1434_v32  ;;  %v1416_v34 = vld [vmem:[%s3020_s4 + $0xa0] sm:$0xf]  ;;  %v1972_v36 = vld [vmem:[%s3020_s4 + $0xac] sm:$0xf0]  ;;  %v1970_v37 = vld [vmem:[%s3020_s4 + $0xa4] sm:$0xf]  ;;  %v1413_v39 = vor.u32 %v1967_v29, %v1410_v30 }
   0xa   :  { %v1418_v38 = vld [vmem:[%s3020_s4 + $0xb0] sm:$0xf0]  ;;  %v1392_v40 = vld [vmem:[%s3020_s4 + $0x68] sm:$0xf]  ;;  %v1965_v41 = vld [vmem:[%s3020_s4 + $0x74] sm:$0xf0]  ;;  %v1417_v43 = vor.u32 %v1972_v36, %v1416_v34 }
   0xb   :  { %v1963_v42 = vld [vmem:[%s3020_s4 + $0x6c] sm:$0xf]  ;;  %v1394_v44 = vld [vmem:[%s3020_s4 + $0x78] sm:$0xf0]  ;;  %v1421_v45 = vor.u32 %v1970_v37, %v1418_v38  ;;  %v1400_v46 = vld [vmem:[%s3020_s4 + $0x80] sm:$0xf]  ;;  %v1393_v50 = vor.u32 %v1965_v41, %v1392_v40 }
   0xc   :  { %293 = vmatpush.bf16.msra.mxu2 %v1425_v21  ;;  %266 = vmatpush.bf16.msra.mxu0 %v1433_v31  ;;  %v1968_v47 = vld [vmem:[%s3020_s4 + $0x8c] sm:$0xf0]  ;;  %v1966_v48 = vld [vmem:[%s3020_s4 + $0x84] sm:$0xf]  ;;  %v1402_v49 = vld [vmem:[%s3020_s4 + $0x90] sm:$0xf0]  ;;  %v1397_v51 = vor.u32 %v1963_v42, %v1394_v44 }
   0xd   :  { %306 = vmatpush.bf16.msra.mxu3 %v1429_v25  ;;  %279 = vmatpush.bf16.msra.mxu1 %v1437_v33  ;;  %v1376_v52 = vld [vmem:[%s3020_s4 + $0x48] sm:$0xf]  ;;  %v1961_v53 = vld [vmem:[%s3020_s4 + $0x54] sm:$0xf0]  ;;  %v1959_v54 = vld [vmem:[%s3020_s4 + $0x4c] sm:$0xf]  ;;  %v1401_v55 = vor.u32 %v1968_v47, %v1400_v46  ;;  %v1405_v57 = vor.u32 %v1966_v48, %v1402_v49 }
   0xe   :  { %v1378_v56 = vld [vmem:[%s3020_s4 + $0x58] sm:$0xf0]  ;;  %v1384_v58 = vld [vmem:[%s3020_s4 + $0x60] sm:$0xf]  ;;  %v1964_v59 = vld [vmem:[%s3020_s4 + $0x6c] sm:$0xf0]  ;;  %v1377_v62 = vor.u32 %v1961_v53, %v1376_v52 }
   0xf   :  { %v1962_v60 = vld [vmem:[%s3020_s4 + $0x64] sm:$0xf]  ;;  %v1386_v61 = vld [vmem:[%s3020_s4 + $0x70] sm:$0xf0]  ;;  %v1381_v63 = vor.u32 %v1959_v54, %v1378_v56  ;;  %v1360_v0 = vld [vmem:[%s3020_s4 + $0x28] sm:$0xf]  ;;  %v1385_v3 = vor.u32 %v1964_v59, %v1384_v58 }
  0x10   :  { %294 = vmatpush.bf16.msra.mxu2 %v1409_v35  ;;  %267 = vmatpush.bf16.msra.mxu0 %v1417_v43  ;;  %v1957_v1 = vld [vmem:[%s3020_s4 + $0x34] sm:$0xf0]  ;;  %v1955_v2 = vld [vmem:[%s3020_s4 + $0x2c] sm:$0xf]  ;;  %v1362_v4 = vld [vmem:[%s3020_s4 + $0x38] sm:$0xf0]  ;;  %v1389_v5 = vor.u32 %v1962_v60, %v1386_v61 }
  0x11   :  { %307 = vmatpush.bf16.msra.mxu3 %v1413_v39  ;;  %280 = vmatpush.bf16.msra.mxu1 %v1421_v45  ;;  %v1368_v6 = vld [vmem:[%s3020_s4 + $0x40] sm:$0xf]  ;;  %v1960_v7 = vld [vmem:[%s3020_s4 + $0x4c] sm:$0xf0]  ;;  %v1958_v8 = vld [vmem:[%s3020_s4 + $0x44] sm:$0xf]  ;;  %v1361_v10 = vor.u32 %v1957_v1, %v1360_v0  ;;  %v1365_v12 = vor.u32 %v1955_v2, %v1362_v4 }
  0x12   :  { %v1370_v9 = vld [vmem:[%s3020_s4 + $0x50] sm:$0xf0]  ;;  %v1344_v11 = vld [vmem:[%s3020_s4 + $0x8] sm:$0xf]  ;;  %v1953_v13 = vld [vmem:[%s3020_s4 + $0x14] sm:$0xf0]  ;;  %v1369_v16 = vor.u32 %v1960_v7, %v1368_v6 }
  0x13   :  { %v1951_v14 = vld [vmem:[%s3020_s4 + $0xc] sm:$0xf]  ;;  %v1346_v15 = vld [vmem:[%s3020_s4 + $0x18] sm:$0xf0]  ;;  %v1584_v17 = vld [vmem:[%s3019_s3 + $0xe8] sm:$0xf]  ;;  %v1373_v20 = vor.u32 %v1958_v8, %v1370_v9  ;;  %v1345_v24 = vor.u32 %v1953_v13, %v1344_v11 }
  0x14   :  { %295 = vmatpush.bf16.msra.mxu2 %v1393_v50  ;;  %268 = vmatpush.bf16.msra.mxu0 %v1401_v55  ;;  %v1949_v18 = vld [vmem:[%s3019_s3 + $0xf4] sm:$0xf0]  ;;  %v1947_v19 = vld [vmem:[%s3019_s3 + $0xec] sm:$0xf]  ;;  %v1586_v21 = vld [vmem:[%s3019_s3 + $0xf8] sm:$0xf0]  ;;  %v1349_v27 = vor.u32 %v1951_v14, %v1346_v15 }
  0x15   :  { %308 = vmatpush.bf16.msra.mxu3 %v1397_v51  ;;  %281 = vmatpush.bf16.msra.mxu1 %v1405_v57  ;;  %v1352_v22 = vld [vmem:[%s3020_s4 + $0x20] sm:$0xf]  ;;  %v1956_v23 = vld [vmem:[%s3020_s4 + $0x2c] sm:$0xf0]  ;;  %v1954_v25 = vld [vmem:[%s3020_s4 + $0x24] sm:$0xf]  ;;  %v1585_v28 = vor.u32 %v1949_v18, %v1584_v17  ;;  %v1589_v31 = vor.u32 %v1947_v19, %v1586_v21 }
  0x16   :  { %v1354_v26 = vld [vmem:[%s3020_s4 + $0x30] sm:$0xf0]  ;;  %v1568_v29 = vld [vmem:[%s3019_s3 + $0xc8] sm:$0xf]  ;;  %v1945_v30 = vld [vmem:[%s3019_s3 + $0xd4] sm:$0xf0]  ;;  %v1353_v35 = vor.u32 %v1956_v23, %v1352_v22 }
  0x17   :  { %v1943_v32 = vld [vmem:[%s3019_s3 + $0xcc] sm:$0xf]  ;;  %v1570_v33 = vld [vmem:[%s3019_s3 + $0xd8] sm:$0xf0]  ;;  %v72_v34 = vld [vmem:[%s3017_s1] sm:$0x1]  ;;  %v1357_v36 = vor.u32 %v1954_v25, %v1354_v26  ;;  %v1569_v43 = vor.u32 %v1945_v30, %v1568_v29 }
  0x18   :  { %296 = vmatpush.bf16.msra.mxu2 %v1377_v62  ;;  %269 = vmatpush.bf16.msra.mxu0 %v1385_v3  ;;  %v1336_v37 = vld [vmem:[%s3020_s4] sm:$0xf]  ;;  %v1952_v38 = vld [vmem:[%s3020_s4 + $0xc] sm:$0xf0]  ;;  %v1950_v41 = vld [vmem:[%s3020_s4 + $0x4] sm:$0xf]  ;;  %v1573_v46 = vor.u32 %v1943_v32, %v1570_v33 }
  0x19   :  { %309 = vmatpush.bf16.msra.mxu3 %v1381_v63  ;;  %282 = vmatpush.bf16.msra.mxu1 %v1389_v5  ;;  %v1576_v39 = vld [vmem:[%s3019_s3 + $0xe0] sm:$0xf]  ;;  %v1948_v40 = vld [vmem:[%s3019_s3 + $0xec] sm:$0xf0]  ;;  %v1338_v42 = vld [vmem:[%s3020_s4 + $0x10] sm:$0xf0]  ;;  %v1337_v49 = vor.u32 %v1952_v38, %v1336_v37 }
  0x1a   :  { %v1946_v44 = vld [vmem:[%s3019_s3 + $0xe4] sm:$0xf]  ;;  %v1578_v45 = vld [vmem:[%s3019_s3 + $0xf0] sm:$0xf0]  ;;  %v1552_v47 = vld [vmem:[%s3019_s3 + $0xa8] sm:$0xf]  ;;  %v1577_v52 = vor.u32 %v1948_v40, %v1576_v39  ;;  %v1341_v53 = vor.u32 %v1950_v41, %v1338_v42 }
  0x1b   :  { %v1941_v48 = vld [vmem:[%s3019_s3 + $0xb4] sm:$0xf0]  ;;  %v1939_v50 = vld [vmem:[%s3019_s3 + $0xac] sm:$0xf]  ;;  %v1554_v51 = vld [vmem:[%s3019_s3 + $0xb8] sm:$0xf0]  ;;  %v1581_v54 = vor.u32 %v1946_v44, %v1578_v45 }
  0x1c   :  { %297 = vmatpush.bf16.msra.mxu2 %v1361_v10  ;;  %270 = vmatpush.bf16.msra.mxu0 %v1369_v16  ;;  %v1560_v55 = vld [vmem:[%s3019_s3 + $0xc0] sm:$0xf]  ;;  %v1944_v56 = vld [vmem:[%s3019_s3 + $0xcc] sm:$0xf0]  ;;  %v1553_v57 = vor.u32 %v1941_v48, %v1552_v47  ;;  %v1942_v58 = vld [vmem:[%s3019_s3 + $0xc4] sm:$0xf]  ;;  %v1557_v60 = vor.u32 %v1939_v50, %v1554_v51 }
  0x1d   :  { %310 = vmatpush.bf16.msra.mxu3 %v1365_v12  ;;  %283 = vmatpush.bf16.msra.mxu1 %v1373_v20  ;;  %v1562_v59 = vld [vmem:[%s3019_s3 + $0xd0] sm:$0xf0]  ;;  %v1536_v61 = vld [vmem:[%s3019_s3 + $0x88] sm:$0xf]  ;;  %v1937_v62 = vld [vmem:[%s3019_s3 + $0x94] sm:$0xf0]  ;;  %v1561_v1 = vor.u32 %v1944_v56, %v1560_v55 }
  0x1e   :  { %v1935_v63 = vld [vmem:[%s3019_s3 + $0x8c] sm:$0xf]  ;;  %v1538_v0 = vld [vmem:[%s3019_s3 + $0x98] sm:$0xf0]  ;;  %v530_v2 = vld [vmem:[%s3021_s5] sm:$0xff]  ;;  %v1565_v3 = vor.u32 %v1942_v58, %v1562_v59  ;;  %v1537_v6 = vor.u32 %v1937_v62, %v1536_v61 }
  0x1f   :  { %v1544_v4 = vld [vmem:[%s3019_s3 + $0xa0] sm:$0xf]  ;;  %v1940_v5 = vld [vmem:[%s3019_s3 + $0xac] sm:$0xf0]  ;;  %534 = vst [vmem:[#allocation1] ss:$2 sm:$0xff] %v530_v2  ;;  %v1541_v9 = vor.u32 %v1935_v63, %v1538_v0 }
  0x20   :  { %298 = vmatpush.bf16.msra.mxu2 %v1345_v24  ;;  %271 = vmatpush.bf16.msra.mxu0 %v1353_v35  ;;  %v1938_v7 = vld [vmem:[%s3019_s3 + $0xa4] sm:$0xf]  ;;  %v1546_v8 = vld [vmem:[%s3019_s3 + $0xb0] sm:$0xf0]  ;;  %v1520_v10 = vld [vmem:[%s3019_s3 + $0x68] sm:$0xf]  ;;  %v1545_v14 = vor.u32 %v1940_v5, %v1544_v4 }
  0x21   :  { %311 = vmatpush.bf16.msra.mxu3 %v1349_v27  ;;  %284 = vmatpush.bf16.msra.mxu1 %v1357_v36  ;;  %v1933_v11 = vld [vmem:[%s3019_s3 + $0x74] sm:$0xf0]  ;;  %v1931_v12 = vld [vmem:[%s3019_s3 + $0x6c] sm:$0xf]  ;;  %v1522_v13 = vld [vmem:[%s3019_s3 + $0x78] sm:$0xf0]  ;;  %v1549_v15 = vor.u32 %v1938_v7, %v1546_v8 }
  0x22   :  { %v1528_v16 = vld [vmem:[%s3019_s3 + $0x80] sm:$0xf]  ;;  %v1936_v17 = vld [vmem:[%s3019_s3 + $0x8c] sm:$0xf0]  ;;  %v1521_v18 = vor.u32 %v1933_v11, %v1520_v10  ;;  %v1934_v19 = vld [vmem:[%s3019_s3 + $0x84] sm:$0xf]  ;;  %v1525_v21 = vor.u32 %v1931_v12, %v1522_v13 }
  0x23   :  { %299 = vmatmul.bf16.vlgmr.msra.gmra.mxu2 %v72_v34  ;;  %v1530_v20 = vld [vmem:[%s3019_s3 + $0x90] sm:$0xf0]  ;;  %v1504_v22 = vld [vmem:[%s3019_s3 + $0x48] sm:$0xf]  ;;  %v1929_v23 = vld [vmem:[%s3019_s3 + $0x54] sm:$0xf0] }
  0x24   :  { %503 = vmatpush.bf16.msrb.mxu2 %v1585_v28  ;;  %312 = vmatmul.bf16.vlgmr.msra.gmra.mxu3 %v72_v34 }
  0x25   :  { %516 = vmatpush.bf16.msrb.mxu3 %v1589_v31  ;;  %272 = vmatpush.bf16.msra.mxu0 %v1337_v49 }
  0x26   :  { %285 = vmatpush.bf16.msra.mxu1 %v1341_v53 }
  0x28   :  { %504 = vmatpush.bf16.msrb.mxu2 %v1569_v43  ;;  %273 = vmatmul.bf16.vlgmr.msra.gmra.mxu0 %v72_v34 }
  0x29   :  { %517 = vmatpush.bf16.msrb.mxu3 %v1573_v46  ;;  %477 = vmatpush.bf16.msrb.mxu0 %v1577_v52 }
  0x2a   :  { %490 = vmatpush.bf16.msrb.mxu1 %v1581_v54 }
  0x2b   :  { %286 = vmatmul.bf16.vlgmr.msra.gmra.mxu1 %v72_v34 }
  0x2c   :  { %505 = vmatpush.bf16.msrb.mxu2 %v1553_v57 }
  0x2d   :  { %518 = vmatpush.bf16.msrb.mxu3 %v1557_v60  ;;  %478 = vmatpush.bf16.msrb.mxu0 %v1561_v1 }
  0x2e   :  { %491 = vmatpush.bf16.msrb.mxu1 %v1565_v3 }
  0x30   :  { %506 = vmatpush.bf16.msrb.mxu2 %v1537_v6 }
  0x31   :  { %519 = vmatpush.bf16.msrb.mxu3 %v1541_v9 }
  0x32   :  { %16 = vsyncpa [#allocation3], 0  ;;  %v1927_v24 = vld [vmem:[%s3019_s3 + $0x4c] sm:$0xf]  ;;  %v1506_v25 = vld [vmem:[%s3019_s3 + $0x58] sm:$0xf0]  ;;  %479 = vmatpush.bf16.msrb.mxu0 %v1545_v14  ;;  %v1529_v26 = vor.u32 %v1936_v17, %v1528_v16  ;;  %492 = vmatpush.bf16.msrb.mxu1 %v1549_v15  ;;  %v1533_v27 = vor.u32 %v1934_v19, %v1530_v20  ;;  %v1505_v31 = vor.u32 %v1929_v23, %v1504_v22 }
  0x33   :  { %v1512_v28 = vld [vmem:[%s3019_s3 + $0x60] sm:$0xf]  ;;  %v1932_v29 = vld [vmem:[%s3019_s3 + $0x6c] sm:$0xf0]  ;;  %v531_v30 = vld [vmem:[%s3021_s5 + $0x8] sm:$0xff]  ;;  %v1509_v34 = vor.u32 %v1927_v24, %v1506_v25  ;;  %vm545_vm0 = vcmask 1043456  }
  0x34   :  { %507 = vmatpush.bf16.msrb.mxu2 %v1521_v18  ;;  %v1930_v32 = vld [vmem:[%s3019_s3 + $0x64] sm:$0xf]  ;;  %v1514_v33 = vld [vmem:[%s3019_s3 + $0x70] sm:$0xf0]  ;;  %536 = vst [vmem:[#allocation1 + $0x10] ss:$2 sm:$0xff] %v531_v30  ;;  %v1513_v39 = vor.u32 %v1932_v29, %v1512_v28 }
  0x35   :  { %520 = vmatpush.bf16.msrb.mxu3 %v1525_v21  ;;  %v1488_v35 = vld [vmem:[%s3019_s3 + $0x28] sm:$0xf]  ;;  %v1925_v36 = vld [vmem:[%s3019_s3 + $0x34] sm:$0xf0]  ;;  %v1923_v37 = vld [vmem:[%s3019_s3 + $0x2c] sm:$0xf]  ;;  %v1517_v40 = vor.u32 %v1930_v32, %v1514_v33 }
  0x36   :  { %v1490_v38 = vld [vmem:[%s3019_s3 + $0x38] sm:$0xf0]  ;;  %480 = vmatpush.bf16.msrb.mxu0 %v1529_v26  ;;  %493 = vmatpush.bf16.msrb.mxu1 %v1533_v27  ;;  %v1496_v41 = vld [vmem:[%s3019_s3 + $0x40] sm:$0xf]  ;;  %v1928_v42 = vld [vmem:[%s3019_s3 + $0x4c] sm:$0xf0]  ;;  %v1489_v43 = vor.u32 %v1925_v36, %v1488_v35 }
  0x37   :  { %v1926_v44 = vld [vmem:[%s3019_s3 + $0x44] sm:$0xf]  ;;  %v1498_v45 = vld [vmem:[%s3019_s3 + $0x50] sm:$0xf0]  ;;  %v1493_v46 = vor.u32 %v1923_v37, %v1490_v38  ;;  %v1472_v47 = vld [vmem:[%s3019_s3 + $0x8] sm:$0xf]  ;;  %v1497_v51 = vor.u32 %v1928_v42, %v1496_v41 }
  0x38   :  { %508 = vmatpush.bf16.msrb.mxu2 %v1505_v31  ;;  %v1921_v48 = vld [vmem:[%s3019_s3 + $0x14] sm:$0xf0]  ;;  %v1919_v49 = vld [vmem:[%s3019_s3 + $0xc] sm:$0xf]  ;;  %v1474_v50 = vld [vmem:[%s3019_s3 + $0x18] sm:$0xf0]  ;;  %v1501_v52 = vor.u32 %v1926_v44, %v1498_v45 }
  0x39   :  { %521 = vmatpush.bf16.msrb.mxu3 %v1509_v34  ;;  %v1480_v53 = vld [vmem:[%s3019_s3 + $0x20] sm:$0xf]  ;;  %v1924_v54 = vld [vmem:[%s3019_s3 + $0x2c] sm:$0xf0]  ;;  %v1473_v55 = vor.u32 %v1921_v48, %v1472_v47  ;;  %v1922_v56 = vld [vmem:[%s3019_s3 + $0x24] sm:$0xf]  ;;  %v1477_v58 = vor.u32 %v1919_v49, %v1474_v50 }
  0x3a   :  { %481 = vmatpush.bf16.msrb.mxu0 %v1513_v39  ;;  %494 = vmatpush.bf16.msrb.mxu1 %v1517_v40  ;;  %v1482_v57 = vld [vmem:[%s3019_s3 + $0x30] sm:$0xf0]  ;;  %v537_v59 = vld.sshfl [vmem:[#allocation1] sm:$0xff pattern:$0x75316420]  ;;  %v1481_v60 = vor.u32 %v1924_v54, %v1480_v53  ;;  %vm541_vm1 = vcmask 31744  }
  0x3b   :  { %v1464_v61 = vld [vmem:[%s3019_s3] sm:$0xf]  ;;  %v538_v62 = vld.sshfl [vmem:[#allocation1 + $0x8] sm:$0xff pattern:$0x75316420]  ;;  %v1485_v63 = vor.u32 %v1922_v56, %v1482_v57  ;;  %s2090_s30 = smov [#allocation2]  }
  0x3c   :  { %509 = vmatpush.bf16.msrb.mxu2 %v1489_v43  ;;  %v1920_v0 = vld [vmem:[%s3019_s3 + $0xc] sm:$0xf0]  ;;  %v39_v1 = vld [vmem:[%s3016_s0] sm:$0x1]  ;;  %v1918_v2 = vld [vmem:[%s3019_s3 + $0x4] sm:$0xf] }
  0x3d   :  { %522 = vmatpush.bf16.msrb.mxu3 %v1493_v46  ;;  %v1466_v3 = vld [vmem:[%s3019_s3 + $0x10] sm:$0xf0]  ;;  %v1465_v5 = vor.u32 %v1920_v0, %v1464_v61  ;;  %v540_v6 = vld.sshfl [vmem:[#allocation1 + $0x18] sm:$0xff pattern:$0x75316420]  ;;  %s1323_s12 = sshll.u32 %s2090_s30, 4  ;;  %s1324_s12 = int_to_ptr.vmem [resolvable:$true] %s1323_s12 }
  0x3e   :  { %482 = vmatpush.bf16.msrb.mxu0 %v1497_v51  ;;  %495 = vmatpush.bf16.msrb.mxu1 %v1501_v52  ;;  %v539_v4 = vld.sshfl [vmem:[#allocation1 + $0x10] sm:$0xff pattern:$0x75316420]  ;;  %v1469_v7 = vor.u32 %v1918_v2, %v1466_v3  ;;  %v529_v8 = vld [vmem:[%s3018_s2] sm:$0x3]  ;;  %s1325_s15 = sshll.u32 %s3027_s11, 4  ;;  %s1326_s15 = int_to_ptr.hbm [resolvable:$true] %s1325_s15 }
  0x3f   :  { %v1656_v9 = vld [vmem:[%s3023_s7 + $0x70] sm:$0xf]  ;;  %v1997_v10 = vld [vmem:[%s3023_s7 + $0x74] sm:$0xf0]  ;;  %v1648_v15 = vld [vmem:[%s3023_s7 + $0x60] sm:$0xf] }
  0x40   :  { %510 = vmatpush.bf16.msrb.mxu2 %v1473_v55  ;;  %v1720_v11 = vld [vmem:[%s3023_s7 + $0xf0] sm:$0xf]  ;;  %v1657_v12 = vor.u32 %v1997_v10, %v1656_v9  ;;  %v2013_v13 = vld [vmem:[%s3023_s7 + $0xf4] sm:$0xf0]  ;;  %v1995_v16 = vld [vmem:[%s3023_s7 + $0x64] sm:$0xf0] }
  0x41   :  { %523 = vmatpush.bf16.msrb.mxu3 %v1477_v58  ;;  %v1721_v14 = vor.u32 %v2013_v13, %v1720_v11  ;;  %v1712_v17 = vld [vmem:[%s3023_s7 + $0xe0] sm:$0xf]  ;;  %v1649_v18 = vor.u32 %v1995_v16, %v1648_v15  ;;  %v2011_v19 = vld [vmem:[%s3023_s7 + $0xe4] sm:$0xf0]  ;;  %v1640_v20 = vld [vmem:[%s3023_s7 + $0x50] sm:$0xf] }
  0x42   :  { %483 = vmatpush.bf16.msrb.mxu0 %v1481_v60  ;;  %496 = vmatpush.bf16.msrb.mxu1 %v1485_v63  ;;  %v1993_v21 = vld [vmem:[%s3023_s7 + $0x54] sm:$0xf0]  ;;  %v1713_v22 = vor.u32 %v2011_v19, %v1712_v17  ;;  %v1704_v23 = vld [vmem:[%s3023_s7 + $0xd0] sm:$0xf]  ;;  %v1632_v33 = vld [vmem:[%s3023_s7 + $0x40] sm:$0xf] }
  0x43   :  { %511 = vmatmul.bf16.vlgmr.msrb.gmra.mxu2 %v39_v1  ;;  %v2009_v24 = vld [vmem:[%s3023_s7 + $0xd4] sm:$0xf0]  ;;  %v1784_v25 = vld [vmem:[%s3023_s7 + $0x170] sm:$0xf]  ;;  %v1641_v26 = vor.u32 %v1993_v21, %v1640_v20  ;;  %v1991_v34 = vld [vmem:[%s3023_s7 + $0x44] sm:$0xf0] }
  0x44   :  { %1590 = vmatpush.msk.msra.mxu2 %vm545_vm0, %v537_v59  ;;  %524 = vmatmul.bf16.vlgmr.msrb.gmra.mxu3 %v39_v1  ;;  %v2029_v27 = vld [vmem:[%s3023_s7 + $0x174] sm:$0xf0]  ;;  %v1848_v28 = vld [vmem:[%s3023_s7 + $0x1f0] sm:$0xf]  ;;  %v1705_v30 = vor.u32 %v2009_v24, %v1704_v23  ;;  %v1696_v35 = vld [vmem:[%s3023_s7 + $0xc0] sm:$0xf]  ;;  %v1633_v42 = vor.u32 %v1991_v34, %v1632_v33 }
  0x45   :  { %1592 = vmatpush.msk.msra.mxu3 %vm545_vm0, %v538_v62  ;;  %v2045_v29 = vld [vmem:[%s3023_s7 + $0x1f4] sm:$0xf0]  ;;  %v1785_v31 = vor.u32 %v2029_v27, %v1784_v25  ;;  %v2007_v36 = vld [vmem:[%s3023_s7 + $0xc4] sm:$0xf0]  ;;  %v1776_v37 = vld [vmem:[%s3023_s7 + $0x160] sm:$0xf] }
  0x46   :  { %1594 = vmatpush.msk.msrb.mxu2 %vm545_vm0, %v539_v4  ;;  %484 = vmatpush.bf16.msrb.mxu0 %v1465_v5  ;;  %v1849_v32 = vor.u32 %v2045_v29, %v1848_v28  ;;  %v2027_v38 = vld [vmem:[%s3023_s7 + $0x164] sm:$0xf0]  ;;  %v1840_v40 = vld [vmem:[%s3023_s7 + $0x1e0] sm:$0xf]  ;;  %v1624_v44 = vld [vmem:[%s3023_s7 + $0x30] sm:$0xf]  ;;  %v1697_v46 = vor.u32 %v2007_v36, %v1696_v35 }
  0x47   :  { %1596 = vmatpush.msk.msrb.mxu3 %vm545_vm0, %v540_v6  ;;  %497 = vmatpush.bf16.msrb.mxu1 %v1469_v7  ;;  %v1777_v39 = vor.u32 %v2027_v38, %v1776_v37  ;;  %v2043_v41 = vld [vmem:[%s3023_s7 + $0x1e4] sm:$0xf0]  ;;  %v1989_v45 = vld [vmem:[%s3023_s7 + $0x34] sm:$0xf0]  ;;  %v1768_v47 = vld [vmem:[%s3023_s7 + $0x150] sm:$0xf] }
  0x48   :  { %v1841_v43 = vor.u32 %v2043_v41, %v1840_v40  ;;  %v2025_v48 = vld [vmem:[%s3023_s7 + $0x154] sm:$0xf0]  ;;  %v1832_v49 = vld [vmem:[%s3023_s7 + $0x1d0] sm:$0xf]  ;;  %v1625_v55 = vor.u32 %v1989_v45, %v1624_v44  ;;  %v1616_v57 = vld [vmem:[%s3023_s7 + $0x20] sm:$0xf] }
  0x49   :  { %485 = vmatmul.bf16.vlgmr.msrb.gmra.mxu0 %v39_v1  ;;  %v1688_v50 = vld [vmem:[%s3023_s7 + $0xb0] sm:$0xf]  ;;  %v2005_v51 = vld [vmem:[%s3023_s7 + $0xb4] sm:$0xf0]  ;;  %v1769_v53 = vor.u32 %v2025_v48, %v1768_v47  ;;  %v1987_v58 = vld [vmem:[%s3023_s7 + $0x24] sm:$0xf0] }
  0x4a   :  { %498 = vmatmul.bf16.vlgmr.msrb.gmra.mxu1 %v39_v1  ;;  %1050 = vmatpush.bf16.msra.mxu0 %v1657_v12  ;;  %v2041_v52 = vld [vmem:[%s3023_s7 + $0x1d4] sm:$0xf0]  ;;  %v1689_v56 = vor.u32 %v2005_v51, %v1688_v50  ;;  %v1680_v59 = vld [vmem:[%s3023_s7 + $0xa0] sm:$0xf]  ;;  %v1617_v60 = vor.u32 %v1987_v58, %v1616_v57  ;;  %v2003_v61 = vld [vmem:[%s3023_s7 + $0xa4] sm:$0xf0] }
  0x4b   :  { %1063 = vmatpush.bf16.msra.mxu1 %v1721_v14  ;;  %v1833_v54 = vor.u32 %v2041_v52, %v1832_v49  ;;  %v1760_v62 = vld [vmem:[%s3023_s7 + $0x140] sm:$0xf]  ;;  %v2023_v63 = vld [vmem:[%s3023_s7 + $0x144] sm:$0xf0]  ;;  %v1681_v0 = vor.u32 %v2003_v61, %v1680_v59  ;;  %v1608_v5 = vld [vmem:[%s3023_s7 + $0x10] sm:$0xf] }
  0x4c   :  { %v1761_v1 = vor.u32 %v2023_v63, %v1760_v62  ;;  %v1824_v2 = vld [vmem:[%s3023_s7 + $0x1c0] sm:$0xf]  ;;  %v2039_v3 = vld [vmem:[%s3023_s7 + $0x1c4] sm:$0xf0]  ;;  %v1985_v6 = vld [vmem:[%s3023_s7 + $0x14] sm:$0xf0] }
  0x4d   :  { %v1825_v4 = vor.u32 %v2039_v3, %v1824_v2  ;;  %v1672_v7 = vld [vmem:[%s3023_s7 + $0x90] sm:$0xf]  ;;  %v1609_v10 = vor.u32 %v1985_v6, %v1608_v5  ;;  %v2001_v11 = vld [vmem:[%s3023_s7 + $0x94] sm:$0xf0]  ;;  %v1600_v21 = vld [vmem:[%s3023_s7] sm:$0xf] }
  0x4e   :  { %1051 = vmatpush.bf16.msra.mxu0 %v1649_v18  ;;  %v1752_v12 = vld [vmem:[%s3023_s7 + $0x130] sm:$0xf]  ;;  %v2021_v13 = vld [vmem:[%s3023_s7 + $0x134] sm:$0xf0]  ;;  %v1673_v16 = vor.u32 %v2001_v11, %v1672_v7  ;;  %v1664_v23 = vld [vmem:[%s3023_s7 + $0x80] sm:$0xf] }
  0x4f   :  { %1064 = vmatpush.bf16.msra.mxu1 %v1713_v22  ;;  %v1753_v17 = vor.u32 %v2021_v13, %v1752_v12  ;;  %v1816_v18 = vld [vmem:[%s3023_s7 + $0x1b0] sm:$0xf]  ;;  %v2037_v19 = vld [vmem:[%s3023_s7 + $0x1b4] sm:$0xf0]  ;;  %v1983_v22 = vld [vmem:[%s3023_s7 + $0x4] sm:$0xf0] }
  0x50   :  { %v1817_v20 = vor.u32 %v2037_v19, %v1816_v18  ;;  %v1601_v24 = vor.u32 %v1983_v22, %v1600_v21  ;;  %v1999_v25 = vld [vmem:[%s3023_s7 + $0x84] sm:$0xf0]  ;;  %v1658_v34 = vld [vmem:[%s3023_s7 + $0x78] sm:$0xf0]  ;;  %v2012_v35 = vld [vmem:[%s3023_s7 + $0xf4] sm:$0xf] }
  0x51   :  { %v2019_v27 = vld [vmem:[%s3023_s7 + $0x124] sm:$0xf0]  ;;  %v1665_v28 = vor.u32 %v1999_v25, %v1664_v23  ;;  %v1722_v36 = vld [vmem:[%s3023_s7 + $0xf8] sm:$0xf0]  ;;  %v1736_v41 = vld [vmem:[%s3023_s7 + $0x110] sm:$0xf] }
  0x52   :  { %1052 = vmatpush.bf16.msra.mxu0 %v1641_v26  ;;  %v1744_v26 = vld [vmem:[%s3023_s7 + $0x120] sm:$0xf]  ;;  %v1725_v40 = vor.u32 %v2012_v35, %v1722_v36  ;;  %v2033_v47 = vld [vmem:[%s3023_s7 + $0x194] sm:$0xf0]  ;;  %v1994_v48 = vld [vmem:[%s3023_s7 + $0x64] sm:$0xf] }
  0x53   :  { %1591 = vmatmul.msk.f32.vlgmr.msra.gmra.mxu2 %vm541_vm1, %v529_v8  ;;  %1065 = vmatpush.bf16.msra.mxu1 %v1705_v30  ;;  %v1745_v29 = vor.u32 %v2019_v27, %v1744_v26  ;;  %v1808_v30 = vld [vmem:[%s3023_s7 + $0x1a0] sm:$0xf]  ;;  %v1650_v49 = vld [vmem:[%s3023_s7 + $0x68] sm:$0xf0]  ;;  %v2010_v52 = vld [vmem:[%s3023_s7 + $0xe4] sm:$0xf] }
  0x54   :  { %1593 = vmatmul.msk.f32.vlgmr.msra.gmra.mxu3 %vm541_vm1, %v529_v8  ;;  %1076 = vmatpush.bf16.msra.mxu2 %v1785_v31  ;;  %v2035_v31 = vld [vmem:[%s3023_s7 + $0x1a4] sm:$0xf0]  ;;  %v1653_v51 = vor.u32 %v1994_v48, %v1650_v49  ;;  %v1792_v57 = vld [vmem:[%s3023_s7 + $0x180] sm:$0xf]  ;;  %v1642_v61 = vld [vmem:[%s3023_s7 + $0x58] sm:$0xf0] }
  0x55   :  { %1089 = vmatpush.bf16.msra.mxu3 %v1849_v32  ;;  %v1996_v32 = vld [vmem:[%s3023_s7 + $0x74] sm:$0xf]  ;;  %v1809_v33 = vor.u32 %v2035_v31, %v1808_v30  ;;  %v2031_v59 = vld [vmem:[%s3023_s7 + $0x184] sm:$0xf0]  ;;  %v1850_v7 = vld [vmem:[%s3023_s7 + $0x1f8] sm:$0xf0] }
  0x56   :  { %1053 = vmatpush.bf16.msra.mxu0 %v1633_v42  ;;  %v2017_v42 = vld [vmem:[%s3023_s7 + $0x114] sm:$0xf0]  ;;  %v1793_v62 = vor.u32 %v2031_v59, %v1792_v57  ;;  %v2028_v3 = vld [vmem:[%s3023_s7 + $0x174] sm:$0xf]  ;;  %v1990_v11 = vld [vmem:[%s3023_s7 + $0x44] sm:$0xf] }
  0x57   :  { %1066 = vmatpush.bf16.msra.mxu1 %v1697_v46  ;;  %v1737_v46 = vor.u32 %v2017_v42, %v1736_v41  ;;  %v2044_v6 = vld [vmem:[%s3023_s7 + $0x1f4] sm:$0xf]  ;;  %v1634_v12 = vld [vmem:[%s3023_s7 + $0x48] sm:$0xf0]  ;;  %v2006_v13 = vld [vmem:[%s3023_s7 + $0xc4] sm:$0xf] }
  0x58   :  { %1077 = vmatpush.bf16.msra.mxu2 %v1777_v39  ;;  %v1661_v39 = vor.u32 %v1996_v32, %v1658_v34  ;;  %v2026_v18 = vld [vmem:[%s3023_s7 + $0x164] sm:$0xf]  ;;  %v1778_v19 = vld [vmem:[%s3023_s7 + $0x168] sm:$0xf0]  ;;  %v1988_v25 = vld [vmem:[%s3023_s7 + $0x34] sm:$0xf] }
  0x59   :  { %1090 = vmatpush.bf16.msra.mxu3 %v1841_v43  ;;  %v1800_v43 = vld [vmem:[%s3023_s7 + $0x190] sm:$0xf]  ;;  %v1781_v21 = vor.u32 %v2026_v18, %v1778_v19  ;;  %v2042_v22 = vld [vmem:[%s3023_s7 + $0x1e4] sm:$0xf]  ;;  %v1842_v23 = vld [vmem:[%s3023_s7 + $0x1e8] sm:$0xf0] }
  0x5a   :  { %1054 = vmatpush.bf16.msra.mxu0 %v1625_v55  ;;  %v1801_v50 = vor.u32 %v2033_v47, %v1800_v43  ;;  %v1728_v55 = vld [vmem:[%s3023_s7 + $0x100] sm:$0xf]  ;;  %v1626_v26 = vld [vmem:[%s3023_s7 + $0x38] sm:$0xf0]  ;;  %v2004_v27 = vld [vmem:[%s3023_s7 + $0xb4] sm:$0xf] }
  0x5b   :  { %1595 = vmatmul.msk.f32.vlgmr.msrb.gmra.mxu2 %vm541_vm1, %v529_v8  ;;  %1067 = vmatpush.bf16.msra.mxu1 %v1689_v56  ;;  %v2015_v56 = vld [vmem:[%s3023_s7 + $0x104] sm:$0xf0]  ;;  %v2024_v30 = vld [vmem:[%s3023_s7 + $0x154] sm:$0xf]  ;;  %v1770_v32 = vld [vmem:[%s3023_s7 + $0x158] sm:$0xf0] }
  0x5c   :  { %1597 = vmatmul.msk.f32.vlgmr.msrb.gmra.mxu3 %vm541_vm1, %v529_v8  ;;  %1078 = vmatpush.bf16.msra.mxu2 %v1769_v53  ;;  %v1714_v53 = vld [vmem:[%s3023_s7 + $0xe8] sm:$0xf0]  ;;  %v1729_v58 = vor.u32 %v2015_v56, %v1728_v55  ;;  %v1773_v34 = vor.u32 %v2024_v30, %v1770_v32  ;;  %v1834_v35 = vld [vmem:[%s3023_s7 + $0x1d8] sm:$0xf0]  ;;  %v2022_v42 = vld [vmem:[%s3023_s7 + $0x144] sm:$0xf] }
  0x5d   :  { %1091 = vmatpush.bf16.msra.mxu3 %v1833_v54  ;;  %v1717_v54 = vor.u32 %v2010_v52, %v1714_v53  ;;  %v1682_v41 = vld [vmem:[%s3023_s7 + $0xa8] sm:$0xf0]  ;;  %v1610_v52 = vld [vmem:[%s3023_s7 + $0x18] sm:$0xf0]  ;;  %v2000_v53 = vld [vmem:[%s3023_s7 + $0x94] sm:$0xf] }
  0x5e   :  { %1055 = vmatpush.bf16.msra.mxu0 %v1617_v60  ;;  %v1992_v60 = vld [vmem:[%s3023_s7 + $0x54] sm:$0xf]  ;;  %v1762_v43 = vld [vmem:[%s3023_s7 + $0x148] sm:$0xf0]  ;;  %v1674_v57 = vld [vmem:[%s3023_s7 + $0x98] sm:$0xf0] }
  0x5f   :  { %1068 = vmatpush.bf16.msra.mxu1 %v1681_v0  ;;  %v1645_v63 = vor.u32 %v1992_v60, %v1642_v61  ;;  %v2008_v0 = vld [vmem:[%s3023_s7 + $0xd4] sm:$0xf]  ;;  %v1826_v47 = vld [vmem:[%s3023_s7 + $0x1c8] sm:$0xf0]  ;;  %v1754_v59 = vld [vmem:[%s3023_s7 + $0x138] sm:$0xf0]  ;;  %v1677_v60 = vor.u32 %v2000_v53, %v1674_v57 }
  0x60   :  { %1079 = vmatpush.bf16.msra.mxu2 %v1761_v1  ;;  %v1706_v1 = vld [vmem:[%s3023_s7 + $0xd8] sm:$0xf0]  ;;  %v2036_v61 = vld [vmem:[%s3023_s7 + $0x1b4] sm:$0xf]  ;;  %v1794_v30 = vld [vmem:[%s3023_s7 + $0x188] sm:$0xf0] }
  0x61   :  { %1092 = vmatpush.bf16.msra.mxu3 %v1825_v4  ;;  %v1709_v2 = vor.u32 %v2008_v0, %v1706_v1  ;;  %v1786_v4 = vld [vmem:[%s3023_s7 + $0x178] sm:$0xf0]  ;;  %v2016_v19 = vld [vmem:[%s3023_s7 + $0x114] sm:$0xf]  ;;  %vm1316_vm2 = vcmask 41984  }
  0x62   :  { %1056 = vmatpush.bf16.msra.mxu0 %v1609_v10  ;;  %v1789_v5 = vor.u32 %v2028_v3, %v1786_v4  ;;  %v1853_v10 = vor.u32 %v2044_v6, %v1850_v7  ;;  %v1998_v3 = vld [vmem:[%s3023_s7 + $0x84] sm:$0xf]  ;;  %v1666_v4 = vld [vmem:[%s3023_s7 + $0x88] sm:$0xf0]  ;;  %v2052_v57 = vld [vmem:[%s3025_s9 + $0x30] sm:$0xff] }
  0x63   :  { %1069 = vmatpush.bf16.msra.mxu1 %v1673_v16  ;;  %v1637_v16 = vor.u32 %v1990_v11, %v1634_v12  ;;  %v1746_v6 = vld [vmem:[%s3023_s7 + $0x128] sm:$0xf0]  ;;  %v2034_v7 = vld [vmem:[%s3023_s7 + $0x1a4] sm:$0xf]  ;;  %v1669_v11 = vor.u32 %v1998_v3, %v1666_v4 }
  0x64   :  { %1080 = vmatpush.bf16.msra.mxu2 %v1753_v17  ;;  %v1698_v17 = vld [vmem:[%s3023_s7 + $0xc8] sm:$0xf0]  ;;  %v2046_v4 = vld [vmem:[%s3025_s9] sm:$0xff] }
  0x65   :  { %1093 = vmatpush.bf16.msra.mxu3 %v1817_v20  ;;  %v1701_v20 = vor.u32 %v2006_v13, %v1698_v17  ;;  %v1810_v12 = vld [vmem:[%s3023_s7 + $0x1a8] sm:$0xf0] }
  0x66   :  { %1057 = vmatpush.bf16.msra.mxu0 %v1601_v24  ;;  %v1845_v24 = vor.u32 %v2042_v22, %v1842_v23  ;;  %v2059_v3 = vld [vmem:[%s3025_s9 + $0x68] sm:$0xff] }
  0x67   :  { %1070 = vmatpush.bf16.msra.mxu1 %v1665_v28  ;;  %v1629_v28 = vor.u32 %v1988_v25, %v1626_v26 }
  0x68   :  { %1081 = vmatpush.bf16.msra.mxu2 %v1745_v29  ;;  %v1690_v29 = vld [vmem:[%s3023_s7 + $0xb8] sm:$0xf0] }
  0x69   :  { %1094 = vmatpush.bf16.msra.mxu3 %v1809_v33  ;;  %v1693_v31 = vor.u32 %v2004_v27, %v1690_v29  ;;  %v2040_v33 = vld [vmem:[%s3023_s7 + $0x1d4] sm:$0xf]  ;;  %v2014_v27 = vld [vmem:[%s3023_s7 + $0x104] sm:$0xf] }
  0x6a   :  { %1102 = vmatpush.bf16.msrb.mxu0 %v1661_v39  ;;  %v1837_v36 = vor.u32 %v2040_v33, %v1834_v35  ;;  %v2002_v39 = vld [vmem:[%s3023_s7 + $0xa4] sm:$0xf] }
  0x6b   :  { %1115 = vmatpush.bf16.msrb.mxu1 %v1725_v40  ;;  %v2030_v29 = vld [vmem:[%s3023_s7 + $0x184] sm:$0xf] }
  0x6c   :  { %1082 = vmatpush.bf16.msra.mxu2 %v1737_v46  ;;  %v2038_v46 = vld [vmem:[%s3023_s7 + $0x1c4] sm:$0xf]  ;;  %v1797_v33 = vor.u32 %v2030_v29, %v1794_v30 }
  0x6d   :  { %1095 = vmatpush.bf16.msra.mxu3 %v1801_v50  ;;  %v1829_v48 = vor.u32 %v2038_v46, %v1826_v47  ;;  %v2053_v46 = vld [vmem:[%s3025_s9 + $0x38] sm:$0xff] }
  0x6e   :  { %1103 = vmatpush.bf16.msrb.mxu0 %v1653_v51  ;;  %v1984_v51 = vld [vmem:[%s3023_s7 + $0x14] sm:$0xf] }
  0x6f   :  { %1116 = vmatpush.bf16.msrb.mxu1 %v1717_v54  ;;  %v1613_v56 = vor.u32 %v1984_v51, %v1610_v52 }
  0x70   :  { %1083 = vmatpush.bf16.msra.mxu2 %v1729_v58  ;;  %v2020_v58 = vld [vmem:[%s3023_s7 + $0x134] sm:$0xf] }
  0x71   :  { %1096 = vmatpush.bf16.msra.mxu3 %v1793_v62  ;;  %v1818_v62 = vld [vmem:[%s3023_s7 + $0x1b8] sm:$0xf0]  ;;  %v1757_v0 = vor.u32 %v2020_v58, %v1754_v59 }
  0x72   :  { %1104 = vmatpush.bf16.msrb.mxu0 %v1645_v63  ;;  %v1982_v63 = vld [vmem:[%s3023_s7 + $0x4] sm:$0xf]  ;;  %v1821_v1 = vor.u32 %v2036_v61, %v1818_v62  ;;  %v2049_v62 = vld [vmem:[%s3025_s9 + $0x18] sm:$0xff] }
  0x73   :  { %1117 = vmatpush.bf16.msrb.mxu1 %v1709_v2  ;;  %v1602_v2 = vld [vmem:[%s3023_s7 + $0x8] sm:$0xf0]  ;;  %v2050_v61 = vld [vmem:[%s3025_s9 + $0x20] sm:$0xff] }
  0x74   :  { %1128 = vmatpush.bf16.msrb.mxu2 %v1789_v5  ;;  %v2018_v5 = vld [vmem:[%s3023_s7 + $0x124] sm:$0xf] }
  0x75   :  { %1141 = vmatpush.bf16.msrb.mxu3 %v1853_v10  ;;  %v1605_v10 = vor.u32 %v1982_v63, %v1602_v2  ;;  %v1749_v13 = vor.u32 %v2018_v5, %v1746_v6  ;;  %v2061_v63 = vld [vmem:[%s3025_s9 + $0x78] sm:$0xff]  ;;  %v2047_v2 = vld [vmem:[%s3025_s9 + $0x8] sm:$0xff]  ;;  %v2058_v5 = vld [vmem:[%s3025_s9 + $0x60] sm:$0xff] }
  0x76   :  { %1105 = vmatpush.bf16.msrb.mxu0 %v1637_v16  ;;  %v1813_v16 = vor.u32 %v2034_v7, %v1810_v12  ;;  %v2057_v6 = vld [vmem:[%s3025_s9 + $0x58] sm:$0xff]  ;;  %v2056_v7 = vld [vmem:[%s3025_s9 + $0x50] sm:$0xff] }
  0x77   :  { %1118 = vmatpush.bf16.msrb.mxu1 %v1701_v20  ;;  %v1738_v20 = vld [vmem:[%s3023_s7 + $0x118] sm:$0xf0] }
  0x78   :  { %1129 = vmatpush.bf16.msrb.mxu2 %v1781_v21  ;;  %v2032_v21 = vld [vmem:[%s3023_s7 + $0x194] sm:$0xf]  ;;  %v1741_v25 = vor.u32 %v2016_v19, %v1738_v20 }
  0x79   :  { %1142 = vmatpush.bf16.msrb.mxu3 %v1845_v24  ;;  %v1802_v24 = vld [vmem:[%s3023_s7 + $0x198] sm:$0xf0] }
  0x7a   :  { %1106 = vmatpush.bf16.msrb.mxu0 %v1629_v28  ;;  %v1805_v26 = vor.u32 %v2032_v21, %v1802_v24  ;;  %v1730_v28 = vld [vmem:[%s3023_s7 + $0x108] sm:$0xf0] }
  0x7b   :  { %1119 = vmatpush.bf16.msrb.mxu1 %v1693_v31  ;;  %v638_v31 = vld [vmem:[%s3022_s6] sm:$0xf]  ;;  %v1733_v32 = vor.u32 %v2014_v27, %v1730_v28 }
  0x7c   :  { %1130 = vmatpush.bf16.msrb.mxu2 %v1773_v34  ;;  %v640_v35 = vperm.slane %v638_v31, 0  ;;  %v643_v52 = vperm.slane %v638_v31, 3 }
  0x7d   :  { %1143 = vmatpush.bf16.msrb.mxu3 %v1837_v36 }
  0x81   :  { %1144 = vmatpush.bf16.msrb.mxu3 %v1829_v48 }
  0x85   :  { %1145 = vmatpush.bf16.msrb.mxu3 %v1821_v1  ;;  %v2060_v1 = vld [vmem:[%s3025_s9 + $0x70] sm:$0xff] }
  0x89   :  { %1146 = vmatpush.bf16.msrb.mxu3 %v1813_v16  ;;  %v2054_v16 = vld [vmem:[%s3025_s9 + $0x40] sm:$0xff] }
  0x8d   :  { %1147 = vmatpush.bf16.msrb.mxu3 %v1805_v26 }
  0x91   :  { %1148 = vmatpush.bf16.msrb.mxu3 %v1797_v33 }
  0xa5   :  { %v2685_v9 = vpop.f32.mrf.mxu0 }
  0xa6   :  { %v2683_v8 = vpop.f32.mrf.mxu2 }
  0xa7   :  { %v2696_v14 = vpop.f32.mrf.mxu3 }
  0xa8   :  { %v2698_v15 = vpop.f32.mrf.mxu1 }
  0xad   :  { %v276_v38 = vpop.f32.mrf.mxu0 }
  0xae   :  { %v302_v37 = vpop.f32.mrf.mxu2  ;;  %v1618_v38 = vld [vmem:[%s3023_s7 + $0x28] sm:$0xf0] }
  0xaf   :  { %v315_v44 = vpop.f32.mrf.mxu3  ;;  %v1986_v37 = vld [vmem:[%s3023_s7 + $0x24] sm:$0xf] }
  0xb0   :  { %v289_v45 = vpop.f32.mrf.mxu1  ;;  %v1621_v40 = vor.u32 %v1986_v37, %v1618_v38  ;;  %v1685_v44 = vor.u32 %v2002_v39, %v1682_v41  ;;  %v641_v38 = vperm.slane %v638_v31, 1 }
  0xb1   :  { %v1765_v45 = vor.u32 %v2022_v42, %v1762_v43 }
  0xb2   :  { %1107 = vmatpush.bf16.msrb.mxu0 %v1621_v40  ;;  %1120 = vmatpush.bf16.msrb.mxu1 %v1685_v44 }
  0xb3   :  { %1131 = vmatpush.bf16.msrb.mxu2 %v1765_v45 }
  0xb6   :  { %1108 = vmatpush.bf16.msrb.mxu0 %v1613_v56  ;;  %1121 = vmatpush.bf16.msrb.mxu1 %v1677_v60 }
  0xb7   :  { %1132 = vmatpush.bf16.msrb.mxu2 %v1757_v0  ;;  %v2048_v0 = vld [vmem:[%s3025_s9 + $0x10] sm:$0xff] }
  0xba   :  { %1109 = vmatpush.bf16.msrb.mxu0 %v1605_v10  ;;  %1122 = vmatpush.bf16.msrb.mxu1 %v1669_v11  ;;  %v2055_v10 = vld [vmem:[%s3025_s9 + $0x48] sm:$0xff] }
  0xbb   :  { %1133 = vmatpush.bf16.msrb.mxu2 %v1749_v13  ;;  %v724_v13 = vld [vmem:[%s3024_s8] sm:$0x3] }
  0xbc   :  { %v727_v30 = vperm.slane %v724_v13, 1 }
  0xbf   :  { %1134 = vmatpush.bf16.msrb.mxu2 %v1741_v25 }
  0xc3   :  { %1135 = vmatpush.bf16.msrb.mxu2 %v1733_v32 }
  0xc6   :  { %v2874_v49 = vpop.f32.mrf.mxu2  ;;  %v486_v50 = vpop.f32.mrf.mxu0 }
  0xc7   :  { %v2885_v54 = vpop.f32.mrf.mxu3  ;;  %v499_v55 = vpop.f32.mrf.mxu1  ;;  %v487_v34 = vadd.f32 %v486_v50, %v2685_v9  ;;  %v513_v9 = vadd.f32 %v2874_v49, %v2683_v8 }
  0xc8   :  { %v500_v36 = vadd.f32 %v499_v55, %v2698_v15  ;;  %v642_v15 = vperm.slane %v638_v31, 2  ;;  %v526_v48 = vadd.f32 %v2885_v54, %v2696_v14  ;;  %v2051_v54 = vld [vmem:[%s3025_s9 + $0x28] sm:$0xff] }
  0xce   :  { %v514_v17 = vpop.f32.mrf.mxu2  ;;  %v488_v18 = vpop.f32.mrf.mxu0 }
  0xcf   :  { %v527_v22 = vpop.f32.mrf.mxu3  ;;  %v501_v23 = vpop.f32.mrf.mxu1  ;;  %v726_v17 = vperm.slane %v724_v13, 0 }
  0xd6   :  { %v571_v37 = vpop.f32.mrf.mxu2 }
  0xd7   :  { %v634_v39 = vadd.f32 %v571_v37, %v487_v34  ;;  %v591_v40 = vpop.f32.mrf.mxu3 }
  0xd8   :  { %v635_v41 = vadd.f32 %v591_v40, %v500_v36 }
  0xd9   :  { %v648_v42 = vadd.f32 %v640_v35, %v634_v39 }
  0xda   :  { %v649_v43 = vadd.f32 %v641_v38, %v635_v41 }
  0xdb   :  { %v652_v44 = vmax.f32 %v648_v42, 0.0 }
  0xdc   :  { %v653_v45 = vmax.f32 %v649_v43, 0.0 }
  0xdd   :  { %v656_v47 = vpack.c.bf16 %v652_v44, %v652_v44 }
  0xde   :  { %v657_v50 = vpack.c.bf16 %v653_v45, %v653_v45  ;;  %v611_v51 = vpop.f32.mrf.mxu2 }
  0xdf   :  { %v636_v53 = vadd.f32 %v611_v51, %v513_v9  ;;  %v631_v55 = vpop.f32.mrf.mxu3  ;;  %1058 = vmatmul.bf16.vlgmr.msra.gmra.mxu0 %v656_v47  ;;  %v2063_v9 = vld [vmem:[%s3026_s10] ss:$0 sm:$0xff] }
  0xe0   :  { %v637_v56 = vadd.f32 %v631_v55, %v526_v48  ;;  %1071 = vmatmul.bf16.vlgmr.msra.gmra.mxu1 %v657_v50  ;;  %1290 = vmatpush.bf16.msra.mxu0 %v2053_v46 }
  0xe1   :  { %v650_v58 = vadd.f32 %v642_v15, %v636_v53  ;;  %1303 = vmatpush.bf16.msra.mxu1 %v2061_v63 }
  0xe2   :  { %v651_v8 = vadd.f32 %v643_v52, %v637_v56 }
  0xe3   :  { %v654_v49 = vmax.f32 %v650_v58, 0.0 }
  0xe4   :  { %v655_v59 = vmax.f32 %v651_v8, 0.0  ;;  %1291 = vmatpush.bf16.msra.mxu0 %v2052_v57 }
  0xe5   :  { %v658_v60 = vpack.c.bf16 %v654_v49, %v654_v49  ;;  %1304 = vmatpush.bf16.msra.mxu1 %v2060_v1 }
  0xe6   :  { %v659_v14 = vpack.c.bf16 %v655_v59, %v655_v59 }
  0xe7   :  { %1084 = vmatmul.bf16.vlgmr.msra.gmra.mxu2 %v658_v60 }
  0xe8   :  { %1097 = vmatmul.bf16.vlgmr.msra.gmra.mxu3 %v659_v14  ;;  %1292 = vmatpush.bf16.msra.mxu0 %v2051_v54 }
  0xe9   :  { %1305 = vmatpush.bf16.msra.mxu1 %v2059_v3 }
  0xec   :  { %1293 = vmatpush.bf16.msra.mxu0 %v2050_v61 }
  0xed   :  { %1306 = vmatpush.bf16.msra.mxu1 %v2058_v5 }
  0xef   :  { %1110 = vmatmul.bf16.vlgmr.msrb.gmra.mxu0 %v656_v47 }
  0xf0   :  { %1123 = vmatmul.bf16.vlgmr.msrb.gmra.mxu1 %v657_v50  ;;  %1294 = vmatpush.bf16.msra.mxu0 %v2049_v62 }
  0xf1   :  { %1307 = vmatpush.bf16.msra.mxu1 %v2057_v6 }
  0xf4   :  { %1295 = vmatpush.bf16.msra.mxu0 %v2048_v0 }
  0xf5   :  { %1308 = vmatpush.bf16.msra.mxu1 %v2056_v7 }
  0xf7   :  { %1136 = vmatmul.bf16.vlgmr.msrb.gmra.mxu2 %v658_v60 }
  0xf8   :  { %1149 = vmatmul.bf16.vlgmr.msrb.gmra.mxu3 %v659_v14  ;;  %1296 = vmatpush.bf16.msra.mxu0 %v2047_v2 }
  0xf9   :  { %1309 = vmatpush.bf16.msra.mxu1 %v2055_v10 }
  0xfc   :  { %1297 = vmatpush.bf16.msra.mxu0 %v2046_v4 }
  0xfd   :  { %1310 = vmatpush.bf16.msra.mxu1 %v2054_v16 }
 0x15c   :  { %v1059_v11 = vpop.f32.mrf.mxu0 }
 0x15d   :  { %v1072_v12 = vpop.f32.mrf.mxu1  ;;  %v1060_v19 = vadd.f32 %v1059_v11, %v726_v17 }
 0x15f   :  { %v1073_v21 = vadd.f32 %v1072_v12, %v1060_v19 }
 0x164   :  { %v1061_v18 = vpop.f32.mrf.mxu0 }
 0x165   :  { %v1074_v20 = vpop.f32.mrf.mxu1 }
 0x16a   :  { %v1085_v22 = vpop.f32.mrf.mxu2 }
 0x16b   :  { %v1086_v23 = vadd.f32 %v1085_v22, %v1073_v21  ;;  %v1098_v24 = vpop.f32.mrf.mxu3 }
 0x16c   :  { %v1111_v25 = vpop.f32.mrf.mxu0 }
 0x16d   :  { %v1099_v26 = vadd.f32 %v1098_v24, %v1086_v23  ;;  %v1124_v27 = vpop.f32.mrf.mxu1  ;;  %v1112_v34 = vadd.f32 %v1111_v25, %v727_v30 }
 0x16f   :  { %v1154_v28 = vmax.f32 %v1099_v26, 0.0  ;;  %v1125_v36 = vadd.f32 %v1124_v27, %v1112_v34 }
 0x171   :  { %v1156_v29 = vpack.c.bf16 %v1154_v28, %v1154_v28 }
 0x172   :  { %v1087_v31 = vpop.f32.mrf.mxu2 }
 0x173   :  { %v1100_v32 = vpop.f32.mrf.mxu3  ;;  %1298 = vmatmul.bf16.vlgmr.msra.gmra.mxu0 %v1156_v29 }
 0x174   :  { %v1113_v33 = vpop.f32.mrf.mxu0 }
 0x175   :  { %v1126_v35 = vpop.f32.mrf.mxu1 }
 0x17a   :  { %v1137_v37 = vpop.f32.mrf.mxu2 }
 0x17b   :  { %v1138_v38 = vadd.f32 %v1137_v37, %v1125_v36  ;;  %v1150_v39 = vpop.f32.mrf.mxu3 }
 0x17d   :  { %v1151_v40 = vadd.f32 %v1150_v39, %v1138_v38 }
 0x17f   :  { %v1155_v41 = vmax.f32 %v1151_v40, 0.0 }
 0x181   :  { %v1157_v42 = vpack.c.bf16 %v1155_v41, %v1155_v41 }
 0x182   :  { %v1139_v43 = vpop.f32.mrf.mxu2 }
 0x183   :  { %v1152_v44 = vpop.f32.mrf.mxu3  ;;  %1311 = vmatmul.bf16.vlgmr.msra.gmra.mxu1 %v1157_v42 }
 0x1f0   :  { %v1299_v45 = vpop.f32.mrf.mxu0 }
 0x1f1   :  { %v1300_v47 = vadd.f32 %v2063_v9, %v1299_v45 }
 0x1f8   :  { %v1301_v46 = vpop.f32.mrf.mxu0 }
 0x200   :  { %v1312_v15 = vpop.f32.mrf.mxu1 }
 0x201   :  { %v1313_v48 = vadd.f32 %v1312_v15, %v1300_v47 }
 0x203   :  { %1317 = vst.msk [vmem:[#allocation2] sm:$0x3] %vm1316_vm2, %v1313_v48 }
 0x204   :  { %1328 = dma.vmem_to_hbm [thread:$0]  %s1324_s12, 32, %s1326_s15, [#allocation3]  }
 0x208   :  { %v1314_v50 = vpop.f32.mrf.mxu1 }
 0x209   :  { %2088 = dma.done.wait [#allocation3], 32  }
 0x20a   :  { %2089 = vsyncadd [#allocation3], 4294967264 }
 0x20b   :  { %1333 = vsyncpa [#allocation3], 1 }

</bundles_post_ra>
